<compile_context>
chip_gen: v7x
topology: tpu7x:2x2x1
jax: 0.10.0
libtpu: 0.0.40
codegen_flags: <defaults>
</compile_context>

<pallas_src>
import math

import jax
import jax.numpy as jnp
from jax import lax
from jax.experimental import pallas as pl
from jax.experimental.pallas import tpu as pltpu

LEAK = 0.2
INV_SQRT2 = 1.0 / math.sqrt(2.0)
BLUR_W = (0.25, 0.5, 0.25)     # [1,2,1]/4 per axis  ->  3x3 kernel /16
SLACK = 8                      # extra zero rows so tap windows never read OOB
VMEM_LIMIT = 64 * 1024 * 1024


def _pf(h, w):
    """Rows of the zero-padded, row-major flattened (H+2)x(W+2) spatial slab."""
    return (h + 2) * (w + 2) + SLACK


def _lrelu(v):
    return jnp.where(v >= 0.0, v, LEAK * v)


# ---------------------------------------------------------------------------
# Fused DiscriminatorBlock (downsample=True) kernel
# ---------------------------------------------------------------------------
def _make_down_kernel(H, W, Cin, Cout):
    Wp = W + 2
    Ho, Wo = H // 2, W // 2
    Wop = Wo + 2
    NF = H * Wp            # flat rows of full-res conv outputs (2 junk cols / row)
    ND = Ho * Wp           # flat rows of stride-2 conv outputs (junk cols masked)
    PF_OUT = _pf(Ho, Wo)
    R = _pf(H, W)          # scratch rows
    head = Wp + 1
    tail = head + NF

    def kernel(x_ref, colf_ref, w1_ref, b1_ref, w2_ref, b2_ref,
               wd_ref, bd_ref, wr_ref, br_ref,
               out_ref, s1, s2):
        colf = colf_ref[...]                       # (NF, 1) int32, col index mod Wp
        mf = colf < W                              # valid full-res columns
        md = colf_ref[pl.ds(0, ND), :] < Wo        # valid half-res columns

        def conv3(src, wref):
            # pure dot-accumulation chain (bias/mask/lrelu only afterwards).
            acc = jnp.zeros((NF, Cout), jnp.float32)
            for dy in range(3):
                for dx in range(3):
                    acc = acc + jnp.dot(
                        src[pl.ds(dy * Wp + dx, NF), :].astype(jnp.bfloat16),
                        wref[dy * 3 + dx],
                        preferred_element_type=jnp.float32)
            return acc

        # zero the scratch pad-frame every step (scratch is per-core; a
        # program_id()==0 guard is unsafe when the batch axis is megacore-split).
        s1[pl.ds(0, head), :] = jnp.zeros((head, Cout), jnp.float32)
        s1[pl.ds(tail, R - tail), :] = jnp.zeros((R - tail, Cout), jnp.float32)
        s2[pl.ds((H + 2) * Wp, SLACK), :] = jnp.zeros((SLACK, Cout), jnp.float32)

        # conv1 (3x3, pad 1) + leaky relu  -> zero-padded h1 in s1
        h1 = _lrelu(conv3(x_ref, w1_ref) + b1_ref[...])
        s1[pl.ds(head, NF), :] = jnp.where(mf, h1, 0.0)

        # conv2 (3x3, pad 1) + leaky relu (junk columns zeroed for the blur shifts)
        h2 = jnp.where(mf, _lrelu(conv3(s1, w2_ref) + b2_ref[...]), 0.0)

        # separable 3x3 blur ([1,2,1]/4 per axis) with reflect padding.
        # horizontal pass on the h2 value; column reflect folded into edge coeffs.
        zrow = jnp.zeros((1, Cout), jnp.float32)
        sh_m1 = jnp.concatenate([zrow, h2[:-1, :]], axis=0)   # [p] = h2[p-1]
        sh_p1 = jnp.concatenate([h2[1:, :], zrow], axis=0)    # [p] = h2[p+1]
        cl = jnp.where(colf == W - 1, 0.5, 0.25)
        cr = jnp.where(colf == 0, 0.5, 0.25)
        hb = cl * sh_m1 + 0.5 * h2 + cr * sh_p1
        s2[pl.ds(head, NF), :] = hb
        # vertical reflect rows: two bulk row copies (no per-row loop)
        s2[pl.ds(0, Wp), :] = s2[pl.ds(2 * Wp, Wp), :]
        s2[pl.ds((H + 1) * Wp, Wp), :] = s2[pl.ds((H - 1) * Wp, Wp), :]
        # vertical pass
        blur = (0.25 * s2[pl.ds(1, NF), :]
                + 0.5 * s2[pl.ds(Wp + 1, NF), :]
                + 0.25 * s2[pl.ds(2 * Wp + 1, NF), :])
        s1[pl.ds(head, NF), :] = jnp.where(mf, blur, 0.0)

        # downsample conv (3x3, stride 2, pad 1) on the blurred map
        # TODO(synk): compact even/odd column phases to avoid strided MXU reads.
        accd = jnp.zeros((ND, Cout), jnp.float32)
        for dy in range(3):
            for dx in range(3):
                accd = accd + jnp.dot(
                    s1[pl.ds(dy * Wp + dx, ND, stride=2), :].astype(jnp.bfloat16),
                    wd_ref[dy * 3 + dx],
                    preferred_element_type=jnp.float32)
        hd = accd + bd_ref[...]

        # residual 1x1 conv, stride 2, on the block input
        res = jnp.dot(x_ref[pl.ds(Wp + 1, ND, stride=2), :].astype(jnp.bfloat16),
                      wr_ref[...],
                      preferred_element_type=jnp.float32) + br_ref[...]

        y = jnp.where(md, (hd + res) * INV_SQRT2, 0.0)

        # emit next block's zero-padded flat layout (row pitch Wp -> Wop),
        # sliced straight from the result value (no scratch staging).
        out_ref[pl.ds(0, Wo + 3), :] = jnp.zeros((Wo + 3, Cout), jnp.float32)
        otail = (Ho + 1) * Wop + 1
        out_ref[pl.ds(otail, PF_OUT - otail), :] = jnp.zeros(
            (PF_OUT - otail, Cout), jnp.float32)
        for i in range(Ho):
            out_ref[pl.ds((i + 1) * Wop + 1, Wop), :] = y[i * Wp:i * Wp + Wop, :]

    return kernel, NF, PF_OUT, R


def _down_block_call(xf, colf, p, H, W, Cin, Cout):
    B, PF_IN, _ = xf.shape
    kernel, NF, PF_OUT, R = _make_down_kernel(H, W, Cin, Cout)
    return pl.pallas_call(
        kernel,
        out_shape=jax.ShapeDtypeStruct((B, PF_OUT, Cout), jnp.float32),
        grid=(B,),
        in_specs=[
            pl.BlockSpec((None, PF_IN, Cin), lambda b: (b, 0, 0)),
            pl.BlockSpec((NF, 1), lambda b: (0, 0)),
            pl.BlockSpec((9, Cin, Cout), lambda b: (0, 0, 0)),
            pl.BlockSpec((1, Cout), lambda b: (0, 0)),
            pl.BlockSpec((9, Cout, Cout), lambda b: (0, 0, 0)),
            pl.BlockSpec((1, Cout), lambda b: (0, 0)),
            pl.BlockSpec((9, Cout, Cout), lambda b: (0, 0, 0)),
            pl.BlockSpec((1, Cout), lambda b: (0, 0)),
            pl.BlockSpec((Cin, Cout), lambda b: (0, 0)),
            pl.BlockSpec((1, Cout), lambda b: (0, 0)),
        ],
        out_specs=pl.BlockSpec((None, PF_OUT, Cout), lambda b: (b, 0, 0)),
        scratch_shapes=[pltpu.VMEM((R, Cout), jnp.float32),
                        pltpu.VMEM((R, Cout), jnp.float32)],
        compiler_params=pltpu.CompilerParams(
            dimension_semantics=("parallel",),
            vmem_limit_bytes=VMEM_LIMIT),
    )(xf, colf, p['w1r'], p['b1'], p['w2r'], p['b2'],
      p['wdr'], p['bd'], p['wrr'], p['br'])


# ---------------------------------------------------------------------------
# Fused last DiscriminatorBlock (no downsample) + final_conv + flatten + logit
# ---------------------------------------------------------------------------
def _make_last_head_kernel(H, W, Cin, Cout):
    Wp = W + 2
    NF = H * Wp
    R = _pf(H, W)
    head = Wp + 1
    tail = head + NF

    def kernel(x_ref, colf_ref,
               w1_ref, b1_ref, w2_ref, b2_ref, wr_ref, br_ref,
               wf_ref, bf_ref, wl_ref, bl_ref,
               out_ref, s1, s2):
        mf = colf_ref[...] < W

        def conv3(src, wref):
            acc = jnp.zeros((NF, Cout), jnp.float32)
            for dy in range(3):
                for dx in range(3):
                    acc = acc + jnp.dot(
                        src[pl.ds(dy * Wp + dx, NF), :].astype(jnp.bfloat16),
                        wref[dy * 3 + dx],
                        preferred_element_type=jnp.float32)
            return acc

        zh = jnp.zeros((head, Cout), jnp.float32)
        zt = jnp.zeros((R - tail, Cout), jnp.float32)
        s1[pl.ds(0, head), :] = zh
        s1[pl.ds(tail, R - tail), :] = zt
        s2[pl.ds(0, head), :] = zh
        s2[pl.ds(tail, R - tail), :] = zt

        h1 = _lrelu(conv3(x_ref, w1_ref) + b1_ref[...])
        s1[pl.ds(head, NF), :] = jnp.where(mf, h1, 0.0)
        h2 = _lrelu(conv3(s1, w2_ref) + b2_ref[...])

        # residual 1x1 conv, stride 1
        res = jnp.dot(x_ref[pl.ds(Wp + 1, NF), :].astype(jnp.bfloat16),
                      wr_ref[...],
                      preferred_element_type=jnp.float32) + br_ref[...]
        y = (h2 + res) * INV_SQRT2
        s2[pl.ds(head, NF), :] = jnp.where(mf, y, 0.0)

        # final 3x3 conv (no activation), then flatten + to_logit
        f = jnp.where(mf, conv3(s2, wf_ref) + bf_ref[...], 0.0)
        logit = jnp.sum(f * wl_ref[...], keepdims=True) + bl_ref[...]   # (1, 1)
        # per-batch (8,128) block: megacore-parallel friendly, no shared write
        out_ref[...] = jnp.broadcast_to(logit, (8, 128))

    return kernel, NF, R


def _last_head_call(xf, colf, p, H, W, Cin, Cout):
    B, PF_IN, _ = xf.shape
    kernel, NF, R = _make_last_head_kernel(H, W, Cin, Cout)
    out = pl.pallas_call(
        kernel,
        out_shape=jax.ShapeDtypeStruct((B, 8, 128), jnp.float32),
        grid=(B,),
        in_specs=[
            pl.BlockSpec((None, PF_IN, Cin), lambda b: (b, 0, 0)),
            pl.BlockSpec((NF, 1), lambda b: (0, 0)),
            pl.BlockSpec((9, Cin, Cout), lambda b: (0, 0, 0)),
            pl.BlockSpec((1, Cout), lambda b: (0, 0)),
            pl.BlockSpec((9, Cout, Cout), lambda b: (0, 0, 0)),
            pl.BlockSpec((1, Cout), lambda b: (0, 0)),
            pl.BlockSpec((Cin, Cout), lambda b: (0, 0)),
            pl.BlockSpec((1, Cout), lambda b: (0, 0)),
            pl.BlockSpec((9, Cout, Cout), lambda b: (0, 0, 0)),
            pl.BlockSpec((1, Cout), lambda b: (0, 0)),
            pl.BlockSpec((NF, Cout), lambda b: (0, 0)),
            pl.BlockSpec((1, 1), lambda b: (0, 0)),
        ],
        out_specs=pl.BlockSpec((None, 8, 128), lambda b: (b, 0, 0)),
        scratch_shapes=[pltpu.VMEM((R, Cout), jnp.float32),
                        pltpu.VMEM((R, Cout), jnp.float32)],
        compiler_params=pltpu.CompilerParams(
            dimension_semantics=("parallel",),
            vmem_limit_bytes=VMEM_LIMIT),
    )(xf, colf, p['w1r'], p['b1'], p['w2r'], p['b2'], p['wrr'], p['br'],
      p['wfr'], p['bf'], p['wlf'], p['bl'])
    return out[:, 0, 0]


# ---------------------------------------------------------------------------
# Module wrapper with deterministic parameter init
# ---------------------------------------------------------------------------
class StyleGan2DiscriminatorPallas:
    def __init__(self, key, image_size, network_capacity=16, fmap_max=512,
                 input_filters=3):
        num_layers = int(math.log2(image_size) - 1)
        filters = [input_filters] + [min(64 * (2 ** i), fmap_max)
                                     for i in range(num_layers + 1)]
        self.image_size = image_size
        self.chan_in_out = list(zip(filters[:-1], filters[1:]))
        self.chan_last = filters[-1]

        def conv_init(k, kh, kw, cin, cout):
            k1, k2 = jax.random.split(k)
            std = math.sqrt(2.0 / (kh * kw * cin))       # kaiming, fan_in, leaky_relu
            w = std * jax.random.normal(k1, (kh, kw, cin, cout), jnp.float32)
            b = 0.02 * jax.random.normal(k2, (cout,), jnp.float32)
            return w, b

        self.blocks = []
        k = key
        for ind, (cin, cout) in enumerate(self.chan_in_out):
            k, k1, k2, k3, k4 = jax.random.split(k, 5)
            downsample = ind != len(self.chan_in_out) - 1
            w1, b1 = conv_init(k1, 3, 3, cin, cout)
            w2, b2 = conv_init(k2, 3, 3, cout, cout)
            wr, br = conv_init(k3, 1, 1, cin, cout)
            blk = dict(downsample=downsample, cin=cin, cout=cout,
                       w1=w1, b1=b1, w2=w2, b2=b2, wr=wr, br=br)
            if downsample:
                wd, bd = conv_init(k4, 3, 3, cout, cout)
                blk.update(wd=wd, bd=bd)
            self.blocks.append(blk)

        k, kf, kl1, kl2 = jax.random.split(k, 4)
        self.wf, self.bf = conv_init(kf, 3, 3, self.chan_last, self.chan_last)
        std = math.sqrt(2.0 / (4 * self.chan_last))
        self.wl = std * jax.random.normal(kl1, (2, 2, self.chan_last), jnp.float32)
        self.bl = 0.02 * jax.random.normal(kl2, (1,), jnp.float32)

    def __call__(self, x_nchw):
        B = x_nchw.shape[0]
        H = W = self.image_size
        x = jnp.transpose(x_nchw, (0, 2, 3, 1)).astype(jnp.float32)      # NHWC
        # zero-padded, row-major flattened spatial slab (+ SLACK zero rows)
        xp = jnp.pad(x, ((0, 0), (1, 1), (1, 1), (0, 0)))
        xf = xp.reshape(B, (H + 2) * (W + 2), x.shape[-1])
        xf = jnp.pad(xf, ((0, 0), (0, SLACK), (0, 0)))

        logits = None
        for blk in self.blocks:
            cin, cout = blk['cin'], blk['cout']
            Wp = W + 2
            NF = H * Wp
            # column-index vector; masks / blur edge coefficients derived in-kernel
            colf = (jnp.arange(NF, dtype=jnp.int32) % Wp).reshape(NF, 1)
            p = dict(
                w1r=blk['w1'].reshape(9, cin, cout).astype(jnp.bfloat16),
                b1=blk['b1'].reshape(1, cout),
                w2r=blk['w2'].reshape(9, cout, cout).astype(jnp.bfloat16),
                b2=blk['b2'].reshape(1, cout),
                wrr=blk['wr'].reshape(cin, cout).astype(jnp.bfloat16),
                br=blk['br'].reshape(1, cout),
            )
            if blk['downsample']:
                p.update(wdr=blk['wd'].reshape(9, cout, cout).astype(jnp.bfloat16),
                         bd=blk['bd'].reshape(1, cout))
                xf = _down_block_call(xf, colf, p, H, W, cin, cout)
                H, W = H // 2, W // 2
            else:
                p.update(
                    wfr=self.wf.reshape(9, cout, cout).astype(jnp.bfloat16),
                    bf=self.bf.reshape(1, cout),
                    wlf=jnp.pad(self.wl, ((0, 0), (0, Wp - W), (0, 0))
                                ).reshape(H * Wp, cout),
                    bl=self.bl.reshape(1, 1),
                )
                logits = _last_head_call(xf, colf, p, H, W, cin, cout)
        return logits


# ---------------------------------------------------------------------------
# Pure-JAX reference (independent path via lax.conv_general_dilated)
# ---------------------------------------------------------------------------
def _ref_conv(x, w, b, stride, pad):
    y = lax.conv_general_dilated(
        x, w, window_strides=(stride, stride),
        padding=((pad, pad), (pad, pad)),
        dimension_numbers=('NHWC', 'HWIO', 'NHWC'),
        precision=lax.Precision.HIGHEST)
    return y + b.reshape(1, 1, 1, -1)


def _ref_blur(x):
    H, W = x.shape[1], x.shape[2]
    xp = jnp.pad(x, ((0, 0), (1, 1), (1, 1), (0, 0)), mode='reflect')
    out = jnp.zeros_like(x)
    for dy in range(3):
        for dx in range(3):
            out = out + (BLUR_W[dy] * BLUR_W[dx]) * xp[:, dy:dy + H, dx:dx + W, :]
    return out


def reference_forward(model, x_nchw):
    x = jnp.transpose(x_nchw, (0, 2, 3, 1)).astype(jnp.float32)
    for blk in model.blocks:
        stride = 2 if blk['downsample'] else 1
        res = _ref_conv(x, blk['wr'], blk['br'], stride, 0)
        h = _lrelu(_ref_conv(x, blk['w1'], blk['b1'], 1, 1))
        h = _lrelu(_ref_conv(h, blk['w2'], blk['b2'], 1, 1))
        if blk['downsample']:
            h = _ref_blur(h)
            h = _ref_conv(h, blk['wd'], blk['bd'], 2, 1)
        x = (h + res) * INV_SQRT2
    f = _ref_conv(x, model.wf, model.bf, 1, 1)
    return jnp.einsum('bhwc,hwc->b', f, model.wl) + model.bl[0]


if __name__ == "__main__":
    key = jax.random.PRNGKey(0)
    kp, kx = jax.random.split(key)

    B, image_size = 2, 16
    model = StyleGan2DiscriminatorPallas(kp, image_size=image_size, fmap_max=128)
    x = jax.random.normal(kx, (B, 3, image_size, image_size), jnp.float32)

    out = model(x)
    jax.block_until_ready(out)
    assert out.shape == (B,), out.shape

    # f32 reference; tolerance widened to cover bf16 MXU operand quantization.
    ref = reference_forward(model, x)
    assert jnp.allclose(out, ref, atol=1.5e-1, rtol=5e-2), (out, ref)

    print("KERNEL_OK")
</pallas_src>

<mosaic_0001>
module attributes {stable_mosaic.version = 11 : i64} {
  func.func @kernel(%arg0: i32, %arg1: memref<1x332x3xf32, #tpu.memory_space<vmem>>, %arg2: memref<288x1xi32, #tpu.memory_space<vmem>>, %arg3: memref<9x3x64xbf16, #tpu.memory_space<vmem>>, %arg4: memref<1x64xf32, #tpu.memory_space<vmem>>, %arg5: memref<9x64x64xbf16, #tpu.memory_space<vmem>>, %arg6: memref<1x64xf32, #tpu.memory_space<vmem>>, %arg7: memref<9x64x64xbf16, #tpu.memory_space<vmem>>, %arg8: memref<1x64xf32, #tpu.memory_space<vmem>>, %arg9: memref<3x64xbf16, #tpu.memory_space<vmem>>, %arg10: memref<1x64xf32, #tpu.memory_space<vmem>>, %arg11: memref<1x108x64xf32, #tpu.memory_space<vmem>>, %arg12: memref<332x64xf32, #tpu.memory_space<vmem>>, %arg13: memref<332x64xf32, #tpu.memory_space<vmem>>) attributes {dimension_semantics = [#tpu.dimension_semantics<parallel>], iteration_bounds = array<i64: 2>, scalar_prefetch = 0 : i64, scratch_operands = 2 : i64, tpu.core_type = #tpu.core_type<tc>, window_params = [{transform_indices = @transform_0, window_bounds = array<i64: 1, 332, 3>}, {pipeline_mode = #tpu.pipeline_mode<synchronous>, transform_indices = @transform_1, window_bounds = array<i64: 288, 1>}, {pipeline_mode = #tpu.pipeline_mode<synchronous>, transform_indices = @transform_2, window_bounds = array<i64: 9, 3, 64>}, {pipeline_mode = #tpu.pipeline_mode<synchronous>, transform_indices = @transform_3, window_bounds = array<i64: 1, 64>}, {pipeline_mode = #tpu.pipeline_mode<synchronous>, transform_indices = @transform_4, window_bounds = array<i64: 9, 64, 64>}, {pipeline_mode = #tpu.pipeline_mode<synchronous>, transform_indices = @transform_5, window_bounds = array<i64: 1, 64>}, {pipeline_mode = #tpu.pipeline_mode<synchronous>, transform_indices = @transform_6, window_bounds = array<i64: 9, 64, 64>}, {pipeline_mode = #tpu.pipeline_mode<synchronous>, transform_indices = @transform_7, window_bounds = array<i64: 1, 64>}, {pipeline_mode = #tpu.pipeline_mode<synchronous>, transform_indices = @transform_8, window_bounds = array<i64: 3, 64>}, {pipeline_mode = #tpu.pipeline_mode<synchronous>, transform_indices = @transform_9, window_bounds = array<i64: 1, 64>}, {transform_indices = @transform_10, window_bounds = array<i64: 1, 108, 64>}]} {
    %c0 = arith.constant 0 : index
    %c0_0 = arith.constant 0 : index
    %0 = vector.load %arg2[%c0, %c0_0] : memref<288x1xi32, #tpu.memory_space<vmem>>, vector<288x1xi32>
    %c16_i32 = arith.constant 16 : i32
    %1 = vector.broadcast %c16_i32 : i32 to vector<288x1xi32>
    %2 = arith.cmpi slt, %0, %1 : vector<288x1xi32>
    %c0_1 = arith.constant 0 : index
    %c0_2 = arith.constant 0 : index
    %3 = vector.load %arg2[%c0_1, %c0_2] : memref<288x1xi32, #tpu.memory_space<vmem>>, vector<144x1xi32>
    %c8_i32 = arith.constant 8 : i32
    %4 = vector.broadcast %c8_i32 : i32 to vector<144x1xi32>
    %5 = arith.cmpi slt, %3, %4 : vector<144x1xi32>
    %cst = arith.constant 0.000000e+00 : f32
    %6 = vector.broadcast %cst : f32 to vector<19x64xf32>
    %c0_3 = arith.constant 0 : index
    %c0_4 = arith.constant 0 : index
    %7 = vector.load %arg12[%c0_3, %c0_4] : memref<332x64xf32, #tpu.memory_space<vmem>>, vector<19x64xf32>
    tpu.vector_store %arg12[%c0_3, %c0_4], %6 {strides = array<i32>} : memref<332x64xf32, #tpu.memory_space<vmem>>, vector<19x64xf32>,
    %cst_5 = arith.constant 0.000000e+00 : f32
    %8 = vector.broadcast %cst_5 : f32 to vector<25x64xf32>
    %c307 = arith.constant 307 : index
    %c0_6 = arith.constant 0 : index
    %9 = vector.load %arg12[%c307, %c0_6] : memref<332x64xf32, #tpu.memory_space<vmem>>, vector<25x64xf32>
    tpu.vector_store %arg12[%c307, %c0_6], %8 {strides = array<i32>} : memref<332x64xf32, #tpu.memory_space<vmem>>, vector<25x64xf32>,
    %cst_7 = arith.constant 0.000000e+00 : f32
    %10 = vector.broadcast %cst_7 : f32 to vector<8x64xf32>
    %c324 = arith.constant 324 : index
    %c0_8 = arith.constant 0 : index
    %11 = vector.load %arg13[%c324, %c0_8] : memref<332x64xf32, #tpu.memory_space<vmem>>, vector<8x64xf32>
    tpu.vector_store %arg13[%c324, %c0_8], %10 {strides = array<i32>} : memref<332x64xf32, #tpu.memory_space<vmem>>, vector<8x64xf32>,
    %cst_9 = arith.constant 0.000000e+00 : f32
    %12 = vector.broadcast %cst_9 : f32 to vector<288x64xf32>
    %c0_10 = arith.constant 0 : index
    %c0_11 = arith.constant 0 : index
    %c0_12 = arith.constant 0 : index
    %13 = vector.load %arg1[%c0_10, %c0_11, %c0_12] : memref<1x332x3xf32, #tpu.memory_space<vmem>>, vector<1x288x3xf32>
    %14 = vector.shape_cast %13 : vector<1x288x3xf32> to vector<288x3xf32>
    %15 = arith.truncf %14 : vector<288x3xf32> to vector<288x3xbf16>
    %c0_13 = arith.constant 0 : index
    %c0_14 = arith.constant 0 : index
    %c0_15 = arith.constant 0 : index
    %16 = vector.load %arg3[%c0_13, %c0_14, %c0_15] : memref<9x3x64xbf16, #tpu.memory_space<vmem>>, vector<1x3x64xbf16>
    %17 = vector.shape_cast %16 : vector<1x3x64xbf16> to vector<3x64xbf16>
    %cst_16 = arith.constant dense<0.000000e+00> : vector<288x64xf32>
    %18 = tpu.matmul %15, %17, %cst_16 {dimension_numbers = #tpu.dot_dimension_numbers<[1], [0], [0], [1], [0, 0, 1, 1], [], []>} : vector<288x3xbf16>, vector<3x64xbf16>, vector<288x64xf32> -> vector<288x64xf32>
    %19 = arith.addf %12, %18 : vector<288x64xf32>
    %c0_17 = arith.constant 0 : index
    %c1 = arith.constant 1 : index
    %c0_18 = arith.constant 0 : index
    %20 = vector.load %arg1[%c0_17, %c1, %c0_18] : memref<1x332x3xf32, #tpu.memory_space<vmem>>, vector<1x288x3xf32>
    %21 = vector.shape_cast %20 : vector<1x288x3xf32> to vector<288x3xf32>
    %22 = arith.truncf %21 : vector<288x3xf32> to vector<288x3xbf16>
    %c1_19 = arith.constant 1 : index
    %c0_20 = arith.constant 0 : index
    %c0_21 = arith.constant 0 : index
    %23 = vector.load %arg3[%c1_19, %c0_20, %c0_21] : memref<9x3x64xbf16, #tpu.memory_space<vmem>>, vector<1x3x64xbf16>
    %24 = vector.shape_cast %23 : vector<1x3x64xbf16> to vector<3x64xbf16>
    %cst_22 = arith.constant dense<0.000000e+00> : vector<288x64xf32>
    %25 = tpu.matmul %22, %24, %cst_22 {dimension_numbers = #tpu.dot_dimension_numbers<[1], [0], [0], [1], [0, 0, 1, 1], [], []>} : vector<288x3xbf16>, vector<3x64xbf16>, vector<288x64xf32> -> vector<288x64xf32>
    %26 = arith.addf %19, %25 : vector<288x64xf32>
    %c0_23 = arith.constant 0 : index
    %c2 = arith.constant 2 : index
    %c0_24 = arith.constant 0 : index
    %27 = vector.load %arg1[%c0_23, %c2, %c0_24] : memref<1x332x3xf32, #tpu.memory_space<vmem>>, vector<1x288x3xf32>
    %28 = vector.shape_cast %27 : vector<1x288x3xf32> to vector<288x3xf32>
    %29 = arith.truncf %28 : vector<288x3xf32> to vector<288x3xbf16>
    %c2_25 = arith.constant 2 : index
    %c0_26 = arith.constant 0 : index
    %c0_27 = arith.constant 0 : index
    %30 = vector.load %arg3[%c2_25, %c0_26, %c0_27] : memref<9x3x64xbf16, #tpu.memory_space<vmem>>, vector<1x3x64xbf16>
    %31 = vector.shape_cast %30 : vector<1x3x64xbf16> to vector<3x64xbf16>
    %cst_28 = arith.constant dense<0.000000e+00> : vector<288x64xf32>
    %32 = tpu.matmul %29, %31, %cst_28 {dimension_numbers = #tpu.dot_dimension_numbers<[1], [0], [0], [1], [0, 0, 1, 1], [], []>} : vector<288x3xbf16>, vector<3x64xbf16>, vector<288x64xf32> -> vector<288x64xf32>
    %33 = arith.addf %26, %32 : vector<288x64xf32>
    %c0_29 = arith.constant 0 : index
    %c18 = arith.constant 18 : index
    %c0_30 = arith.constant 0 : index
    %34 = vector.load %arg1[%c0_29, %c18, %c0_30] : memref<1x332x3xf32, #tpu.memory_space<vmem>>, vector<1x288x3xf32>
    %35 = vector.shape_cast %34 : vector<1x288x3xf32> to vector<288x3xf32>
    %36 = arith.truncf %35 : vector<288x3xf32> to vector<288x3xbf16>
    %c3 = arith.constant 3 : index
    %c0_31 = arith.constant 0 : index
    %c0_32 = arith.constant 0 : index
    %37 = vector.load %arg3[%c3, %c0_31, %c0_32] : memref<9x3x64xbf16, #tpu.memory_space<vmem>>, vector<1x3x64xbf16>
    %38 = vector.shape_cast %37 : vector<1x3x64xbf16> to vector<3x64xbf16>
    %cst_33 = arith.constant dense<0.000000e+00> : vector<288x64xf32>
    %39 = tpu.matmul %36, %38, %cst_33 {dimension_numbers = #tpu.dot_dimension_numbers<[1], [0], [0], [1], [0, 0, 1, 1], [], []>} : vector<288x3xbf16>, vector<3x64xbf16>, vector<288x64xf32> -> vector<288x64xf32>
    %40 = arith.addf %33, %39 : vector<288x64xf32>
    %c0_34 = arith.constant 0 : index
    %c19 = arith.constant 19 : index
    %c0_35 = arith.constant 0 : index
    %41 = vector.load %arg1[%c0_34, %c19, %c0_35] : memref<1x332x3xf32, #tpu.memory_space<vmem>>, vector<1x288x3xf32>
    %42 = vector.shape_cast %41 : vector<1x288x3xf32> to vector<288x3xf32>
    %43 = arith.truncf %42 : vector<288x3xf32> to vector<288x3xbf16>
    %c4 = arith.constant 4 : index
    %c0_36 = arith.constant 0 : index
    %c0_37 = arith.constant 0 : index
    %44 = vector.load %arg3[%c4, %c0_36, %c0_37] : memref<9x3x64xbf16, #tpu.memory_space<vmem>>, vector<1x3x64xbf16>
    %45 = vector.shape_cast %44 : vector<1x3x64xbf16> to vector<3x64xbf16>
    %cst_38 = arith.constant dense<0.000000e+00> : vector<288x64xf32>
    %46 = tpu.matmul %43, %45, %cst_38 {dimension_numbers = #tpu.dot_dimension_numbers<[1], [0], [0], [1], [0, 0, 1, 1], [], []>} : vector<288x3xbf16>, vector<3x64xbf16>, vector<288x64xf32> -> vector<288x64xf32>
    %47 = arith.addf %40, %46 : vector<288x64xf32>
    %c0_39 = arith.constant 0 : index
    %c20 = arith.constant 20 : index
    %c0_40 = arith.constant 0 : index
    %48 = vector.load %arg1[%c0_39, %c20, %c0_40] : memref<1x332x3xf32, #tpu.memory_space<vmem>>, vector<1x288x3xf32>
    %49 = vector.shape_cast %48 : vector<1x288x3xf32> to vector<288x3xf32>
    %50 = arith.truncf %49 : vector<288x3xf32> to vector<288x3xbf16>
    %c5 = arith.constant 5 : index
    %c0_41 = arith.constant 0 : index
    %c0_42 = arith.constant 0 : index
    %51 = vector.load %arg3[%c5, %c0_41, %c0_42] : memref<9x3x64xbf16, #tpu.memory_space<vmem>>, vector<1x3x64xbf16>
    %52 = vector.shape_cast %51 : vector<1x3x64xbf16> to vector<3x64xbf16>
    %cst_43 = arith.constant dense<0.000000e+00> : vector<288x64xf32>
    %53 = tpu.matmul %50, %52, %cst_43 {dimension_numbers = #tpu.dot_dimension_numbers<[1], [0], [0], [1], [0, 0, 1, 1], [], []>} : vector<288x3xbf16>, vector<3x64xbf16>, vector<288x64xf32> -> vector<288x64xf32>
    %54 = arith.addf %47, %53 : vector<288x64xf32>
    %c0_44 = arith.constant 0 : index
    %c36 = arith.constant 36 : index
    %c0_45 = arith.constant 0 : index
    %55 = vector.load %arg1[%c0_44, %c36, %c0_45] : memref<1x332x3xf32, #tpu.memory_space<vmem>>, vector<1x288x3xf32>
    %56 = vector.shape_cast %55 : vector<1x288x3xf32> to vector<288x3xf32>
    %57 = arith.truncf %56 : vector<288x3xf32> to vector<288x3xbf16>
    %c6 = arith.constant 6 : index
    %c0_46 = arith.constant 0 : index
    %c0_47 = arith.constant 0 : index
    %58 = vector.load %arg3[%c6, %c0_46, %c0_47] : memref<9x3x64xbf16, #tpu.memory_space<vmem>>, vector<1x3x64xbf16>
    %59 = vector.shape_cast %58 : vector<1x3x64xbf16> to vector<3x64xbf16>
    %cst_48 = arith.constant dense<0.000000e+00> : vector<288x64xf32>
    %60 = tpu.matmul %57, %59, %cst_48 {dimension_numbers = #tpu.dot_dimension_numbers<[1], [0], [0], [1], [0, 0, 1, 1], [], []>} : vector<288x3xbf16>, vector<3x64xbf16>, vector<288x64xf32> -> vector<288x64xf32>
    %61 = arith.addf %54, %60 : vector<288x64xf32>
    %c0_49 = arith.constant 0 : index
    %c37 = arith.constant 37 : index
    %c0_50 = arith.constant 0 : index
    %62 = vector.load %arg1[%c0_49, %c37, %c0_50] : memref<1x332x3xf32, #tpu.memory_space<vmem>>, vector<1x288x3xf32>
    %63 = vector.shape_cast %62 : vector<1x288x3xf32> to vector<288x3xf32>
    %64 = arith.truncf %63 : vector<288x3xf32> to vector<288x3xbf16>
    %c7 = arith.constant 7 : index
    %c0_51 = arith.constant 0 : index
    %c0_52 = arith.constant 0 : index
    %65 = vector.load %arg3[%c7, %c0_51, %c0_52] : memref<9x3x64xbf16, #tpu.memory_space<vmem>>, vector<1x3x64xbf16>
    %66 = vector.shape_cast %65 : vector<1x3x64xbf16> to vector<3x64xbf16>
    %cst_53 = arith.constant dense<0.000000e+00> : vector<288x64xf32>
    %67 = tpu.matmul %64, %66, %cst_53 {dimension_numbers = #tpu.dot_dimension_numbers<[1], [0], [0], [1], [0, 0, 1, 1], [], []>} : vector<288x3xbf16>, vector<3x64xbf16>, vector<288x64xf32> -> vector<288x64xf32>
    %68 = arith.addf %61, %67 : vector<288x64xf32>
    %c0_54 = arith.constant 0 : index
    %c38 = arith.constant 38 : index
    %c0_55 = arith.constant 0 : index
    %69 = vector.load %arg1[%c0_54, %c38, %c0_55] : memref<1x332x3xf32, #tpu.memory_space<vmem>>, vector<1x288x3xf32>
    %70 = vector.shape_cast %69 : vector<1x288x3xf32> to vector<288x3xf32>
    %71 = arith.truncf %70 : vector<288x3xf32> to vector<288x3xbf16>
    %c8 = arith.constant 8 : index
    %c0_56 = arith.constant 0 : index
    %c0_57 = arith.constant 0 : index
    %72 = vector.load %arg3[%c8, %c0_56, %c0_57] : memref<9x3x64xbf16, #tpu.memory_space<vmem>>, vector<1x3x64xbf16>
    %73 = vector.shape_cast %72 : vector<1x3x64xbf16> to vector<3x64xbf16>
    %cst_58 = arith.constant dense<0.000000e+00> : vector<288x64xf32>
    %74 = tpu.matmul %71, %73, %cst_58 {dimension_numbers = #tpu.dot_dimension_numbers<[1], [0], [0], [1], [0, 0, 1, 1], [], []>} : vector<288x3xbf16>, vector<3x64xbf16>, vector<288x64xf32> -> vector<288x64xf32>
    %75 = arith.addf %68, %74 : vector<288x64xf32>
    %c0_59 = arith.constant 0 : index
    %c0_60 = arith.constant 0 : index
    %76 = vector.load %arg4[%c0_59, %c0_60] : memref<1x64xf32, #tpu.memory_space<vmem>>, vector<1x64xf32>
    %77 = vector.broadcast %76 : vector<1x64xf32> to vector<288x64xf32>
    %78 = arith.addf %75, %77 : vector<288x64xf32>
    %cst_61 = arith.constant 0.000000e+00 : f32
    %79 = vector.broadcast %cst_61 : f32 to vector<288x64xf32>
    %80 = arith.cmpf oge, %78, %79 : vector<288x64xf32>
    %cst_62 = arith.constant 2.000000e-01 : f32
    %81 = vector.broadcast %cst_62 : f32 to vector<288x64xf32>
    %82 = arith.mulf %81, %78 : vector<288x64xf32>
    %83 = arith.select %80, %78, %82 : vector<288x64xi1>, vector<288x64xf32>
    %cst_63 = arith.constant 0.000000e+00 : f32
    %84 = vector.shape_cast %2 : vector<288x1xi1> to vector<288x1xi1>
    %85 = vector.broadcast %84 : vector<288x1xi1> to vector<288x64xi1>
    %86 = vector.broadcast %cst_63 : f32 to vector<288x64xf32>
    %87 = arith.select %85, %83, %86 : vector<288x64xi1>, vector<288x64xf32>
    %c19_64 = arith.constant 19 : index
    %c0_65 = arith.constant 0 : index
    %88 = vector.load %arg12[%c19_64, %c0_65] : memref<332x64xf32, #tpu.memory_space<vmem>>, vector<288x64xf32>
    tpu.vector_store %arg12[%c19_64, %c0_65], %87 {strides = array<i32>} : memref<332x64xf32, #tpu.memory_space<vmem>>, vector<288x64xf32>,
    %cst_66 = arith.constant 0.000000e+00 : f32
    %89 = vector.broadcast %cst_66 : f32 to vector<288x64xf32>
    %c0_67 = arith.constant 0 : index
    %c0_68 = arith.constant 0 : index
    %90 = vector.load %arg12[%c0_67, %c0_68] : memref<332x64xf32, #tpu.memory_space<vmem>>, vector<288x64xf32>
    %91 = arith.truncf %90 : vector<288x64xf32> to vector<288x64xbf16>
    %c0_69 = arith.constant 0 : index
    %c0_70 = arith.constant 0 : index
    %c0_71 = arith.constant 0 : index
    %92 = vector.load %arg5[%c0_69, %c0_70, %c0_71] : memref<9x64x64xbf16, #tpu.memory_space<vmem>>, vector<1x64x64xbf16>
    %93 = vector.shape_cast %92 : vector<1x64x64xbf16> to vector<64x64xbf16>
    %cst_72 = arith.constant dense<0.000000e+00> : vector<288x64xf32>
    %94 = tpu.matmul %91, %93, %cst_72 {dimension_numbers = #tpu.dot_dimension_numbers<[1], [0], [0], [1], [0, 0, 1, 1], [], []>} : vector<288x64xbf16>, vector<64x64xbf16>, vector<288x64xf32> -> vector<288x64xf32>
    %95 = arith.addf %89, %94 : vector<288x64xf32>
    %c1_73 = arith.constant 1 : index
    %c0_74 = arith.constant 0 : index
    %96 = vector.load %arg12[%c1_73, %c0_74] : memref<332x64xf32, #tpu.memory_space<vmem>>, vector<288x64xf32>
    %97 = arith.truncf %96 : vector<288x64xf32> to vector<288x64xbf16>
    %c1_75 = arith.constant 1 : index
    %c0_76 = arith.constant 0 : index
    %c0_77 = arith.constant 0 : index
    %98 = vector.load %arg5[%c1_75, %c0_76, %c0_77] : memref<9x64x64xbf16, #tpu.memory_space<vmem>>, vector<1x64x64xbf16>
    %99 = vector.shape_cast %98 : vector<1x64x64xbf16> to vector<64x64xbf16>
    %cst_78 = arith.constant dense<0.000000e+00> : vector<288x64xf32>
    %100 = tpu.matmul %97, %99, %cst_78 {dimension_numbers = #tpu.dot_dimension_numbers<[1], [0], [0], [1], [0, 0, 1, 1], [], []>} : vector<288x64xbf16>, vector<64x64xbf16>, vector<288x64xf32> -> vector<288x64xf32>
    %101 = arith.addf %95, %100 : vector<288x64xf32>
    %c2_79 = arith.constant 2 : index
    %c0_80 = arith.constant 0 : index
    %102 = vector.load %arg12[%c2_79, %c0_80] : memref<332x64xf32, #tpu.memory_space<vmem>>, vector<288x64xf32>
    %103 = arith.truncf %102 : vector<288x64xf32> to vector<288x64xbf16>
    %c2_81 = arith.constant 2 : index
    %c0_82 = arith.constant 0 : index
    %c0_83 = arith.constant 0 : index
    %104 = vector.load %arg5[%c2_81, %c0_82, %c0_83] : memref<9x64x64xbf16, #tpu.memory_space<vmem>>, vector<1x64x64xbf16>
    %105 = vector.shape_cast %104 : vector<1x64x64xbf16> to vector<64x64xbf16>
    %cst_84 = arith.constant dense<0.000000e+00> : vector<288x64xf32>
    %106 = tpu.matmul %103, %105, %cst_84 {dimension_numbers = #tpu.dot_dimension_numbers<[1], [0], [0], [1], [0, 0, 1, 1], [], []>} : vector<288x64xbf16>, vector<64x64xbf16>, vector<288x64xf32> -> vector<288x64xf32>
    %107 = arith.addf %101, %106 : vector<288x64xf32>
    %c18_85 = arith.constant 18 : index
    %c0_86 = arith.constant 0 : index
    %108 = vector.load %arg12[%c18_85, %c0_86] : memref<332x64xf32, #tpu.memory_space<vmem>>, vector<288x64xf32>
    %109 = arith.truncf %108 : vector<288x64xf32> to vector<288x64xbf16>
    %c3_87 = arith.constant 3 : index
    %c0_88 = arith.constant 0 : index
    %c0_89 = arith.constant 0 : index
    %110 = vector.load %arg5[%c3_87, %c0_88, %c0_89] : memref<9x64x64xbf16, #tpu.memory_space<vmem>>, vector<1x64x64xbf16>
    %111 = vector.shape_cast %110 : vector<1x64x64xbf16> to vector<64x64xbf16>
    %cst_90 = arith.constant dense<0.000000e+00> : vector<288x64xf32>
    %112 = tpu.matmul %109, %111, %cst_90 {dimension_numbers = #tpu.dot_dimension_numbers<[1], [0], [0], [1], [0, 0, 1, 1], [], []>} : vector<288x64xbf16>, vector<64x64xbf16>, vector<288x64xf32> -> vector<288x64xf32>
    %113 = arith.addf %107, %112 : vector<288x64xf32>
    %c19_91 = arith.constant 19 : index
    %c0_92 = arith.constant 0 : index
    %114 = vector.load %arg12[%c19_91, %c0_92] : memref<332x64xf32, #tpu.memory_space<vmem>>, vector<288x64xf32>
    %115 = arith.truncf %114 : vector<288x64xf32> to vector<288x64xbf16>
    %c4_93 = arith.constant 4 : index
    %c0_94 = arith.constant 0 : index
    %c0_95 = arith.constant 0 : index
    %116 = vector.load %arg5[%c4_93, %c0_94, %c0_95] : memref<9x64x64xbf16, #tpu.memory_space<vmem>>, vector<1x64x64xbf16>
    %117 = vector.shape_cast %116 : vector<1x64x64xbf16> to vector<64x64xbf16>
    %cst_96 = arith.constant dense<0.000000e+00> : vector<288x64xf32>
    %118 = tpu.matmul %115, %117, %cst_96 {dimension_numbers = #tpu.dot_dimension_numbers<[1], [0], [0], [1], [0, 0, 1, 1], [], []>} : vector<288x64xbf16>, vector<64x64xbf16>, vector<288x64xf32> -> vector<288x64xf32>
    %119 = arith.addf %113, %118 : vector<288x64xf32>
    %c20_97 = arith.constant 20 : index
    %c0_98 = arith.constant 0 : index
    %120 = vector.load %arg12[%c20_97, %c0_98] : memref<332x64xf32, #tpu.memory_space<vmem>>, vector<288x64xf32>
    %121 = arith.truncf %120 : vector<288x64xf32> to vector<288x64xbf16>
    %c5_99 = arith.constant 5 : index
    %c0_100 = arith.constant 0 : index
    %c0_101 = arith.constant 0 : index
    %122 = vector.load %arg5[%c5_99, %c0_100, %c0_101] : memref<9x64x64xbf16, #tpu.memory_space<vmem>>, vector<1x64x64xbf16>
    %123 = vector.shape_cast %122 : vector<1x64x64xbf16> to vector<64x64xbf16>
    %cst_102 = arith.constant dense<0.000000e+00> : vector<288x64xf32>
    %124 = tpu.matmul %121, %123, %cst_102 {dimension_numbers = #tpu.dot_dimension_numbers<[1], [0], [0], [1], [0, 0, 1, 1], [], []>} : vector<288x64xbf16>, vector<64x64xbf16>, vector<288x64xf32> -> vector<288x64xf32>
    %125 = arith.addf %119, %124 : vector<288x64xf32>
    %c36_103 = arith.constant 36 : index
    %c0_104 = arith.constant 0 : index
    %126 = vector.load %arg12[%c36_103, %c0_104] : memref<332x64xf32, #tpu.memory_space<vmem>>, vector<288x64xf32>
    %127 = arith.truncf %126 : vector<288x64xf32> to vector<288x64xbf16>
    %c6_105 = arith.constant 6 : index
    %c0_106 = arith.constant 0 : index
    %c0_107 = arith.constant 0 : index
    %128 = vector.load %arg5[%c6_105, %c0_106, %c0_107] : memref<9x64x64xbf16, #tpu.memory_space<vmem>>, vector<1x64x64xbf16>
    %129 = vector.shape_cast %128 : vector<1x64x64xbf16> to vector<64x64xbf16>
    %cst_108 = arith.constant dense<0.000000e+00> : vector<288x64xf32>
    %130 = tpu.matmul %127, %129, %cst_108 {dimension_numbers = #tpu.dot_dimension_numbers<[1], [0], [0], [1], [0, 0, 1, 1], [], []>} : vector<288x64xbf16>, vector<64x64xbf16>, vector<288x64xf32> -> vector<288x64xf32>
    %131 = arith.addf %125, %130 : vector<288x64xf32>
    %c37_109 = arith.constant 37 : index
    %c0_110 = arith.constant 0 : index
    %132 = vector.load %arg12[%c37_109, %c0_110] : memref<332x64xf32, #tpu.memory_space<vmem>>, vector<288x64xf32>
    %133 = arith.truncf %132 : vector<288x64xf32> to vector<288x64xbf16>
    %c7_111 = arith.constant 7 : index
    %c0_112 = arith.constant 0 : index
    %c0_113 = arith.constant 0 : index
    %134 = vector.load %arg5[%c7_111, %c0_112, %c0_113] : memref<9x64x64xbf16, #tpu.memory_space<vmem>>, vector<1x64x64xbf16>
    %135 = vector.shape_cast %134 : vector<1x64x64xbf16> to vector<64x64xbf16>
    %cst_114 = arith.constant dense<0.000000e+00> : vector<288x64xf32>
    %136 = tpu.matmul %133, %135, %cst_114 {dimension_numbers = #tpu.dot_dimension_numbers<[1], [0], [0], [1], [0, 0, 1, 1], [], []>} : vector<288x64xbf16>, vector<64x64xbf16>, vector<288x64xf32> -> vector<288x64xf32>
    %137 = arith.addf %131, %136 : vector<288x64xf32>
    %c38_115 = arith.constant 38 : index
    %c0_116 = arith.constant 0 : index
    %138 = vector.load %arg12[%c38_115, %c0_116] : memref<332x64xf32, #tpu.memory_space<vmem>>, vector<288x64xf32>
    %139 = arith.truncf %138 : vector<288x64xf32> to vector<288x64xbf16>
    %c8_117 = arith.constant 8 : index
    %c0_118 = arith.constant 0 : index
    %c0_119 = arith.constant 0 : index
    %140 = vector.load %arg5[%c8_117, %c0_118, %c0_119] : memref<9x64x64xbf16, #tpu.memory_space<vmem>>, vector<1x64x64xbf16>
    %141 = vector.shape_cast %140 : vector<1x64x64xbf16> to vector<64x64xbf16>
    %cst_120 = arith.constant dense<0.000000e+00> : vector<288x64xf32>
    %142 = tpu.matmul %139, %141, %cst_120 {dimension_numbers = #tpu.dot_dimension_numbers<[1], [0], [0], [1], [0, 0, 1, 1], [], []>} : vector<288x64xbf16>, vector<64x64xbf16>, vector<288x64xf32> -> vector<288x64xf32>
    %143 = arith.addf %137, %142 : vector<288x64xf32>
    %c0_121 = arith.constant 0 : index
    %c0_122 = arith.constant 0 : index
    %144 = vector.load %arg6[%c0_121, %c0_122] : memref<1x64xf32, #tpu.memory_space<vmem>>, vector<1x64xf32>
    %145 = vector.broadcast %144 : vector<1x64xf32> to vector<288x64xf32>
    %146 = arith.addf %143, %145 : vector<288x64xf32>
    %cst_123 = arith.constant 0.000000e+00 : f32
    %147 = vector.broadcast %cst_123 : f32 to vector<288x64xf32>
    %148 = arith.cmpf oge, %146, %147 : vector<288x64xf32>
    %cst_124 = arith.constant 2.000000e-01 : f32
    %149 = vector.broadcast %cst_124 : f32 to vector<288x64xf32>
    %150 = arith.mulf %149, %146 : vector<288x64xf32>
    %151 = arith.select %148, %146, %150 : vector<288x64xi1>, vector<288x64xf32>
    %cst_125 = arith.constant 0.000000e+00 : f32
    %152 = vector.shape_cast %2 : vector<288x1xi1> to vector<288x1xi1>
    %153 = vector.broadcast %152 : vector<288x1xi1> to vector<288x64xi1>
    %154 = vector.broadcast %cst_125 : f32 to vector<288x64xf32>
    %155 = arith.select %153, %151, %154 : vector<288x64xi1>, vector<288x64xf32>
    %cst_126 = arith.constant 0.000000e+00 : f32
    %156 = vector.broadcast %cst_126 : f32 to vector<1x64xf32>
    %157 = vector.extract_strided_slice %155 {offsets = [0, 0], sizes = [287, 64], strides = [1, 1]} : vector<288x64xf32> to vector<287x64xf32>
    %158 = tpu.concatenate %156, %157 in 0 : vector<1x64xf32>, vector<287x64xf32> -> vector<288x64xf32>
    %159 = vector.extract_strided_slice %155 {offsets = [1, 0], sizes = [287, 64], strides = [1, 1]} : vector<288x64xf32> to vector<287x64xf32>
    %160 = tpu.concatenate %159, %156 in 0 : vector<287x64xf32>, vector<1x64xf32> -> vector<288x64xf32>
    %c15_i32 = arith.constant 15 : i32
    %161 = vector.broadcast %c15_i32 : i32 to vector<288x1xi32>
    %162 = arith.cmpi eq, %0, %161 : vector<288x1xi32>
    %cst_127 = arith.constant 5.000000e-01 : f32
    %cst_128 = arith.constant 2.500000e-01 : f32
    %163 = vector.broadcast %cst_127 : f32 to vector<288x1xf32>
    %164 = vector.broadcast %cst_128 : f32 to vector<288x1xf32>
    %165 = arith.select %162, %163, %164 : vector<288x1xi1>, vector<288x1xf32>
    %c0_i32 = arith.constant 0 : i32
    %166 = vector.broadcast %c0_i32 : i32 to vector<288x1xi32>
    %167 = arith.cmpi eq, %0, %166 : vector<288x1xi32>
    %cst_129 = arith.constant 5.000000e-01 : f32
    %cst_130 = arith.constant 2.500000e-01 : f32
    %168 = vector.broadcast %cst_129 : f32 to vector<288x1xf32>
    %169 = vector.broadcast %cst_130 : f32 to vector<288x1xf32>
    %170 = arith.select %167, %168, %169 : vector<288x1xi1>, vector<288x1xf32>
    %171 = vector.broadcast %165 : vector<288x1xf32> to vector<288x64xf32>
    %172 = arith.mulf %171, %158 : vector<288x64xf32>
    %cst_131 = arith.constant 5.000000e-01 : f32
    %173 = vector.broadcast %cst_131 : f32 to vector<288x64xf32>
    %174 = arith.mulf %173, %155 : vector<288x64xf32>
    %175 = arith.addf %172, %174 : vector<288x64xf32>
    %176 = vector.broadcast %170 : vector<288x1xf32> to vector<288x64xf32>
    %177 = arith.mulf %176, %160 : vector<288x64xf32>
    %178 = arith.addf %175, %177 : vector<288x64xf32>
    %c19_132 = arith.constant 19 : index
    %c0_133 = arith.constant 0 : index
    %179 = vector.load %arg13[%c19_132, %c0_133] : memref<332x64xf32, #tpu.memory_space<vmem>>, vector<288x64xf32>
    tpu.vector_store %arg13[%c19_132, %c0_133], %178 {strides = array<i32>} : memref<332x64xf32, #tpu.memory_space<vmem>>, vector<288x64xf32>,
    %c36_134 = arith.constant 36 : index
    %c0_135 = arith.constant 0 : index
    %180 = vector.load %arg13[%c36_134, %c0_135] : memref<332x64xf32, #tpu.memory_space<vmem>>, vector<18x64xf32>
    %c0_136 = arith.constant 0 : index
    %c0_137 = arith.constant 0 : index
    %181 = vector.load %arg13[%c0_136, %c0_137] : memref<332x64xf32, #tpu.memory_space<vmem>>, vector<18x64xf32>
    tpu.vector_store %arg13[%c0_136, %c0_137], %180 {strides = array<i32>} : memref<332x64xf32, #tpu.memory_space<vmem>>, vector<18x64xf32>,
    %c270 = arith.constant 270 : index
    %c0_138 = arith.constant 0 : index
    %182 = vector.load %arg13[%c270, %c0_138] : memref<332x64xf32, #tpu.memory_space<vmem>>, vector<18x64xf32>
    %c306 = arith.constant 306 : index
    %c0_139 = arith.constant 0 : index
    %183 = vector.load %arg13[%c306, %c0_139] : memref<332x64xf32, #tpu.memory_space<vmem>>, vector<18x64xf32>
    tpu.vector_store %arg13[%c306, %c0_139], %182 {strides = array<i32>} : memref<332x64xf32, #tpu.memory_space<vmem>>, vector<18x64xf32>,
    %c1_140 = arith.constant 1 : index
    %c0_141 = arith.constant 0 : index
    %184 = vector.load %arg13[%c1_140, %c0_141] : memref<332x64xf32, #tpu.memory_space<vmem>>, vector<288x64xf32>
    %cst_142 = arith.constant 2.500000e-01 : f32
    %185 = vector.broadcast %cst_142 : f32 to vector<288x64xf32>
    %186 = arith.mulf %185, %184 : vector<288x64xf32>
    %c19_143 = arith.constant 19 : index
    %c0_144 = arith.constant 0 : index
    %187 = vector.load %arg13[%c19_143, %c0_144] : memref<332x64xf32, #tpu.memory_space<vmem>>, vector<288x64xf32>
    %cst_145 = arith.constant 5.000000e-01 : f32
    %188 = vector.broadcast %cst_145 : f32 to vector<288x64xf32>
    %189 = arith.mulf %188, %187 : vector<288x64xf32>
    %190 = arith.addf %186, %189 : vector<288x64xf32>
    %c37_146 = arith.constant 37 : index
    %c0_147 = arith.constant 0 : index
    %191 = vector.load %arg13[%c37_146, %c0_147] : memref<332x64xf32, #tpu.memory_space<vmem>>, vector<288x64xf32>
    %cst_148 = arith.constant 2.500000e-01 : f32
    %192 = vector.broadcast %cst_148 : f32 to vector<288x64xf32>
    %193 = arith.mulf %192, %191 : vector<288x64xf32>
    %194 = arith.addf %190, %193 : vector<288x64xf32>
    %cst_149 = arith.constant 0.000000e+00 : f32
    %195 = vector.shape_cast %2 : vector<288x1xi1> to vector<288x1xi1>
    %196 = vector.broadcast %195 : vector<288x1xi1> to vector<288x64xi1>
    %197 = vector.broadcast %cst_149 : f32 to vector<288x64xf32>
    %198 = arith.select %196, %194, %197 : vector<288x64xi1>, vector<288x64xf32>
    %c19_150 = arith.constant 19 : index
    %c0_151 = arith.constant 0 : index
    %199 = vector.load %arg12[%c19_150, %c0_151] : memref<332x64xf32, #tpu.memory_space<vmem>>, vector<288x64xf32>
    tpu.vector_store %arg12[%c19_150, %c0_151], %198 {strides = array<i32>} : memref<332x64xf32, #tpu.memory_space<vmem>>, vector<288x64xf32>,
    %cst_152 = arith.constant 0.000000e+00 : f32
    %200 = vector.broadcast %cst_152 : f32 to vector<144x64xf32>
    %c0_153 = arith.constant 0 : index
    %c0_154 = arith.constant 0 : index
    %201 = tpu.strided_load %arg12[%c0_153, %c0_154] {strides = array<i32: 2, 1>} : memref<332x64xf32, #tpu.memory_space<vmem>>, vector<144x64xf32>
    %202 = arith.truncf %201 : vector<144x64xf32> to vector<144x64xbf16>
    %c0_155 = arith.constant 0 : index
    %c0_156 = arith.constant 0 : index
    %c0_157 = arith.constant 0 : index
    %203 = vector.load %arg7[%c0_155, %c0_156, %c0_157] : memref<9x64x64xbf16, #tpu.memory_space<vmem>>, vector<1x64x64xbf16>
    %204 = vector.shape_cast %203 : vector<1x64x64xbf16> to vector<64x64xbf16>
    %cst_158 = arith.constant dense<0.000000e+00> : vector<144x64xf32>
    %205 = tpu.matmul %202, %204, %cst_158 {dimension_numbers = #tpu.dot_dimension_numbers<[1], [0], [0], [1], [0, 0, 1, 1], [], []>} : vector<144x64xbf16>, vector<64x64xbf16>, vector<144x64xf32> -> vector<144x64xf32>
    %206 = arith.addf %200, %205 : vector<144x64xf32>
    %c1_159 = arith.constant 1 : index
    %c0_160 = arith.constant 0 : index
    %207 = tpu.strided_load %arg12[%c1_159, %c0_160] {strides = array<i32: 2, 1>} : memref<332x64xf32, #tpu.memory_space<vmem>>, vector<144x64xf32>
    %208 = arith.truncf %207 : vector<144x64xf32> to vector<144x64xbf16>
    %c1_161 = arith.constant 1 : index
    %c0_162 = arith.constant 0 : index
    %c0_163 = arith.constant 0 : index
    %209 = vector.load %arg7[%c1_161, %c0_162, %c0_163] : memref<9x64x64xbf16, #tpu.memory_space<vmem>>, vector<1x64x64xbf16>
    %210 = vector.shape_cast %209 : vector<1x64x64xbf16> to vector<64x64xbf16>
    %cst_164 = arith.constant dense<0.000000e+00> : vector<144x64xf32>
    %211 = tpu.matmul %208, %210, %cst_164 {dimension_numbers = #tpu.dot_dimension_numbers<[1], [0], [0], [1], [0, 0, 1, 1], [], []>} : vector<144x64xbf16>, vector<64x64xbf16>, vector<144x64xf32> -> vector<144x64xf32>
    %212 = arith.addf %206, %211 : vector<144x64xf32>
    %c2_165 = arith.constant 2 : index
    %c0_166 = arith.constant 0 : index
    %213 = tpu.strided_load %arg12[%c2_165, %c0_166] {strides = array<i32: 2, 1>} : memref<332x64xf32, #tpu.memory_space<vmem>>, vector<144x64xf32>
    %214 = arith.truncf %213 : vector<144x64xf32> to vector<144x64xbf16>
    %c2_167 = arith.constant 2 : index
    %c0_168 = arith.constant 0 : index
    %c0_169 = arith.constant 0 : index
    %215 = vector.load %arg7[%c2_167, %c0_168, %c0_169] : memref<9x64x64xbf16, #tpu.memory_space<vmem>>, vector<1x64x64xbf16>
    %216 = vector.shape_cast %215 : vector<1x64x64xbf16> to vector<64x64xbf16>
    %cst_170 = arith.constant dense<0.000000e+00> : vector<144x64xf32>
    %217 = tpu.matmul %214, %216, %cst_170 {dimension_numbers = #tpu.dot_dimension_numbers<[1], [0], [0], [1], [0, 0, 1, 1], [], []>} : vector<144x64xbf16>, vector<64x64xbf16>, vector<144x64xf32> -> vector<144x64xf32>
    %218 = arith.addf %212, %217 : vector<144x64xf32>
    %c18_171 = arith.constant 18 : index
    %c0_172 = arith.constant 0 : index
    %219 = tpu.strided_load %arg12[%c18_171, %c0_172] {strides = array<i32: 2, 1>} : memref<332x64xf32, #tpu.memory_space<vmem>>, vector<144x64xf32>
    %220 = arith.truncf %219 : vector<144x64xf32> to vector<144x64xbf16>
    %c3_173 = arith.constant 3 : index
    %c0_174 = arith.constant 0 : index
    %c0_175 = arith.constant 0 : index
    %221 = vector.load %arg7[%c3_173, %c0_174, %c0_175] : memref<9x64x64xbf16, #tpu.memory_space<vmem>>, vector<1x64x64xbf16>
    %222 = vector.shape_cast %221 : vector<1x64x64xbf16> to vector<64x64xbf16>
    %cst_176 = arith.constant dense<0.000000e+00> : vector<144x64xf32>
    %223 = tpu.matmul %220, %222, %cst_176 {dimension_numbers = #tpu.dot_dimension_numbers<[1], [0], [0], [1], [0, 0, 1, 1], [], []>} : vector<144x64xbf16>, vector<64x64xbf16>, vector<144x64xf32> -> vector<144x64xf32>
    %224 = arith.addf %218, %223 : vector<144x64xf32>
    %c19_177 = arith.constant 19 : index
    %c0_178 = arith.constant 0 : index
    %225 = tpu.strided_load %arg12[%c19_177, %c0_178] {strides = array<i32: 2, 1>} : memref<332x64xf32, #tpu.memory_space<vmem>>, vector<144x64xf32>
    %226 = arith.truncf %225 : vector<144x64xf32> to vector<144x64xbf16>
    %c4_179 = arith.constant 4 : index
    %c0_180 = arith.constant 0 : index
    %c0_181 = arith.constant 0 : index
    %227 = vector.load %arg7[%c4_179, %c0_180, %c0_181] : memref<9x64x64xbf16, #tpu.memory_space<vmem>>, vector<1x64x64xbf16>
    %228 = vector.shape_cast %227 : vector<1x64x64xbf16> to vector<64x64xbf16>
    %cst_182 = arith.constant dense<0.000000e+00> : vector<144x64xf32>
    %229 = tpu.matmul %226, %228, %cst_182 {dimension_numbers = #tpu.dot_dimension_numbers<[1], [0], [0], [1], [0, 0, 1, 1], [], []>} : vector<144x64xbf16>, vector<64x64xbf16>, vector<144x64xf32> -> vector<144x64xf32>
    %230 = arith.addf %224, %229 : vector<144x64xf32>
    %c20_183 = arith.constant 20 : index
    %c0_184 = arith.constant 0 : index
    %231 = tpu.strided_load %arg12[%c20_183, %c0_184] {strides = array<i32: 2, 1>} : memref<332x64xf32, #tpu.memory_space<vmem>>, vector<144x64xf32>
    %232 = arith.truncf %231 : vector<144x64xf32> to vector<144x64xbf16>
    %c5_185 = arith.constant 5 : index
    %c0_186 = arith.constant 0 : index
    %c0_187 = arith.constant 0 : index
    %233 = vector.load %arg7[%c5_185, %c0_186, %c0_187] : memref<9x64x64xbf16, #tpu.memory_space<vmem>>, vector<1x64x64xbf16>
    %234 = vector.shape_cast %233 : vector<1x64x64xbf16> to vector<64x64xbf16>
    %cst_188 = arith.constant dense<0.000000e+00> : vector<144x64xf32>
    %235 = tpu.matmul %232, %234, %cst_188 {dimension_numbers = #tpu.dot_dimension_numbers<[1], [0], [0], [1], [0, 0, 1, 1], [], []>} : vector<144x64xbf16>, vector<64x64xbf16>, vector<144x64xf32> -> vector<144x64xf32>
    %236 = arith.addf %230, %235 : vector<144x64xf32>
    %c36_189 = arith.constant 36 : index
    %c0_190 = arith.constant 0 : index
    %237 = tpu.strided_load %arg12[%c36_189, %c0_190] {strides = array<i32: 2, 1>} : memref<332x64xf32, #tpu.memory_space<vmem>>, vector<144x64xf32>
    %238 = arith.truncf %237 : vector<144x64xf32> to vector<144x64xbf16>
    %c6_191 = arith.constant 6 : index
    %c0_192 = arith.constant 0 : index
    %c0_193 = arith.constant 0 : index
    %239 = vector.load %arg7[%c6_191, %c0_192, %c0_193] : memref<9x64x64xbf16, #tpu.memory_space<vmem>>, vector<1x64x64xbf16>
    %240 = vector.shape_cast %239 : vector<1x64x64xbf16> to vector<64x64xbf16>
    %cst_194 = arith.constant dense<0.000000e+00> : vector<144x64xf32>
    %241 = tpu.matmul %238, %240, %cst_194 {dimension_numbers = #tpu.dot_dimension_numbers<[1], [0], [0], [1], [0, 0, 1, 1], [], []>} : vector<144x64xbf16>, vector<64x64xbf16>, vector<144x64xf32> -> vector<144x64xf32>
    %242 = arith.addf %236, %241 : vector<144x64xf32>
    %c37_195 = arith.constant 37 : index
    %c0_196 = arith.constant 0 : index
    %243 = tpu.strided_load %arg12[%c37_195, %c0_196] {strides = array<i32: 2, 1>} : memref<332x64xf32, #tpu.memory_space<vmem>>, vector<144x64xf32>
    %244 = arith.truncf %243 : vector<144x64xf32> to vector<144x64xbf16>
    %c7_197 = arith.constant 7 : index
    %c0_198 = arith.constant 0 : index
    %c0_199 = arith.constant 0 : index
    %245 = vector.load %arg7[%c7_197, %c0_198, %c0_199] : memref<9x64x64xbf16, #tpu.memory_space<vmem>>, vector<1x64x64xbf16>
    %246 = vector.shape_cast %245 : vector<1x64x64xbf16> to vector<64x64xbf16>
    %cst_200 = arith.constant dense<0.000000e+00> : vector<144x64xf32>
    %247 = tpu.matmul %244, %246, %cst_200 {dimension_numbers = #tpu.dot_dimension_numbers<[1], [0], [0], [1], [0, 0, 1, 1], [], []>} : vector<144x64xbf16>, vector<64x64xbf16>, vector<144x64xf32> -> vector<144x64xf32>
    %248 = arith.addf %242, %247 : vector<144x64xf32>
    %c38_201 = arith.constant 38 : index
    %c0_202 = arith.constant 0 : index
    %249 = tpu.strided_load %arg12[%c38_201, %c0_202] {strides = array<i32: 2, 1>} : memref<332x64xf32, #tpu.memory_space<vmem>>, vector<144x64xf32>
    %250 = arith.truncf %249 : vector<144x64xf32> to vector<144x64xbf16>
    %c8_203 = arith.constant 8 : index
    %c0_204 = arith.constant 0 : index
    %c0_205 = arith.constant 0 : index
    %251 = vector.load %arg7[%c8_203, %c0_204, %c0_205] : memref<9x64x64xbf16, #tpu.memory_space<vmem>>, vector<1x64x64xbf16>
    %252 = vector.shape_cast %251 : vector<1x64x64xbf16> to vector<64x64xbf16>
    %cst_206 = arith.constant dense<0.000000e+00> : vector<144x64xf32>
    %253 = tpu.matmul %250, %252, %cst_206 {dimension_numbers = #tpu.dot_dimension_numbers<[1], [0], [0], [1], [0, 0, 1, 1], [], []>} : vector<144x64xbf16>, vector<64x64xbf16>, vector<144x64xf32> -> vector<144x64xf32>
    %254 = arith.addf %248, %253 : vector<144x64xf32>
    %c0_207 = arith.constant 0 : index
    %c0_208 = arith.constant 0 : index
    %255 = vector.load %arg8[%c0_207, %c0_208] : memref<1x64xf32, #tpu.memory_space<vmem>>, vector<1x64xf32>
    %256 = vector.broadcast %255 : vector<1x64xf32> to vector<144x64xf32>
    %257 = arith.addf %254, %256 : vector<144x64xf32>
    %c0_209 = arith.constant 0 : index
    %c19_210 = arith.constant 19 : index
    %c0_211 = arith.constant 0 : index
    %258 = tpu.strided_load %arg1[%c0_209, %c19_210, %c0_211] {strides = array<i32: 1, 2, 1>} : memref<1x332x3xf32, #tpu.memory_space<vmem>>, vector<1x144x3xf32>
    %259 = vector.shape_cast %258 : vector<1x144x3xf32> to vector<144x3xf32>
    %260 = arith.truncf %259 : vector<144x3xf32> to vector<144x3xbf16>
    %c0_212 = arith.constant 0 : index
    %c0_213 = arith.constant 0 : index
    %261 = vector.load %arg9[%c0_212, %c0_213] : memref<3x64xbf16, #tpu.memory_space<vmem>>, vector<3x64xbf16>
    %cst_214 = arith.constant dense<0.000000e+00> : vector<144x64xf32>
    %262 = tpu.matmul %260, %261, %cst_214 {dimension_numbers = #tpu.dot_dimension_numbers<[1], [0], [0], [1], [0, 0, 1, 1], [], []>} : vector<144x3xbf16>, vector<3x64xbf16>, vector<144x64xf32> -> vector<144x64xf32>
    %c0_215 = arith.constant 0 : index
    %c0_216 = arith.constant 0 : index
    %263 = vector.load %arg10[%c0_215, %c0_216] : memref<1x64xf32, #tpu.memory_space<vmem>>, vector<1x64xf32>
    %264 = vector.broadcast %263 : vector<1x64xf32> to vector<144x64xf32>
    %265 = arith.addf %262, %264 : vector<144x64xf32>
    %266 = arith.addf %257, %265 : vector<144x64xf32>
    %cst_217 = arith.constant 0.707106769 : f32
    %267 = vector.broadcast %cst_217 : f32 to vector<144x64xf32>
    %268 = arith.mulf %266, %267 : vector<144x64xf32>
    %cst_218 = arith.constant 0.000000e+00 : f32
    %269 = vector.shape_cast %5 : vector<144x1xi1> to vector<144x1xi1>
    %270 = vector.broadcast %269 : vector<144x1xi1> to vector<144x64xi1>
    %271 = vector.broadcast %cst_218 : f32 to vector<144x64xf32>
    %272 = arith.select %270, %268, %271 : vector<144x64xi1>, vector<144x64xf32>
    %cst_219 = arith.constant 0.000000e+00 : f32
    %273 = vector.broadcast %cst_219 : f32 to vector<11x64xf32>
    %c0_220 = arith.constant 0 : index
    %c0_221 = arith.constant 0 : index
    %c0_222 = arith.constant 0 : index
    %274 = vector.load %arg11[%c0_220, %c0_221, %c0_222] : memref<1x108x64xf32, #tpu.memory_space<vmem>>, vector<1x11x64xf32>
    %275 = vector.shape_cast %274 : vector<1x11x64xf32> to vector<11x64xf32>
    %276 = vector.shape_cast %273 : vector<11x64xf32> to vector<1x11x64xf32>
    tpu.vector_store %arg11[%c0_220, %c0_221, %c0_222], %276 {strides = array<i32>} : memref<1x108x64xf32, #tpu.memory_space<vmem>>, vector<1x11x64xf32>,
    %cst_223 = arith.constant 0.000000e+00 : f32
    %277 = vector.broadcast %cst_223 : f32 to vector<17x64xf32>
    %c0_224 = arith.constant 0 : index
    %c91 = arith.constant 91 : index
    %c0_225 = arith.constant 0 : index
    %278 = vector.load %arg11[%c0_224, %c91, %c0_225] : memref<1x108x64xf32, #tpu.memory_space<vmem>>, vector<1x17x64xf32>
    %279 = vector.shape_cast %278 : vector<1x17x64xf32> to vector<17x64xf32>
    %280 = vector.shape_cast %277 : vector<17x64xf32> to vector<1x17x64xf32>
    tpu.vector_store %arg11[%c0_224, %c91, %c0_225], %280 {strides = array<i32>} : memref<1x108x64xf32, #tpu.memory_space<vmem>>, vector<1x17x64xf32>,
    %281 = vector.extract_strided_slice %272 {offsets = [0, 0], sizes = [10, 64], strides = [1, 1]} : vector<144x64xf32> to vector<10x64xf32>
    %c0_226 = arith.constant 0 : index
    %c11 = arith.constant 11 : index
    %c0_227 = arith.constant 0 : index
    %282 = vector.load %arg11[%c0_226, %c11, %c0_227] : memref<1x108x64xf32, #tpu.memory_space<vmem>>, vector<1x10x64xf32>
    %283 = vector.shape_cast %282 : vector<1x10x64xf32> to vector<10x64xf32>
    %284 = vector.shape_cast %281 : vector<10x64xf32> to vector<1x10x64xf32>
    tpu.vector_store %arg11[%c0_226, %c11, %c0_227], %284 {strides = array<i32>} : memref<1x108x64xf32, #tpu.memory_space<vmem>>, vector<1x10x64xf32>,
    %285 = vector.extract_strided_slice %272 {offsets = [18, 0], sizes = [10, 64], strides = [1, 1]} : vector<144x64xf32> to vector<10x64xf32>
    %c0_228 = arith.constant 0 : index
    %c21 = arith.constant 21 : index
    %c0_229 = arith.constant 0 : index
    %286 = vector.load %arg11[%c0_228, %c21, %c0_229] : memref<1x108x64xf32, #tpu.memory_space<vmem>>, vector<1x10x64xf32>
    %287 = vector.shape_cast %286 : vector<1x10x64xf32> to vector<10x64xf32>
    %288 = vector.shape_cast %285 : vector<10x64xf32> to vector<1x10x64xf32>
    tpu.vector_store %arg11[%c0_228, %c21, %c0_229], %288 {strides = array<i32>} : memref<1x108x64xf32, #tpu.memory_space<vmem>>, vector<1x10x64xf32>,
    %289 = vector.extract_strided_slice %272 {offsets = [36, 0], sizes = [10, 64], strides = [1, 1]} : vector<144x64xf32> to vector<10x64xf32>
    %c0_230 = arith.constant 0 : index
    %c31 = arith.constant 31 : index
    %c0_231 = arith.constant 0 : index
    %290 = vector.load %arg11[%c0_230, %c31, %c0_231] : memref<1x108x64xf32, #tpu.memory_space<vmem>>, vector<1x10x64xf32>
    %291 = vector.shape_cast %290 : vector<1x10x64xf32> to vector<10x64xf32>
    %292 = vector.shape_cast %289 : vector<10x64xf32> to vector<1x10x64xf32>
    tpu.vector_store %arg11[%c0_230, %c31, %c0_231], %292 {strides = array<i32>} : memref<1x108x64xf32, #tpu.memory_space<vmem>>, vector<1x10x64xf32>,
    %293 = vector.extract_strided_slice %272 {offsets = [54, 0], sizes = [10, 64], strides = [1, 1]} : vector<144x64xf32> to vector<10x64xf32>
    %c0_232 = arith.constant 0 : index
    %c41 = arith.constant 41 : index
    %c0_233 = arith.constant 0 : index
    %294 = vector.load %arg11[%c0_232, %c41, %c0_233] : memref<1x108x64xf32, #tpu.memory_space<vmem>>, vector<1x10x64xf32>
    %295 = vector.shape_cast %294 : vector<1x10x64xf32> to vector<10x64xf32>
    %296 = vector.shape_cast %293 : vector<10x64xf32> to vector<1x10x64xf32>
    tpu.vector_store %arg11[%c0_232, %c41, %c0_233], %296 {strides = array<i32>} : memref<1x108x64xf32, #tpu.memory_space<vmem>>, vector<1x10x64xf32>,
    %297 = vector.extract_strided_slice %272 {offsets = [72, 0], sizes = [10, 64], strides = [1, 1]} : vector<144x64xf32> to vector<10x64xf32>
    %c0_234 = arith.constant 0 : index
    %c51 = arith.constant 51 : index
    %c0_235 = arith.constant 0 : index
    %298 = vector.load %arg11[%c0_234, %c51, %c0_235] : memref<1x108x64xf32, #tpu.memory_space<vmem>>, vector<1x10x64xf32>
    %299 = vector.shape_cast %298 : vector<1x10x64xf32> to vector<10x64xf32>
    %300 = vector.shape_cast %297 : vector<10x64xf32> to vector<1x10x64xf32>
    tpu.vector_store %arg11[%c0_234, %c51, %c0_235], %300 {strides = array<i32>} : memref<1x108x64xf32, #tpu.memory_space<vmem>>, vector<1x10x64xf32>,
    %301 = vector.extract_strided_slice %272 {offsets = [90, 0], sizes = [10, 64], strides = [1, 1]} : vector<144x64xf32> to vector<10x64xf32>
    %c0_236 = arith.constant 0 : index
    %c61 = arith.constant 61 : index
    %c0_237 = arith.constant 0 : index
    %302 = vector.load %arg11[%c0_236, %c61, %c0_237] : memref<1x108x64xf32, #tpu.memory_space<vmem>>, vector<1x10x64xf32>
    %303 = vector.shape_cast %302 : vector<1x10x64xf32> to vector<10x64xf32>
    %304 = vector.shape_cast %301 : vector<10x64xf32> to vector<1x10x64xf32>
    tpu.vector_store %arg11[%c0_236, %c61, %c0_237], %304 {strides = array<i32>} : memref<1x108x64xf32, #tpu.memory_space<vmem>>, vector<1x10x64xf32>,
    %305 = vector.extract_strided_slice %272 {offsets = [108, 0], sizes = [10, 64], strides = [1, 1]} : vector<144x64xf32> to vector<10x64xf32>
    %c0_238 = arith.constant 0 : index
    %c71 = arith.constant 71 : index
    %c0_239 = arith.constant 0 : index
    %306 = vector.load %arg11[%c0_238, %c71, %c0_239] : memref<1x108x64xf32, #tpu.memory_space<vmem>>, vector<1x10x64xf32>
    %307 = vector.shape_cast %306 : vector<1x10x64xf32> to vector<10x64xf32>
    %308 = vector.shape_cast %305 : vector<10x64xf32> to vector<1x10x64xf32>
    tpu.vector_store %arg11[%c0_238, %c71, %c0_239], %308 {strides = array<i32>} : memref<1x108x64xf32, #tpu.memory_space<vmem>>, vector<1x10x64xf32>,
    %309 = vector.extract_strided_slice %272 {offsets = [126, 0], sizes = [10, 64], strides = [1, 1]} : vector<144x64xf32> to vector<10x64xf32>
    %c0_240 = arith.constant 0 : index
    %c81 = arith.constant 81 : index
    %c0_241 = arith.constant 0 : index
    %310 = vector.load %arg11[%c0_240, %c81, %c0_241] : memref<1x108x64xf32, #tpu.memory_space<vmem>>, vector<1x10x64xf32>
    %311 = vector.shape_cast %310 : vector<1x10x64xf32> to vector<10x64xf32>
    %312 = vector.shape_cast %309 : vector<10x64xf32> to vector<1x10x64xf32>
    tpu.vector_store %arg11[%c0_240, %c81, %c0_241], %312 {strides = array<i32>} : memref<1x108x64xf32, #tpu.memory_space<vmem>>, vector<1x10x64xf32>,
    return
  }
  func.func @transform_0(%arg0: i32) -> (i32, i32, i32) {
    %c0_i32 = arith.constant 0 : i32
    %c0_i32_0 = arith.constant 0 : i32
    %c0_i32_1 = arith.constant 0 : i32
    return %arg0, %c0_i32, %c0_i32_0 : i32, i32, i32
  }
  func.func @transform_1(%arg0: i32) -> (i32, i32) {
    %c0_i32 = arith.constant 0 : i32
    %c0_i32_0 = arith.constant 0 : i32
    %c0_i32_1 = arith.constant 0 : i32
    return %c0_i32, %c0_i32_0 : i32, i32
  }
  func.func @transform_2(%arg0: i32) -> (i32, i32, i32) {
    %c0_i32 = arith.constant 0 : i32
    %c0_i32_0 = arith.constant 0 : i32
    %c0_i32_1 = arith.constant 0 : i32
    %c0_i32_2 = arith.constant 0 : i32
    return %c0_i32, %c0_i32_0, %c0_i32_1 : i32, i32, i32
  }
  func.func @transform_3(%arg0: i32) -> (i32, i32) {
    %c0_i32 = arith.constant 0 : i32
    %c0_i32_0 = arith.constant 0 : i32
    %c0_i32_1 = arith.constant 0 : i32
    return %c0_i32, %c0_i32_0 : i32, i32
  }
  func.func @transform_4(%arg0: i32) -> (i32, i32, i32) {
    %c0_i32 = arith.constant 0 : i32
    %c0_i32_0 = arith.constant 0 : i32
    %c0_i32_1 = arith.constant 0 : i32
    %c0_i32_2 = arith.constant 0 : i32
    return %c0_i32, %c0_i32_0, %c0_i32_1 : i32, i32, i32
  }
  func.func @transform_5(%arg0: i32) -> (i32, i32) {
    %c0_i32 = arith.constant 0 : i32
    %c0_i32_0 = arith.constant 0 : i32
    %c0_i32_1 = arith.constant 0 : i32
    return %c0_i32, %c0_i32_0 : i32, i32
  }
  func.func @transform_6(%arg0: i32) -> (i32, i32, i32) {
    %c0_i32 = arith.constant 0 : i32
    %c0_i32_0 = arith.constant 0 : i32
    %c0_i32_1 = arith.constant 0 : i32
    %c0_i32_2 = arith.constant 0 : i32
    return %c0_i32, %c0_i32_0, %c0_i32_1 : i32, i32, i32
  }
  func.func @transform_7(%arg0: i32) -> (i32, i32) {
    %c0_i32 = arith.constant 0 : i32
    %c0_i32_0 = arith.constant 0 : i32
    %c0_i32_1 = arith.constant 0 : i32
    return %c0_i32, %c0_i32_0 : i32, i32
  }
  func.func @transform_8(%arg0: i32) -> (i32, i32) {
    %c0_i32 = arith.constant 0 : i32
    %c0_i32_0 = arith.constant 0 : i32
    %c0_i32_1 = arith.constant 0 : i32
    return %c0_i32, %c0_i32_0 : i32, i32
  }
  func.func @transform_9(%arg0: i32) -> (i32, i32) {
    %c0_i32 = arith.constant 0 : i32
    %c0_i32_0 = arith.constant 0 : i32
    %c0_i32_1 = arith.constant 0 : i32
    return %c0_i32, %c0_i32_0 : i32, i32
  }
  func.func @transform_10(%arg0: i32) -> (i32, i32, i32) {
    %c0_i32 = arith.constant 0 : i32
    %c0_i32_0 = arith.constant 0 : i32
    %c0_i32_1 = arith.constant 0 : i32
    return %arg0, %c0_i32, %c0_i32_0 : i32, i32, i32
  }
}

</mosaic_0001>

<bundles_post_ra>
// kernel: tpu_custom_call.1
= control target key start
LH: loop header
LB: loop body
LE: loop exit
PB: predicated region body
PF: predicated region fallthrough
CT: control target
= control target key end

     0   :  { %s18299_s0 = inlined_call_operand.hbm [shape: f32[2,332,3], index: 0, kind: input, shape index: {}]   ;;  %s18300_s1 = inlined_call_operand.hbm [shape: s32[288,1], index: 1, kind: input, shape index: {}]   ;;  %s18301_s2 = inlined_call_operand.hbm [shape: bf16[9,3,64], index: 2, kind: input, shape index: {}]   ;;  %s18302_s3 = inlined_call_operand.hbm [shape: f32[1,64], index: 3, kind: input, shape index: {}]   ;;  %s18303_s4 = inlined_call_operand.hbm [shape: bf16[9,64,64], index: 4, kind: input, shape index: {}]   ;;  %s18304_s5 = inlined_call_operand.hbm [shape: f32[1,64], index: 5, kind: input, shape index: {}]   ;;  %s18305_s6 = inlined_call_operand.hbm [shape: bf16[9,64,64], index: 6, kind: input, shape index: {}]   ;;  %s18306_s7 = inlined_call_operand.hbm [shape: f32[1,64], index: 7, kind: input, shape index: {}]   ;;  %s18307_s8 = inlined_call_operand.hbm [shape: bf16[3,64], index: 8, kind: input, shape index: {}]   ;;  %s18308_s9 = inlined_call_operand.hbm [shape: f32[1,64], index: 9, kind: input, shape index: {}]   ;;  %s18309_s10 = inlined_call_operand.hbm [shape: f32[2,108,64], index: 10, kind: output, shape index: {}]  }
   0x1   :  { %18450 = sst [smem:[#allocation85_spill]] %s18300_s1 }
   0x2   :  { %18451 = sst [smem:[#allocation86_spill]] %s18301_s2 }
   0x3   :  { %18452 = sst [smem:[#allocation87_spill]] %s18309_s10 }
   0x4   :  { %15 = vsyncpa [#allocation5], 0 }
   0x5   :  { %17 = vsyncpa [#allocation5 + $0x1], 0 }
   0x6   :  { %18 = vsyncpa [#allocation8], 0 }
   0x7   :  { %19 = vsyncpa [#allocation11], 0 }
   0x8   :  { %20 = vsyncpa [#allocation14], 0 }
   0x9   :  { %21 = vsyncpa [#allocation17], 0 }
   0xa   :  { %22 = vsyncpa [#allocation20], 0 }
   0xb   :  { %23 = vsyncpa [#allocation6], 0 }
   0xc   :  { %25 = vsyncpa [#allocation6 + $0x1], 0  ;;  %s15007_s13 = smov 0   ;;  %s15009_s14 = smov 0  }
   0xd   :  { %s15011_s15 = smov 0   ;;  %s15013_s16 = smov 0  }
   0xe LB: > { %s14928_s17 = smov [#allocation7]   ;;  %s15028_s19 = sadd.s32 4294967295, %s14926_s16   ;;  %s14926_s16 = sphi %s15013_s16, %s18742_s16   ;;  %s14922_s15 = sphi %s15011_s15, %s18741_s15   ;;  %s14918_s14 = sphi %s15009_s14, %s18740_s14   ;;  %s14914_s13 = sphi %s15007_s13, %s18739_s13  }
   0xf   : > { %s289_s18 = sshll.u32 %s14928_s17, 4  ;;  %p10999_p0 = scmp.ge.s32.totalorder %s14926_s16, 1  ;;  %s15033_s18 = int_to_ptr.vmem [resolvable:$true] %s289_s18 }
  0x10   : > { %p18313_p1 = scmp.eq.s32.totalorder %s15028_s19, 0  ;;  %p277_p2 = scmp.lt.s32.totalorder %s14926_s16, 3 }
  0x11   : > { %s14929_s21 = smov [#allocation10]   ;;  %s14930_s24 = smov [#allocation13]  }
  0x12   : > { %p15035_p3 = pnand %p10999_p0, %p277_p2  ;;  %s316_s22 = sshll.u32 %s14929_s21, 4  ;;  %s15048_s22 = int_to_ptr.vmem [resolvable:$true] %s316_s22 }
  0x13   : > { %s340_s25 = sshll.u32 %s14930_s24, 4  ;;  %s18456_s1 = sld [smem:[#allocation85_spill]]  ;;  %s15050_s25 = int_to_ptr.vmem [resolvable:$true] %s340_s25 }
  0x14   : > { %s18453_s20 = scalar_select %p15035_p3, 1, 0 }
  0x15   : > { %p14177_p5 = pneg %p15035_p3 }
  0x16   : > { %18454 = sst [smem:[#allocation29_spill]] %s18453_s20 }
  0x17   : > { %p15044_p6 = pnand %p14177_p5, %p18313_p1 }
  0x19   : > { %s14558_s28 = scalar_lea.hbm %s18456_s1, 4608  ;;  %p15060_p8 = pneg %p15044_p6 }
  0x1a   : > { %p14559_p7 = scmp.ne.s32.totalorder %s18456_s1, %s14558_s28  ;;  %p14565_p11 = scmp.lt.u32.totalorder %s14558_s28, %s18456_s1 }
  0x1c   : > { %p14561_p9 = pnand %p15060_p8, %p14559_p7 }
  0x1e   : > { %p14562_p10 = pneg %p14561_p9 }
  0x20   : > { %p14567_p12 = pnand %p14565_p11, %p14562_p10 }
  0x22   : > { %14570 = shalt.err (!%p14567_p12)
}
  0x23   : > { %s14571_s21 = scalar_lea.vmem %s15033_s18, 4608  ;;  %p14579_p5 = scmp.lt.s32.totalorder %s15033_s18, %s15033_s18 }
  0x24   : > { %p14572_p13 = scmp.ne.s32.totalorder %s15033_s18, %s14571_s21  ;;  %p14580_p4 = scmp.lt.s32.totalorder %s14571_s21, %s14571_s21 }
  0x26   : > { %p14574_p0 = pnand %p14572_p13, %p15060_p8  ;;  %p14581_p7 = por %p14580_p4, %p14579_p5 }
  0x28   : > { %p14575_p2 = pneg %p14574_p0 }
  0x2a   : > { %p14582_p9 = pnand %p14581_p7, %p14575_p2 }
  0x2c   : > { %14585 = shalt.err (!%p14582_p9)
}
  0x2d   : > { %s18312_s24 = smov 128   ;;  %s18315_s26 = smov 8  }
  0x2e   : > { %14180 = dma.hbm_to_vmem [thread:$0]  (!%p15044_p6), %s18456_s1, 4608, %s15033_s18, [#allocation8], %s18312_s24, %s18312_s24, %s18315_s26  }
  0x2f   : > { %s14586_s12 = scalar_lea.hbm %s18302_s3, 16 }
  0x30   : > { %p14587_p4 = scmp.ne.s32.totalorder %s18302_s3, %s14586_s12  ;;  %p14593_p12 = scmp.lt.u32.totalorder %s14586_s12, %s18302_s3 }
  0x32   : > { %p14589_p10 = pnand %p14587_p4, %p15060_p8 }
  0x34   : > { %p14590_p11 = pneg %p14589_p10 }
  0x36   : > { %p14595_p13 = pnand %p14593_p12, %p14590_p11 }
  0x38   : > { %14598 = shalt.err (!%p14595_p13)
}
  0x39   : > { %s14599_s18 = scalar_lea.vmem %s15048_s22, 16  ;;  %s14606_s27 = scalar_lea.vmem %s15048_s22, 32 }
  0x3a   : > { %p14600_p0 = scmp.ne.s32.totalorder %s15048_s22, %s14599_s18  ;;  %p14607_p7 = scmp.lt.s32.totalorder %s15048_s22, %s15048_s22 }
  0x3b   : > { %p14608_p9 = scmp.lt.s32.totalorder %s14606_s27, %s14599_s18 }
  0x3c   : > { %p14602_p2 = pnand %p14600_p0, %p15060_p8 }
  0x3d   : > { %p14609_p4 = por %p14608_p9, %p14607_p7 }
  0x3e   : > { %p14603_p5 = pneg %p14602_p2 }
  0x40   : > { %p14610_p10 = pnand %p14609_p4, %p14603_p5 }
  0x42   : > { %14613 = shalt.err (!%p14610_p10)
}
  0x43   : > { %14186 = dma.hbm_to_vmem [thread:$0]  (!%p15044_p6), %s18302_s3, 16, %s15048_s22, [#allocation11]  }
  0x44   : > { %s14614_s30 = scalar_lea.hbm %s18304_s5, 16 }
  0x45   : > { %p14615_p11 = scmp.ne.s32.totalorder %s18304_s5, %s14614_s30  ;;  %p14621_p0 = scmp.lt.u32.totalorder %s14614_s30, %s18304_s5 }
  0x47   : > { %p14617_p12 = pnand %p14615_p11, %p15060_p8 }
  0x49   : > { %p14618_p13 = pneg %p14617_p12 }
  0x4b   : > { %p14623_p2 = pnand %p14621_p0, %p14618_p13 }
  0x4d   : > { %14626 = shalt.err (!%p14623_p2)
}
  0x4e   : > { %s14627_s22 = scalar_lea.vmem %s15050_s25, 16  ;;  %s14634_s27 = scalar_lea.vmem %s15050_s25, 32 }
  0x4f   : > { %p14628_p5 = scmp.ne.s32.totalorder %s15050_s25, %s14627_s22  ;;  %p14635_p4 = scmp.lt.s32.totalorder %s15050_s25, %s15050_s25 }
  0x50   : > { %p14636_p10 = scmp.lt.s32.totalorder %s14634_s27, %s14627_s22 }
  0x51   : > { %p14630_p7 = pnand %p14628_p5, %p15060_p8 }
  0x52   : > { %p14637_p11 = por %p14636_p10, %p14635_p4 }
  0x53   : > { %p14631_p9 = pneg %p14630_p7 }
  0x55   : > { %p14638_p12 = pnand %p14637_p11, %p14631_p9 }
  0x57   : > { %14641 = shalt.err (!%p14638_p12)
}
  0x58   : > { %14192 = dma.hbm_to_vmem [thread:$0]  (!%p15044_p6), %s18304_s5, 16, %s15050_s25, [#allocation14]  }
  0x59   : > { %s14933_s28 = smov [#allocation16]   ;;  %s14934_s30 = smov [#allocation9]  }
  0x5a   : > { %s364_s29 = sshll.u32 %s14933_s28, 4  ;;  %s302_s12 = sshll.u32 %s14934_s30, 4  ;;  %s365_s29 = int_to_ptr.vmem [resolvable:$true] %s364_s29  ;;  %s303_s12 = int_to_ptr.vmem [resolvable:$true] %s302_s12 }
  0x5b   : > { %s14642_s18 = scalar_lea.hbm %s18306_s7, 16 }
  0x5c   : > { %p14643_p13 = scmp.ne.s32.totalorder %s18306_s7, %s14642_s18  ;;  %p14649_p5 = scmp.lt.u32.totalorder %s14642_s18, %s18306_s7 }
  0x5e   : > { %p14645_p0 = pnand %p14643_p13, %p15060_p8 }
  0x60   : > { %p14646_p2 = pneg %p14645_p0 }
  0x62   : > { %p14651_p7 = pnand %p14649_p5, %p14646_p2 }
  0x64   : > { %14654 = shalt.err (!%p14651_p7)
}
  0x65   : > { %s14655_s25 = scalar_lea.vmem %s365_s29, 16  ;;  %s14662_s20 = scalar_lea.vmem %s365_s29, 32 }
  0x66   : > { %p14656_p9 = scmp.ne.s32.totalorder %s365_s29, %s14655_s25  ;;  %p14663_p11 = scmp.lt.s32.totalorder %s365_s29, %s365_s29 }
  0x67   : > { %p14664_p12 = scmp.lt.s32.totalorder %s14662_s20, %s14655_s25 }
  0x68   : > { %p14658_p4 = pnand %p14656_p9, %p15060_p8 }
  0x69   : > { %p14665_p1 = por %p14664_p12, %p14663_p11 }
  0x6a   : > { %p14659_p10 = pneg %p14658_p4 }
  0x6c   : > { %p14666_p3 = pnand %p14665_p1, %p14659_p10 }
  0x6e   : > { %14669 = shalt.err (!%p14666_p3)
}
  0x6f   : > { %14198 = dma.hbm_to_vmem [thread:$0]  (!%p15044_p6), %s18306_s7, 16, %s365_s29, [#allocation17]  }
  0x70   : > { %s18458_s2 = sld [smem:[#allocation86_spill]] }
  0x76   : > { %s14670_s21 = scalar_lea.hbm %s18458_s2, 288 }
  0x77   : > { %p14671_p13 = scmp.ne.s32.totalorder %s18458_s2, %s14670_s21  ;;  %p14677_p3 = scmp.lt.u32.totalorder %s14670_s21, %s18458_s2 }
  0x79   : > { %p14673_p0 = pnand %p14671_p13, %p15060_p8 }
  0x7b   : > { %p14674_p1 = pneg %p14673_p0 }
  0x7d   : > { %p14679_p2 = pnand %p14677_p3, %p14674_p1 }
  0x7f   : > { %14682 = shalt.err (!%p14679_p2)
}
  0x80   : > { %s14683_s25 = scalar_lea.vmem %s303_s12, 288  ;;  %p14691_p4 = scmp.lt.s32.totalorder %s303_s12, %s303_s12 }
  0x81   : > { %p14684_p5 = scmp.ne.s32.totalorder %s303_s12, %s14683_s25  ;;  %p14692_p10 = scmp.lt.s32.totalorder %s14683_s25, %s14683_s25 }
  0x83   : > { %p14686_p7 = pnand %p14684_p5, %p15060_p8  ;;  %p14693_p11 = por %p14692_p10, %p14691_p4 }
  0x85   : > { %p14687_p9 = pneg %p14686_p7 }
  0x87   : > { %p14694_p12 = pnand %p14693_p11, %p14687_p9 }
  0x89   : > { %14697 = shalt.err (!%p14694_p12)
}
  0x8a   : > { %s14935_s29 = smov 32   ;;  %s14936_s20 = smov 2  }
  0x8b   : > { %14183 = dma.hbm_to_vmem [thread:$0]  (!%p15044_p6), %s18458_s2, 288, %s303_s12, [#allocation8], %s14935_s29, %s14935_s29, %s14936_s20  }
  0x8c   : > { %s14937_s24 = smov [#allocation12]   ;;  %s14698_s22 = scalar_lea.hbm %s18303_s4, 4608 }
  0x8d   : > { %s326_s17 = sshll.u32 %s14937_s24, 4  ;;  %p14699_p13 = scmp.ne.s32.totalorder %s18303_s4, %s14698_s22  ;;  %s327_s17 = int_to_ptr.vmem [resolvable:$true] %s326_s17 }
  0x8e   : > { %p14705_p3 = scmp.lt.u32.totalorder %s14698_s22, %s18303_s4 }
  0x8f   : > { %p14701_p0 = pnand %p14699_p13, %p15060_p8 }
  0x91   : > { %p14702_p1 = pneg %p14701_p0 }
  0x93   : > { %p14707_p2 = pnand %p14705_p3, %p14702_p1 }
  0x95   : > { %14710 = shalt.err (!%p14707_p2)
}
  0x96   : > { %s14711_s12 = scalar_lea.vmem %s327_s17, 4608  ;;  %p14719_p4 = scmp.lt.s32.totalorder %s327_s17, %s327_s17 }
  0x97   : > { %p14712_p5 = scmp.ne.s32.totalorder %s327_s17, %s14711_s12  ;;  %p14720_p10 = scmp.lt.s32.totalorder %s14711_s12, %s14711_s12 }
  0x99   : > { %p14714_p7 = pnand %p14712_p5, %p15060_p8  ;;  %p14721_p11 = por %p14720_p10, %p14719_p4 }
  0x9b   : > { %p14715_p9 = pneg %p14714_p7 }
  0x9d   : > { %p14722_p12 = pnand %p14721_p11, %p14715_p9 }
  0x9f   : > { %14725 = shalt.err (!%p14722_p12)
}
  0xa0   : > { %s14938_s29 = smov 64   ;;  %s14939_s20 = smov 4  }
  0xa1   : > { %14189 = dma.hbm_to_vmem [thread:$0]  (!%p15044_p6), %s18303_s4, 4608, %s327_s17, [#allocation11], %s14938_s29, %s14938_s29, %s14939_s20  }
  0xa2   : > { %s14940_s30 = smov [#allocation15]   ;;  %s14941_s21 = smov [#allocation18]  }
  0xa3   : > { %s350_s24 = sshll.u32 %s14940_s30, 4  ;;  %s375_s18 = sshll.u32 %s14941_s21, 4  ;;  %s351_s24 = int_to_ptr.vmem [resolvable:$true] %s350_s24  ;;  %s15186_s18 = int_to_ptr.vmem [resolvable:$true] %s375_s18 }
  0xa4   : > { %s14726_s10 = scalar_lea.hbm %s18305_s6, 4608 }
  0xa5   : > { %p14727_p13 = scmp.ne.s32.totalorder %s18305_s6, %s14726_s10  ;;  %p14733_p3 = scmp.lt.u32.totalorder %s14726_s10, %s18305_s6 }
  0xa7   : > { %p14729_p0 = pnand %p14727_p13, %p15060_p8 }
  0xa9   : > { %p14730_p1 = pneg %p14729_p0 }
  0xab   : > { %p14735_p2 = pnand %p14733_p3, %p14730_p1 }
  0xad   : > { %14738 = shalt.err (!%p14735_p2)
}
  0xae   : > { %s14739_s28 = scalar_lea.vmem %s351_s24, 4608  ;;  %p14747_p4 = scmp.lt.s32.totalorder %s351_s24, %s351_s24 }
  0xaf   : > { %p14740_p5 = scmp.ne.s32.totalorder %s351_s24, %s14739_s28  ;;  %p14748_p10 = scmp.lt.s32.totalorder %s14739_s28, %s14739_s28 }
  0xb1   : > { %p14742_p7 = pnand %p14740_p5, %p15060_p8  ;;  %p14749_p11 = por %p14748_p10, %p14747_p4 }
  0xb3   : > { %p14743_p9 = pneg %p14742_p7 }
  0xb5   : > { %p14750_p12 = pnand %p14749_p11, %p14743_p9 }
  0xb7   : > { %14753 = shalt.err (!%p14750_p12)
}
  0xb8   : > { %14195 = dma.hbm_to_vmem [thread:$0]  (!%p15044_p6), %s18305_s6, 4608, %s351_s24, [#allocation14], %s14938_s29, %s14938_s29, %s14939_s20  }
  0xb9   : > { %s14754_s10 = scalar_lea.hbm %s18307_s8, 32 }
  0xba   : > { %p14755_p13 = scmp.ne.s32.totalorder %s18307_s8, %s14754_s10  ;;  %p14761_p3 = scmp.lt.u32.totalorder %s14754_s10, %s18307_s8 }
  0xbc   : > { %p14757_p0 = pnand %p14755_p13, %p15060_p8 }
  0xbe   : > { %p14758_p1 = pneg %p14757_p0 }
  0xc0   : > { %p14763_p2 = pnand %p14761_p3, %p14758_p1 }
  0xc2   : > { %14766 = shalt.err (!%p14763_p2)
}
  0xc3   : > { %s14767_s29 = scalar_lea.vmem %s15186_s18, 32  ;;  %p14775_p4 = scmp.lt.s32.totalorder %s15186_s18, %s15186_s18 }
  0xc4   : > { %p14768_p5 = scmp.ne.s32.totalorder %s15186_s18, %s14767_s29  ;;  %p14776_p10 = scmp.lt.s32.totalorder %s14767_s29, %s14767_s29 }
  0xc6   : > { %p14770_p7 = pnand %p14768_p5, %p15060_p8  ;;  %p14777_p11 = por %p14776_p10, %p14775_p4 }
  0xc8   : > { %p14771_p9 = pneg %p14770_p7 }
  0xca   : > { %p14778_p12 = pnand %p14777_p11, %p14771_p9 }
  0xcc   : > { %14781 = shalt.err (!%p14778_p12)
}
  0xcd   : > { %14201 = dma.hbm_to_vmem [thread:$0]  (!%p15044_p6), %s18307_s8, 32, %s15186_s18, [#allocation17]  }
  0xce   : > { %s14942_s28 = smov [#allocation19]   ;;  %s14782_s27 = scalar_lea.hbm %s18308_s9, 16 }
  0xcf   : > { %s386_s30 = sshll.u32 %s14942_s28, 4  ;;  %p14783_p13 = scmp.ne.s32.totalorder %s18308_s9, %s14782_s27  ;;  %s387_s30 = int_to_ptr.vmem [resolvable:$true] %s386_s30 }
  0xd0   : > { %p14789_p3 = scmp.lt.u32.totalorder %s14782_s27, %s18308_s9 }
  0xd1   : > { %p14785_p0 = pnand %p14783_p13, %p15060_p8 }
  0xd3   : > { %p14786_p1 = pneg %p14785_p0 }
  0xd5   : > { %p14791_p2 = pnand %p14789_p3, %p14786_p1 }
  0xd7   : > { %14794 = shalt.err (!%p14791_p2)
}
  0xd8   : > { %s14795_s18 = scalar_lea.vmem %s387_s30, 16  ;;  %s14802_s17 = scalar_lea.vmem %s387_s30, 32 }
  0xd9   : > { %p14796_p5 = scmp.ne.s32.totalorder %s387_s30, %s14795_s18  ;;  %p14803_p4 = scmp.lt.s32.totalorder %s387_s30, %s387_s30 }
  0xda   : > { %p14804_p10 = scmp.lt.s32.totalorder %s14802_s17, %s14795_s18 }
  0xdb   : > { %p14798_p7 = pnand %p14796_p5, %p15060_p8 }
  0xdc   : > { %p14805_p11 = por %p14804_p10, %p14803_p4 }
  0xdd   : > { %p14799_p9 = pneg %p14798_p7 }
  0xdf   : > { %p14806_p12 = pnand %p14805_p11, %p14799_p9 }
  0xe1   : > { %14809 = shalt.err (!%p14806_p12)
}
  0xe2   : > { %14204 = dma.hbm_to_vmem [thread:$0]  (!%p15044_p6), %s18308_s9, 16, %s387_s30, [#allocation20]  }
  0xe3   : > { %s10998_s11 = sadd.s32 4294967294, %s14926_s16   ;;  %s15249_s23 = sadd.s32 1, %s14926_s16  }
  0xe4   : > { %s38_s24 = sadd.s32 1, %s14922_s15  ;;  %s35_s28 = ssub.s32 %s14926_s16, %s15249_s23 }
  0xe5   : > { %p45_p8 = scmp.ne.s32.totalorder %s14922_s15, %s14918_s14  ;;  %p36_p13 = scmp.eq.s32.totalorder %s35_s28, 0 }
  0xe6   : > { %p46_p0 = scmp.eq.s32.totalorder %s14926_s16, 0  ;;  %p51_p1 = scmp.ne.s32.totalorder %s14918_s14, %s14914_s13 }
  0xe7   : > { %p264_p3 = scmp.eq.s32.totalorder %s15028_s19, 1  ;;  %p18459_p5 = scmp.eq.s32.totalorder %s15028_s19, 0 }
  0xe8   : > { %s15261_s21 = scalar_select %p36_p13, %s14922_s15, %s38_s24  }
  0xe9   : > { %p47_p2 = por %p46_p0, %p45_p8  ;;  %p15265_p7 = por %p18459_p5, %p51_p1 }
  0xea   : > { %p15269_p6 = por %p264_p3, %p45_p8  ;;  %p270_p9 = scmp.eq.s32.totalorder %s10998_s11, 1 }
  0xeb   : > { %p14222_p4 = scmp.lt.s32.totalorder %s14926_s16, 2  ;;  %s397_s27 = sand.u32 1, %s14922_s15  }
  0xec   : > { %s18461_s30 = scalar_select %p15269_p6, 1, 0 }
  0xed   : > { %p15275_p10 = por %p270_p9, %p51_p1  ;;  %s14132_s25 = smul.u32 336, %s397_s27 }
  0xee   : > { %p15279_p11 = pnand %p14222_p4, %p47_p2  ;;  %s14133_s26 = smul.u32 5376, %s14926_s16 }
  0xef   : > { %s18462_s10 = scalar_select %p15275_p10, 1, 0 }
  0xf0   : > { %s15287_s29 = scalar_lea.hbm %s18299_s0, %s14133_s26  ;;  %s401_s20 = scalar_lea.vmem [#allocation4], %s14132_s25 }
  0xf1   : > { %s408_s11 = sshll.u32 %s401_s20, 4  ;;  %s15291_s24 = scalar_lea.sflag [#allocation5], %s397_s27  ;;  %s15289_s11 = int_to_ptr.vmem [resolvable:$true] %s408_s11 }
  0xf2   : > { %s14810_s28 = scalar_lea.hbm %s15287_s29, 5376  ;;  %p14812_p8 = pneg %p15279_p11 }
  0xf3   : > { %p14811_p12 = scmp.ne.s32.totalorder %s15287_s29, %s14810_s28  ;;  %s14815_s17 = scalar_lea.hbm %s18299_s0, 10752 }
  0xf4   : > { %p14816_p1 = scmp.lt.u32.totalorder %s15287_s29, %s18299_s0  ;;  %p14817_p3 = scmp.lt.u32.totalorder %s14815_s17, %s14810_s28 }
  0xf5   : > { %p14813_p13 = pnand %p14812_p8, %p14811_p12  ;;  %p14819_p5 = scmp.lt.u32.totalorder %s14810_s28, %s15287_s29 }
  0xf6   : > { %p14818_p2 = por %p14817_p3, %p14816_p1 }
  0xf7   : > { %p14814_p0 = pneg %p14813_p13 }
  0xf8   : > { %p14820_p9 = por %p14819_p5, %p14818_p2 }
  0xfa   : > { %p14821_p4 = pnand %p14820_p9, %p14814_p0 }
  0xfc   : > { %14824 = shalt.err (!%p14821_p4)
}
  0xfd   : > { %s14825_s27 = scalar_lea.vmem %s15289_s11, 5376  ;;  %s14943_s25 = smov [#allocation4]  }
  0xfe   : > { %p14826_p12 = scmp.ne.s32.totalorder %s15289_s11, %s14825_s27  ;;  %s14830_s20 = sshll.u32 %s14943_s25, 4  ;;  %s14831_s20 = int_to_ptr.vmem [resolvable:$false] %s14830_s20 }
  0xff   : > { %s14832_s1 = scalar_lea.vmem %s14831_s20, 10752  ;;  %p14833_p6 = scmp.lt.s32.totalorder %s15289_s11, %s14831_s20 }
 0x100   : > { %p14828_p13 = pnand %p14826_p12, %p14812_p8  ;;  %p14834_p1 = scmp.lt.s32.totalorder %s14832_s1, %s14825_s27 }
 0x102   : > { %p14829_p10 = pneg %p14828_p13  ;;  %p14835_p3 = por %p14834_p1, %p14833_p6 }
 0x104   : > { %p14836_p2 = pnand %p14835_p3, %p14829_p10 }
 0x106   : > { %14839 = shalt.err (!%p14836_p2)
}
 0x107   : > { %s18464_s2 = smov 8   ;;  %s18465_s28 = smov 128  }
 0x108   : > { %14208 = dma.hbm_to_vmem [thread:$0]  (!%p15279_p11), %s15287_s29, 5376, %s15289_s11, %s15291_s24, %s18465_s28, %s18465_s28, %s18464_s2  }
 0x109   : > { %s18466_s26 = sld [smem:[#allocation29_spill]] }
 0x10f   : > { %p18467_p8 = scmp.ne.s32.totalorder %s18466_s26, 0 }
 0x111   : > { %420 = sbr.rel (%p18467_p8) target bundleno = 2739 (0xab3), region = 60 }
 0x118   : > { %s15325_s18 = sand.u32 1, %s14918_s14  }
 0x119   : > { %s14134_s17 = smul.u32 336, %s15325_s18  ;;  %s423_s27 = scalar_lea.sflag [#allocation5], %s15325_s18 }
 0x11b   : > { %s15329_s25 = scalar_lea.vmem [#allocation4], %s14134_s17 }
 0x11c   : > { %14885 = dma.done.wait (%p15265_p7), %s423_s27, 5376  }
 0x11d   : > { %14887 = vsyncadd (%p15265_p7), %s423_s27, 4294961920  ;;  %p18468_p6 = scmp.eq.s32.totalorder %s15028_s19, 0 }
 0x11f   : > { %14889 = dma.done.wait (%p18468_p6), [#allocation8], 4896   ;;  %p18469_p10 = pmov %p18468_p6 }
 0x120   : > { %p18470_p11 = pmov %p18468_p6 }
 0x121   : > { %14891 = vsyncadd (%p18469_p10), [#allocation8], 4294962400 }
 0x122   : > { %14893 = dma.done.wait (%p18470_p11), [#allocation11], 4624   ;;  %p18471_p0 = pmov %p18468_p6 }
 0x124   : > { %14895 = vsyncadd (%p18471_p0), [#allocation11], 4294962672  ;;  %p18472_p5 = pmov %p18471_p0 }
 0x125   : > { %p18473_p9 = pmov %p18471_p0 }
 0x126   : > { %14897 = dma.done.wait (%p18472_p5), [#allocation14], 4624  }
 0x127   : > { %14899 = vsyncadd (%p18473_p9), [#allocation14], 4294962672  ;;  %p18474_p7 = pmov %p18471_p0 }
 0x128   : > { %p18475_p4 = pmov %p18471_p0 }
 0x129   : > { %14901 = dma.done.wait (%p18474_p7), [#allocation17], 48  }
 0x12a   : > { %14903 = vsyncadd (%p18475_p4), [#allocation17], 4294967248  ;;  %p18476_p12 = pmov %p18471_p0 }
 0x12b   : > { %p18477_p13 = pmov %p18471_p0 }
 0x12c   : > { %14905 = dma.done.wait (%p18476_p12), [#allocation20], 16  }
 0x12d   : > { %14907 = vsyncadd (%p18477_p13), [#allocation20], 4294967280  ;;  %vm765_vm0 = vcmask 1040384   ;;  %vm766_vm1 = vcmask 1041408   ;;  %v14944_v0 = vmov 65535   ;;  %v654_v5 = vld [vmem:[%s15329_s25 + $0x1] sm:$0xff] }
 0x12e   : > { %v767_v1 = vsel %vm765_vm0, 4294967295, %v14944_v0  ;;  %v709_v3 = vld [vmem:[#allocation9 + $0x2] sm:$0x3]  ;;  %v2216_v4 = vld [vmem:[#allocation9 + $0xa] sm:$0x3]  ;;  %vm18320_vm2 = vcmask 23552  }
 0x12f   : > { %v15356_v2 = vsel %vm766_vm1, %v767_v1, 0  ;;  %v655_v8 = vld [vmem:[%s15329_s25 + $0x9] sm:$0xff]  ;;  %v2161_v9 = vld [vmem:[%s15329_s25 + $0x14] sm:$0xff]  ;;  %v2162_v10 = vld [vmem:[%s15329_s25 + $0x1c] sm:$0xff]  ;;  %s14135_s22 = smul.u32 112, %s15325_s18  ;;  %s18735_s1 = sld [smem:[#allocation87_spill]] }
 0x130   : > { %18478 = vst [vmem:[#allocation30_spill] sm:$0xff] %v15356_v2  ;;  %v770_v6 = vand.u32 %v15356_v2, %v709_v3  ;;  %v2272_v7 = vand.u32 %v2216_v4, %v15356_v2  ;;  %v690_v11 = vpack.c.bf16 %v655_v8, %v654_v5  ;;  %v2197_v12 = vpack.c.bf16 %v2162_v10, %v2161_v9  ;;  %v656_v13 = vld [vmem:[%s15329_s25 + $0x11] sm:$0xff]  ;;  %v657_v14 = vld [vmem:[%s15329_s25 + $0x19] sm:$0xff]  ;;  %v2163_v18 = vld [vmem:[%s15329_s25 + $0x24] sm:$0xff]  ;;  %s14136_s29 = smul.u32 1792, %s15028_s19  ;;  %s10826_s19 = scalar_lea.sflag [#allocation6], %s15325_s18 }
 0x131   : > { %v653_v15 = vld [vmem:[#allocation9] sm:$0x3]  ;;  %v691_v16 = vpack.c.bf16 %v657_v14, %v656_v13  ;;  %v2165_v23 = vld [vmem:[%s15329_s25 + $0x34] sm:$0xff]  ;;  %v2167_v29 = vld [vmem:[%s15329_s25 + $0x44] sm:$0xff]  ;;  %s16267_s12 = scalar_lea.vmem [#allocation21], %s14135_s22  ;;  %p18736_p3 = scmp.ne.s32.totalorder %s18461_s30, 0 }
 0x132   : > { %12028 = vmatprep.subr.bf16.mxu1 %v770_v6  ;;  %12218 = vmatprep.subr.bf16.mxu0 %v2272_v7  ;;  %v1004_v17 = vand.u32 %v15356_v2, %v653_v15  ;;  %v2164_v19 = vld [vmem:[%s15329_s25 + $0x2c] sm:$0xff]  ;;  %v658_v20 = vld [vmem:[%s15329_s25 + $0x21] sm:$0xff]  ;;  %v661_v28 = vld [vmem:[%s15329_s25 + $0x39] sm:$0xff]  ;;  %s10839_s11 = sshll.u32 %s16267_s12, 4  ;;  %s14949_s26 = smov [#allocation21]   ;;  %s18253_s11 = int_to_ptr.vmem [resolvable:$true] %s10839_s11 }
 0x133   : > { %12029 = vmatpush3.bf16.msra.mxu1 %v770_v6  ;;  %12219 = vmatpush3.bf16.msra.mxu0 %v2272_v7  ;;  %v15370_v21 = vpack.c.bf16 %v2164_v19, %v2163_v18  ;;  %v659_v22 = vld [vmem:[%s15329_s25 + $0x29] sm:$0xff]  ;;  %v2166_v24 = vld [vmem:[%s15329_s25 + $0x3c] sm:$0xff]  ;;  %v660_v27 = vld [vmem:[%s15329_s25 + $0x31] sm:$0xff]  ;;  %s14840_s28 = scalar_lea.vmem %s18253_s11, 1792  ;;  %s14844_s17 = sshll.u32 %s14949_s26, 4  ;;  %s14845_s17 = int_to_ptr.vmem [resolvable:$false] %s14844_s17 }
 0x134   : > { %12030 = vmatprep.mubr.msk.bf16.mxu1 %vm18320_vm2, %v690_v11  ;;  %12220 = vmatprep.mubr.msk.bf16.mxu0 %vm18320_vm2, %v2197_v12  ;;  %v692_v25 = vpack.c.bf16 %v659_v22, %v658_v20  ;;  %v15377_v26 = vpack.c.bf16 %v2166_v24, %v2165_v23  ;;  %v2168_v30 = vld [vmem:[%s15329_s25 + $0x4c] sm:$0xff]  ;;  %v662_v31 = vld [vmem:[%s15329_s25 + $0x41] sm:$0xff]  ;;  %v2169_v33 = vld [vmem:[%s15329_s25 + $0x54] sm:$0xff]  ;;  %v693_v35 = vpack.c.bf16 %v661_v28, %v660_v27  ;;  %p14841_p1 = scmp.ne.s32.totalorder %s18253_s11, %s14840_s28  ;;  %s14846_s27 = scalar_lea.vmem %s14845_s17, 3584 }
 0x135   : > { %12066 = vmatprep.subr.bf16.mxu1 %v1004_v17  ;;  %v663_v32 = vld [vmem:[%s15329_s25 + $0x49] sm:$0xff]  ;;  %v2170_v34 = vld [vmem:[%s15329_s25 + $0x5c] sm:$0xff]  ;;  %v15393_v36 = vpack.c.bf16 %v2168_v30, %v2167_v29  ;;  %v664_v39 = vld [vmem:[%s15329_s25 + $0x51] sm:$0xff]  ;;  %s18251_s2 = scalar_lea.hbm %s18735_s1, %s14136_s29  ;;  %p14847_p6 = scmp.lt.s32.totalorder %s18253_s11, %s14845_s17 }
 0x136   : > { %12031 = vmatmul.mubr.msk.bf16.vlgmr.msra.gmra.mrb[0].mxu1 %vm18320_vm2, %v691_v16  ;;  %12221 = vmatmul.mubr.msk.bf16.vlgmr.msra.gmra.mrb[0].mxu0 %vm18320_vm2, %v15370_v21  ;;  %v694_v37 = vpack.c.bf16 %v663_v32, %v662_v31  ;;  %v15395_v38 = vpack.c.bf16 %v2170_v34, %v2169_v33  ;;  %v665_v40 = vld [vmem:[%s15329_s25 + $0x59] sm:$0xff]  ;;  %v2171_v41 = vld [vmem:[%s15329_s25 + $0x64] sm:$0xff]  ;;  %v2172_v42 = vld [vmem:[%s15329_s25 + $0x6c] sm:$0xff]  ;;  %p14842_p2 = pnand %p14841_p1, %p18736_p3  ;;  %p14848_p10 = scmp.lt.s32.totalorder %s14846_s27, %s14840_s28 }
 0x137   : > { %12067 = vmatpush3.bf16.msra.mxu1 %v1004_v17  ;;  %12034 = vmatprep.mubr.msk.bf16.mxu1 %vm18320_vm2, %v692_v25  ;;  %v666_v43 = vld [vmem:[%s15329_s25 + $0x61] sm:$0xff]  ;;  %v667_v44 = vld [vmem:[%s15329_s25 + $0x69] sm:$0xff]  ;;  %v2173_v45 = vld [vmem:[%s15329_s25 + $0x74] sm:$0xff]  ;;  %v695_v47 = vpack.c.bf16 %v665_v40, %v664_v39  ;;  %v15411_v48 = vpack.c.bf16 %v2172_v42, %v2171_v41 }
 0x138   : > { %12224 = vmatprep.mubr.msk.bf16.mxu0 %vm18320_vm2, %v15377_v26  ;;  %v2174_v46 = vld [vmem:[%s15329_s25 + $0x7c] sm:$0xff]  ;;  %v696_v49 = vpack.c.bf16 %v667_v44, %v666_v43  ;;  %v668_v51 = vld [vmem:[%s15329_s25 + $0x71] sm:$0xff]  ;;  %v2175_v53 = vld [vmem:[%s15329_s25 + $0x84] sm:$0xff]  ;;  %p14843_p8 = pneg %p14842_p2  ;;  %p14849_p11 = por %p14848_p10, %p14847_p6 }
 0x139   : > { %v15413_v50 = vpack.c.bf16 %v2174_v46, %v2173_v45  ;;  %v669_v52 = vld [vmem:[%s15329_s25 + $0x79] sm:$0xff]  ;;  %v2176_v54 = vld [vmem:[%s15329_s25 + $0x8c] sm:$0xff]  ;;  %v670_v55 = vld [vmem:[%s15329_s25 + $0x81] sm:$0xff] }
 0x13a   : > { %v671_v56 = vld [vmem:[%s15329_s25 + $0x89] sm:$0xff]  ;;  %v2177_v57 = vld [vmem:[%s15329_s25 + $0x94] sm:$0xff]  ;;  %v2178_v58 = vld [vmem:[%s15329_s25 + $0x9c] sm:$0xff]  ;;  %v697_v62 = vpack.c.bf16 %v669_v52, %v668_v51  ;;  %v15430_v63 = vpack.c.bf16 %v2176_v54, %v2175_v53  ;;  %p14850_p0 = pnand %p14849_p11, %p14843_p8 }
 0x13b   : > { %v2542_v59 = vld [vmem:[#allocation9 + $0xc] sm:$0x3]  ;;  %v1238_v61 = vld [vmem:[#allocation9 + $0x4] sm:$0x3]  ;;  %v698_v1 = vpack.c.bf16 %v671_v56, %v670_v55  ;;  %v15435_v3 = vpack.c.bf16 %v2178_v58, %v2177_v57  ;;  %v2868_v16 = vld [vmem:[#allocation9 + $0xe] sm:$0x3] }
 0x13c   : > { %v2598_v60 = vand.u32 %v2542_v59, %v15356_v2  ;;  %v15433_v0 = vand.u32 %v1238_v61, %v15356_v2  ;;  %v672_v4 = vld [vmem:[%s15329_s25 + $0x91] sm:$0xff]  ;;  %v673_v5 = vld [vmem:[%s15329_s25 + $0x99] sm:$0xff]  ;;  %v2179_v6 = vld [vmem:[%s15329_s25 + $0xa4] sm:$0xff]  ;;  %v15462_v19 = vand.u32 %v2868_v16, %v15356_v2 }
 0x13d   : > { %v2180_v7 = vld [vmem:[%s15329_s25 + $0xac] sm:$0xff]  ;;  %v674_v8 = vld [vmem:[%s15329_s25 + $0xa1] sm:$0xff]  ;;  %v2181_v10 = vld [vmem:[%s15329_s25 + $0xb4] sm:$0xff]  ;;  %v699_v12 = vpack.c.bf16 %v673_v5, %v672_v4 }
 0x13e   : > { %12035 = vmatmul.mubr.msk.bf16.gmra.mrb[4].mxu1 %vm18320_vm2, %v693_v35  ;;  %12225 = vmatmul.mubr.msk.bf16.gmra.mrb[4].mxu0 %vm18320_vm2, %v15393_v36  ;;  %v675_v9 = vld [vmem:[%s15329_s25 + $0xa9] sm:$0xff]  ;;  %v2182_v11 = vld [vmem:[%s15329_s25 + $0xbc] sm:$0xff]  ;;  %v15452_v13 = vpack.c.bf16 %v2180_v7, %v2179_v6  ;;  %v676_v17 = vld [vmem:[%s15329_s25 + $0xb1] sm:$0xff] }
 0x13f   : > { %12038 = vmatprep.mubr.msk.bf16.mxu1 %vm18320_vm2, %v694_v37  ;;  %12228 = vmatprep.mubr.msk.bf16.mxu0 %vm18320_vm2, %v15395_v38  ;;  %v700_v14 = vpack.c.bf16 %v675_v9, %v674_v8  ;;  %v15454_v15 = vpack.c.bf16 %v2182_v11, %v2181_v10  ;;  %v677_v18 = vld [vmem:[%s15329_s25 + $0xb9] sm:$0xff]  ;;  %v2183_v20 = vld [vmem:[%s15329_s25 + $0xc4] sm:$0xff]  ;;  %v2184_v22 = vld [vmem:[%s15329_s25 + $0xcc] sm:$0xff] }
 0x140   : > { %12256 = vmatprep.subr.bf16.mxu0 %v2598_v60  ;;  %12104 = vmatprep.subr.bf16.mxu1 %v15433_v0  ;;  %v678_v23 = vld [vmem:[%s15329_s25 + $0xc1] sm:$0xff]  ;;  %v679_v24 = vld [vmem:[%s15329_s25 + $0xc9] sm:$0xff]  ;;  %v2185_v25 = vld [vmem:[%s15329_s25 + $0xd4] sm:$0xff]  ;;  %v701_v28 = vpack.c.bf16 %v677_v18, %v676_v17  ;;  %v15474_v29 = vpack.c.bf16 %v2184_v22, %v2183_v20 }
 0x141   : > { %12257 = vmatpush3.bf16.msra.mxu0 %v2598_v60  ;;  %v2186_v27 = vld [vmem:[%s15329_s25 + $0xdc] sm:$0xff]  ;;  %v702_v30 = vpack.c.bf16 %v679_v24, %v678_v23  ;;  %v680_v32 = vld [vmem:[%s15329_s25 + $0xd1] sm:$0xff]  ;;  %v2187_v34 = vld [vmem:[%s15329_s25 + $0xe4] sm:$0xff] }
 0x142   : > { %12294 = vmatprep.subr.bf16.mxu0 %v15462_v19  ;;  %v15476_v31 = vpack.c.bf16 %v2186_v27, %v2185_v25  ;;  %v681_v33 = vld [vmem:[%s15329_s25 + $0xd9] sm:$0xff]  ;;  %v2188_v35 = vld [vmem:[%s15329_s25 + $0xec] sm:$0xff]  ;;  %v682_v37 = vld [vmem:[%s15329_s25 + $0xe1] sm:$0xff] }
 0x143   : > { %v683_v39 = vld [vmem:[%s15329_s25 + $0xe9] sm:$0xff]  ;;  %v2189_v40 = vld [vmem:[%s15329_s25 + $0xf4] sm:$0xff]  ;;  %v2190_v41 = vld [vmem:[%s15329_s25 + $0xfc] sm:$0xff]  ;;  %v703_v42 = vpack.c.bf16 %v681_v33, %v680_v32  ;;  %v15492_v43 = vpack.c.bf16 %v2188_v35, %v2187_v34 }
 0x144   : > { %v704_v44 = vpack.c.bf16 %v683_v39, %v682_v37  ;;  %v15494_v45 = vpack.c.bf16 %v2190_v41, %v2189_v40  ;;  %v684_v46 = vld [vmem:[%s15329_s25 + $0xf1] sm:$0xff]  ;;  %v686_v52 = vld [vmem:[%s15329_s25 + $0x101] sm:$0xff]  ;;  %v687_v53 = vld [vmem:[%s15329_s25 + $0x109] sm:$0xff] }
 0x145   : > { %v2192_v51 = vld [vmem:[%s15329_s25 + $0x10c] sm:$0xff]  ;;  %v2193_v54 = vld [vmem:[%s15329_s25 + $0x114] sm:$0xff]  ;;  %v2194_v55 = vld [vmem:[%s15329_s25 + $0x11c] sm:$0xff]  ;;  %v706_v58 = vpack.c.bf16 %v687_v53, %v686_v52 }
 0x146   : > { %12039 = vmatmul.mubr.msk.bf16.gmra.mrb[8].mxu1 %vm18320_vm2, %v695_v47  ;;  %12229 = vmatmul.mubr.msk.bf16.gmra.mrb[8].mxu0 %vm18320_vm2, %v15411_v48  ;;  %v685_v47 = vld [vmem:[%s15329_s25 + $0xf9] sm:$0xff]  ;;  %v15512_v59 = vpack.c.bf16 %v2194_v55, %v2193_v54  ;;  %v688_v60 = vld [vmem:[%s15329_s25 + $0x111] sm:$0xff]  ;;  %v600_v5 = vld [vmem:[%s15329_s25 + $0x8] sm:$0xff] }
 0x147   : > { %12042 = vmatprep.mubr.msk.bf16.mxu1 %vm18320_vm2, %v696_v49  ;;  %12232 = vmatprep.mubr.msk.bf16.mxu0 %vm18320_vm2, %v15413_v50  ;;  %v2191_v49 = vld [vmem:[%s15329_s25 + $0x104] sm:$0xff]  ;;  %v705_v56 = vpack.c.bf16 %v685_v47, %v684_v46  ;;  %v689_v61 = vld [vmem:[%s15329_s25 + $0x119] sm:$0xff]  ;;  %v601_v9 = vld [vmem:[%s15329_s25 + $0x10] sm:$0xff] }
 0x148   : > { %v15510_v57 = vpack.c.bf16 %v2192_v51, %v2191_v49  ;;  %v599_v4 = vld [vmem:[%s15329_s25] sm:$0xff]  ;;  %v707_v6 = vpack.c.bf16 %v689_v61, %v688_v60  ;;  %v602_v10 = vld [vmem:[%s15329_s25 + $0x18] sm:$0xff]  ;;  %v608_v24 = vld [vmem:[%s15329_s25 + $0x48] sm:$0xff] }
 0x149   : > { %v635_v8 = vpack.c.bf16 %v600_v5, %v599_v4  ;;  %v603_v11 = vld [vmem:[%s15329_s25 + $0x20] sm:$0xff]  ;;  %v636_v16 = vpack.c.bf16 %v602_v10, %v601_v9  ;;  %v606_v22 = vld [vmem:[%s15329_s25 + $0x38] sm:$0xff]  ;;  %v612_v40 = vld [vmem:[%s15329_s25 + $0x68] sm:$0xff] }
 0x14a   : > { %v15544_v20 = vld [vmem:[#allocation7] sm:$0xff]  ;;  %v3194_v34 = vld [vmem:[#allocation9 + $0x10] sm:$0x3]  ;;  %v15573_v35 = vld [vmem:[#allocation7 + $0x18] sm:$0xff] }
 0x14b   : > { %v607_v23 = vld [vmem:[%s15329_s25 + $0x40] sm:$0xff]  ;;  %vm536_vm3 = vcmp.lt.s32.totalorder %v15544_v20, 16  ;;  %v15583_v41 = vand.u32 %v3194_v34, %v15356_v2  ;;  %vm539_vm6 = vcmp.lt.s32.totalorder %v15573_v35, 16  ;;  %v15590_v46 = vld [vmem:[#allocation7 + $0x28] sm:$0xff]  ;;  %v613_v49 = vld [vmem:[%s15329_s25 + $0x70] sm:$0xff] }
 0x14c   : > { %v639_v27 = vpack.c.bf16 %v608_v24, %v607_v23  ;;  %v15575_v37 = vld [vmem:[#allocation7 + $0x20] sm:$0xff]  ;;  %v15592_v47 = vld [vmem:[#allocation7 + $0x30] sm:$0xff]  ;;  %vm541_vm8 = vcmp.lt.s32.totalorder %v15590_v46, 16  ;;  %v614_v53 = vld [vmem:[%s15329_s25 + $0x78] sm:$0xff] }
 0x14d   : > { %v611_v39 = vld [vmem:[%s15329_s25 + $0x60] sm:$0xff]  ;;  %vm540_vm7 = vcmp.lt.s32.totalorder %v15575_v37, 16  ;;  %vm542_vm9 = vcmp.lt.s32.totalorder %v15592_v47, 16  ;;  %v15606_v54 = vld [vmem:[#allocation7 + $0x38] sm:$0xff]  ;;  %v617_v4 = vld [vmem:[%s15329_s25 + $0x90] sm:$0xff] }
 0x14e   : > { %12043 = vmatmul.mubr.msk.bf16.gmra.mrb[12].mxu1 %vm18320_vm2, %v697_v62  ;;  %12233 = vmatmul.mubr.msk.bf16.gmra.mrb[12].mxu0 %vm18320_vm2, %v15430_v63  ;;  %v2195_v62 = vld [vmem:[%s15329_s25 + $0x124] sm:$0xff]  ;;  %vm543_vm10 = vcmp.lt.s32.totalorder %v15606_v54, 16  ;;  %v618_v5 = vld [vmem:[%s15329_s25 + $0x98] sm:$0xff] }
 0x14f   : > { %12046 = vmatprep.mubr.msk.bf16.mxu1 %vm18320_vm2, %v698_v1  ;;  %12236 = vmatprep.mubr.msk.bf16.mxu0 %vm18320_vm2, %v15435_v3  ;;  %v2196_v1 = vld [vmem:[%s15329_s25 + $0x12c] sm:$0xff]  ;;  %v622_v23 = vld [vmem:[%s15329_s25 + $0xb8] sm:$0xff] }
 0x150   : > { %v15526_v7 = vpack.c.bf16 %v2196_v1, %v2195_v62  ;;  %v15608_v55 = vld [vmem:[#allocation7 + $0x40] sm:$0xff]  ;;  %v15616_v62 = vld [vmem:[#allocation7 + $0x48] sm:$0xff]  ;;  %v15618_v1 = vld [vmem:[#allocation7 + $0x50] sm:$0xff] }
 0x151   : > { %vm544_vm11 = vcmp.lt.s32.totalorder %v15608_v55, 16  ;;  %vm545_vm12 = vcmp.lt.s32.totalorder %v15616_v62, 16  ;;  %vm546_vm13 = vcmp.lt.s32.totalorder %v15618_v1, 16  ;;  %v15629_v9 = vld [vmem:[#allocation7 + $0x58] sm:$0xff]  ;;  %v15631_v10 = vld [vmem:[#allocation7 + $0x60] sm:$0xff] }
 0x152   : > { %vm547_vm14 = vcmp.lt.s32.totalorder %v15629_v9, 16  ;;  %vm548_vm15 = vcmp.lt.s32.totalorder %v15631_v10, 16 }
 0x156   : > { %12047 = vmatmul.mubr.msk.bf16.gmra.mrb[16].mxu1 %vm18320_vm2, %v699_v12  ;;  %12237 = vmatmul.mubr.msk.bf16.gmra.mrb[16].mxu0 %vm18320_vm2, %v15452_v13  ;;  %v604_v12 = vld [vmem:[%s15329_s25 + $0x28] sm:$0xff] }
 0x157   : > { %12050 = vmatprep.mubr.msk.bf16.mxu1 %vm18320_vm2, %v700_v14  ;;  %12240 = vmatprep.mubr.msk.bf16.mxu0 %vm18320_vm2, %v15454_v15  ;;  %v1564_v14 = vld [vmem:[#allocation9 + $0x6] sm:$0x3]  ;;  %v637_v17 = vpack.c.bf16 %v604_v12, %v603_v11  ;;  %v620_v12 = vld [vmem:[%s15329_s25 + $0xa8] sm:$0xff] }
 0x158   : > { %v15539_v18 = vand.u32 %v1564_v14, %v15356_v2  ;;  %v619_v11 = vld [vmem:[%s15329_s25 + $0xa0] sm:$0xff] }
 0x15e   : > { %12051 = vmatmul.mubr.msk.bf16.gmra.mrb[20].mxu1 %vm18320_vm2, %v701_v28  ;;  %12241 = vmatmul.mubr.msk.bf16.gmra.mrb[20].mxu0 %vm18320_vm2, %v15474_v29  ;;  %v15560_v28 = vld [vmem:[#allocation7 + $0x10] sm:$0xff] }
 0x15f   : > { %12054 = vmatprep.mubr.msk.bf16.mxu1 %vm18320_vm2, %v702_v30  ;;  %12244 = vmatprep.mubr.msk.bf16.mxu0 %vm18320_vm2, %v15476_v31  ;;  %v609_v30 = vld [vmem:[%s15329_s25 + $0x50] sm:$0xff]  ;;  %vm538_vm4 = vcmp.lt.s32.totalorder %v15560_v28, 16 }
 0x166   : > { %12055 = vmatmul.mubr.msk.bf16.gmra.mrb[24].mxu1 %vm18320_vm2, %v703_v42  ;;  %12245 = vmatmul.mubr.msk.bf16.gmra.mrb[24].mxu0 %vm18320_vm2, %v15492_v43 }
 0x167   : > { %12058 = vmatprep.mubr.msk.bf16.mxu1 %vm18320_vm2, %v704_v44  ;;  %12248 = vmatprep.mubr.msk.bf16.mxu0 %vm18320_vm2, %v15494_v45  ;;  %v641_v44 = vpack.c.bf16 %v612_v40, %v611_v39  ;;  %v15670_v39 = vld [vmem:[#allocation7 + $0x90] sm:$0xff] }
 0x168   : > { %v625_v40 = vld [vmem:[%s15329_s25 + $0xd0] sm:$0xff] }
 0x16e   : > { %12059 = vmatmul.mubr.msk.bf16.gmra.mrb[28].mxu1 %vm18320_vm2, %v705_v56  ;;  %12249 = vmatmul.mubr.msk.bf16.gmra.mrb[28].mxu0 %vm18320_vm2, %v15510_v57  ;;  %v615_v56 = vld [vmem:[%s15329_s25 + $0x80] sm:$0xff] }
 0x16f   : > { %12062 = vmatprep.mubr.msk.bf16.mxu1 %vm18320_vm2, %v706_v58  ;;  %12252 = vmatprep.mubr.msk.bf16.mxu0 %vm18320_vm2, %v15512_v59  ;;  %v616_v58 = vld [vmem:[%s15329_s25 + $0x88] sm:$0xff] }
 0x170   : > { %v643_v61 = vpack.c.bf16 %v616_v58, %v615_v56 }
 0x176   : > { %12063 = vmatmul.mubr.msk.bf16.gmra.mrb[32].mxu1 %vm18320_vm2, %v707_v6  ;;  %12253 = vmatmul.mubr.msk.bf16.gmra.mrb[32].mxu0 %vm18320_vm2, %v15526_v7 }
 0x177   : > { %12068 = vmatprep.mubr.msk.bf16.mxu1 %vm18320_vm2, %v635_v8  ;;  %12258 = vmatprep.mubr.msk.bf16.mxu0 %vm18320_vm2, %v15370_v21  ;;  %v605_v21 = vld [vmem:[%s15329_s25 + $0x30] sm:$0xff] }
 0x17e   : > { %12069 = vmatmul.mubr.msk.bf16.vlgmr.msra.gmra.mrb[0].mxu1 %vm18320_vm2, %v636_v16  ;;  %12259 = vmatmul.mubr.msk.bf16.vlgmr.msra.gmra.mrb[0].mxu0 %vm18320_vm2, %v15377_v26  ;;  %v14945_v26 = vmov 0   ;;  %v644_v16 = vpack.c.bf16 %v618_v5, %v617_v4  ;;  %v15707_v5 = vld [vmem:[#allocation7 + $0xb8] sm:$0xff] }
 0x17f   : > { %12105 = vmatpush3.bf16.msra.mxu1 %v15433_v0  ;;  %12072 = vmatprep.mubr.msk.bf16.mxu1 %vm18320_vm2, %v637_v17  ;;  %v3616_v25 = vsel %vm536_vm3, 1, %v14945_v26  ;;  %v638_v0 = vpack.c.bf16 %v606_v22, %v605_v21  ;;  %v3618_v32 = vsel %vm538_vm4, 1, %v14945_v26  ;;  %v3620_v42 = vsel %vm540_vm7, 1, %v14945_v26  ;;  %v15644_v21 = vld [vmem:[#allocation7 + $0x70] sm:$0xff] }
 0x180   : > { %12262 = vmatprep.mubr.msk.bf16.mxu0 %vm18320_vm2, %v15393_v36  ;;  %12295 = vmatpush3.bf16.msra.mxu0 %v15462_v19  ;;  %v15562_v36 = vld [vmem:[#allocation7 + $0x8] sm:$0xff]  ;;  %v3621_v51 = vsel %vm541_vm8, 1, %v14945_v26  ;;  %v3622_v52 = vsel %vm542_vm9, 1, %v14945_v26  ;;  %v3624_v60 = vsel %vm544_vm11, 1, %v14945_v26  ;;  %v3625_v6 = vsel %vm545_vm12, 1, %v14945_v26  ;;  %v621_v22 = vld [vmem:[%s15329_s25 + $0xb0] sm:$0xff] }
 0x181   : > { %12142 = vmatprep.subr.bf16.mxu1 %v15539_v18  ;;  %14287 = vset.pattern.permute.xlu0 %v14945_v26  ;;  %v610_v19 = vld [vmem:[%s15329_s25 + $0x58] sm:$0xff]  ;;  %vm537_vm5 = vcmp.lt.s32.totalorder %v15562_v36, 16  ;;  %v3626_v8 = vsel %vm546_vm13, 1, %v14945_v26  ;;  %v3628_v14 = vsel %vm548_vm15, 1, %v14945_v26  ;;  %v645_v17 = vpack.c.bf16 %v620_v12, %v619_v11  ;;  %v632_v11 = vld [vmem:[%s15329_s25 + $0x108] sm:$0xff] }
 0x182   : > { %3653 = vperm.xlu0 %14287, %v3616_v25   ;;  %14288 = vset.pattern.permute.xlu1 %v14945_v26  ;;  %v3617_v33 = vsel %vm537_vm5, 1, %v14945_v26  ;;  %vm550_vm3 = vcmp.lt.s32.totalorder %v15644_v21, 16  ;;  %vm554_vm7 = vcmp.lt.s32.totalorder %v15670_v39, 16  ;;  %vm559_vm12 = vcmp.lt.s32.totalorder %v15707_v5, 16 }
 0x183   : > { %3659 = vperm.xlu1 %14288, %v3618_v32   ;;  %12332 = vmatprep.subr.bf16.mxu0 %v15583_v41  ;;  %v3630_v25 = vsel %vm550_vm3, 1, %v14945_v26 }
 0x186   : > { %12073 = vmatmul.mubr.msk.bf16.gmra.mrb[4].mxu1 %vm18320_vm2, %v638_v0  ;;  %12263 = vmatmul.mubr.msk.bf16.gmra.mrb[4].mxu0 %vm18320_vm2, %v15395_v38  ;;  %v3619_v38 = vsel %vm539_vm6, 1, %v14945_v26  ;;  %v15655_v0 = vld [vmem:[#allocation7 + $0x78] sm:$0xff] }
 0x187   : > { %12076 = vmatprep.mubr.msk.bf16.mxu1 %vm18320_vm2, %v639_v27  ;;  %12266 = vmatprep.mubr.msk.bf16.mxu0 %vm18320_vm2, %v15411_v48  ;;  %v640_v48 = vpack.c.bf16 %v610_v19, %v609_v30  ;;  %v15657_v27 = vld [vmem:[#allocation7 + $0x80] sm:$0xff]  ;;  %v624_v19 = vld [vmem:[%s15329_s25 + $0xc8] sm:$0xff]  ;;  %vm551_vm4 = vcmp.lt.s32.totalorder %v15655_v0, 16 }
 0x188   : > { %3656 = vperm.xlu0 %14287, %v3617_v33   ;;  %3662 = vperm.xlu1 %14288, %v3619_v38   ;;  %v623_v30 = vld [vmem:[%s15329_s25 + $0xc0] sm:$0xff]  ;;  %vm552_vm5 = vcmp.lt.s32.totalorder %v15657_v27, 16  ;;  %v646_v33 = vpack.c.bf16 %v622_v23, %v621_v22  ;;  %v626_v38 = vld [vmem:[%s15329_s25 + $0xd8] sm:$0xff] }
 0x189   : > { %v3632_v32 = vsel %vm552_vm5, 1, %v14945_v26  ;;  %v647_v34 = vpack.c.bf16 %v624_v19, %v623_v30  ;;  %v648_v56 = vpack.c.bf16 %v626_v38, %v625_v40  ;;  %v634_v22 = vld [vmem:[%s15329_s25 + $0x118] sm:$0xff]  ;;  %v15735_v30 = vld [vmem:[#allocation7 + $0xe0] sm:$0xff] }
 0x18a   : > { %v2521_v19 = vld [vmem:[%s15329_s25 + $0x134] sm:$0xff]  ;;  %vm564_vm3 = vcmp.lt.s32.totalorder %v15735_v30, 16 }
 0x18b   : > { %v3644_v38 = vsel %vm564_vm3, 1, %v14945_v26  ;;  %vm7421_vm3 = vcmp.eq.s32.totalorder %v15544_v20, 15 }
 0x18c   : > { %3665 = vperm.xlu0 %14287, %v3620_v42   ;;  %3668 = vperm.xlu1 %14288, %v3621_v51   ;;  %v627_v51 = vld [vmem:[%s15329_s25 + $0xe0] sm:$0xff] }
 0x18e   : > { %12077 = vmatmul.mubr.msk.bf16.gmra.mrb[8].mxu1 %vm18320_vm2, %v640_v48  ;;  %12267 = vmatmul.mubr.msk.bf16.gmra.mrb[8].mxu0 %vm18320_vm2, %v15413_v50  ;;  %v3623_v50 = vsel %vm543_vm10, 1, %v14945_v26  ;;  %v3634_v48 = vsel %vm554_vm7, 1, %v14945_v26 }
 0x18f   : > { %12080 = vmatprep.mubr.msk.bf16.mxu1 %vm18320_vm2, %v641_v44  ;;  %12270 = vmatprep.mubr.msk.bf16.mxu0 %vm18320_vm2, %v15430_v63  ;;  %v642_v63 = vpack.c.bf16 %v614_v53, %v613_v49  ;;  %v15681_v44 = vld [vmem:[#allocation7 + $0x98] sm:$0xff]  ;;  %v15683_v49 = vld [vmem:[#allocation7 + $0xa0] sm:$0xff] }
 0x190   : > { %3671 = vperm.xlu0 %14287, %v3622_v52   ;;  %3674 = vperm.xlu1 %14288, %v3623_v50   ;;  %v628_v52 = vld [vmem:[%s15329_s25 + $0xe8] sm:$0xff]  ;;  %vm555_vm8 = vcmp.lt.s32.totalorder %v15681_v44, 16  ;;  %vm556_vm9 = vcmp.lt.s32.totalorder %v15683_v49, 16  ;;  %v15696_v50 = vld [vmem:[#allocation7 + $0xb0] sm:$0xff] }
 0x191   : > { %v3636_v53 = vsel %vm556_vm9, 1, %v14945_v26  ;;  %v649_v58 = vpack.c.bf16 %v628_v52, %v627_v51  ;;  %vm558_vm11 = vcmp.lt.s32.totalorder %v15696_v50, 16  ;;  %v15750_v52 = vld [vmem:[#allocation7 + $0xe8] sm:$0xff] }
 0x192   : > { %v3638_v4 = vsel %vm558_vm11, 1, %v14945_v26  ;;  %vm7424_vm11 = vcmp.eq.s32.totalorder %v15573_v35, 15 }
 0x194   : > { %3677 = vperm.xlu0 %14287, %v3624_v60   ;;  %3680 = vperm.xlu1 %14288, %v3625_v6   ;;  %v629_v60 = vld [vmem:[%s15329_s25 + $0xf0] sm:$0xff] }
 0x195   : > { %v15709_v6 = vld [vmem:[#allocation7 + $0xc0] sm:$0xff] }
 0x196   : > { %12081 = vmatmul.mubr.msk.bf16.gmra.mrb[12].mxu1 %vm18320_vm2, %v642_v63  ;;  %12271 = vmatmul.mubr.msk.bf16.gmra.mrb[12].mxu0 %vm18320_vm2, %v15435_v3  ;;  %v3627_v3 = vsel %vm547_vm14, 1, %v14945_v26  ;;  %v630_v63 = vld [vmem:[%s15329_s25 + $0xf8] sm:$0xff]  ;;  %vm560_vm13 = vcmp.lt.s32.totalorder %v15709_v6, 16 }
 0x197   : > { %12084 = vmatprep.mubr.msk.bf16.mxu1 %vm18320_vm2, %v643_v61  ;;  %12274 = vmatprep.mubr.msk.bf16.mxu0 %vm18320_vm2, %v15452_v13  ;;  %v15642_v13 = vld [vmem:[#allocation7 + $0x68] sm:$0xff]  ;;  %v3640_v12 = vsel %vm560_vm13, 1, %v14945_v26  ;;  %vm7425_vm13 = vcmp.eq.s32.totalorder %v15575_v37, 15 }
 0x198   : > { %3683 = vperm.xlu0 %14287, %v3626_v8   ;;  %3686 = vperm.xlu1 %14288, %v3627_v3   ;;  %vm549_vm1 = vcmp.lt.s32.totalorder %v15642_v13, 16  ;;  %v631_v8 = vld [vmem:[%s15329_s25 + $0x100] sm:$0xff]  ;;  %v650_v3 = vpack.c.bf16 %v630_v63, %v629_v60  ;;  %v15761_v60 = vld [vmem:[#allocation7 + $0xf8] sm:$0xff] }
 0x199   : > { %v3629_v24 = vsel %vm549_vm1, 1, %v14945_v26  ;;  %v15763_v63 = vld [vmem:[#allocation7 + $0x100] sm:$0xff] }
 0x19a   : > { %vm568_vm7 = vcmp.lt.s32.totalorder %v15763_v63, 16 }
 0x19c   : > { %3689 = vperm.xlu0 %14287, %v3628_v14   ;;  %3692 = vperm.xlu1 %14288, %v3629_v24   ;;  %v651_v14 = vpack.c.bf16 %v632_v11, %v631_v8  ;;  %v2816_v8 = vld [vmem:[%s15329_s25 + $0x3d] sm:$0xff] }
 0x19d   : > { %v1187_v11 = vld [vmem:[%s15329_s25 + $0x22] sm:$0xff] }
 0x19e   : > { %12085 = vmatmul.mubr.msk.bf16.gmra.mrb[16].mxu1 %vm18320_vm2, %v644_v16  ;;  %12275 = vmatmul.mubr.msk.bf16.gmra.mrb[16].mxu0 %vm18320_vm2, %v15454_v15  ;;  %v3631_v15 = vsel %vm551_vm4, 1, %v14945_v26  ;;  %v15722_v16 = vld [vmem:[#allocation7 + $0xd0] sm:$0xff]  ;;  %vm565_vm4 = vcmp.lt.s32.totalorder %v15750_v52, 16 }
 0x19f   : > { %12088 = vmatprep.mubr.msk.bf16.mxu1 %vm18320_vm2, %v645_v17  ;;  %12278 = vmatprep.mubr.msk.bf16.mxu0 %vm18320_vm2, %v15474_v29  ;;  %v15668_v29 = vld [vmem:[#allocation7 + $0x88] sm:$0xff]  ;;  %v633_v17 = vld [vmem:[%s15329_s25 + $0x110] sm:$0xff]  ;;  %vm562_vm15 = vcmp.lt.s32.totalorder %v15722_v16, 16 }
 0x1a0   : > { %3695 = vperm.xlu0 %14287, %v3630_v25   ;;  %3698 = vperm.xlu1 %14288, %v3631_v15   ;;  %vm553_vm6 = vcmp.lt.s32.totalorder %v15668_v29, 16  ;;  %v3642_v24 = vsel %vm562_vm15, 1, %v14945_v26  ;;  %v15733_v25 = vld [vmem:[#allocation7 + $0xd8] sm:$0xff]  ;;  %vm7496_vm15 = vcmp.eq.s32.totalorder %v15573_v35, 0 }
 0x1a1   : > { %v3633_v42 = vsel %vm553_vm6, 1, %v14945_v26  ;;  %v2522_v15 = vld [vmem:[%s15329_s25 + $0x13c] sm:$0xff]  ;;  %vm563_vm1 = vcmp.lt.s32.totalorder %v15733_v25, 16  ;;  %vm567_vm6 = vcmp.lt.s32.totalorder %v15761_v60, 16 }
 0x1a2   : > { %v3643_v40 = vsel %vm563_vm1, 1, %v14945_v26  ;;  %vm7497_vm1 = vcmp.eq.s32.totalorder %v15575_v37, 0  ;;  %v2823_v35 = vld [vmem:[%s15329_s25 + $0x75] sm:$0xff]  ;;  %v2824_v37 = vld [vmem:[%s15329_s25 + $0x7d] sm:$0xff] }
 0x1a4   : > { %3701 = vperm.xlu0 %14287, %v3632_v32   ;;  %3704 = vperm.xlu1 %14288, %v3633_v42   ;;  %v1183_v32 = vld [vmem:[%s15329_s25 + $0x2] sm:$0xff]  ;;  %v652_v42 = vpack.c.bf16 %v634_v22, %v633_v17  ;;  %v3648_v17 = vsel %vm568_vm7, 1, %v14945_v26  ;;  %vm7426_vm7 = vcmp.eq.s32.totalorder %v15590_v46, 15 }
 0x1a6   : > { %12089 = vmatmul.mubr.msk.bf16.gmra.mrb[20].mxu1 %vm18320_vm2, %v646_v33  ;;  %12279 = vmatmul.mubr.msk.bf16.gmra.mrb[20].mxu0 %vm18320_vm2, %v15476_v31  ;;  %v3635_v31 = vsel %vm555_vm8, 1, %v14945_v26  ;;  %v2813_v33 = vld [vmem:[%s15329_s25 + $0x25] sm:$0xff] }
 0x1a7   : > { %12092 = vmatprep.mubr.msk.bf16.mxu1 %vm18320_vm2, %v647_v34  ;;  %12282 = vmatprep.mubr.msk.bf16.mxu0 %vm18320_vm2, %v15492_v43  ;;  %v15694_v43 = vld [vmem:[#allocation7 + $0xa8] sm:$0xff] }
 0x1a8   : > { %3707 = vperm.xlu0 %14287, %v3634_v48   ;;  %3710 = vperm.xlu1 %14288, %v3635_v31   ;;  %vm557_vm10 = vcmp.lt.s32.totalorder %v15694_v43, 16  ;;  %v2814_v34 = vld [vmem:[%s15329_s25 + $0x2d] sm:$0xff]  ;;  %v2540_v48 = vpack.c.bf16 %v2522_v15, %v2521_v19 }
 0x1a9   : > { %v3637_v61 = vsel %vm557_vm10, 1, %v14945_v26  ;;  %v2849_v51 = vpack.c.bf16 %v2814_v34, %v2813_v33  ;;  %v15752_v31 = vld [vmem:[#allocation7 + $0xf0] sm:$0xff]  ;;  %vm7423_vm10 = vcmp.eq.s32.totalorder %v15560_v28, 15 }
 0x1aa   : > { %vm566_vm5 = vcmp.lt.s32.totalorder %v15752_v31, 16  ;;  %v1189_v33 = vld [vmem:[%s15329_s25 + $0x32] sm:$0xff]  ;;  %v1190_v34 = vld [vmem:[%s15329_s25 + $0x3a] sm:$0xff] }
 0x1ac   : > { %3713 = vperm.xlu0 %14287, %v3636_v53   ;;  %3716 = vperm.xlu1 %14288, %v3637_v61   ;;  %v1185_v53 = vld [vmem:[%s15329_s25 + $0x12] sm:$0xff]  ;;  %v1186_v61 = vld [vmem:[%s15329_s25 + $0x1a] sm:$0xff] }
 0x1ad   : > { %v15778_v22 = vpack.c.bf16 %v1186_v61, %v1185_v53  ;;  %v1192_v53 = vld [vmem:[%s15329_s25 + $0x4a] sm:$0xff] }
 0x1ae   : > { %12093 = vmatmul.mubr.msk.bf16.gmra.mrb[24].mxu1 %vm18320_vm2, %v648_v56  ;;  %12283 = vmatmul.mubr.msk.bf16.gmra.mrb[24].mxu0 %vm18320_vm2, %v15494_v45  ;;  %v3639_v45 = vsel %vm559_vm12, 1, %v14945_v26  ;;  %v3645_v56 = vsel %vm565_vm4, 1, %v14945_v26  ;;  %vm7422_vm4 = vcmp.eq.s32.totalorder %v15562_v36, 15 }
 0x1af   : > { %12096 = vmatprep.mubr.msk.bf16.mxu1 %vm18320_vm2, %v649_v58  ;;  %12286 = vmatprep.mubr.msk.bf16.mxu0 %vm18320_vm2, %v15510_v57  ;;  %v15720_v57 = vld [vmem:[#allocation7 + $0xc8] sm:$0xff]  ;;  %v3646_v58 = vsel %vm566_vm5, 1, %v14945_v26  ;;  %vm7493_vm5 = vcmp.eq.s32.totalorder %v15544_v20, 0 }
 0x1b0   : > { %3719 = vperm.xlu0 %14287, %v3638_v4   ;;  %3722 = vperm.xlu1 %14288, %v3639_v45   ;;  %vm561_vm14 = vcmp.lt.s32.totalorder %v15720_v57, 16  ;;  %v2815_v4 = vld [vmem:[%s15329_s25 + $0x35] sm:$0xff]  ;;  %v1188_v45 = vld [vmem:[%s15329_s25 + $0x2a] sm:$0xff] }
 0x1b1   : > { %v3641_v23 = vsel %vm561_vm14, 1, %v14945_v26  ;;  %v15780_v19 = vpack.c.bf16 %v1188_v45, %v1187_v11  ;;  %vm7495_vm14 = vcmp.eq.s32.totalorder %v15560_v28, 0 }
 0x1b4   : > { %3725 = vperm.xlu0 %14287, %v3640_v12   ;;  %3728 = vperm.xlu1 %14288, %v3641_v23   ;;  %v2817_v12 = vld [vmem:[%s15329_s25 + $0x45] sm:$0xff]  ;;  %v2850_v23 = vpack.c.bf16 %v2816_v8, %v2815_v4  ;;  %v15814_v4 = vpack.c.bf16 %v1190_v34, %v1189_v33 }
 0x1b6   : > { %12097 = vmatmul.mubr.msk.bf16.gmra.mrb[28].mxu1 %vm18320_vm2, %v650_v3  ;;  %12287 = vmatmul.mubr.msk.bf16.gmra.mrb[28].mxu0 %vm18320_vm2, %v15512_v59  ;;  %v1184_v59 = vld [vmem:[%s15329_s25 + $0xa] sm:$0xff] }
 0x1b7   : > { %12100 = vmatprep.mubr.msk.bf16.mxu1 %vm18320_vm2, %v651_v14  ;;  %12290 = vmatprep.mubr.msk.bf16.mxu0 %vm18320_vm2, %v15526_v7  ;;  %v1219_v7 = vpack.c.bf16 %v1184_v59, %v1183_v32  ;;  %v2818_v3 = vld [vmem:[%s15329_s25 + $0x4d] sm:$0xff]  ;;  %v3647_v14 = vsel %vm567_vm6, 1, %v14945_v26  ;;  %vm7494_vm6 = vcmp.eq.s32.totalorder %v15562_v36, 0 }
 0x1b8   : > { %3731 = vperm.xlu0 %14287, %v3642_v24   ;;  %3734 = vperm.xlu1 %14288, %v3643_v40   ;;  %v1890_v24 = vld [vmem:[#allocation9 + $0x8] sm:$0x3]  ;;  %v2851_v15 = vpack.c.bf16 %v2818_v3, %v2817_v12  ;;  %v15784_v59 = vld [vmem:[#allocation7 + $0x110] sm:$0xff] }
 0x1b9   : > { %v15782_v32 = vld [vmem:[#allocation7 + $0x108] sm:$0xff]  ;;  %vm570_vm9 = vcmp.lt.s32.totalorder %v15784_v59, 16 }
 0x1ba   : > { %v2819_v40 = vld [vmem:[%s15329_s25 + $0x55] sm:$0xff]  ;;  %vm569_vm8 = vcmp.lt.s32.totalorder %v15782_v32, 16  ;;  %v3650_v61 = vsel %vm570_vm9, 1, %v14945_v26  ;;  %vm7428_vm9 = vcmp.eq.s32.totalorder %v15606_v54, 15 }
 0x1bc   : > { %3737 = vperm.xlu0 %14287, %v3644_v38   ;;  %3740 = vperm.xlu1 %14288, %v3645_v56   ;;  %v15790_v38 = vand.u32 %v1890_v24, %v15356_v2  ;;  %v2821_v56 = vld [vmem:[%s15329_s25 + $0x65] sm:$0xff]  ;;  %v1193_v24 = vld [vmem:[%s15329_s25 + $0x52] sm:$0xff] }
 0x1be   : > { %12101 = vmatmul.mubr.msk.bf16.gmra.mrb[32].mxu1 %vm18320_vm2, %v652_v42  ;;  %12291 = vmatmul.mubr.msk.bf16.gmra.mrb[32].mxu0 %vm18320_vm2, %v2540_v48  ;;  %v2820_v42 = vld [vmem:[%s15329_s25 + $0x5d] sm:$0xff] }
 0x1bf   : > { %12106 = vmatprep.mubr.msk.bf16.mxu1 %vm18320_vm2, %v1219_v7  ;;  %12296 = vmatprep.mubr.msk.bf16.mxu0 %vm18320_vm2, %v2849_v51  ;;  %v1191_v48 = vld [vmem:[%s15329_s25 + $0x42] sm:$0xff]  ;;  %v3649_v7 = vsel %vm569_vm8, 1, %v14945_v26  ;;  %v2852_v45 = vpack.c.bf16 %v2820_v42, %v2819_v40  ;;  %v1196_v42 = vld [vmem:[%s15329_s25 + $0x6a] sm:$0xff]  ;;  %vm7427_vm8 = vcmp.eq.s32.totalorder %v15592_v47, 15 }
 0x1c0   : > { %3743 = vperm.xlu0 %14287, %v3646_v58   ;;  %3746 = vperm.xlu1 %14288, %v3647_v14   ;;  %v15800_v51 = vld [vmem:[#allocation7 + $0x118] sm:$0xff]  ;;  %v15819_v12 = vpack.c.bf16 %v1192_v53, %v1191_v48 }
 0x1c1   : > { %v2822_v58 = vld [vmem:[%s15329_s25 + $0x6d] sm:$0xff]  ;;  %vm571_vm12 = vcmp.lt.s32.totalorder %v15800_v51, 16  ;;  %v1195_v40 = vld [vmem:[%s15329_s25 + $0x62] sm:$0xff] }
 0x1c2   : > { %v2853_v3 = vpack.c.bf16 %v2822_v58, %v2821_v56  ;;  %v3651_v14 = vsel %vm571_vm12, 1, %v14945_v26  ;;  %v2825_v48 = vld [vmem:[%s15329_s25 + $0x85] sm:$0xff]  ;;  %vm7499_vm12 = vcmp.eq.s32.totalorder %v15592_v47, 0 }
 0x1c4   : > { %3749 = vperm.xlu0 %14287, %v3648_v17   ;;  %3752 = vperm.xlu1 %14288, %v3649_v7   ;;  %v2826_v7 = vld [vmem:[%s15329_s25 + $0x8d] sm:$0xff] }
 0x1c6   : > { %12107 = vmatmul.mubr.msk.bf16.vlgmr.msra.gmra.mrb[0].mxu1 %vm18320_vm2, %v15778_v22  ;;  %12297 = vmatmul.mubr.msk.bf16.vlgmr.msra.gmra.mrb[0].mxu0 %vm18320_vm2, %v2850_v23 }
 0x1c7   : > { %12143 = vmatpush3.bf16.msra.mxu1 %v15539_v18  ;;  %12110 = vmatprep.mubr.msk.bf16.mxu1 %vm18320_vm2, %v15780_v19  ;;  %v14946_v18 = vmov 0.25  }
 0x1c8   : > { %12300 = vmatprep.mubr.msk.bf16.mxu0 %vm18320_vm2, %v2851_v15  ;;  %12333 = vmatpush3.bf16.msra.mxu0 %v15583_v41  ;;  %v7459_v8 = vsel %vm7423_vm10, 0.5, %v14946_v18  ;;  %v7460_v11 = vsel %vm7424_vm11, 0.5, %v14946_v18  ;;  %v7461_v17 = vsel %vm7425_vm13, 0.5, %v14946_v18  ;;  %v7531_v23 = vsel %vm7495_vm14, 0.5, %v14946_v18  ;;  %v1194_v15 = vld [vmem:[%s15329_s25 + $0x5a] sm:$0xff] }
 0x1c9   : > { %12180 = vmatprep.subr.bf16.mxu1 %v15790_v38  ;;  %3755 = vperm.xlu0 %14287, %v3650_v61   ;;  %v14289_v41 = vpack.i.bf16 %v7460_v11, %v7459_v8  ;;  %v14294_v33 = vpack.i.bf16 %v7531_v23, %v7461_v17  ;;  %v7532_v34 = vsel %vm7496_vm15, 0.5, %v14946_v18  ;;  %v7533_v28 = vsel %vm7497_vm1, 0.5, %v14946_v18  ;;  %v1197_v23 = vld [vmem:[%s15329_s25 + $0x72] sm:$0xff] }
 0x1ca   : > { %3758 = vperm.xlu1 %14288, %v3651_v14   ;;  %v7457_v53 = vsel %vm7421_vm3, 0.5, %v14946_v18  ;;  %v7458_v56 = vsel %vm7422_vm4, 0.5, %v14946_v18  ;;  %v14299_v58 = vpack.i.bf16 %v7533_v28, %v7532_v34  ;;  %v7529_v20 = vsel %vm7493_vm5, 0.5, %v14946_v18 }
 0x1cb   : > { %v14304_v61 = vpack.i.bf16 %v7458_v56, %v7457_v53  ;;  %v7530_v8 = vsel %vm7494_vm6, 0.5, %v14946_v18  ;;  %v15852_v11 = vpack.c.bf16 %v1194_v15, %v1193_v24  ;;  %v2855_v14 = vpack.c.bf16 %v2826_v7, %v2825_v48  ;;  %v1198_v24 = vld [vmem:[%s15329_s25 + $0x7a] sm:$0xff]  ;;  %v2830_v48 = vld [vmem:[%s15329_s25 + $0xad] sm:$0xff] }
 0x1cc   : > { %vm7429_vm10 = vcmp.eq.s32.totalorder %v15608_v55, 15  ;;  %v14309_v36 = vpack.i.bf16 %v7530_v8, %v7529_v20  ;;  %v7463_v17 = vsel %vm7427_vm8, 0.5, %v14946_v18  ;;  %v2827_v15 = vld [vmem:[%s15329_s25 + $0x95] sm:$0xff]  ;;  %v7464_v34 = vsel %vm7428_vm9, 0.5, %v14946_v18 }
 0x1cd   : > { %14290 = vperm.xlu0 %14287, %v14289_v41   ;;  %v7462_v41 = vsel %vm7426_vm7, 0.5, %v14946_v18  ;;  %v7465_v28 = vsel %vm7429_vm10, 0.5, %v14946_v18  ;;  %vm7498_vm11 = vcmp.eq.s32.totalorder %v15590_v46, 0  ;;  %vm7500_vm13 = vcmp.eq.s32.totalorder %v15606_v54, 0 }
 0x1ce   : > { %12111 = vmatmul.mubr.msk.bf16.gmra.mrb[4].mxu1 %vm18320_vm2, %v15814_v4  ;;  %12301 = vmatmul.mubr.msk.bf16.gmra.mrb[4].mxu0 %vm18320_vm2, %v2852_v45  ;;  %v2854_v45 = vpack.c.bf16 %v2824_v37, %v2823_v35  ;;  %v2828_v35 = vld [vmem:[%s15329_s25 + $0x9d] sm:$0xff]  ;;  %vm7501_vm14 = vcmp.eq.s32.totalorder %v15608_v55, 0  ;;  %v7534_v7 = vsel %vm7498_vm11, 0.5, %v14946_v18  ;;  %v7535_v53 = vsel %vm7499_vm12, 0.5, %v14946_v18 }
 0x1cf   : > { %12114 = vmatprep.mubr.msk.bf16.mxu1 %vm18320_vm2, %v15819_v12  ;;  %12304 = vmatprep.mubr.msk.bf16.mxu0 %vm18320_vm2, %v2853_v3  ;;  %v15854_v3 = vpack.c.bf16 %v1196_v42, %v1195_v40  ;;  %v1199_v37 = vld [vmem:[%s15329_s25 + $0x82] sm:$0xff]  ;;  %v1200_v40 = vld [vmem:[%s15329_s25 + $0x8a] sm:$0xff]  ;;  %v14319_v46 = vpack.i.bf16 %v7465_v28, %v7464_v34  ;;  %v14324_v47 = vpack.i.bf16 %v7535_v53, %v7534_v7  ;;  %v7536_v54 = vsel %vm7500_vm13, 0.5, %v14946_v18 }
 0x1d0   : > { %14295 = vperm.xlu1 %14288, %v14294_v33   ;;  %v14314_v33 = vpack.i.bf16 %v7463_v17, %v7462_v41  ;;  %v2829_v42 = vld [vmem:[%s15329_s25 + $0xa5] sm:$0xff]  ;;  %v7537_v55 = vsel %vm7501_vm14, 0.5, %v14946_v18  ;;  %v15886_v56 = vpack.c.bf16 %v1198_v24, %v1197_v23  ;;  %vm7430_vm15 = vcmp.eq.s32.totalorder %v15616_v62, 15  ;;  %v1202_v41 = vld [vmem:[%s15329_s25 + $0x9a] sm:$0xff] }
 0x1d1   : > { %14300 = vperm.xlu0 %14287, %v14299_v58   ;;  %v2856_v58 = vpack.c.bf16 %v2828_v35, %v2827_v15  ;;  %v2857_v20 = vpack.c.bf16 %v2830_v48, %v2829_v42  ;;  %vm7431_vm1 = vcmp.eq.s32.totalorder %v15618_v1, 15  ;;  %vm7432_vm3 = vcmp.eq.s32.totalorder %v15629_v9, 15  ;;  %v2831_v17 = vld [vmem:[%s15329_s25 + $0xb5] sm:$0xff]  ;;  %v1203_v34 = vld [vmem:[%s15329_s25 + $0xa2] sm:$0xff]  ;;  %v1204_v28 = vld [vmem:[%s15329_s25 + $0xaa] sm:$0xff] }
 0x1d2   : > { %vm7433_vm4 = vcmp.eq.s32.totalorder %v15631_v10, 15  ;;  %v14329_v8 = vpack.i.bf16 %v7537_v55, %v7536_v54  ;;  %v7468_v24 = vsel %vm7432_vm3, 0.5, %v14946_v18  ;;  %vm7502_vm5 = vcmp.eq.s32.totalorder %v15616_v62, 0  ;;  %v2833_v35 = vld [vmem:[%s15329_s25 + $0xc5] sm:$0xff] }
 0x1d3   : > { %v7469_v15 = vsel %vm7433_vm4, 0.5, %v14946_v18  ;;  %vm7503_vm6 = vcmp.eq.s32.totalorder %v15618_v1, 0  ;;  %vm7504_vm7 = vcmp.eq.s32.totalorder %v15629_v9, 0  ;;  %vm7505_vm8 = vcmp.eq.s32.totalorder %v15631_v10, 0 }
 0x1d4   : > { %14305 = vperm.xlu1 %14288, %v14304_v61   ;;  %v15888_v61 = vpack.c.bf16 %v1200_v40, %v1199_v37  ;;  %v2834_v37 = vld [vmem:[%s15329_s25 + $0xcd] sm:$0xff]  ;;  %v7538_v40 = vsel %vm7502_vm5, 0.5, %v14946_v18  ;;  %v7539_v42 = vsel %vm7503_vm6, 0.5, %v14946_v18  ;;  %v14339_v62 = vpack.i.bf16 %v7469_v15, %v7468_v24  ;;  %v2837_v24 = vld [vmem:[%s15329_s25 + $0xe5] sm:$0xff] }
 0x1d5   : > { %14310 = vperm.xlu0 %14287, %v14309_v36   ;;  %v1201_v36 = vld [vmem:[%s15329_s25 + $0x92] sm:$0xff]  ;;  %v14344_v1 = vpack.i.bf16 %v7539_v42, %v7538_v40  ;;  %v7540_v9 = vsel %vm7504_vm7, 0.5, %v14946_v18  ;;  %v7541_v10 = vsel %vm7505_vm8, 0.5, %v14946_v18  ;;  %v15922_v53 = vpack.c.bf16 %v1204_v28, %v1203_v34 }
 0x1d6   : > { %12115 = vmatmul.mubr.msk.bf16.gmra.mrb[8].mxu1 %vm18320_vm2, %v15852_v11  ;;  %12305 = vmatmul.mubr.msk.bf16.gmra.mrb[8].mxu0 %vm18320_vm2, %v2854_v45  ;;  %v7466_v45 = vsel %vm7430_vm15, 0.5, %v14946_v18  ;;  %v15920_v48 = vpack.c.bf16 %v1202_v41, %v1201_v36  ;;  %vm7434_vm9 = vcmp.eq.s32.totalorder %v15642_v13, 15  ;;  %vm7435_vm10 = vcmp.eq.s32.totalorder %v15644_v21, 15  ;;  %v2836_v41 = vld [vmem:[%s15329_s25 + $0xdd] sm:$0xff]  ;;  %v2838_v15 = vld [vmem:[%s15329_s25 + $0xed] sm:$0xff] }
 0x1d7   : > { %12118 = vmatprep.mubr.msk.bf16.mxu1 %vm18320_vm2, %v15854_v3  ;;  %12308 = vmatprep.mubr.msk.bf16.mxu0 %vm18320_vm2, %v2855_v14  ;;  %v7467_v14 = vsel %vm7431_vm1, 0.5, %v14946_v18  ;;  %vm7436_vm11 = vcmp.eq.s32.totalorder %v15655_v0, 15  ;;  %vm7437_vm12 = vcmp.eq.s32.totalorder %v15657_v27, 15  ;;  %v7470_v54 = vsel %vm7434_vm9, 0.5, %v14946_v18 }
 0x1d8   : > { %14315 = vperm.xlu1 %14288, %v14314_v33   ;;  %v14334_v23 = vpack.i.bf16 %v7467_v14, %v7466_v45  ;;  %v2832_v33 = vld [vmem:[%s15329_s25 + $0xbd] sm:$0xff]  ;;  %v7471_v55 = vsel %vm7435_vm10, 0.5, %v14946_v18  ;;  %v7472_v14 = vsel %vm7436_vm11, 0.5, %v14946_v18  ;;  %v7473_v36 = vsel %vm7437_vm12, 0.5, %v14946_v18 }
 0x1d9   : > { %14320 = vperm.xlu0 %14287, %v14319_v46   ;;  %v2858_v7 = vpack.c.bf16 %v2832_v33, %v2831_v17  ;;  %v2859_v46 = vpack.c.bf16 %v2834_v37, %v2833_v35  ;;  %v14354_v45 = vpack.i.bf16 %v7471_v55, %v7470_v54  ;;  %v1207_v17 = vld [vmem:[%s15329_s25 + $0xc2] sm:$0xff]  ;;  %vm7506_vm13 = vcmp.eq.s32.totalorder %v15642_v13, 0 }
 0x1da   : > { %vm7507_vm14 = vcmp.eq.s32.totalorder %v15644_v21, 0  ;;  %vm7508_vm15 = vcmp.eq.s32.totalorder %v15655_v0, 0  ;;  %vm7509_vm1 = vcmp.eq.s32.totalorder %v15657_v27, 0  ;;  %v7542_v33 = vsel %vm7506_vm13, 0.5, %v14946_v18  ;;  %v2840_v55 = vld [vmem:[%s15329_s25 + $0xfd] sm:$0xff] }
 0x1db   : > { %v7543_v34 = vsel %vm7507_vm14, 0.5, %v14946_v18  ;;  %v14359_v13 = vpack.i.bf16 %v7473_v36, %v7472_v14  ;;  %v7544_v0 = vsel %vm7508_vm15, 0.5, %v14946_v18  ;;  %v7545_v27 = vsel %vm7509_vm1, 0.5, %v14946_v18 }
 0x1dc   : > { %14325 = vperm.xlu1 %14288, %v14324_v47   ;;  %v14349_v47 = vpack.i.bf16 %v7541_v10, %v7540_v9  ;;  %v14364_v21 = vpack.i.bf16 %v7543_v34, %v7542_v33  ;;  %v2861_v40 = vpack.c.bf16 %v2838_v15, %v2837_v24  ;;  %vm7438_vm3 = vcmp.eq.s32.totalorder %v15668_v29, 15  ;;  %v1209_v9 = vld [vmem:[%s15329_s25 + $0xd2] sm:$0xff]  ;;  %v1210_v10 = vld [vmem:[%s15329_s25 + $0xda] sm:$0xff] }
 0x1dd   : > { %14330 = vperm.xlu0 %14287, %v14329_v8   ;;  %v2835_v8 = vld [vmem:[%s15329_s25 + $0xd5] sm:$0xff]  ;;  %vm7439_vm4 = vcmp.eq.s32.totalorder %v15670_v39, 15  ;;  %vm7440_vm5 = vcmp.eq.s32.totalorder %v15681_v44, 15  ;;  %vm7441_vm6 = vcmp.eq.s32.totalorder %v15683_v49, 15  ;;  %v14369_v42 = vpack.i.bf16 %v7545_v27, %v7544_v0 }
 0x1de   : > { %12119 = vmatmul.mubr.msk.bf16.gmra.mrb[12].mxu1 %vm18320_vm2, %v15886_v56  ;;  %12309 = vmatmul.mubr.msk.bf16.gmra.mrb[12].mxu0 %vm18320_vm2, %v2856_v58  ;;  %v1205_v58 = vld [vmem:[%s15329_s25 + $0xb2] sm:$0xff]  ;;  %v2860_v35 = vpack.c.bf16 %v2836_v41, %v2835_v8  ;;  %v7477_v54 = vsel %vm7441_vm6, 0.5, %v14946_v18  ;;  %vm7510_vm7 = vcmp.eq.s32.totalorder %v15668_v29, 0  ;;  %vm7511_vm8 = vcmp.eq.s32.totalorder %v15670_v39, 0  ;;  %v2841_v8 = vld [vmem:[%s15329_s25 + $0x105] sm:$0xff] }
 0x1df   : > { %12122 = vmatprep.mubr.msk.bf16.mxu1 %vm18320_vm2, %v15888_v61  ;;  %12312 = vmatprep.mubr.msk.bf16.mxu0 %vm18320_vm2, %v2857_v20  ;;  %v1206_v20 = vld [vmem:[%s15329_s25 + $0xba] sm:$0xff]  ;;  %vm7512_vm9 = vcmp.eq.s32.totalorder %v15681_v44, 0  ;;  %vm7513_vm10 = vcmp.eq.s32.totalorder %v15683_v49, 0  ;;  %v7546_v14 = vsel %vm7510_vm7, 0.5, %v14946_v18  ;;  %v7547_v36 = vsel %vm7511_vm8, 0.5, %v14946_v18 }
 0x1e0   : > { %14335 = vperm.xlu1 %14288, %v14334_v23   ;;  %v1208_v23 = vld [vmem:[%s15329_s25 + $0xca] sm:$0xff]  ;;  %v15954_v28 = vpack.c.bf16 %v1206_v20, %v1205_v58  ;;  %v1211_v58 = vld [vmem:[%s15329_s25 + $0xe2] sm:$0xff]  ;;  %v14384_v39 = vpack.i.bf16 %v7547_v36, %v7546_v14  ;;  %v7548_v44 = vsel %vm7512_vm9, 0.5, %v14946_v18  ;;  %v7549_v49 = vsel %vm7513_vm10, 0.5, %v14946_v18  ;;  %v2843_v0 = vld [vmem:[%s15329_s25 + $0x115] sm:$0xff] }
 0x1e1   : > { %14340 = vperm.xlu0 %14287, %v14339_v62   ;;  %v15956_v37 = vpack.c.bf16 %v1208_v23, %v1207_v17  ;;  %v7474_v62 = vsel %vm7438_vm3, 0.5, %v14946_v18  ;;  %v1212_v20 = vld [vmem:[%s15329_s25 + $0xea] sm:$0xff]  ;;  %v15988_v41 = vpack.c.bf16 %v1210_v10, %v1209_v9  ;;  %vm7442_vm11 = vcmp.eq.s32.totalorder %v15694_v43, 15  ;;  %v1217_v14 = vld [vmem:[%s15329_s25 + $0x112] sm:$0xff] }
 0x1e2   : > { %v15990_v23 = vpack.c.bf16 %v1212_v20, %v1211_v58  ;;  %vm7443_vm12 = vcmp.eq.s32.totalorder %v15696_v50, 15  ;;  %vm7444_vm13 = vcmp.eq.s32.totalorder %v15707_v5, 15  ;;  %vm7445_vm14 = vcmp.eq.s32.totalorder %v15709_v6, 15  ;;  %v2845_v9 = vld [vmem:[%s15329_s25 + $0x125] sm:$0xff]  ;;  %v2846_v10 = vld [vmem:[%s15329_s25 + $0x12d] sm:$0xff] }
 0x1e3   : > { %v14389_v15 = vpack.i.bf16 %v7549_v49, %v7548_v44  ;;  %v7478_v33 = vsel %vm7442_vm11, 0.5, %v14946_v18  ;;  %v7479_v34 = vsel %vm7443_vm12, 0.5, %v14946_v18  ;;  %vm7514_vm15 = vcmp.eq.s32.totalorder %v15694_v43, 0  ;;  %v1218_v44 = vld [vmem:[%s15329_s25 + $0x11a] sm:$0xff] }
 0x1e4   : > { %14345 = vperm.xlu1 %14288, %v14344_v1   ;;  %v7475_v1 = vsel %vm7439_vm4, 0.5, %v14946_v18  ;;  %v14394_v27 = vpack.i.bf16 %v7479_v34, %v7478_v33  ;;  %vm7515_vm1 = vcmp.eq.s32.totalorder %v15696_v50, 0  ;;  %vm7516_vm3 = vcmp.eq.s32.totalorder %v15707_v5, 0  ;;  %v2847_v49 = vld [vmem:[%s15329_s25 + $0x135] sm:$0xff] }
 0x1e5   : > { %14350 = vperm.xlu0 %14287, %v14349_v47   ;;  %v7476_v47 = vsel %vm7440_vm5, 0.5, %v14946_v18  ;;  %vm7517_vm4 = vcmp.eq.s32.totalorder %v15709_v6, 0  ;;  %v7552_v5 = vsel %vm7516_vm3, 0.5, %v14946_v18  ;;  %v2865_v58 = vpack.c.bf16 %v2846_v10, %v2845_v9  ;;  %v3141_v9 = vld [vmem:[%s15329_s25 + $0x36] sm:$0xff]  ;;  %v3142_v10 = vld [vmem:[%s15329_s25 + $0x3e] sm:$0xff] }
 0x1e6   : > { %12123 = vmatmul.mubr.msk.bf16.gmra.mrb[16].mxu1 %vm18320_vm2, %v15920_v48  ;;  %12313 = vmatmul.mubr.msk.bf16.gmra.mrb[16].mxu0 %vm18320_vm2, %v2858_v7  ;;  %v2839_v7 = vld [vmem:[%s15329_s25 + $0xf5] sm:$0xff]  ;;  %v14379_v29 = vpack.i.bf16 %v7477_v54, %v7476_v47  ;;  %v7553_v6 = vsel %vm7517_vm4, 0.5, %v14946_v18  ;;  %vm7446_vm5 = vcmp.eq.s32.totalorder %v15720_v57, 15  ;;  %vm7447_vm6 = vcmp.eq.s32.totalorder %v15722_v16, 15 }
 0x1e7   : > { %12126 = vmatprep.mubr.msk.bf16.mxu1 %vm18320_vm2, %v15922_v53  ;;  %12316 = vmatprep.mubr.msk.bf16.mxu0 %vm18320_vm2, %v2859_v46  ;;  %v14374_v46 = vpack.i.bf16 %v7475_v1, %v7474_v62  ;;  %v2862_v17 = vpack.c.bf16 %v2840_v55, %v2839_v7  ;;  %v1215_v62 = vld [vmem:[%s15329_s25 + $0x102] sm:$0xff]  ;;  %v1216_v1 = vld [vmem:[%s15329_s25 + $0x10a] sm:$0xff]  ;;  %v7550_v7 = vsel %vm7514_vm15, 0.5, %v14946_v18  ;;  %vm7448_vm7 = vcmp.eq.s32.totalorder %v15733_v25, 15 }
 0x1e8   : > { %14355 = vperm.xlu1 %14288, %v14354_v45   ;;  %v2842_v45 = vld [vmem:[%s15329_s25 + $0x10d] sm:$0xff]  ;;  %v16024_v55 = vpack.c.bf16 %v1216_v1, %v1215_v62  ;;  %vm7449_vm8 = vcmp.eq.s32.totalorder %v15735_v30, 15  ;;  %v14409_v20 = vpack.i.bf16 %v7553_v6, %v7552_v5  ;;  %vm7518_vm9 = vcmp.eq.s32.totalorder %v15720_v57, 0 }
 0x1e9   : > { %14360 = vperm.xlu0 %14287, %v14359_v13   ;;  %v2863_v24 = vpack.c.bf16 %v2842_v45, %v2841_v8  ;;  %v1213_v13 = vld [vmem:[%s15329_s25 + $0xf2] sm:$0xff]  ;;  %v7482_v8 = vsel %vm7446_vm5, 0.5, %v14946_v18  ;;  %v7483_v45 = vsel %vm7447_vm6, 0.5, %v14946_v18  ;;  %vm7519_vm10 = vcmp.eq.s32.totalorder %v15722_v16, 0 }
 0x1ea   : > { %v14414_v36 = vpack.i.bf16 %v7483_v45, %v7482_v8  ;;  %vm7520_vm11 = vcmp.eq.s32.totalorder %v15733_v25, 0  ;;  %vm7521_vm12 = vcmp.eq.s32.totalorder %v15735_v30, 0  ;;  %v7554_v33 = vsel %vm7518_vm9, 0.5, %v14946_v18 }
 0x1eb   : > { %v7555_v34 = vsel %vm7519_vm10, 0.5, %v14946_v18  ;;  %v7556_v25 = vsel %vm7520_vm11, 0.5, %v14946_v18  ;;  %v7557_v30 = vsel %vm7521_vm12, 0.5, %v14946_v18  ;;  %vm7452_vm15 = vcmp.eq.s32.totalorder %v15761_v60, 15 }
 0x1ec   : > { %14365 = vperm.xlu1 %14288, %v14364_v21   ;;  %v1214_v21 = vld [vmem:[%s15329_s25 + $0xfa] sm:$0xff]  ;;  %v14424_v16 = vpack.i.bf16 %v7555_v34, %v7554_v33  ;;  %v7488_v62 = vsel %vm7452_vm15, 0.5, %v14946_v18  ;;  %vm7522_vm3 = vcmp.eq.s32.totalorder %v15750_v52, 0  ;;  %vm7523_vm4 = vcmp.eq.s32.totalorder %v15752_v31, 0 }
 0x1ed   : > { %14370 = vperm.xlu0 %14287, %v14369_v42   ;;  %v2844_v42 = vld [vmem:[%s15329_s25 + $0x11d] sm:$0xff]  ;;  %v16022_v47 = vpack.c.bf16 %v1214_v21, %v1213_v13  ;;  %v16054_v13 = vpack.c.bf16 %v1218_v44, %v1217_v14  ;;  %vm7524_vm5 = vcmp.eq.s32.totalorder %v15761_v60, 0  ;;  %vm7525_vm6 = vcmp.eq.s32.totalorder %v15763_v63, 0 }
 0x1ee   : > { %12127 = vmatmul.mubr.msk.bf16.gmra.mrb[20].mxu1 %vm18320_vm2, %v15954_v28  ;;  %12317 = vmatmul.mubr.msk.bf16.gmra.mrb[20].mxu0 %vm18320_vm2, %v2860_v35  ;;  %v7480_v35 = vsel %vm7444_vm13, 0.5, %v14946_v18  ;;  %v2864_v54 = vpack.c.bf16 %v2844_v42, %v2843_v0  ;;  %vm7450_vm13 = vcmp.eq.s32.totalorder %v15750_v52, 15  ;;  %v3143_v52 = vld [vmem:[%s15329_s25 + $0x46] sm:$0xff]  ;;  %v7560_v60 = vsel %vm7524_vm5, 0.5, %v14946_v18  ;;  %v3146_v14 = vld [vmem:[%s15329_s25 + $0x5e] sm:$0xff] }
 0x1ef   : > { %12130 = vmatprep.mubr.msk.bf16.mxu1 %vm18320_vm2, %v15956_v37  ;;  %12320 = vmatprep.mubr.msk.bf16.mxu0 %vm18320_vm2, %v2861_v40  ;;  %v7481_v40 = vsel %vm7445_vm14, 0.5, %v14946_v18  ;;  %vm7451_vm14 = vcmp.eq.s32.totalorder %v15752_v31, 15  ;;  %v3176_v5 = vpack.c.bf16 %v3142_v10, %v3141_v9  ;;  %vm7455_vm9 = vcmp.eq.s32.totalorder %v15784_v59, 15  ;;  %v3150_v33 = vld [vmem:[%s15329_s25 + $0x7e] sm:$0xff]  ;;  %v3155_v9 = vld [vmem:[%s15329_s25 + $0xa6] sm:$0xff]  ;;  %v3156_v10 = vld [vmem:[%s15329_s25 + $0xae] sm:$0xff] }
 0x1f0   : > { %14375 = vperm.xlu1 %14288, %v14374_v46   ;;  %v7551_v46 = vsel %vm7515_vm1, 0.5, %v14946_v18  ;;  %v14399_v43 = vpack.i.bf16 %v7481_v40, %v7480_v35  ;;  %vm7453_vm1 = vcmp.eq.s32.totalorder %v15763_v63, 15  ;;  %v7486_v35 = vsel %vm7450_vm13, 0.5, %v14946_v18  ;;  %v14544_v34 = vld [vmem:[#allocation7 + $0x18] sm:$0xff] }
 0x1f1   : > { %14380 = vperm.xlu0 %14287, %v14379_v29   ;;  %v14404_v50 = vpack.i.bf16 %v7551_v46, %v7550_v7  ;;  %v7484_v29 = vsel %vm7448_vm7, 0.5, %v14946_v18  ;;  %v7487_v40 = vsel %vm7451_vm14, 0.5, %v14946_v18  ;;  %v7489_v1 = vsel %vm7453_vm1, 0.5, %v14946_v18 }
 0x1f2   : > { %v14434_v42 = vpack.i.bf16 %v7487_v40, %v7486_v35  ;;  %v7558_v7 = vsel %vm7522_vm3, 0.5, %v14946_v18  ;;  %v7559_v46 = vsel %vm7523_vm4, 0.5, %v14946_v18  ;;  %v7561_v63 = vsel %vm7525_vm6, 0.5, %v14946_v18  ;;  %v14547_v40 = vld [vmem:[#allocation7 + $0x30] sm:$0xff] }
 0x1f3   : > { %v14444_v31 = vpack.i.bf16 %v7559_v46, %v7558_v7  ;;  %vm7454_vm7 = vcmp.eq.s32.totalorder %v15782_v32, 15  ;;  %vm7526_vm10 = vcmp.eq.s32.totalorder %v15782_v32, 0  ;;  %v14449_v6 = vpack.i.bf16 %v7561_v63, %v7560_v60  ;;  %v3145_v32 = vld [vmem:[%s15329_s25 + $0x56] sm:$0xff] }
 0x1f4   : > { %14385 = vperm.xlu1 %14288, %v14384_v39   ;;  %v7485_v39 = vsel %vm7449_vm8, 0.5, %v14946_v18  ;;  %vm7456_vm8 = vcmp.eq.s32.totalorder %v15800_v51, 15  ;;  %v7491_v8 = vsel %vm7455_vm9, 0.5, %v14946_v18  ;;  %v7562_v45 = vsel %vm7526_vm10, 0.5, %v14946_v18  ;;  %v14551_v60 = vld [vmem:[#allocation7 + $0x58] sm:$0xff] }
 0x1f5   : > { %14390 = vperm.xlu0 %14287, %v14389_v15   ;;  %v3140_v15 = vld [vmem:[%s15329_s25 + $0x2e] sm:$0xff]  ;;  %v14419_v57 = vpack.i.bf16 %v7485_v39, %v7484_v29  ;;  %vm7527_vm11 = vcmp.eq.s32.totalorder %v15784_v59, 0  ;;  %vm7528_vm12 = vcmp.eq.s32.totalorder %v15800_v51, 0  ;;  %v14459_v44 = vpack.i.bf16 %v7562_v45, %v7491_v8  ;;  %v3157_v63 = vld [vmem:[%s15329_s25 + $0xb6] sm:$0xff] }
 0x1f6   : > { %12131 = vmatmul.mubr.msk.bf16.gmra.mrb[24].mxu1 %vm18320_vm2, %v15988_v41  ;;  %12321 = vmatmul.mubr.msk.bf16.gmra.mrb[24].mxu0 %vm18320_vm2, %v2862_v17  ;;  %v2848_v17 = vld [vmem:[%s15329_s25 + $0x13d] sm:$0xff]  ;;  %v7564_v29 = vsel %vm7528_vm12, 0.5, %v14946_v18  ;;  %v3148_v39 = vld [vmem:[%s15329_s25 + $0x6e] sm:$0xff]  ;;  %v3178_v51 = vpack.c.bf16 %v3146_v14, %v3145_v32  ;;  %vm575_vm1 = vcmp.lt.s32.totalorder %v14544_v34, 8  ;;  %vm578_vm5 = vcmp.lt.s32.totalorder %v14547_v40, 8 }
 0x1f7   : > { %12134 = vmatprep.mubr.msk.bf16.mxu1 %vm18320_vm2, %v15990_v23  ;;  %12324 = vmatprep.mubr.msk.bf16.mxu0 %vm18320_vm2, %v2863_v24  ;;  %v3139_v24 = vld [vmem:[%s15329_s25 + $0x26] sm:$0xff]  ;;  %v2866_v21 = vpack.c.bf16 %v2848_v17, %v2847_v49  ;;  %vm582_vm9 = vcmp.lt.s32.totalorder %v14551_v60, 8 }
 0x1f8   : > { %14395 = vperm.xlu1 %14288, %v14394_v27   ;;  %v3175_v0 = vpack.c.bf16 %v3140_v15, %v3139_v24  ;;  %v14429_v27 = vpack.i.bf16 %v7557_v30, %v7556_v25  ;;  %v14542_v49 = vld [vmem:[#allocation7 + $0x8] sm:$0xff]  ;;  %v14543_v24 = vld [vmem:[#allocation7 + $0x10] sm:$0xff]  ;;  %v10706_v30 = vsel %vm575_vm1, 1, %v14945_v26  ;;  %vm591_vm1 = vcmask 518144  }
 0x1f9   : > { %14400 = vperm.xlu0 %14287, %v14399_v43   ;;  %v14439_v43 = vpack.i.bf16 %v7489_v1, %v7488_v62  ;;  %vm573_vm14 = vcmp.lt.s32.totalorder %v14542_v49, 8  ;;  %vm574_vm15 = vcmp.lt.s32.totalorder %v14543_v24, 8  ;;  %v3149_v15 = vld [vmem:[%s15329_s25 + $0x76] sm:$0xff]  ;;  %v3154_v62 = vld [vmem:[%s15329_s25 + $0x9e] sm:$0xff]  ;;  %v3168_v49 = vld [vmem:[%s15329_s25 + $0x10e] sm:$0xff] }
 0x1fa   : > { %v10704_v17 = vsel %vm573_vm14, 1, %v14945_v26  ;;  %v3180_v25 = vpack.c.bf16 %v3150_v33, %v3149_v15  ;;  %v14548_v1 = vld [vmem:[#allocation7 + $0x38] sm:$0xff]  ;;  %v14553_v8 = vld [vmem:[#allocation7 + $0x68] sm:$0xff]  ;;  %v14554_v45 = vld [vmem:[#allocation7 + $0x70] sm:$0xff] }
 0x1fb   : > { %vm579_vm6 = vcmp.lt.s32.totalorder %v14548_v1, 8  ;;  %vm585_vm12 = vcmp.lt.s32.totalorder %v14554_v45, 8  ;;  %v3171_v15 = vld [vmem:[%s15329_s25 + $0x126] sm:$0xff]  ;;  %v3172_v33 = vld [vmem:[%s15329_s25 + $0x12e] sm:$0xff] }
 0x1fc   : > { %14405 = vperm.xlu1 %14288, %v14404_v50   ;;  %v3144_v50 = vld [vmem:[%s15329_s25 + $0x4e] sm:$0xff]  ;;  %v10710_v46 = vsel %vm579_vm6, 1, %v14945_v26  ;;  %v10716_v14 = vsel %vm585_vm12, 1, %v14945_v26  ;;  %v1849_v60 = vld [vmem:[%s15329_s25 + $0x83] sm:$0xff] }
 0x1fd   : > { %14410 = vperm.xlu0 %14287, %v14409_v20   ;;  %v1842_v1 = vld [vmem:[%s15329_s25 + $0x4b] sm:$0xff] }
 0x1fe   : > { %12135 = vmatmul.mubr.msk.bf16.gmra.mrb[28].mxu1 %vm18320_vm2, %v16022_v47  ;;  %12325 = vmatmul.mubr.msk.bf16.gmra.mrb[28].mxu0 %vm18320_vm2, %v2864_v54  ;;  %v7490_v54 = vsel %vm7454_vm7, 0.5, %v14946_v18 }
 0x1ff   : > { %12138 = vmatprep.mubr.msk.bf16.mxu1 %vm18320_vm2, %v16024_v55  ;;  %12328 = vmatprep.mubr.msk.bf16.mxu0 %vm18320_vm2, %v2865_v58  ;;  %v7492_v58 = vsel %vm7456_vm8, 0.5, %v14946_v18 }
 0x200   : > { %14415 = vperm.xlu1 %14288, %v14414_v36   ;;  %v14454_v20 = vpack.i.bf16 %v7492_v58, %v7490_v54  ;;  %v7563_v36 = vsel %vm7527_vm11, 0.5, %v14946_v18  ;;  %v3160_v54 = vld [vmem:[%s15329_s25 + $0xce] sm:$0xff]  ;;  %vm584_vm11 = vcmp.lt.s32.totalorder %v14553_v8, 8  ;;  %v1856_v8 = vld [vmem:[%s15329_s25 + $0xbb] sm:$0xff] }
 0x201   : > { %14420 = vperm.xlu0 %14287, %v14419_v57   ;;  %v14464_v59 = vpack.i.bf16 %v7563_v36, %v7564_v29  ;;  %v3151_v57 = vld [vmem:[%s15329_s25 + $0x86] sm:$0xff]  ;;  %v10715_v32 = vsel %vm584_vm11, 1, %v14945_v26  ;;  %v3161_v29 = vld [vmem:[%s15329_s25 + $0xd6] sm:$0xff] }
 0x202   : > { %v14555_v36 = vld [vmem:[#allocation7 + $0x78] sm:$0xff] }
 0x204   : > { %14425 = vperm.xlu1 %14288, %v14424_v16   ;;  %v3152_v16 = vld [vmem:[%s15329_s25 + $0x8e] sm:$0xff] }
 0x205   : > { %14430 = vperm.xlu0 %14287, %v14429_v27  }
 0x206   : > { %12139 = vmatmul.mubr.msk.bf16.gmra.mrb[32].mxu1 %vm18320_vm2, %v16054_v13  ;;  %12329 = vmatmul.mubr.msk.bf16.gmra.mrb[32].mxu0 %vm18320_vm2, %v2866_v21  ;;  %v14545_v21 = vld [vmem:[#allocation7 + $0x20] sm:$0xff] }
 0x207   : > { %12144 = vmatprep.mubr.msk.bf16.mxu1 %vm18320_vm2, %v15778_v22  ;;  %12334 = vmatprep.mubr.msk.bf16.mxu0 %vm18320_vm2, %v3175_v0  ;;  %v3177_v22 = vpack.c.bf16 %v3144_v50, %v3143_v52  ;;  %vm576_vm3 = vcmp.lt.s32.totalorder %v14545_v21, 8  ;;  %v14546_v0 = vld [vmem:[#allocation7 + $0x28] sm:$0xff]  ;;  %v14550_v52 = vld [vmem:[#allocation7 + $0x50] sm:$0xff] }
 0x208   : > { %14435 = vperm.xlu1 %14288, %v14434_v42   ;;  %vm577_vm4 = vcmp.lt.s32.totalorder %v14546_v0, 8  ;;  %v10707_v27 = vsel %vm576_vm3, 1, %v14945_v26  ;;  %v3153_v42 = vld [vmem:[%s15329_s25 + $0x96] sm:$0xff]  ;;  %vm581_vm8 = vcmp.lt.s32.totalorder %v14550_v52, 8  ;;  %v1838_v0 = vld [vmem:[%s15329_s25 + $0x2b] sm:$0xff] }
 0x209   : > { %14440 = vperm.xlu0 %14287, %v14439_v43   ;;  %v10708_v35 = vsel %vm577_vm4, 1, %v14945_v26  ;;  %v3182_v7 = vpack.c.bf16 %v3154_v62, %v3153_v42  ;;  %v14549_v43 = vld [vmem:[#allocation7 + $0x48] sm:$0xff] }
 0x20a   : > { %vm580_vm7 = vcmp.lt.s32.totalorder %v14549_v43, 8  ;;  %v1841_v62 = vld [vmem:[%s15329_s25 + $0x43] sm:$0xff]  ;;  %v1846_v43 = vld [vmem:[%s15329_s25 + $0x6b] sm:$0xff]  ;;  %v1848_v52 = vld [vmem:[%s15329_s25 + $0x7b] sm:$0xff] }
 0x20b   : > { %v10711_v50 = vsel %vm580_vm7, 1, %v14945_v26 }
 0x20c   : > { %14445 = vperm.xlu1 %14288, %v14444_v31   ;;  %v10712_v31 = vsel %vm581_vm8, 1, %v14945_v26 }
 0x20d   : > { %14450 = vperm.xlu0 %14287, %v14449_v6   ;;  %v3159_v6 = vld [vmem:[%s15329_s25 + $0xc6] sm:$0xff] }
 0x20e   : > { %12145 = vmatmul.mubr.msk.bf16.vlgmr.msra.gmra.mrb[0].mxu1 %vm18320_vm2, %v15780_v19  ;;  %12335 = vmatmul.mubr.msk.bf16.vlgmr.msra.gmra.mrb[0].mxu0 %vm18320_vm2, %v3176_v5  ;;  %v3147_v19 = vld [vmem:[%s15329_s25 + $0x66] sm:$0xff]  ;;  %v3158_v5 = vld [vmem:[%s15329_s25 + $0xbe] sm:$0xff] }
 0x20f   : > { %12181 = vmatpush3.bf16.msra.mxu1 %v15790_v38  ;;  %12148 = vmatprep.mubr.msk.bf16.mxu1 %vm18320_vm2, %v15814_v4  ;;  %v14541_v38 = vld [vmem:[#allocation7] sm:$0xff]  ;;  %v3179_v4 = vpack.c.bf16 %v3148_v39, %v3147_v19  ;;  %v3184_v58 = vpack.c.bf16 %v3158_v5, %v3157_v63 }
 0x210   : > { %12338 = vmatprep.mubr.msk.bf16.mxu0 %vm18320_vm2, %v3177_v22  ;;  %14455 = vperm.xlu1 %14288, %v14454_v20   ;;  %vm572_vm13 = vcmp.lt.s32.totalorder %v14541_v38, 8  ;;  %v14552_v22 = vld [vmem:[#allocation7 + $0x60] sm:$0xff] }
 0x211   : > { %14460 = vperm.xlu0 %14287, %v14459_v44   ;;  %v10703_v18 = vsel %vm572_vm13, 1, %v14945_v26  ;;  %vm583_vm10 = vcmp.lt.s32.totalorder %v14552_v22, 8  ;;  %vm586_vm13 = vcmp.lt.s32.totalorder %v14555_v36, 8  ;;  %v3162_v19 = vld [vmem:[%s15329_s25 + $0xde] sm:$0xff]  ;;  %v3163_v44 = vld [vmem:[%s15329_s25 + $0xe6] sm:$0xff]  ;;  %v1851_v5 = vld [vmem:[%s15329_s25 + $0x93] sm:$0xff] }
 0x212   : > { %v10714_v20 = vsel %vm583_vm10, 1, %v14945_v26  ;;  %v14556_v39 = vld [vmem:[#allocation7 + $0x80] sm:$0xff] }
 0x213   : > { %vm587_vm14 = vcmp.lt.s32.totalorder %v14556_v39, 8  ;;  %v1850_v63 = vld [vmem:[%s15329_s25 + $0x8b] sm:$0xff]  ;;  %v1852_v22 = vld [vmem:[%s15329_s25 + $0x9b] sm:$0xff] }
 0x214   : > { %14465 = vperm.xlu1 %14288, %v14464_v59   ;;  %v10717_v59 = vsel %vm586_vm13, 1, %v14945_v26  ;;  %v10718_v38 = vsel %vm587_vm14, 1, %v14945_v26  ;;  %v1858_v36 = vld [vmem:[%s15329_s25 + $0xcb] sm:$0xff] }
 0x215   : > { %10720 = vperm.xlu0 %14287, %v10703_v18   ;;  %v3166_v18 = vld [vmem:[%s15329_s25 + $0xfe] sm:$0xff] }
 0x216   : > { %12149 = vmatmul.mubr.msk.bf16.gmra.mrb[4].mxu1 %vm18320_vm2, %v15819_v12  ;;  %12339 = vmatmul.mubr.msk.bf16.gmra.mrb[4].mxu0 %vm18320_vm2, %v3178_v51  ;;  %v10705_v12 = vsel %vm574_vm15, 1, %v14945_v26  ;;  %v3186_v51 = vpack.c.bf16 %v3162_v19, %v3161_v29  ;;  %v1859_v29 = vld [vmem:[%s15329_s25 + $0xd3] sm:$0xff]  ;;  %v1860_v19 = vld [vmem:[%s15329_s25 + $0xdb] sm:$0xff]  ;;  %vm588_vm15 = vcmask 523264  }
 0x217   : > { %12152 = vmatprep.mubr.msk.bf16.mxu1 %vm18320_vm2, %v15852_v11  ;;  %12342 = vmatprep.mubr.msk.bf16.mxu0 %vm18320_vm2, %v3179_v4  ;;  %v3181_v11 = vpack.c.bf16 %v3152_v16, %v3151_v57  ;;  %v3165_v4 = vld [vmem:[%s15329_s25 + $0xf6] sm:$0xff]  ;;  %v3191_v57 = vpack.c.bf16 %v3172_v33, %v3171_v15  ;;  %v1869_v15 = vld [vmem:[%s15329_s25 + $0x123] sm:$0xff]  ;;  %v1870_v33 = vld [vmem:[%s15329_s25 + $0x12b] sm:$0xff] }
 0x218   : > { %10723 = vperm.xlu1 %14288, %v10704_v17   ;;  %v3188_v17 = vpack.c.bf16 %v3166_v18, %v3165_v4  ;;  %v3173_v16 = vld [vmem:[%s15329_s25 + $0x136] sm:$0xff]  ;;  %v1865_v18 = vld [vmem:[%s15329_s25 + $0x103] sm:$0xff] }
 0x219   : > { %10726 = vperm.xlu0 %14287, %v10705_v12   ;;  %v3174_v12 = vld [vmem:[%s15329_s25 + $0x13e] sm:$0xff] }
 0x21a   : > { %v3192_v21 = vpack.c.bf16 %v3174_v12, %v3173_v16 }
 0x21c   : > { %10729 = vperm.xlu1 %14288, %v10706_v30   ;;  %v1836_v30 = vld [vmem:[%s15329_s25 + $0x1b] sm:$0xff] }
 0x21d   : > { %10732 = vperm.xlu0 %14287, %v10707_v27   ;;  %v1839_v27 = vld [vmem:[%s15329_s25 + $0x33] sm:$0xff] }
 0x21e   : > { %12153 = vmatmul.mubr.msk.bf16.gmra.mrb[8].mxu1 %vm18320_vm2, %v15854_v3  ;;  %12343 = vmatmul.mubr.msk.bf16.gmra.mrb[8].mxu0 %vm18320_vm2, %v3180_v25  ;;  %v10709_v3 = vsel %vm578_vm5, 1, %v14945_v26  ;;  %v1835_v25 = vld [vmem:[%s15329_s25 + $0x13] sm:$0xff] }
 0x21f   : > { %12156 = vmatprep.mubr.msk.bf16.mxu1 %vm18320_vm2, %v15886_v56  ;;  %12346 = vmatprep.mubr.msk.bf16.mxu0 %vm18320_vm2, %v3181_v11  ;;  %v3183_v56 = vpack.c.bf16 %v3156_v10, %v3155_v9  ;;  %v1871_v11 = vpack.c.bf16 %v1836_v30, %v1835_v25  ;;  %v1843_v9 = vld [vmem:[%s15329_s25 + $0x53] sm:$0xff]  ;;  %v1844_v10 = vld [vmem:[%s15329_s25 + $0x5b] sm:$0xff] }
 0x220   : > { %10735 = vperm.xlu1 %14288, %v10708_v35   ;;  %v1840_v35 = vld [vmem:[%s15329_s25 + $0x3b] sm:$0xff] }
 0x221   : > { %10738 = vperm.xlu0 %14287, %v10709_v3   ;;  %v1873_v42 = vpack.c.bf16 %v1840_v35, %v1839_v27  ;;  %v1874_v3 = vpack.c.bf16 %v1842_v1, %v1841_v62  ;;  %v16264_v30 = vld [vmem:[#allocation12] sm:$0xff]  }
 0x224   : > { %10741 = vperm.xlu1 %14288, %v10710_v46   ;;  %v1845_v46 = vld [vmem:[%s15329_s25 + $0x63] sm:$0xff] }
 0x225   : > { %10744 = vperm.xlu0 %14287, %v10711_v50   ;;  %v1876_v50 = vpack.c.bf16 %v1846_v43, %v1845_v46 }
 0x226   : > { %12157 = vmatmul.mubr.msk.bf16.gmra.mrb[12].mxu1 %vm18320_vm2, %v15888_v61  ;;  %12347 = vmatmul.mubr.msk.bf16.gmra.mrb[12].mxu0 %vm18320_vm2, %v3182_v7  ;;  %v10713_v61 = vsel %vm582_vm9, 1, %v14945_v26  ;;  %v3167_v26 = vld [vmem:[%s15329_s25 + $0x106] sm:$0xff]  ;;  %v1875_v7 = vpack.c.bf16 %v1844_v10, %v1843_v9 }
 0x227   : > { %12160 = vmatprep.mubr.msk.bf16.mxu1 %vm18320_vm2, %v15920_v48  ;;  %12350 = vmatprep.mubr.msk.bf16.mxu0 %vm18320_vm2, %v3183_v56  ;;  %v3185_v48 = vpack.c.bf16 %v3160_v54, %v3159_v6  ;;  %v3189_v24 = vpack.c.bf16 %v3168_v49, %v3167_v26  ;;  %v1847_v56 = vld [vmem:[%s15329_s25 + $0x73] sm:$0xff]  ;;  %v1878_v6 = vpack.c.bf16 %v1850_v63, %v1849_v60  ;;  %v1866_v26 = vld [vmem:[%s15329_s25 + $0x10b] sm:$0xff] }
 0x228   : > { %10747 = vperm.xlu1 %14288, %v10712_v31   ;;  %v1877_v31 = vpack.c.bf16 %v1848_v52, %v1847_v56  ;;  %v1879_v54 = vpack.c.bf16 %v1852_v22, %v1851_v5  ;;  %v1867_v49 = vld [vmem:[%s15329_s25 + $0x113] sm:$0xff]  ;;  %v16319_v5 = vpop.permute.xlu1 %3659 }
 0x229   : > { %10750 = vperm.xlu0 %14287, %v10713_v61   ;;  %v1853_v61 = vld [vmem:[%s15329_s25 + $0xa3] sm:$0xff]  ;;  %vm3762_vm3 = vcmp.eq.s32.totalorder %v16319_v5, 1 }
 0x22c   : > { %10753 = vperm.xlu1 %14288, %v10714_v20   ;;  %v1855_v20 = vld [vmem:[%s15329_s25 + $0xb3] sm:$0xff] }
 0x22d   : > { %10756 = vperm.xlu0 %14287, %v10715_v32   ;;  %v1881_v45 = vpack.c.bf16 %v1856_v8, %v1855_v20  ;;  %v14469_v32 = vld [vmem:[#allocation12 + $0x20] sm:$0xff]  }
 0x22e   : > { %12161 = vmatmul.mubr.msk.bf16.gmra.mrb[16].mxu1 %vm18320_vm2, %v15922_v53  ;;  %12351 = vmatmul.mubr.msk.bf16.gmra.mrb[16].mxu0 %vm18320_vm2, %v3184_v58  ;;  %v3164_v53 = vld [vmem:[%s15329_s25 + $0xee] sm:$0xff] }
 0x22f   : > { %12164 = vmatprep.mubr.msk.bf16.mxu1 %vm18320_vm2, %v15954_v28  ;;  %12354 = vmatprep.mubr.msk.bf16.mxu0 %vm18320_vm2, %v3185_v48  ;;  %v3187_v28 = vpack.c.bf16 %v3164_v53, %v3163_v44  ;;  %v1854_v58 = vld [vmem:[%s15329_s25 + $0xab] sm:$0xff]  ;;  %v1883_v44 = vpack.c.bf16 %v1860_v19, %v1859_v29  ;;  %v1861_v53 = vld [vmem:[%s15329_s25 + $0xe3] sm:$0xff] }
 0x230   : > { %10759 = vperm.xlu1 %14288, %v10716_v14   ;;  %v1880_v48 = vpack.c.bf16 %v1854_v58, %v1853_v61  ;;  %12370 = vmatprep.subr.bf16.mxu1 %v14469_v32  ;;  %v1857_v14 = vld [vmem:[%s15329_s25 + $0xc3] sm:$0xff]  ;;  %v16327_v61 = vpop.permute.xlu1 %3662 }
 0x231   : > { %10762 = vperm.xlu0 %14287, %v10717_v59   ;;  %v1882_v39 = vpack.c.bf16 %v1858_v36, %v1857_v14  ;;  %v1862_v59 = vld [vmem:[%s15329_s25 + $0xeb] sm:$0xff]  ;;  %vm3763_vm7 = vcmp.eq.s32.totalorder %v16327_v61, 1 }
 0x234   : > { %10765 = vperm.xlu1 %14288, %v10718_v38   ;;  %v1864_v38 = vld [vmem:[%s15329_s25 + $0xfb] sm:$0xff] }
 0x236   : > { %12165 = vmatmul.mubr.msk.bf16.gmra.mrb[20].mxu1 %vm18320_vm2, %v15956_v37  ;;  %12355 = vmatmul.mubr.msk.bf16.gmra.mrb[20].mxu0 %vm18320_vm2, %v3186_v51  ;;  %v3169_v37 = vld [vmem:[%s15329_s25 + $0x116] sm:$0xff] }
 0x237   : > { %12168 = vmatprep.mubr.msk.bf16.mxu1 %vm18320_vm2, %v15988_v41  ;;  %12358 = vmatprep.mubr.msk.bf16.mxu0 %vm18320_vm2, %v3187_v28  ;;  %v3170_v41 = vld [vmem:[%s15329_s25 + $0x11e] sm:$0xff]  ;;  %v1863_v51 = vld [vmem:[%s15329_s25 + $0xf3] sm:$0xff]  ;;  %v1884_v28 = vpack.c.bf16 %v1862_v59, %v1861_v53 }
 0x238   : > { %v3190_v34 = vpack.c.bf16 %v3170_v41, %v3169_v37  ;;  %v1885_v4 = vpack.c.bf16 %v1864_v38, %v1863_v51  ;;  %v1886_v37 = vpack.c.bf16 %v1866_v26, %v1865_v18 }
 0x23e   : > { %12169 = vmatmul.mubr.msk.bf16.gmra.mrb[24].mxu1 %vm18320_vm2, %v15990_v23  ;;  %12359 = vmatmul.mubr.msk.bf16.gmra.mrb[24].mxu0 %vm18320_vm2, %v3188_v17  ;;  %v1543_v23 = vld [vmem:[%s15329_s25 + $0x122] sm:$0xff] }
 0x23f   : > { %12172 = vmatprep.mubr.msk.bf16.mxu1 %vm18320_vm2, %v16022_v47  ;;  %12362 = vmatprep.mubr.msk.bf16.mxu0 %vm18320_vm2, %v3189_v24  ;;  %v1544_v47 = vld [vmem:[%s15329_s25 + $0x12a] sm:$0xff]  ;;  %v1868_v17 = vld [vmem:[%s15329_s25 + $0x11b] sm:$0xff] }
 0x240   : > { %v14470_v24 = vld [vmem:[#allocation12 + $0x28] sm:$0xff]   ;;  %v1887_v41 = vpack.c.bf16 %v1868_v17, %v1867_v49  ;;  %v16369_v17 = vld [vmem:[#allocation10] ss:$0 sm:$0xff] }
 0x246   : > { %12173 = vmatmul.mubr.msk.bf16.gmra.mrb[28].mxu1 %vm18320_vm2, %v16024_v55  ;;  %12363 = vmatmul.mubr.msk.bf16.gmra.mrb[28].mxu0 %vm18320_vm2, %v3190_v34  ;;  %v1562_v55 = vpack.c.bf16 %v1544_v47, %v1543_v23  ;;  %v1888_v34 = vpack.c.bf16 %v1870_v33, %v1869_v15  ;;  %v18317_v23 = vmov 0.0   ;;  %v14472_v47 = vld [vmem:[#allocation12 + $0x38] sm:$0xff]  }
 0x247   : > { %12176 = vmatprep.mubr.msk.bf16.mxu1 %vm18320_vm2, %v16054_v13  ;;  %12366 = vmatprep.mubr.msk.bf16.mxu0 %vm18320_vm2, %v3191_v57  ;;  %v1837_v13 = vld [vmem:[%s15329_s25 + $0x23] sm:$0xff]  ;;  %589 = vst.msk [vmem:[#allocation2] sm:$0xff] %vm588_vm15, %v18317_v23  ;;  %590 = vst.msk [vmem:[#allocation2 + $0x8] sm:$0xff] %vm588_vm15, %v18317_v23 }
 0x248   : > { %v1872_v40 = vpack.c.bf16 %v1838_v0, %v1837_v13  ;;  %v14471_v57 = vld [vmem:[#allocation12 + $0x30] sm:$0xff]   ;;  %592 = vst.msk [vmem:[#allocation2 + $0x10] sm:$0x7] %vm591_vm1, %v18317_v23  ;;  %12766 = vmatprep.subr.bf16.mxu0 %v18317_v23  ;;  %10800 = vst.msk [vmem:[%s16267_s12 + $0x8] sm:$0x7] %vm591_vm1, %v18317_v23 }
 0x249   : > { %593 = vst.msk [vmem:[#allocation2 + $0x133] sm:$0xff] %vm588_vm15, %v18317_v23  ;;  %594 = vst.msk [vmem:[#allocation2 + $0x13b] sm:$0xff] %vm588_vm15, %v18317_v23 }
 0x24a   : > { %595 = vst.msk [vmem:[#allocation2 + $0x143] sm:$0xff] %vm588_vm15, %v18317_v23  ;;  %598 = vst.msk [vmem:[#allocation3 + $0x144] sm:$0xff] %vm588_vm15, %v18317_v23 }
 0x24b   : > { %10799 = vst.msk [vmem:[%s16267_s12] sm:$0xff] %vm588_vm15, %v18317_v23  ;;  %10801 = vst.msk [vmem:[%s16267_s12 + $0x5b] sm:$0xff] %vm588_vm15, %v18317_v23 }
 0x24c   : > { %10802 = vst.msk [vmem:[%s16267_s12 + $0x63] sm:$0xff] %vm588_vm15, %v18317_v23 }
 0x24e   : > { %12177 = vmatmul.mubr.msk.bf16.gmra.mrb[32].mxu1 %vm18320_vm2, %v1562_v55  ;;  %12367 = vmatmul.mubr.msk.bf16.gmra.mrb[32].mxu0 %vm18320_vm2, %v3192_v21  ;;  %v3930_v16 = vld [vmem:[#allocation2 + $0x1] sm:$0xff] }
 0x24f   : > { %12182 = vmatprep.mubr.msk.bf16.mxu1 %vm18320_vm2, %v1871_v11  ;;  %v3931_v12 = vld [vmem:[#allocation2 + $0x9] sm:$0xff] }
 0x250   : > { %v3966_v25 = vpack.c.bf16 %v3931_v12, %v3930_v16 }
 0x256   : > { %12183 = vmatmul.mubr.msk.bf16.vlgmr.msra.gmra.mrb[0].mxu1 %vm18320_vm2, %v1872_v40 }
 0x257   : > { %12186 = vmatprep.mubr.msk.bf16.mxu1 %vm18320_vm2, %v1873_v42  ;;  %12371 = vmatpush3.bf16.msra.mxu1 %v14469_v32  ;;  %v16339_v32 = vpop.permute.xlu1 %3668 }
 0x258   : > { %12372 = vmatprep.subr.bf16.mxu1 %v14470_v24  ;;  %18479 = vst [vmem:[#allocation31_spill] sm:$0xff] %v16339_v32 }
 0x25b   : > { %12373 = vmatpush3.bf16.msra.mxu1 %v14470_v24 }
 0x25c   : > { %12374 = vmatprep.subr.bf16.mxu1 %v14471_v57 }
 0x25e   : > { %12187 = vmatmul.mubr.msk.bf16.gmra.mrb[4].mxu1 %vm18320_vm2, %v1874_v3 }
 0x25f   : > { %12190 = vmatprep.mubr.msk.bf16.mxu1 %vm18320_vm2, %v1875_v7  ;;  %12375 = vmatpush3.bf16.msra.mxu1 %v14471_v57 }
 0x260   : > { %12376 = vmatprep.subr.bf16.mxu1 %v14472_v47 }
 0x263   : > { %12377 = vmatpush3.bf16.msra.mxu1 %v14472_v47 }
 0x264   : > { %12414 = vmatprep.subr.bf16.mxu1 %v16264_v30 }
 0x266   : > { %12191 = vmatmul.mubr.msk.bf16.gmra.mrb[8].mxu1 %vm18320_vm2, %v1876_v50 }
 0x267   : > { %12194 = vmatprep.mubr.msk.bf16.mxu1 %vm18320_vm2, %v1877_v31  ;;  %v16313_v31 = vpop.permute.xlu0 %3653 }
 0x268   : > { %vm3760_vm5 = vcmp.eq.s32.totalorder %v16313_v31, 1 }
 0x26e   : > { %12195 = vmatmul.mubr.msk.bf16.gmra.mrb[12].mxu1 %vm18320_vm2, %v1878_v6 }
 0x26f   : > { %12198 = vmatprep.mubr.msk.bf16.mxu1 %vm18320_vm2, %v1879_v54  ;;  %v16325_v54 = vpop.permute.xlu0 %3656 }
 0x270   : > { %vm3761_vm10 = vcmp.eq.s32.totalorder %v16325_v54, 1 }
 0x276   : > { %12199 = vmatmul.mubr.msk.bf16.gmra.mrb[16].mxu1 %vm18320_vm2, %v1880_v48 }
 0x277   : > { %12202 = vmatprep.mubr.msk.bf16.mxu1 %vm18320_vm2, %v1881_v45  ;;  %v16337_v45 = vpop.permute.xlu0 %3665 }
 0x278   : > { %vm3764_vm12 = vcmp.eq.s32.totalorder %v16337_v45, 1 }
 0x27b   : > { %v16345_v29 = vpop.permute.xlu0 %3671 }
 0x27c   : > { %18480 = vst [vmem:[#allocation32_spill] sm:$0xff] %v16345_v29  ;;  %vm3766_vm14 = vcmp.eq.s32.totalorder %v16345_v29, 1 }
 0x27e   : > { %12203 = vmatmul.mubr.msk.bf16.gmra.mrb[20].mxu1 %vm18320_vm2, %v1882_v39 }
 0x27f   : > { %12206 = vmatprep.mubr.msk.bf16.mxu1 %vm18320_vm2, %v1883_v44  ;;  %v16351_v44 = vpop.permute.xlu1 %3674  ;;  %v16353_v53 = vpop.permute.xlu0 %3677 }
 0x280   : > { %18481 = vst [vmem:[#allocation33_spill] sm:$0xff] %v16351_v44  ;;  %18482 = vst [vmem:[#allocation34_spill] sm:$0xff] %v16353_v53 }
 0x283   : > { %v16359_v38 = vpop.permute.xlu1 %3680  ;;  %v16365_v18 = vpop.permute.xlu0 %3683 }
 0x284   : > { %18483 = vst [vmem:[#allocation35_spill] sm:$0xff] %v16359_v38  ;;  %18484 = vst [vmem:[#allocation36_spill] sm:$0xff] %v16365_v18 }
 0x286   : > { %12207 = vmatmul.mubr.msk.bf16.gmra.mrb[24].mxu1 %vm18320_vm2, %v1884_v28 }
 0x287   : > { %12210 = vmatprep.mubr.msk.bf16.mxu1 %vm18320_vm2, %v1885_v4  ;;  %v16367_v26 = vpop.permute.xlu1 %3686  ;;  %v16372_v47 = vpop.permute.xlu0 %3689 }
 0x288   : > { %18485 = vst [vmem:[#allocation37_spill] sm:$0xff] %v16367_v26 }
 0x28e   : > { %12211 = vmatmul.mubr.msk.bf16.gmra.mrb[28].mxu1 %vm18320_vm2, %v1886_v37 }
 0x28f   : > { %12214 = vmatprep.mubr.msk.bf16.mxu1 %vm18320_vm2, %v1887_v41 }
 0x296   : > { %12215 = vmatmul.mubr.msk.bf16.gmra.mrb[32].mxu1 %vm18320_vm2, %v1888_v34 }
 0x297   : > { %12378 = vmatprep.mubr.msk.bf16.mxu1 %vm588_vm15, %v3966_v25 }
 0x2e1   : > { %v12336_v55 = vpop.f32.mrb[0].mxu0 }
 0x2e2   : > { %v3286_v21 = vpop.f32.mrb[1].mxu0 }
 0x2e3   : > { %v12337_v11 = vpop.f32.mrb[2].mxu0 }
 0x2e4   : > { %v3289_v13 = vpop.f32.mrb[3].mxu0 }
 0x2e9   : > { %v16281_v0 = vpop.f32.mrb[4].mxu0 }
 0x2ea   : > { %v16283_v27 = vpop.f32.mrb[5].mxu0 }
 0x2eb   : > { %v16285_v35 = vpop.f32.mrb[6].mxu0 }
 0x2ec   : > { %v16287_v40 = vpop.f32.mrb[7].mxu0 }
 0x2f1   : > { %v16289_v42 = vpop.f32.mrb[8].mxu0 }
 0x2f2   : > { %v16291_v62 = vpop.f32.mrb[9].mxu0 }
 0x2f3   : > { %v16293_v1 = vpop.f32.mrb[10].mxu0 }
 0x2f4   : > { %v16295_v9 = vpop.f32.mrb[11].mxu0 }
 0x2f9   : > { %v16297_v10 = vpop.f32.mrb[12].mxu0 }
 0x2fa   : > { %v16299_v3 = vpop.f32.mrb[13].mxu0 }
 0x2fb   : > { %v16301_v7 = vpop.f32.mrb[14].mxu0 }
 0x2fc   : > { %v16303_v46 = vpop.f32.mrb[15].mxu0 }
 0x301   : > { %v16305_v43 = vpop.f32.mrb[16].mxu0 }
 0x302   : > { %v16307_v56 = vpop.f32.mrb[17].mxu0 }
 0x303   : > { %v16309_v52 = vpop.f32.mrb[18].mxu0 }
 0x304   : > { %v16311_v50 = vpop.f32.mrb[19].mxu0 }
 0x309   : > { %v16315_v60 = vpop.f32.mrb[20].mxu0 }
 0x30a   : > { %v16317_v63 = vpop.f32.mrb[21].mxu0 }
 0x30b   : > { %v16321_v22 = vpop.f32.mrb[22].mxu0 }
 0x30c   : > { %v16323_v6 = vpop.f32.mrb[23].mxu0 }
 0x311   : > { %v16329_v58 = vpop.f32.mrb[24].mxu0 }
 0x312   : > { %v16331_v20 = vpop.f32.mrb[25].mxu0 }
 0x313   : > { %v16333_v8 = vpop.f32.mrb[26].mxu0 }
 0x314   : > { %v16335_v48 = vpop.f32.mrb[27].mxu0 }
 0x319   : > { %v16341_v14 = vpop.f32.mrb[28].mxu0 }
 0x31a   : > { %v16343_v36 = vpop.f32.mrb[29].mxu0 }
 0x31b   : > { %v16347_v19 = vpop.f32.mrb[30].mxu0 }
 0x31c   : > { %v16349_v39 = vpop.f32.mrb[31].mxu0 }
 0x321   : > { %v16355_v59 = vpop.f32.mrb[32].mxu0 }
 0x322   : > { %v16357_v51 = vpop.f32.mrb[33].mxu0 }
 0x323   : > { %v16361_v28 = vpop.f32.mrb[34].mxu0 }
 0x324   : > { %v16363_v4 = vpop.f32.mrb[35].mxu0 }
 0x329   : > { %v12184_v49 = vpop.f32.mrb[0].mxu1 }
 0x32a   : > { %v13200_v24 = vadd.f32 %v12336_v55, %v12184_v49  ;;  %v1982_v37 = vpop.f32.mrb[1].mxu1  ;;  %v16378_v55 = vpop.permute.xlu1 %3692 }
 0x32b   : > { %v13201_v41 = vadd.f32 %v3286_v21, %v1982_v37  ;;  %v12185_v15 = vpop.f32.mrb[2].mxu1  ;;  %18486 = vst [vmem:[#allocation38_spill] sm:$0xff] %v16378_v55 }
 0x32c   : > { %v3474_v33 = vadd.f32 %v13200_v24, %v16369_v17  ;;  %v13202_v34 = vadd.f32 %v12337_v11, %v12185_v15  ;;  %v1985_v57 = vpop.f32.mrb[3].mxu1 }
 0x32d   : > { %v3472_v16 = vadd.f32 %v13201_v41, %v16369_v17  ;;  %v13203_v12 = vadd.f32 %v3289_v13, %v1985_v57 }
 0x32e   : > { %vm3510_vm4 = vcmp.ge.f32.partialorder %v3474_v33, 0.0  ;;  %v3546_v25 = vmul.f32 0.2, %v3474_v33  ;;  %v3475_v23 = vadd.f32 %v13202_v34, %v16369_v17 }
 0x32f   : > { %vm3508_vm6 = vcmp.ge.f32.partialorder %v3472_v16, 0.0  ;;  %v3544_v21 = vmul.f32 0.2, %v3472_v16  ;;  %v3473_v11 = vadd.f32 %v13203_v12, %v16369_v17 }
 0x330   : > { %v3582_v49 = vsel %vm3510_vm4, %v3474_v33, %v3546_v25  ;;  %vm3511_vm8 = vcmp.ge.f32.partialorder %v3475_v23, 0.0  ;;  %v3547_v24 = vmul.f32 0.2, %v3475_v23  ;;  %v16389_v33 = vpop.permute.xlu0 %3695 }
 0x331   : > { %v3798_v13 = vsel %vm3762_vm3, %v3582_v49, 0.0  ;;  %v3580_v37 = vsel %vm3508_vm6, %v3472_v16, %v3544_v21  ;;  %vm3509_vm9 = vcmp.ge.f32.partialorder %v3473_v11, 0.0  ;;  %v3545_v41 = vmul.f32 0.2, %v3473_v11  ;;  %v12188_v15 = vpop.f32.mrb[4].mxu1 }
 0x332   : > { %3834 = vst.msk [vmem:[#allocation2 + $0x23] sm:$0xff] %vm588_vm15, %v3798_v13  ;;  %v3796_v34 = vsel %vm3760_vm5, %v3580_v37, 0.0  ;;  %v3583_v57 = vsel %vm3511_vm8, %v3475_v23, %v3547_v24  ;;  %v13204_v12 = vadd.f32 %v16281_v0, %v12188_v15  ;;  %v1998_v2 = vpop.f32.mrb[5].mxu1  ;;  %v16400_v37 = vpop.permute.xlu1 %3698  ;;  %vm3767_vm6 = vcmp.eq.s32.totalorder %v16351_v44, 1 }
 0x333   : > { %3832 = vst.msk [vmem:[#allocation2 + $0x13] sm:$0xff] %vm588_vm15, %v3796_v34  ;;  %v3799_v16 = vsel %vm3763_vm7, %v3583_v57, 0.0  ;;  %v3581_v25 = vsel %vm3509_vm9, %v3473_v11, %v3545_v41  ;;  %v13205_v21 = vadd.f32 %v16283_v27, %v1998_v2  ;;  %v12189_v49 = vpop.f32.mrb[6].mxu1  ;;  %vm18321_vm8 = vcmp.eq.s32.totalorder %v16339_v32, 1 }
 0x334   : > { %3835 = vst.msk [vmem:[#allocation2 + $0x2b] sm:$0xff] %vm588_vm15, %v3799_v16  ;;  %v3797_v23 = vsel %vm3761_vm10, %v3581_v25, 0.0  ;;  %v3478_v0 = vadd.f32 %v13204_v12, %v16369_v17  ;;  %v13206_v24 = vadd.f32 %v16285_v35, %v12189_v49  ;;  %v2001_v13 = vpop.f32.mrb[7].mxu1  ;;  %v16409_v12 = vpop.permute.xlu0 %3701 }
 0x335   : > { %3833 = vst.msk [vmem:[#allocation2 + $0x1b] sm:$0xff] %vm588_vm15, %v3797_v23  ;;  %v3476_v15 = vadd.f32 %v13205_v21, %v16369_v17  ;;  %v13207_v11 = vadd.f32 %v16287_v40, %v2001_v13  ;;  %18487 = vst [vmem:[#allocation39_spill] sm:$0xff] %v16409_v12 }
 0x336   : > { %vm3514_vm11 = vcmp.ge.f32.partialorder %v3478_v0, 0.0  ;;  %v3550_v2 = vmul.f32 0.2, %v3478_v0  ;;  %v3479_v27 = vadd.f32 %v13206_v24, %v16369_v17  ;;  %v16419_v13 = vpop.permute.xlu1 %3704 }
 0x337   : > { %vm3512_vm13 = vcmp.ge.f32.partialorder %v3476_v15, 0.0  ;;  %v3548_v41 = vmul.f32 0.2, %v3476_v15  ;;  %v3477_v34 = vadd.f32 %v13207_v11, %v16369_v17  ;;  %18488 = vst [vmem:[#allocation40_spill] sm:$0xff] %v16419_v13 }
 0x338   : > { %v3586_v35 = vsel %vm3514_vm11, %v3478_v0, %v3550_v2  ;;  %vm3515_vm1 = vcmp.ge.f32.partialorder %v3479_v27, 0.0  ;;  %v3551_v57 = vmul.f32 0.2, %v3479_v27  ;;  %vm18324_vm11 = vcmp.eq.s32.totalorder %v16353_v53, 1 }
 0x339   : > { %v3802_v40 = vsel %vm3766_vm14, %v3586_v35, 0.0  ;;  %v3584_v16 = vsel %vm3512_vm13, %v3476_v15, %v3548_v41  ;;  %vm3513_vm4 = vcmp.ge.f32.partialorder %v3477_v34, 0.0  ;;  %v3549_v25 = vmul.f32 0.2, %v3477_v34  ;;  %v12192_v21 = vpop.f32.mrb[8].mxu1 }
 0x33a   : > { %3838 = vst.msk [vmem:[#allocation2 + $0x43] sm:$0xff] %vm588_vm15, %v3802_v40  ;;  %v3800_v49 = vsel %vm3764_vm12, %v3584_v16, 0.0  ;;  %v3587_v23 = vsel %vm3515_vm1, %v3479_v27, %v3551_v57  ;;  %v13208_v0 = vadd.f32 %v16289_v42, %v12192_v21  ;;  %v2014_v24 = vpop.f32.mrb[9].mxu1  ;;  %v3932_v16 = vld [vmem:[#allocation2 + $0x11] sm:$0xff]  ;;  %vm18325_vm1 = vcmp.eq.s32.totalorder %v16365_v18, 1 }
 0x33b   : > { %3836 = vst.msk [vmem:[#allocation2 + $0x33] sm:$0xff] %vm588_vm15, %v3800_v49  ;;  %v3803_v15 = vsel %vm3767_vm6, %v3587_v23, 0.0  ;;  %v3585_v11 = vsel %vm3513_vm4, %v3477_v34, %v3549_v25  ;;  %v13209_v2 = vadd.f32 %v16291_v62, %v2014_v24  ;;  %v12193_v41 = vpop.f32.mrb[10].mxu1  ;;  %v3935_v35 = vld [vmem:[#allocation2 + $0x29] sm:$0xff]  ;;  %v14474_v24 = vld [vmem:[#allocation12 + $0x8] sm:$0xff]  }
 0x33c   : > { %3839 = vst.msk [vmem:[#allocation2 + $0x4b] sm:$0xff] %vm588_vm15, %v3803_v15  ;;  %v3801_v42 = vsel %vm18321_vm8, %v3585_v11, 0.0  ;;  %v3482_v27 = vadd.f32 %v13208_v0, %v16369_v17  ;;  %v13210_v57 = vadd.f32 %v16293_v1, %v12193_v41  ;;  %v2017_v40 = vpop.f32.mrb[11].mxu1  ;;  %v3933_v21 = vld [vmem:[#allocation2 + $0x19] sm:$0xff]  ;;  %v3934_v49 = vld [vmem:[#allocation2 + $0x21] sm:$0xff]  ;;  %v16435_v1 = vpop.permute.xlu0 %3707  ;;  %vm18323_vm8 = vcmp.eq.s32.totalorder %v16367_v26, 1 }
 0x33d   : > { %3837 = vst.msk [vmem:[#allocation2 + $0x3b] sm:$0xff] %vm588_vm15, %v3801_v42  ;;  %v3480_v34 = vadd.f32 %v13209_v2, %v16369_v17  ;;  %v13211_v62 = vadd.f32 %v16295_v9, %v2017_v40  ;;  %v3967_v25 = vpack.c.bf16 %v3933_v21, %v3932_v16  ;;  %v3968_v23 = vpack.c.bf16 %v3935_v35, %v3934_v49  ;;  %v16442_v35 = vpop.permute.xlu1 %3710  ;;  %v14475_v21 = vld [vmem:[#allocation12 + $0x10] sm:$0xff]  }
 0x33e   : > { %vm3518_vm9 = vcmp.ge.f32.partialorder %v3482_v27, 0.0  ;;  %v3554_v15 = vmul.f32 0.2, %v3482_v27  ;;  %v3483_v11 = vadd.f32 %v13210_v57, %v16369_v17  ;;  %18489 = vst [vmem:[#allocation41_spill] sm:$0xff] %v16435_v1  ;;  %18490 = vst [vmem:[#allocation42_spill] sm:$0xff] %v16442_v35 }
 0x33f   : > { %vm3516_vm13 = vcmp.ge.f32.partialorder %v3480_v34, 0.0  ;;  %v3552_v0 = vmul.f32 0.2, %v3480_v34  ;;  %v3481_v41 = vadd.f32 %v13211_v62, %v16369_v17  ;;  %12379 = vmatmul.mubr.msk.bf16.vlgmr.msra.gmra.mrb[36].mxu1 %vm588_vm15, %v3967_v25 }
 0x340   : > { %v3590_v9 = vsel %vm3518_vm9, %v3482_v27, %v3554_v15  ;;  %vm3519_vm4 = vcmp.ge.f32.partialorder %v3483_v11, 0.0  ;;  %v3555_v2 = vmul.f32 0.2, %v3483_v11  ;;  %12382 = vmatprep.mubr.msk.bf16.mxu1 %vm588_vm15, %v3968_v23  ;;  %12415 = vmatpush3.bf16.msra.mxu1 %v16264_v30  ;;  %vm18322_vm9 = vcmp.eq.s32.totalorder %v16359_v38, 1 }
 0x341   : > { %v3806_v42 = vsel %vm18325_vm1, %v3590_v9, 0.0  ;;  %v3588_v57 = vsel %vm3516_vm13, %v3480_v34, %v3552_v0  ;;  %vm3517_vm2 = vcmp.ge.f32.partialorder %v3481_v41, 0.0  ;;  %v3553_v40 = vmul.f32 0.2, %v3481_v41  ;;  %v12196_v16 = vpop.f32.mrb[12].mxu1  ;;  %12416 = vmatprep.subr.bf16.mxu1 %v14474_v24 }
 0x342   : > { %3842 = vst.msk [vmem:[#allocation2 + $0x63] sm:$0xff] %vm588_vm15, %v3806_v42  ;;  %v3804_v27 = vsel %vm18324_vm11, %v3588_v57, 0.0  ;;  %v3591_v49 = vsel %vm3519_vm4, %v3483_v11, %v3555_v2  ;;  %v13212_v30 = vadd.f32 %v16297_v10, %v12196_v16  ;;  %v2030_v62 = vpop.f32.mrb[13].mxu1  ;;  %v3936_v42 = vld [vmem:[#allocation2 + $0x31] sm:$0xff]  ;;  %vm18328_vm13 = vcmp.eq.s32.totalorder %v16372_v47, 1 }
 0x343   : > { %3840 = vst.msk [vmem:[#allocation2 + $0x53] sm:$0xff] %vm588_vm15, %v3804_v27  ;;  %v3807_v34 = vsel %vm18323_vm8, %v3591_v49, 0.0  ;;  %v3589_v25 = vsel %vm3517_vm2, %v3481_v41, %v3553_v40  ;;  %v13213_v23 = vadd.f32 %v16299_v3, %v2030_v62  ;;  %v12197_v15 = vpop.f32.mrb[14].mxu1  ;;  %v3939_v0 = vld [vmem:[#allocation2 + $0x49] sm:$0xff]  ;;  %v16461_v27 = vpop.permute.xlu0 %3713  ;;  %vm18327_vm1 = vcmp.eq.s32.totalorder %v16400_v37, 1 }
 0x344   : > { %3843 = vst.msk [vmem:[#allocation2 + $0x6b] sm:$0xff] %vm588_vm15, %v3807_v34  ;;  %v3805_v11 = vsel %vm18322_vm9, %v3589_v25, 0.0  ;;  %v3486_v10 = vadd.f32 %v13212_v30, %v16369_v17  ;;  %v13214_v9 = vadd.f32 %v16301_v7, %v12197_v15  ;;  %v2033_v2 = vpop.f32.mrb[15].mxu1  ;;  %v3937_v57 = vld [vmem:[#allocation2 + $0x39] sm:$0xff]  ;;  %v3938_v16 = vld [vmem:[#allocation2 + $0x41] sm:$0xff]  ;;  %12417 = vmatpush3.bf16.msra.mxu1 %v14474_v24  ;;  %18491 = vst [vmem:[#allocation43_spill] sm:$0xff] %v16461_v27  ;;  %v16468_v34 = vpop.permute.xlu1 %3716 }
 0x345   : > { %3841 = vst.msk [vmem:[#allocation2 + $0x5b] sm:$0xff] %vm588_vm15, %v3805_v11  ;;  %v3484_v3 = vadd.f32 %v13213_v23, %v16369_v17  ;;  %v13215_v41 = vadd.f32 %v16303_v46, %v2033_v2  ;;  %v3969_v40 = vpack.c.bf16 %v3937_v57, %v3936_v42  ;;  %v3970_v49 = vpack.c.bf16 %v3939_v0, %v3938_v16  ;;  %v14476_v62 = vld [vmem:[#allocation12 + $0x18] sm:$0xff]   ;;  %v16476_v2 = vld [vmem:[#allocation12 + $0x40] sm:$0xff]  }
 0x346   : > { %12418 = vmatprep.subr.bf16.mxu1 %v14475_v21  ;;  %vm3522_vm2 = vcmp.ge.f32.partialorder %v3486_v10, 0.0  ;;  %v3558_v30 = vmul.f32 0.2, %v3486_v10  ;;  %v3487_v7 = vadd.f32 %v13214_v9, %v16369_v17  ;;  %18492 = vst [vmem:[#allocation44_spill] sm:$0xff] %v16468_v34  ;;  %vm18329_vm9 = vcmp.eq.s32.totalorder %v16389_v33, 1 }
 0x347   : > { %vm3520_vm4 = vcmp.ge.f32.partialorder %v3484_v3, 0.0  ;;  %v3556_v24 = vmul.f32 0.2, %v3484_v3  ;;  %v3485_v25 = vadd.f32 %v13215_v41, %v16369_v17  ;;  %12383 = vmatmul.mubr.msk.bf16.gmra.mrb[40].mxu1 %vm588_vm15, %v3969_v40  ;;  %v16484_v16 = vpop.permute.xlu0 %3719 }
 0x348   : > { %v3594_v46 = vsel %vm3522_vm2, %v3486_v10, %v3558_v30  ;;  %vm3523_vm8 = vcmp.ge.f32.partialorder %v3487_v7, 0.0  ;;  %v3559_v23 = vmul.f32 0.2, %v3487_v7  ;;  %12386 = vmatprep.mubr.msk.bf16.mxu1 %vm588_vm15, %v3970_v49  ;;  %12419 = vmatpush3.bf16.msra.mxu1 %v14475_v21  ;;  %vm18326_vm2 = vcmp.eq.s32.totalorder %v16378_v55, 1  ;;  %18493 = vst [vmem:[#allocation45_spill] sm:$0xff] %v16484_v16 }
 0x349   : > { %v3810_v15 = vsel %vm18329_vm9, %v3594_v46, 0.0  ;;  %v3592_v0 = vsel %vm3520_vm4, %v3484_v3, %v3556_v24  ;;  %vm3521_vm11 = vcmp.ge.f32.partialorder %v3485_v25, 0.0  ;;  %v3557_v11 = vmul.f32 0.2, %v3485_v25  ;;  %v12200_v9 = vpop.f32.mrb[16].mxu1  ;;  %12420 = vmatprep.subr.bf16.mxu1 %v14476_v62 }
 0x34a   : > { %3846 = vst.msk [vmem:[#allocation2 + $0x83] sm:$0xff] %vm588_vm15, %v3810_v15  ;;  %v3808_v10 = vsel %vm18328_vm13, %v3592_v0, 0.0  ;;  %v3595_v42 = vsel %vm3523_vm8, %v3487_v7, %v3559_v23  ;;  %v13216_v21 = vadd.f32 %v16305_v43, %v12200_v9  ;;  %v2046_v57 = vpop.f32.mrb[17].mxu1  ;;  %v3940_v23 = vld [vmem:[#allocation2 + $0x51] sm:$0xff]  ;;  %v16495_v9 = vpop.permute.xlu1 %3722  ;;  %vm18331_vm9 = vcmp.eq.s32.totalorder %v16442_v35, 1 }
 0x34b   : > { %3844 = vst.msk [vmem:[#allocation2 + $0x73] sm:$0xff] %vm588_vm15, %v3808_v10  ;;  %v3811_v3 = vsel %vm18327_vm1, %v3595_v42, 0.0  ;;  %v3593_v41 = vsel %vm3521_vm11, %v3485_v25, %v3557_v11  ;;  %v13217_v40 = vadd.f32 %v16307_v56, %v2046_v57  ;;  %v12201_v49 = vpop.f32.mrb[18].mxu1  ;;  %v3943_v30 = vld [vmem:[#allocation2 + $0x69] sm:$0xff]  ;;  %18494 = vst [vmem:[#allocation46_spill] sm:$0xff] %v16495_v9  ;;  %vm18332_vm11 = vcmp.eq.s32.totalorder %v16409_v12, 1 }
 0x34c   : > { %3847 = vst.msk [vmem:[#allocation2 + $0x8b] sm:$0xff] %vm588_vm15, %v3811_v3  ;;  %v3809_v43 = vsel %vm18326_vm2, %v3593_v41, 0.0  ;;  %v3490_v7 = vadd.f32 %v13216_v21, %v16369_v17  ;;  %v13218_v24 = vadd.f32 %v16309_v52, %v12201_v49  ;;  %v2049_v46 = vpop.f32.mrb[19].mxu1  ;;  %v3941_v15 = vld [vmem:[#allocation2 + $0x59] sm:$0xff]  ;;  %v3942_v0 = vld [vmem:[#allocation2 + $0x61] sm:$0xff]  ;;  %12421 = vmatpush3.bf16.msra.mxu1 %v14476_v62  ;;  %vm18333_vm2 = vcmp.eq.s32.totalorder %v16435_v1, 1  ;;  %v16507_v3 = vpop.permute.xlu0 %3725 }
 0x34d   : > { %3845 = vst.msk [vmem:[#allocation2 + $0x7b] sm:$0xff] %vm588_vm15, %v3809_v43  ;;  %v3488_v56 = vadd.f32 %v13217_v40, %v16369_v17  ;;  %v13219_v25 = vadd.f32 %v16311_v50, %v2049_v46  ;;  %v3971_v11 = vpack.c.bf16 %v3941_v15, %v3940_v23  ;;  %v3972_v10 = vpack.c.bf16 %v3943_v30, %v3942_v0 }
 0x34e   : > { %12458 = vmatprep.subr.bf16.mxu1 %v16476_v2  ;;  %vm3526_vm8 = vcmp.ge.f32.partialorder %v3490_v7, 0.0  ;;  %v3562_v42 = vmul.f32 0.2, %v3490_v7  ;;  %v3491_v52 = vadd.f32 %v13218_v24, %v16369_v17  ;;  %18495 = vst [vmem:[#allocation47_spill] sm:$0xff] %v16507_v3  ;;  %v16517_v23 = vpop.permute.xlu1 %3728 }
 0x34f   : > { %vm3524_vm4 = vcmp.ge.f32.partialorder %v3488_v56, 0.0  ;;  %v3560_v62 = vmul.f32 0.2, %v3488_v56  ;;  %v3489_v21 = vadd.f32 %v13219_v25, %v16369_v17  ;;  %12387 = vmatmul.mubr.msk.bf16.gmra.mrb[44].mxu1 %vm588_vm15, %v3971_v11  ;;  %18496 = vst [vmem:[#allocation48_spill] sm:$0xff] %v16517_v23 }
 0x350   : > { %v3598_v57 = vsel %vm3526_vm8, %v3490_v7, %v3562_v42  ;;  %vm3527_vm1 = vcmp.ge.f32.partialorder %v3491_v52, 0.0  ;;  %v3563_v50 = vmul.f32 0.2, %v3491_v52  ;;  %12390 = vmatprep.mubr.msk.bf16.mxu1 %vm588_vm15, %v3972_v10  ;;  %vm18330_vm8 = vcmp.eq.s32.totalorder %v16419_v13, 1 }
 0x351   : > { %v3814_v41 = vsel %vm18333_vm2, %v3598_v57, 0.0  ;;  %v3596_v40 = vsel %vm3524_vm4, %v3488_v56, %v3560_v62  ;;  %vm3525_vm13 = vcmp.ge.f32.partialorder %v3489_v21, 0.0  ;;  %v3561_v49 = vmul.f32 0.2, %v3489_v21  ;;  %v12204_v30 = vpop.f32.mrb[20].mxu1 }
 0x352   : > { %3850 = vst.msk [vmem:[#allocation2 + $0xa3] sm:$0xff] %vm588_vm15, %v3814_v41  ;;  %v3812_v43 = vsel %vm18332_vm11, %v3596_v40, 0.0  ;;  %v3599_v7 = vsel %vm3527_vm1, %v3491_v52, %v3563_v50  ;;  %v13220_v24 = vadd.f32 %v16315_v60, %v12204_v30  ;;  %v2062_v46 = vpop.f32.mrb[21].mxu1  ;;  %v3944_v62 = vld [vmem:[#allocation2 + $0x71] sm:$0xff]  ;;  %vm18335_vm2 = vcmp.eq.s32.totalorder %v16495_v9, 1 }
 0x353   : > { %3848 = vst.msk [vmem:[#allocation2 + $0x93] sm:$0xff] %vm588_vm15, %v3812_v43  ;;  %v3815_v15 = vsel %vm18331_vm9, %v3599_v7, 0.0  ;;  %v3597_v0 = vsel %vm3525_vm13, %v3489_v21, %v3561_v49  ;;  %v13221_v56 = vadd.f32 %v16317_v63, %v2062_v46  ;;  %v12205_v25 = vpop.f32.mrb[22].mxu1  ;;  %v3947_v11 = vld [vmem:[#allocation2 + $0x89] sm:$0xff]  ;;  %vm18336_vm13 = vcmp.eq.s32.totalorder %v16461_v27, 1  ;;  %v16533_v43 = vpop.permute.xlu0 %3731 }
 0x354   : > { %3851 = vst.msk [vmem:[#allocation2 + $0xab] sm:$0xff] %vm588_vm15, %v3815_v15  ;;  %v3813_v60 = vsel %vm18330_vm8, %v3597_v0, 0.0  ;;  %v3494_v10 = vadd.f32 %v13220_v24, %v16369_v17  ;;  %v13222_v42 = vadd.f32 %v16321_v22, %v12205_v25  ;;  %v2065_v52 = vpop.f32.mrb[23].mxu1  ;;  %v3945_v57 = vld [vmem:[#allocation2 + $0x79] sm:$0xff]  ;;  %v3946_v50 = vld [vmem:[#allocation2 + $0x81] sm:$0xff]  ;;  %18497 = vst [vmem:[#allocation49_spill] sm:$0xff] %v16533_v43  ;;  %v16539_v46 = vpop.permute.xlu1 %3734 }
 0x355   : > { %3849 = vst.msk [vmem:[#allocation2 + $0x9b] sm:$0xff] %vm588_vm15, %v3813_v60  ;;  %v3492_v21 = vadd.f32 %v13221_v56, %v16369_v17  ;;  %v13223_v63 = vadd.f32 %v16323_v6, %v2065_v52  ;;  %v3973_v41 = vpack.c.bf16 %v3945_v57, %v3944_v62  ;;  %v3974_v40 = vpack.c.bf16 %v3947_v11, %v3946_v50 }
 0x356   : > { %vm3530_vm1 = vcmp.ge.f32.partialorder %v3494_v10, 0.0  ;;  %v3566_v49 = vmul.f32 0.2, %v3494_v10  ;;  %v3495_v30 = vadd.f32 %v13222_v42, %v16369_v17  ;;  %vm18337_vm8 = vcmp.eq.s32.totalorder %v16484_v16, 1  ;;  %18498 = vst [vmem:[#allocation50_spill] sm:$0xff] %v16539_v46 }
 0x357   : > { %vm3528_vm4 = vcmp.ge.f32.partialorder %v3492_v21, 0.0  ;;  %v3564_v22 = vmul.f32 0.2, %v3492_v21  ;;  %v3493_v7 = vadd.f32 %v13223_v63, %v16369_v17  ;;  %12391 = vmatmul.mubr.msk.bf16.gmra.mrb[48].mxu1 %vm588_vm15, %v3973_v41 }
 0x358   : > { %v3602_v24 = vsel %vm3530_vm1, %v3494_v10, %v3566_v49  ;;  %vm3531_vm9 = vcmp.ge.f32.partialorder %v3495_v30, 0.0  ;;  %v3567_v6 = vmul.f32 0.2, %v3495_v30  ;;  %12394 = vmatprep.mubr.msk.bf16.mxu1 %vm588_vm15, %v3974_v40  ;;  %vm18334_vm1 = vcmp.eq.s32.totalorder %v16468_v34, 1 }
 0x359   : > { %v3818_v15 = vsel %vm18337_vm8, %v3602_v24, 0.0  ;;  %v3600_v0 = vsel %vm3528_vm4, %v3492_v21, %v3564_v22  ;;  %vm3529_vm11 = vcmp.ge.f32.partialorder %v3493_v7, 0.0  ;;  %v3565_v56 = vmul.f32 0.2, %v3493_v7  ;;  %v12208_v25 = vpop.f32.mrb[24].mxu1  ;;  %v16558_v24 = vpop.permute.xlu0 %3737 }
 0x35a   : > { %3854 = vst.msk [vmem:[#allocation2 + $0xc3] sm:$0xff] %vm588_vm15, %v3818_v15  ;;  %v3816_v11 = vsel %vm18336_vm13, %v3600_v0, 0.0  ;;  %v3603_v60 = vsel %vm3531_vm9, %v3495_v30, %v3567_v6  ;;  %v13224_v10 = vadd.f32 %v16329_v58, %v12208_v25  ;;  %v2078_v42 = vpop.f32.mrb[25].mxu1  ;;  %v3948_v49 = vld [vmem:[#allocation2 + $0x91] sm:$0xff]  ;;  %18499 = vst [vmem:[#allocation51_spill] sm:$0xff] %v16558_v24  ;;  %vm18339_vm8 = vcmp.eq.s32.totalorder %v16539_v46, 1 }
 0x35b   : > { %3852 = vst.msk [vmem:[#allocation2 + $0xb3] sm:$0xff] %vm588_vm15, %v3816_v11  ;;  %v3819_v52 = vsel %vm18335_vm2, %v3603_v60, 0.0  ;;  %v3601_v62 = vsel %vm3529_vm11, %v3493_v7, %v3565_v56  ;;  %v13225_v57 = vadd.f32 %v16331_v20, %v2078_v42  ;;  %v12209_v50 = vpop.f32.mrb[26].mxu1  ;;  %v3951_v21 = vld [vmem:[#allocation2 + $0xa9] sm:$0xff]  ;;  %vm18340_vm11 = vcmp.eq.s32.totalorder %v16507_v3, 1 }
 0x35c   : > { %3855 = vst.msk [vmem:[#allocation2 + $0xcb] sm:$0xff] %vm588_vm15, %v3819_v52  ;;  %v3817_v63 = vsel %vm18334_vm1, %v3601_v62, 0.0  ;;  %v3498_v58 = vadd.f32 %v13224_v10, %v16369_v17  ;;  %v13226_v41 = vadd.f32 %v16333_v8, %v12209_v50  ;;  %v2081_v40 = vpop.f32.mrb[27].mxu1  ;;  %v3949_v30 = vld [vmem:[#allocation2 + $0x99] sm:$0xff]  ;;  %v3950_v22 = vld [vmem:[#allocation2 + $0xa1] sm:$0xff]  ;;  %v16565_v8 = vpop.permute.xlu1 %3740  ;;  %vm18341_vm1 = vcmp.eq.s32.totalorder %v16533_v43, 1 }
 0x35d   : > { %3853 = vst.msk [vmem:[#allocation2 + $0xbb] sm:$0xff] %vm588_vm15, %v3817_v63  ;;  %v3496_v20 = vadd.f32 %v13225_v57, %v16369_v17  ;;  %v13227_v7 = vadd.f32 %v16335_v48, %v2081_v40  ;;  %v3975_v6 = vpack.c.bf16 %v3949_v30, %v3948_v49  ;;  %v3976_v15 = vpack.c.bf16 %v3951_v21, %v3950_v22  ;;  %v14508_v46 = vld [vmem:[#allocation15 + $0x38] sm:$0xff]  }
 0x35e   : > { %vm3534_vm9 = vcmp.ge.f32.partialorder %v3498_v58, 0.0  ;;  %v3570_v0 = vmul.f32 0.2, %v3498_v58  ;;  %v3499_v56 = vadd.f32 %v13226_v41, %v16369_v17  ;;  %18500 = vst [vmem:[#allocation52_spill] sm:$0xff] %v16565_v8  ;;  %v16951_v3 = vld [vmem:[#allocation13] ss:$0 sm:$0xff] }
 0x35f   : > { %vm3532_vm4 = vcmp.ge.f32.partialorder %v3496_v20, 0.0  ;;  %v3568_v25 = vmul.f32 0.2, %v3496_v20  ;;  %v3497_v11 = vadd.f32 %v13227_v7, %v16369_v17  ;;  %12395 = vmatmul.mubr.msk.bf16.gmra.mrb[52].mxu1 %vm588_vm15, %v3975_v6 }
 0x360   : > { %v3606_v60 = vsel %vm3534_vm9, %v3498_v58, %v3570_v0  ;;  %vm3535_vm2 = vcmp.ge.f32.partialorder %v3499_v56, 0.0  ;;  %v3571_v48 = vmul.f32 0.2, %v3499_v56  ;;  %12398 = vmatprep.mubr.msk.bf16.mxu1 %vm588_vm15, %v3976_v15  ;;  %vm18338_vm9 = vcmp.eq.s32.totalorder %v16517_v23, 1  ;;  %v16579_v58 = vpop.permute.xlu0 %3743 }
 0x361   : > { %v3822_v10 = vsel %vm18341_vm1, %v3606_v60, 0.0  ;;  %v3604_v42 = vsel %vm3532_vm4, %v3496_v20, %v3568_v25  ;;  %vm3533_vm13 = vcmp.ge.f32.partialorder %v3497_v11, 0.0  ;;  %v3569_v52 = vmul.f32 0.2, %v3497_v11  ;;  %v12212_v62 = vpop.f32.mrb[28].mxu1  ;;  %18501 = vst [vmem:[#allocation53_spill] sm:$0xff] %v16579_v58  ;;  %v16590_v25 = vpop.permute.xlu1 %3746 }
 0x362   : > { %3858 = vst.msk [vmem:[#allocation2 + $0xe3] sm:$0xff] %vm588_vm15, %v3822_v10  ;;  %v3820_v57 = vsel %vm18340_vm11, %v3604_v42, 0.0  ;;  %v3607_v50 = vsel %vm3535_vm2, %v3499_v56, %v3571_v48  ;;  %v13228_v21 = vadd.f32 %v16341_v14, %v12212_v62  ;;  %v2094_v63 = vpop.f32.mrb[29].mxu1  ;;  %v3952_v15 = vld [vmem:[#allocation2 + $0xb1] sm:$0xff]  ;;  %18502 = vst [vmem:[#allocation54_spill] sm:$0xff] %v16590_v25  ;;  %vm18343_vm1 = vcmp.eq.s32.totalorder %v16590_v25, 1 }
 0x363   : > { %3856 = vst.msk [vmem:[#allocation2 + $0xd3] sm:$0xff] %vm588_vm15, %v3820_v57  ;;  %v3823_v41 = vsel %vm18339_vm8, %v3607_v50, 0.0  ;;  %v3605_v40 = vsel %vm3533_vm13, %v3497_v11, %v3569_v52  ;;  %v13229_v49 = vadd.f32 %v16343_v36, %v2094_v63  ;;  %v12213_v30 = vpop.f32.mrb[30].mxu1  ;;  %v3955_v22 = vld [vmem:[#allocation2 + $0xc9] sm:$0xff]  ;;  %vm18344_vm13 = vcmp.eq.s32.totalorder %v16558_v24, 1 }
 0x364   : > { %3859 = vst.msk [vmem:[#allocation2 + $0xeb] sm:$0xff] %vm588_vm15, %v3823_v41  ;;  %v3821_v14 = vsel %vm18338_vm9, %v3605_v40, 0.0  ;;  %v3502_v20 = vadd.f32 %v13228_v21, %v16369_v17  ;;  %v13230_v7 = vadd.f32 %v16347_v19, %v12213_v30  ;;  %v2097_v6 = vpop.f32.mrb[31].mxu1  ;;  %v3953_v0 = vld [vmem:[#allocation2 + $0xb9] sm:$0xff]  ;;  %v3954_v56 = vld [vmem:[#allocation2 + $0xc1] sm:$0xff]  ;;  %vm18345_vm9 = vcmp.eq.s32.totalorder %v16579_v58, 1 }
 0x365   : > { %3857 = vst.msk [vmem:[#allocation2 + $0xdb] sm:$0xff] %vm588_vm15, %v3821_v14  ;;  %v3500_v36 = vadd.f32 %v13229_v49, %v16369_v17  ;;  %v13231_v11 = vadd.f32 %v16349_v39, %v2097_v6  ;;  %v3977_v60 = vpack.c.bf16 %v3953_v0, %v3952_v15  ;;  %v3978_v48 = vpack.c.bf16 %v3955_v22, %v3954_v56  ;;  %v16601_v39 = vpop.permute.xlu0 %3749  ;;  %v16611_v14 = vpop.permute.xlu1 %3752 }
 0x366   : > { %vm3538_vm2 = vcmp.ge.f32.partialorder %v3502_v20, 0.0  ;;  %v3574_v10 = vmul.f32 0.2, %v3502_v20  ;;  %v3503_v42 = vadd.f32 %v13230_v7, %v16369_v17  ;;  %18503 = vst [vmem:[#allocation55_spill] sm:$0xff] %v16601_v39  ;;  %18504 = vst [vmem:[#allocation56_spill] sm:$0xff] %v16611_v14 }
 0x367   : > { %vm3536_vm4 = vcmp.ge.f32.partialorder %v3500_v36, 0.0  ;;  %v3572_v19 = vmul.f32 0.2, %v3500_v36  ;;  %v3501_v52 = vadd.f32 %v13231_v11, %v16369_v17  ;;  %12399 = vmatmul.mubr.msk.bf16.gmra.mrb[56].mxu1 %vm588_vm15, %v3977_v60 }
 0x368   : > { %v3610_v62 = vsel %vm3538_vm2, %v3502_v20, %v3574_v10  ;;  %vm3539_vm8 = vcmp.ge.f32.partialorder %v3503_v42, 0.0  ;;  %v3575_v57 = vmul.f32 0.2, %v3503_v42  ;;  %12402 = vmatprep.mubr.msk.bf16.mxu1 %vm588_vm15, %v3978_v48  ;;  %vm18342_vm2 = vcmp.eq.s32.totalorder %v16565_v8, 1 }
 0x369   : > { %v3826_v50 = vsel %vm18345_vm9, %v3610_v62, 0.0  ;;  %v3608_v21 = vsel %vm3536_vm4, %v3500_v36, %v3572_v19  ;;  %vm3537_vm11 = vcmp.ge.f32.partialorder %v3501_v52, 0.0  ;;  %v3573_v63 = vmul.f32 0.2, %v3501_v52  ;;  %v12216_v41 = vpop.f32.mrb[32].mxu1 }
 0x36a   : > { %3862 = vst.msk [vmem:[#allocation2 + $0x103] sm:$0xff] %vm588_vm15, %v3826_v50  ;;  %v3824_v40 = vsel %vm18344_vm13, %v3608_v21, 0.0  ;;  %v3611_v49 = vsel %vm3539_vm8, %v3503_v42, %v3575_v57  ;;  %v13232_v30 = vadd.f32 %v16355_v59, %v12216_v41  ;;  %v2110_v22 = vpop.f32.mrb[33].mxu1  ;;  %v3956_v60 = vld [vmem:[#allocation2 + $0xd1] sm:$0xff]  ;;  %v16627_v50 = vpop.permute.xlu0 %3755 }
 0x36b   : > { %3860 = vst.msk [vmem:[#allocation2 + $0xf3] sm:$0xff] %vm588_vm15, %v3824_v40  ;;  %v3827_v20 = vsel %vm18343_vm1, %v3611_v49, 0.0  ;;  %v3609_v7 = vsel %vm3537_vm11, %v3501_v52, %v3573_v63  ;;  %v13233_v6 = vadd.f32 %v16357_v51, %v2110_v22  ;;  %v12217_v15 = vpop.f32.mrb[34].mxu1  ;;  %v3959_v0 = vld [vmem:[#allocation2 + $0xe9] sm:$0xff]  ;;  %vm18425_vm11 = vcmp.eq.s32.totalorder %v16601_v39, 1  ;;  %18505 = vst [vmem:[#allocation57_spill] sm:$0xff] %v16627_v50  ;;  %v16633_v41 = vpop.permute.xlu1 %3758 }
 0x36c   : > { %3863 = vst.msk [vmem:[#allocation2 + $0x10b] sm:$0xff] %vm588_vm15, %v3827_v20  ;;  %v3825_v59 = vsel %vm18342_vm2, %v3609_v7, 0.0  ;;  %v3506_v56 = vadd.f32 %v13232_v30, %v16369_v17  ;;  %v13234_v36 = vadd.f32 %v16361_v28, %v12217_v15  ;;  %v2113_v11 = vpop.f32.mrb[35].mxu1  ;;  %v3957_v48 = vld [vmem:[#allocation2 + $0xd9] sm:$0xff]  ;;  %v3958_v10 = vld [vmem:[#allocation2 + $0xe1] sm:$0xff]  ;;  %vm18426_vm2 = vcmp.eq.s32.totalorder %v16627_v50, 1 }
 0x36d   : > { %3861 = vst.msk [vmem:[#allocation2 + $0xfb] sm:$0xff] %vm588_vm15, %v3825_v59  ;;  %v3504_v42 = vadd.f32 %v13233_v6, %v16369_v17  ;;  %v13235_v51 = vadd.f32 %v16363_v4, %v2113_v11  ;;  %v3979_v19 = vpack.c.bf16 %v3957_v48, %v3956_v60  ;;  %v3980_v52 = vpack.c.bf16 %v3959_v0, %v3958_v10  ;;  %v3868_v60 = vld [vmem:[#allocation2] sm:$0xff]  ;;  %v3869_v48 = vld [vmem:[#allocation2 + $0x8] sm:$0xff] }
 0x36e   : > { %vm3542_vm8 = vcmp.ge.f32.partialorder %v3506_v56, 0.0  ;;  %v3578_v62 = vmul.f32 0.2, %v3506_v56  ;;  %v3507_v57 = vadd.f32 %v13234_v36, %v16369_v17  ;;  %18506 = vst [vmem:[#allocation58_spill] sm:$0xff] %v16633_v41  ;;  %vm18389_vm9 = vcmp.eq.s32.totalorder %v16633_v41, 1 }
 0x36f   : > { %vm3540_vm4 = vcmp.ge.f32.partialorder %v3504_v42, 0.0  ;;  %v3576_v28 = vmul.f32 0.2, %v3504_v42  ;;  %v3505_v21 = vadd.f32 %v13235_v51, %v16369_v17  ;;  %12403 = vmatmul.mubr.msk.bf16.gmra.mrb[60].mxu1 %vm588_vm15, %v3979_v19  ;;  %v3904_v51 = vpack.c.bf16 %v3869_v48, %v3868_v60  ;;  %v3883_v60 = vld [vmem:[#allocation2 + $0x78] sm:$0xff]  ;;  %v3884_v48 = vld [vmem:[#allocation2 + $0x80] sm:$0xff] }
 0x370   : > { %v3614_v63 = vsel %vm3542_vm8, %v3506_v56, %v3578_v62  ;;  %vm3543_vm1 = vcmp.ge.f32.partialorder %v3507_v57, 0.0  ;;  %v3579_v4 = vmul.f32 0.2, %v3507_v57  ;;  %12406 = vmatprep.mubr.msk.bf16.mxu1 %vm588_vm15, %v3980_v52  ;;  %vm18384_vm8 = vcmp.eq.s32.totalorder %v16611_v14, 1  ;;  %v3871_v52 = vld [vmem:[#allocation2 + $0x18] sm:$0xff]  ;;  %v3872_v62 = vld [vmem:[#allocation2 + $0x20] sm:$0xff] }
 0x371   : > { %v3830_v40 = vsel %vm18426_vm2, %v3614_v63, 0.0  ;;  %v3612_v49 = vsel %vm3540_vm4, %v3504_v42, %v3576_v28  ;;  %vm3541_vm13 = vcmp.ge.f32.partialorder %v3505_v21, 0.0  ;;  %v3577_v30 = vmul.f32 0.2, %v3505_v21  ;;  %v3870_v28 = vld [vmem:[#allocation2 + $0x10] sm:$0xff]  ;;  %v14478_v63 = vld [vmem:[#allocation12 + $0x48] sm:$0xff]  }
 0x372   : > { %3866 = vst.msk [vmem:[#allocation2 + $0x123] sm:$0xff] %vm588_vm15, %v3830_v40  ;;  %v3828_v17 = vsel %vm18425_vm11, %v3612_v49, 0.0  ;;  %v3615_v22 = vsel %vm3543_vm1, %v3507_v57, %v3579_v4  ;;  %v3960_v0 = vld [vmem:[#allocation2 + $0xf1] sm:$0xff]  ;;  %v3873_v57 = vld [vmem:[#allocation2 + $0x28] sm:$0xff]  ;;  %vm18547_vm11 = vcmp.eq.s32.totalorder %v16365_v18, 1  ;;  %vm18548_vm2 = vcmp.eq.s32.totalorder %v16353_v53, 1 }
 0x373   : > { %3864 = vst.msk [vmem:[#allocation2 + $0x113] sm:$0xff] %vm588_vm15, %v3828_v17  ;;  %v3831_v20 = vsel %vm18389_vm9, %v3615_v22, 0.0  ;;  %v3613_v7 = vsel %vm3541_vm13, %v3505_v21, %v3577_v30  ;;  %v3963_v6 = vld [vmem:[#allocation2 + $0x109] sm:$0xff]  ;;  %v3905_v21 = vpack.c.bf16 %v3871_v52, %v3870_v28  ;;  %v3906_v4 = vpack.c.bf16 %v3873_v57, %v3872_v62  ;;  %v3875_v49 = vld [vmem:[#allocation2 + $0x38] sm:$0xff]  ;;  %v3876_v30 = vld [vmem:[#allocation2 + $0x40] sm:$0xff] }
 0x374   : > { %3867 = vst.msk [vmem:[#allocation2 + $0x12b] sm:$0xff] %vm588_vm15, %v3831_v20  ;;  %v3829_v15 = vsel %vm18384_vm8, %v3613_v7, 0.0  ;;  %v3961_v59 = vld [vmem:[#allocation2 + $0xf9] sm:$0xff]  ;;  %v3962_v56 = vld [vmem:[#allocation2 + $0x101] sm:$0xff]  ;;  %v3874_v22 = vld [vmem:[#allocation2 + $0x30] sm:$0xff]  ;;  %vm7312_vm9 = vcmask 1046528  }
 0x375   : > { %3865 = vst.msk [vmem:[#allocation2 + $0x11b] sm:$0xff] %vm588_vm15, %v3829_v15  ;;  %v3981_v36 = vpack.c.bf16 %v3961_v59, %v3960_v0  ;;  %v3982_v11 = vpack.c.bf16 %v3963_v6, %v3962_v56  ;;  %v14479_v40 = vld [vmem:[#allocation12 + $0x50] sm:$0xff]   ;;  %v3907_v20 = vpack.c.bf16 %v3875_v49, %v3874_v22  ;;  %v14480_v7 = vld [vmem:[#allocation12 + $0x58] sm:$0xff]   ;;  %v16658_v15 = vld [vmem:[#allocation12 + $0x60] sm:$0xff]  }
 0x376   : > { %v3877_v17 = vld [vmem:[#allocation2 + $0x48] sm:$0xff]  ;;  %v3880_v0 = vld [vmem:[#allocation2 + $0x60] sm:$0xff]  ;;  %v3878_v56 = vld [vmem:[#allocation2 + $0x50] sm:$0xff] }
 0x377   : > { %12407 = vmatmul.mubr.msk.bf16.gmra.mrb[64].mxu1 %vm588_vm15, %v3981_v36  ;;  %v3908_v6 = vpack.c.bf16 %v3877_v17, %v3876_v30  ;;  %v3881_v59 = vld [vmem:[#allocation2 + $0x68] sm:$0xff]  ;;  %v3887_v52 = vld [vmem:[#allocation2 + $0x98] sm:$0xff]  ;;  %v3888_v62 = vld [vmem:[#allocation2 + $0xa0] sm:$0xff] }
 0x378   : > { %12410 = vmatprep.mubr.msk.bf16.mxu1 %vm588_vm15, %v3982_v11  ;;  %v3910_v11 = vpack.c.bf16 %v3881_v59, %v3880_v0  ;;  %v3889_v57 = vld [vmem:[#allocation2 + $0xa8] sm:$0xff]  ;;  %v3886_v28 = vld [vmem:[#allocation2 + $0x90] sm:$0xff] }
 0x379   : > { %v3893_v49 = vld [vmem:[#allocation2 + $0xc8] sm:$0xff]  ;;  %v3890_v30 = vld [vmem:[#allocation2 + $0xb0] sm:$0xff] }
 0x37a   : > { %v3964_v10 = vld [vmem:[#allocation2 + $0x111] sm:$0xff] }
 0x37c   : > { %v3965_v42 = vld [vmem:[#allocation2 + $0x119] sm:$0xff] }
 0x37d   : > { %v3983_v19 = vpack.c.bf16 %v3965_v42, %v3964_v10  ;;  %v3885_v10 = vld [vmem:[#allocation2 + $0x88] sm:$0xff]  ;;  %v3882_v42 = vld [vmem:[#allocation2 + $0x70] sm:$0xff] }
 0x37f   : > { %12411 = vmatmul.mubr.msk.bf16.gmra.mrb[68].mxu1 %vm588_vm15, %v3983_v19  ;;  %v3912_v19 = vpack.c.bf16 %v3885_v10, %v3884_v48 }
 0x380   : > { %12422 = vmatprep.mubr.msk.bf16.mxu1 %vm588_vm15, %v3904_v51  ;;  %v3911_v51 = vpack.c.bf16 %v3883_v60, %v3882_v42  ;;  %v3898_v60 = vld [vmem:[#allocation2 + $0xf0] sm:$0xff]  ;;  %v4503_v42 = vld [vmem:[#allocation2 + $0x2] sm:$0xff] }
 0x387   : > { %12423 = vmatmul.mubr.msk.bf16.vlgmr.msra.gmra.mrb[36].mxu1 %vm588_vm15, %v3905_v21  ;;  %v3913_v21 = vpack.c.bf16 %v3887_v52, %v3886_v28  ;;  %v3902_v52 = vld [vmem:[#allocation2 + $0x110] sm:$0xff]  ;;  %v4506_v28 = vld [vmem:[#allocation2 + $0x1a] sm:$0xff] }
 0x388   : > { %12426 = vmatprep.mubr.msk.bf16.mxu1 %vm588_vm15, %v3906_v4  ;;  %12459 = vmatpush3.bf16.msra.mxu1 %v16476_v2  ;;  %v3879_v2 = vld [vmem:[#allocation2 + $0x58] sm:$0xff] }
 0x389   : > { %12460 = vmatprep.subr.bf16.mxu1 %v14478_v63  ;;  %v3909_v36 = vpack.c.bf16 %v3879_v2, %v3878_v56  ;;  %v3891_v4 = vld [vmem:[#allocation2 + $0xb8] sm:$0xff]  ;;  %v3894_v2 = vld [vmem:[#allocation2 + $0xd0] sm:$0xff] }
 0x38a   : > { %v3915_v17 = vpack.c.bf16 %v3891_v4, %v3890_v30  ;;  %v3899_v56 = vld [vmem:[#allocation2 + $0xf8] sm:$0xff] }
 0x38b   : > { %v3919_v48 = vpack.c.bf16 %v3899_v56, %v3898_v60  ;;  %v4505_v4 = vld [vmem:[#allocation2 + $0x12] sm:$0xff]  ;;  %v4514_v56 = vld [vmem:[#allocation2 + $0x5a] sm:$0xff] }
 0x38c   : > { %12461 = vmatpush3.bf16.msra.mxu1 %v14478_v63  ;;  %v3914_v63 = vpack.c.bf16 %v3889_v57, %v3888_v62  ;;  %v4513_v60 = vld [vmem:[#allocation2 + $0x52] sm:$0xff] }
 0x38d   : > { %12462 = vmatprep.subr.bf16.mxu1 %v14479_v40 }
 0x38f   : > { %12427 = vmatmul.mubr.msk.bf16.gmra.mrb[40].mxu1 %vm588_vm15, %v3907_v20  ;;  %v3895_v20 = vld [vmem:[#allocation2 + $0xd8] sm:$0xff] }
 0x390   : > { %12430 = vmatprep.mubr.msk.bf16.mxu1 %vm588_vm15, %v3908_v6  ;;  %12463 = vmatpush3.bf16.msra.mxu1 %v14479_v40  ;;  %v3892_v40 = vld [vmem:[#allocation2 + $0xc0] sm:$0xff]  ;;  %v3897_v6 = vld [vmem:[#allocation2 + $0xe8] sm:$0xff]  ;;  %v3917_v0 = vpack.c.bf16 %v3895_v20, %v3894_v2 }
 0x391   : > { %12464 = vmatprep.subr.bf16.mxu1 %v14480_v7  ;;  %v3916_v22 = vpack.c.bf16 %v3893_v49, %v3892_v40  ;;  %v16675_v40 = vpack.c.bf16 %v4506_v28, %v4505_v4  ;;  %v14482_v49 = vld [vmem:[#allocation12 + $0x68] sm:$0xff]   ;;  %v4521_v4 = vld [vmem:[#allocation2 + $0x92] sm:$0xff] }
 0x392   : > { %v4511_v20 = vld [vmem:[#allocation2 + $0x42] sm:$0xff]  ;;  %v4522_v28 = vld [vmem:[#allocation2 + $0x9a] sm:$0xff] }
 0x394   : > { %12465 = vmatpush3.bf16.msra.mxu1 %v14480_v7  ;;  %v3896_v7 = vld [vmem:[#allocation2 + $0xe0] sm:$0xff] }
 0x395   : > { %12502 = vmatprep.subr.bf16.mxu1 %v16658_v15  ;;  %v3918_v59 = vpack.c.bf16 %v3897_v6, %v3896_v7  ;;  %v4512_v7 = vld [vmem:[#allocation2 + $0x4a] sm:$0xff]  ;;  %v4509_v6 = vld [vmem:[#allocation2 + $0x32] sm:$0xff] }
 0x397   : > { %12431 = vmatmul.mubr.msk.bf16.gmra.mrb[44].mxu1 %vm588_vm15, %v3909_v36  ;;  %v3900_v36 = vld [vmem:[#allocation2 + $0x100] sm:$0xff] }
 0x398   : > { %12434 = vmatprep.mubr.msk.bf16.mxu1 %vm588_vm15, %v3910_v11  ;;  %v3901_v11 = vld [vmem:[#allocation2 + $0x108] sm:$0xff] }
 0x399   : > { %v3920_v10 = vpack.c.bf16 %v3901_v11, %v3900_v36  ;;  %v4515_v36 = vld [vmem:[#allocation2 + $0x62] sm:$0xff]  ;;  %v4516_v11 = vld [vmem:[#allocation2 + $0x6a] sm:$0xff] }
 0x39f   : > { %12435 = vmatmul.mubr.msk.bf16.gmra.mrb[48].mxu1 %vm588_vm15, %v3911_v51  ;;  %v4504_v51 = vld [vmem:[#allocation2 + $0xa] sm:$0xff] }
 0x3a0   : > { %12438 = vmatprep.mubr.msk.bf16.mxu1 %vm588_vm15, %v3912_v19  ;;  %v3903_v19 = vld [vmem:[#allocation2 + $0x118] sm:$0xff]  ;;  %v4539_v62 = vpack.c.bf16 %v4504_v51, %v4503_v42  ;;  %v4519_v51 = vld [vmem:[#allocation2 + $0x82] sm:$0xff] }
 0x3a1   : > { %v3921_v57 = vpack.c.bf16 %v3903_v19, %v3902_v52  ;;  %v4518_v42 = vld [vmem:[#allocation2 + $0x7a] sm:$0xff]  ;;  %v4520_v19 = vld [vmem:[#allocation2 + $0x8a] sm:$0xff]  ;;  %v4517_v52 = vld [vmem:[#allocation2 + $0x72] sm:$0xff] }
 0x3a7   : > { %12439 = vmatmul.mubr.msk.bf16.gmra.mrb[52].mxu1 %vm588_vm15, %v3913_v21  ;;  %v4507_v21 = vld [vmem:[#allocation2 + $0x22] sm:$0xff] }
 0x3a8   : > { %12442 = vmatprep.mubr.msk.bf16.mxu1 %vm588_vm15, %v3914_v63  ;;  %v4508_v63 = vld [vmem:[#allocation2 + $0x2a] sm:$0xff] }
 0x3a9   : > { %v16677_v30 = vpack.c.bf16 %v4508_v63, %v4507_v21  ;;  %v4523_v21 = vld [vmem:[#allocation2 + $0xa2] sm:$0xff]  ;;  %v4524_v63 = vld [vmem:[#allocation2 + $0xaa] sm:$0xff] }
 0x3af   : > { %12443 = vmatmul.mubr.msk.bf16.gmra.mrb[56].mxu1 %vm588_vm15, %v3915_v17  ;;  %v14483_v17 = vld [vmem:[#allocation12 + $0x70] sm:$0xff]  }
 0x3b0   : > { %12446 = vmatprep.mubr.msk.bf16.mxu1 %vm588_vm15, %v3916_v22  ;;  %v4510_v22 = vld [vmem:[#allocation2 + $0x3a] sm:$0xff] }
 0x3b1   : > { %v16684_v2 = vpack.c.bf16 %v4510_v22, %v4509_v6  ;;  %v4526_v22 = vld [vmem:[#allocation2 + $0xba] sm:$0xff]  ;;  %v4525_v6 = vld [vmem:[#allocation2 + $0xb2] sm:$0xff] }
 0x3b7   : > { %12447 = vmatmul.mubr.msk.bf16.gmra.mrb[60].mxu1 %vm588_vm15, %v3917_v0  ;;  %v14484_v0 = vld [vmem:[#allocation12 + $0x78] sm:$0xff]  }
 0x3b8   : > { %12450 = vmatprep.mubr.msk.bf16.mxu1 %vm588_vm15, %v3918_v59  ;;  %v16686_v59 = vpack.c.bf16 %v4512_v7, %v4511_v20  ;;  %v4527_v20 = vld [vmem:[#allocation2 + $0xc2] sm:$0xff]  ;;  %v4528_v7 = vld [vmem:[#allocation2 + $0xca] sm:$0xff] }
 0x3bf   : > { %12451 = vmatmul.mubr.msk.bf16.gmra.mrb[64].mxu1 %vm588_vm15, %v3919_v48  ;;  %v4544_v48 = vpack.c.bf16 %v4514_v56, %v4513_v60  ;;  %v4551_v56 = vpack.c.bf16 %v4528_v7, %v4527_v20  ;;  %v4532_v60 = vld [vmem:[#allocation2 + $0xea] sm:$0xff]  ;;  %v4538_v20 = vld [vmem:[#allocation2 + $0x11a] sm:$0xff]  ;;  %v4537_v7 = vld [vmem:[#allocation2 + $0x112] sm:$0xff] }
 0x3c0   : > { %12454 = vmatprep.mubr.msk.bf16.mxu1 %vm588_vm15, %v3920_v10  ;;  %v16692_v10 = vpack.c.bf16 %v4516_v11, %v4515_v36  ;;  %v4530_v36 = vld [vmem:[#allocation2 + $0xda] sm:$0xff]  ;;  %v4531_v11 = vld [vmem:[#allocation2 + $0xe2] sm:$0xff] }
 0x3c7   : > { %12455 = vmatmul.mubr.msk.bf16.gmra.mrb[68].mxu1 %vm588_vm15, %v3921_v57  ;;  %v4547_v57 = vpack.c.bf16 %v4520_v19, %v4519_v51  ;;  %v4553_v19 = vpack.c.bf16 %v4532_v60, %v4531_v11  ;;  %v14487_v11 = vld [vmem:[#allocation12 + $0x90] sm:$0xff]   ;;  %v14488_v60 = vld [vmem:[#allocation12 + $0x98] sm:$0xff]  }
 0x3c8   : > { %12466 = vmatprep.mubr.msk.bf16.mxu1 %vm588_vm15, %v4539_v62  ;;  %v4546_v62 = vpack.c.bf16 %v4518_v42, %v4517_v52  ;;  %v4529_v42 = vld [vmem:[#allocation2 + $0xd2] sm:$0xff]  ;;  %v4534_v52 = vld [vmem:[#allocation2 + $0xfa] sm:$0xff] }
 0x3c9   : > { %v4552_v51 = vpack.c.bf16 %v4530_v36, %v4529_v42  ;;  %v14486_v36 = vld [vmem:[#allocation12 + $0x88] sm:$0xff]  }
 0x3cf   : > { %12467 = vmatmul.mubr.msk.bf16.vlgmr.msra.gmra.mrb[36].mxu1 %vm588_vm15, %v16675_v40 }
 0x3d0   : > { %12470 = vmatprep.mubr.msk.bf16.mxu1 %vm588_vm15, %v16677_v30  ;;  %12503 = vmatpush3.bf16.msra.mxu1 %v16658_v15  ;;  %v14485_v15 = vld [vmem:[#allocation12 + $0x80] sm:$0xff]  }
 0x3d1   : > { %12504 = vmatprep.subr.bf16.mxu1 %v14482_v49 }
 0x3d4   : > { %12505 = vmatpush3.bf16.msra.mxu1 %v14482_v49  ;;  %v4548_v49 = vpack.c.bf16 %v4522_v28, %v4521_v4  ;;  %v4535_v28 = vld [vmem:[#allocation2 + $0x102] sm:$0xff] }
 0x3d5   : > { %12506 = vmatprep.subr.bf16.mxu1 %v14483_v17 }
 0x3d7   : > { %12471 = vmatmul.mubr.msk.bf16.gmra.mrb[40].mxu1 %vm588_vm15, %v16684_v2 }
 0x3d8   : > { %12474 = vmatprep.mubr.msk.bf16.mxu1 %vm588_vm15, %v16686_v59  ;;  %12507 = vmatpush3.bf16.msra.mxu1 %v14483_v17  ;;  %v4549_v17 = vpack.c.bf16 %v4524_v63, %v4523_v21  ;;  %v4536_v21 = vld [vmem:[#allocation2 + $0x10a] sm:$0xff]  ;;  %v4533_v63 = vld [vmem:[#allocation2 + $0xf2] sm:$0xff] }
 0x3d9   : > { %12508 = vmatprep.subr.bf16.mxu1 %v14484_v0  ;;  %v4554_v4 = vpack.c.bf16 %v4534_v52, %v4533_v63  ;;  %v5220_v52 = vld [vmem:[#allocation2 + $0x5b] sm:$0xff]  ;;  %v5219_v63 = vld [vmem:[#allocation2 + $0x53] sm:$0xff] }
 0x3dc   : > { %12509 = vmatpush3.bf16.msra.mxu1 %v14484_v0  ;;  %v4550_v0 = vpack.c.bf16 %v4526_v22, %v4525_v6  ;;  %v4555_v22 = vpack.c.bf16 %v4536_v21, %v4535_v28  ;;  %v4556_v6 = vpack.c.bf16 %v4538_v20, %v4537_v7  ;;  %v5217_v28 = vld [vmem:[#allocation2 + $0x43] sm:$0xff]  ;;  %v16736_v20 = vld [vmem:[#allocation12 + $0xc0] sm:$0xff]   ;;  %v5222_v7 = vld [vmem:[#allocation2 + $0x6b] sm:$0xff] }
 0x3dd   : > { %12546 = vmatprep.subr.bf16.mxu1 %v14485_v15 }
 0x3df   : > { %12475 = vmatmul.mubr.msk.bf16.gmra.mrb[44].mxu1 %vm588_vm15, %v4544_v48 }
 0x3e0   : > { %12478 = vmatprep.mubr.msk.bf16.mxu1 %vm588_vm15, %v16692_v10 }
 0x3e7   : > { %12479 = vmatmul.mubr.msk.bf16.gmra.mrb[48].mxu1 %vm588_vm15, %v4546_v62 }
 0x3e8   : > { %12482 = vmatprep.mubr.msk.bf16.mxu1 %vm588_vm15, %v4547_v57 }
 0x3ef   : > { %12483 = vmatmul.mubr.msk.bf16.gmra.mrb[52].mxu1 %vm588_vm15, %v4548_v49 }
 0x3f0   : > { %12486 = vmatprep.mubr.msk.bf16.mxu1 %vm588_vm15, %v4549_v17 }
 0x3f7   : > { %12487 = vmatmul.mubr.msk.bf16.gmra.mrb[56].mxu1 %vm588_vm15, %v4550_v0 }
 0x3f8   : > { %12490 = vmatprep.mubr.msk.bf16.mxu1 %vm588_vm15, %v4551_v56 }
 0x3ff   : > { %12491 = vmatmul.mubr.msk.bf16.gmra.mrb[60].mxu1 %vm588_vm15, %v4552_v51 }
 0x400   : > { %12494 = vmatprep.mubr.msk.bf16.mxu1 %vm588_vm15, %v4553_v19 }
 0x407   : > { %12495 = vmatmul.mubr.msk.bf16.gmra.mrb[64].mxu1 %vm588_vm15, %v4554_v4 }
 0x408   : > { %12498 = vmatprep.mubr.msk.bf16.mxu1 %vm588_vm15, %v4555_v22 }
 0x40f   : > { %12499 = vmatmul.mubr.msk.bf16.gmra.mrb[68].mxu1 %vm588_vm15, %v4556_v6 }
 0x410   : > { %12510 = vmatprep.mubr.msk.bf16.mxu1 %vm588_vm15, %v16675_v40  ;;  %v14489_v40 = vld [vmem:[#allocation12 + $0xa0] sm:$0xff]  }
 0x417   : > { %12511 = vmatmul.mubr.msk.bf16.vlgmr.msra.gmra.mrb[36].mxu1 %vm588_vm15, %v16677_v30  ;;  %v4891_v30 = vld [vmem:[#allocation2 + $0x122] sm:$0xff] }
 0x418   : > { %12514 = vmatprep.mubr.msk.bf16.mxu1 %vm588_vm15, %v16684_v2  ;;  %12547 = vmatpush3.bf16.msra.mxu1 %v14485_v15  ;;  %v4892_v2 = vld [vmem:[#allocation2 + $0x12a] sm:$0xff] }
 0x419   : > { %12548 = vmatprep.subr.bf16.mxu1 %v14486_v36  ;;  %v4910_v15 = vpack.c.bf16 %v4892_v2, %v4891_v30  ;;  %v5226_v30 = vld [vmem:[#allocation2 + $0x8b] sm:$0xff]  ;;  %v5228_v2 = vld [vmem:[#allocation2 + $0x9b] sm:$0xff] }
 0x41c   : > { %12549 = vmatpush3.bf16.msra.mxu1 %v14486_v36  ;;  %v5221_v36 = vld [vmem:[#allocation2 + $0x63] sm:$0xff] }
 0x41d   : > { %12550 = vmatprep.subr.bf16.mxu1 %v14487_v11 }
 0x41f   : > { %12515 = vmatmul.mubr.msk.bf16.gmra.mrb[40].mxu1 %vm588_vm15, %v16686_v59  ;;  %v5212_v59 = vld [vmem:[#allocation2 + $0x1b] sm:$0xff] }
 0x420   : > { %12518 = vmatprep.mubr.msk.bf16.mxu1 %vm588_vm15, %v4544_v48  ;;  %12551 = vmatpush3.bf16.msra.mxu1 %v14487_v11  ;;  %v5211_v48 = vld [vmem:[#allocation2 + $0x13] sm:$0xff]  ;;  %v5252_v11 = vpack.c.bf16 %v5222_v7, %v5221_v36 }
 0x421   : > { %12552 = vmatprep.subr.bf16.mxu1 %v14488_v60 }
 0x424   : > { %12553 = vmatpush3.bf16.msra.mxu1 %v14488_v60  ;;  %v5223_v60 = vld [vmem:[#allocation2 + $0x73] sm:$0xff] }
 0x425   : > { %12590 = vmatprep.subr.bf16.mxu1 %v14489_v40 }
 0x427   : > { %12519 = vmatmul.mubr.msk.bf16.gmra.mrb[44].mxu1 %vm588_vm15, %v16692_v10  ;;  %v5247_v10 = vpack.c.bf16 %v5212_v59, %v5211_v48  ;;  %v5225_v59 = vld [vmem:[#allocation2 + $0x83] sm:$0xff]  ;;  %v5227_v48 = vld [vmem:[#allocation2 + $0x93] sm:$0xff] }
 0x428   : > { %12522 = vmatprep.mubr.msk.bf16.mxu1 %vm588_vm15, %v4546_v62  ;;  %v5214_v62 = vld [vmem:[#allocation2 + $0x2b] sm:$0xff] }
 0x42f   : > { %12523 = vmatmul.mubr.msk.bf16.gmra.mrb[48].mxu1 %vm588_vm15, %v4547_v57  ;;  %v5216_v57 = vld [vmem:[#allocation2 + $0x3b] sm:$0xff] }
 0x430   : > { %12526 = vmatprep.mubr.msk.bf16.mxu1 %vm588_vm15, %v4548_v49  ;;  %v5213_v49 = vld [vmem:[#allocation2 + $0x23] sm:$0xff] }
 0x437   : > { %12527 = vmatmul.mubr.msk.bf16.gmra.mrb[52].mxu1 %vm588_vm15, %v4549_v17  ;;  %v5248_v17 = vpack.c.bf16 %v5214_v62, %v5213_v49  ;;  %v5230_v62 = vld [vmem:[#allocation2 + $0xab] sm:$0xff]  ;;  %v5229_v49 = vld [vmem:[#allocation2 + $0xa3] sm:$0xff] }
 0x438   : > { %12530 = vmatprep.mubr.msk.bf16.mxu1 %vm588_vm15, %v4550_v0  ;;  %v5215_v0 = vld [vmem:[#allocation2 + $0x33] sm:$0xff] }
 0x439   : > { %v5249_v42 = vpack.c.bf16 %v5216_v57, %v5215_v0  ;;  %v5232_v57 = vld [vmem:[#allocation2 + $0xbb] sm:$0xff]  ;;  %v5231_v0 = vld [vmem:[#allocation2 + $0xb3] sm:$0xff] }
 0x43f   : > { %12531 = vmatmul.mubr.msk.bf16.gmra.mrb[56].mxu1 %vm588_vm15, %v4551_v56  ;;  %v14490_v56 = vld [vmem:[#allocation12 + $0xa8] sm:$0xff]  }
 0x440   : > { %12534 = vmatprep.mubr.msk.bf16.mxu1 %vm588_vm15, %v4552_v51  ;;  %v14491_v51 = vld [vmem:[#allocation12 + $0xb0] sm:$0xff]  }
 0x447   : > { %12535 = vmatmul.mubr.msk.bf16.gmra.mrb[60].mxu1 %vm588_vm15, %v4553_v19  ;;  %v5218_v19 = vld [vmem:[#allocation2 + $0x4b] sm:$0xff] }
 0x448   : > { %12538 = vmatprep.mubr.msk.bf16.mxu1 %vm588_vm15, %v4554_v4  ;;  %v5250_v21 = vpack.c.bf16 %v5218_v19, %v5217_v28  ;;  %v14492_v4 = vld [vmem:[#allocation12 + $0xb8] sm:$0xff]   ;;  %v5233_v19 = vld [vmem:[#allocation2 + $0xc3] sm:$0xff] }
 0x449   : > { %v5235_v28 = vld [vmem:[#allocation2 + $0xd3] sm:$0xff] }
 0x44f   : > { %12539 = vmatmul.mubr.msk.bf16.gmra.mrb[64].mxu1 %vm588_vm15, %v4555_v22  ;;  %v5251_v22 = vpack.c.bf16 %v5220_v52, %v5219_v63  ;;  %v5238_v63 = vld [vmem:[#allocation2 + $0xeb] sm:$0xff] }
 0x450   : > { %12542 = vmatprep.mubr.msk.bf16.mxu1 %vm588_vm15, %v4556_v6  ;;  %v5224_v6 = vld [vmem:[#allocation2 + $0x7b] sm:$0xff] }
 0x457   : > { %12543 = vmatmul.mubr.msk.bf16.gmra.mrb[68].mxu1 %vm588_vm15, %v4910_v15  ;;  %v5254_v15 = vpack.c.bf16 %v5226_v30, %v5225_v59 }
 0x458   : > { %12554 = vmatprep.mubr.msk.bf16.mxu1 %vm588_vm15, %v5247_v10  ;;  %v5255_v10 = vpack.c.bf16 %v5228_v2, %v5227_v48  ;;  %v5243_v2 = vld [vmem:[#allocation2 + $0x113] sm:$0xff] }
 0x459   : > { %v5565_v48 = vld [vmem:[#allocation2 + $0x14] sm:$0xff] }
 0x45f   : > { %12555 = vmatmul.mubr.msk.bf16.vlgmr.msra.gmra.mrb[36].mxu1 %vm588_vm15, %v5248_v17  ;;  %v5256_v17 = vpack.c.bf16 %v5230_v62, %v5229_v49  ;;  %v5245_v62 = vld [vmem:[#allocation2 + $0x123] sm:$0xff] }
 0x460   : > { %12558 = vmatprep.mubr.msk.bf16.mxu1 %vm588_vm15, %v5249_v42  ;;  %12591 = vmatpush3.bf16.msra.mxu1 %v14489_v40  ;;  %v5253_v40 = vpack.c.bf16 %v5224_v6, %v5223_v60  ;;  %v5234_v42 = vld [vmem:[#allocation2 + $0xcb] sm:$0xff]  ;;  %v5239_v6 = vld [vmem:[#allocation2 + $0xf3] sm:$0xff]  ;;  %v5244_v60 = vld [vmem:[#allocation2 + $0x11b] sm:$0xff] }
 0x461   : > { %12592 = vmatprep.subr.bf16.mxu1 %v14490_v56  ;;  %v5258_v52 = vpack.c.bf16 %v5234_v42, %v5233_v19  ;;  %v5263_v59 = vpack.c.bf16 %v5244_v60, %v5243_v2  ;;  %v5567_v42 = vld [vmem:[#allocation2 + $0x24] sm:$0xff]  ;;  %v14494_v19 = vld [vmem:[#allocation12 + $0xc8] sm:$0xff]   ;;  %v5577_v60 = vld [vmem:[#allocation2 + $0x74] sm:$0xff] }
 0x464   : > { %12593 = vmatpush3.bf16.msra.mxu1 %v14490_v56  ;;  %v5257_v56 = vpack.c.bf16 %v5232_v57, %v5231_v0  ;;  %v5569_v0 = vld [vmem:[#allocation2 + $0x34] sm:$0xff] }
 0x465   : > { %12594 = vmatprep.subr.bf16.mxu1 %v14491_v51 }
 0x467   : > { %12559 = vmatmul.mubr.msk.bf16.gmra.mrb[40].mxu1 %vm588_vm15, %v5250_v21 }
 0x468   : > { %12562 = vmatprep.mubr.msk.bf16.mxu1 %vm588_vm15, %v5251_v22  ;;  %12595 = vmatpush3.bf16.msra.mxu1 %v14491_v51  ;;  %v5236_v51 = vld [vmem:[#allocation2 + $0xdb] sm:$0xff]  ;;  %v5237_v22 = vld [vmem:[#allocation2 + $0xe3] sm:$0xff] }
 0x469   : > { %12596 = vmatprep.subr.bf16.mxu1 %v14492_v4  ;;  %v5259_v21 = vpack.c.bf16 %v5236_v51, %v5235_v28  ;;  %v5260_v7 = vpack.c.bf16 %v5238_v63, %v5237_v22  ;;  %v14495_v28 = vld [vmem:[#allocation12 + $0xd0] sm:$0xff]   ;;  %v5573_v63 = vld [vmem:[#allocation2 + $0x54] sm:$0xff] }
 0x46a   : > { %v5571_v22 = vld [vmem:[#allocation2 + $0x44] sm:$0xff] }
 0x46c   : > { %12597 = vmatpush3.bf16.msra.mxu1 %v14492_v4  ;;  %v5240_v4 = vld [vmem:[#allocation2 + $0xfb] sm:$0xff] }
 0x46d   : > { %12634 = vmatprep.subr.bf16.mxu1 %v16736_v20  ;;  %v5261_v36 = vpack.c.bf16 %v5240_v4, %v5239_v6  ;;  %v5574_v4 = vld [vmem:[#allocation2 + $0x5c] sm:$0xff]  ;;  %v14496_v6 = vld [vmem:[#allocation12 + $0xd8] sm:$0xff]  }
 0x46f   : > { %12563 = vmatmul.mubr.msk.bf16.gmra.mrb[44].mxu1 %vm588_vm15, %v5252_v11  ;;  %v5242_v11 = vld [vmem:[#allocation2 + $0x10b] sm:$0xff] }
 0x470   : > { %12566 = vmatprep.mubr.msk.bf16.mxu1 %vm588_vm15, %v5253_v40  ;;  %v5241_v40 = vld [vmem:[#allocation2 + $0x103] sm:$0xff] }
 0x471   : > { %v5262_v30 = vpack.c.bf16 %v5242_v11, %v5241_v40  ;;  %v5576_v11 = vld [vmem:[#allocation2 + $0x6c] sm:$0xff]  ;;  %v5578_v40 = vld [vmem:[#allocation2 + $0x7c] sm:$0xff] }
 0x477   : > { %12567 = vmatmul.mubr.msk.bf16.gmra.mrb[48].mxu1 %vm588_vm15, %v5254_v15  ;;  %v5246_v15 = vld [vmem:[#allocation2 + $0x12b] sm:$0xff] }
 0x478   : > { %12570 = vmatprep.mubr.msk.bf16.mxu1 %vm588_vm15, %v5255_v10  ;;  %v5566_v10 = vld [vmem:[#allocation2 + $0x1c] sm:$0xff]  ;;  %v5264_v57 = vpack.c.bf16 %v5246_v15, %v5245_v62  ;;  %v5580_v15 = vld [vmem:[#allocation2 + $0x8c] sm:$0xff]  ;;  %v5579_v62 = vld [vmem:[#allocation2 + $0x84] sm:$0xff] }
 0x479   : > { %v5601_v49 = vpack.c.bf16 %v5566_v10, %v5565_v48  ;;  %v5581_v48 = vld [vmem:[#allocation2 + $0x94] sm:$0xff]  ;;  %v5582_v10 = vld [vmem:[#allocation2 + $0x9c] sm:$0xff] }
 0x47f   : > { %12571 = vmatmul.mubr.msk.bf16.gmra.mrb[52].mxu1 %vm588_vm15, %v5256_v17  ;;  %v5568_v17 = vld [vmem:[#allocation2 + $0x2c] sm:$0xff] }
 0x480   : > { %12574 = vmatprep.mubr.msk.bf16.mxu1 %vm588_vm15, %v5257_v56  ;;  %v5570_v56 = vld [vmem:[#allocation2 + $0x3c] sm:$0xff]  ;;  %v16753_v51 = vpack.c.bf16 %v5568_v17, %v5567_v42  ;;  %v5584_v17 = vld [vmem:[#allocation2 + $0xac] sm:$0xff]  ;;  %v5583_v42 = vld [vmem:[#allocation2 + $0xa4] sm:$0xff] }
 0x487   : > { %12575 = vmatmul.mubr.msk.bf16.gmra.mrb[56].mxu1 %vm588_vm15, %v5258_v52  ;;  %v16755_v52 = vpack.c.bf16 %v5570_v56, %v5569_v0  ;;  %v5585_v0 = vld [vmem:[#allocation2 + $0xb4] sm:$0xff]  ;;  %v5586_v56 = vld [vmem:[#allocation2 + $0xbc] sm:$0xff] }
 0x488   : > { %12578 = vmatprep.mubr.msk.bf16.mxu1 %vm588_vm15, %v5259_v21  ;;  %v5572_v21 = vld [vmem:[#allocation2 + $0x4c] sm:$0xff] }
 0x48f   : > { %12579 = vmatmul.mubr.msk.bf16.gmra.mrb[60].mxu1 %vm588_vm15, %v5260_v7  ;;  %v16762_v7 = vpack.c.bf16 %v5572_v21, %v5571_v22  ;;  %v5588_v21 = vld [vmem:[#allocation2 + $0xcc] sm:$0xff]  ;;  %v5587_v22 = vld [vmem:[#allocation2 + $0xc4] sm:$0xff] }
 0x490   : > { %12582 = vmatprep.mubr.msk.bf16.mxu1 %vm588_vm15, %v5261_v36  ;;  %v16764_v36 = vpack.c.bf16 %v5574_v4, %v5573_v63  ;;  %v5589_v63 = vld [vmem:[#allocation2 + $0xd4] sm:$0xff]  ;;  %v5590_v4 = vld [vmem:[#allocation2 + $0xdc] sm:$0xff] }
 0x497   : > { %12583 = vmatmul.mubr.msk.bf16.gmra.mrb[64].mxu1 %vm588_vm15, %v5262_v30  ;;  %v5575_v30 = vld [vmem:[#allocation2 + $0x64] sm:$0xff] }
 0x498   : > { %12586 = vmatprep.mubr.msk.bf16.mxu1 %vm588_vm15, %v5263_v59  ;;  %v5606_v2 = vpack.c.bf16 %v5576_v11, %v5575_v30  ;;  %v16770_v59 = vpack.c.bf16 %v5578_v40, %v5577_v60  ;;  %v5613_v11 = vpack.c.bf16 %v5590_v4, %v5589_v63  ;;  %v5592_v60 = vld [vmem:[#allocation2 + $0xec] sm:$0xff]  ;;  %v5593_v40 = vld [vmem:[#allocation2 + $0xf4] sm:$0xff]  ;;  %v5594_v30 = vld [vmem:[#allocation2 + $0xfc] sm:$0xff] }
 0x499   : > { %v5599_v63 = vld [vmem:[#allocation2 + $0x124] sm:$0xff]  ;;  %v5600_v4 = vld [vmem:[#allocation2 + $0x12c] sm:$0xff] }
 0x49f   : > { %12587 = vmatmul.mubr.msk.bf16.gmra.mrb[68].mxu1 %vm588_vm15, %v5264_v57  ;;  %v5608_v57 = vpack.c.bf16 %v5580_v15, %v5579_v62  ;;  %v5591_v15 = vld [vmem:[#allocation2 + $0xe4] sm:$0xff]  ;;  %v5596_v62 = vld [vmem:[#allocation2 + $0x10c] sm:$0xff] }
 0x4a0   : > { %12598 = vmatprep.mubr.msk.bf16.mxu1 %vm588_vm15, %v5601_v49  ;;  %v5609_v49 = vpack.c.bf16 %v5582_v10, %v5581_v48  ;;  %v5614_v48 = vpack.c.bf16 %v5592_v60, %v5591_v15  ;;  %v5615_v10 = vpack.c.bf16 %v5594_v30, %v5593_v40  ;;  %v14498_v60 = vld [vmem:[#allocation12 + $0xe8] sm:$0xff]   ;;  %v14499_v40 = vld [vmem:[#allocation12 + $0xf0] sm:$0xff]   ;;  %v14500_v30 = vld [vmem:[#allocation12 + $0xf8] sm:$0xff]  }
 0x4a7   : > { %12599 = vmatmul.mubr.msk.bf16.vlgmr.msra.gmra.mrb[36].mxu1 %vm588_vm15, %v16753_v51 }
 0x4a8   : > { %12602 = vmatprep.mubr.msk.bf16.mxu1 %vm588_vm15, %v16755_v52  ;;  %12635 = vmatpush3.bf16.msra.mxu1 %v16736_v20  ;;  %v14497_v20 = vld [vmem:[#allocation12 + $0xe0] sm:$0xff]  }
 0x4a9   : > { %12636 = vmatprep.subr.bf16.mxu1 %v14494_v19 }
 0x4ac   : > { %12637 = vmatpush3.bf16.msra.mxu1 %v14494_v19  ;;  %v5610_v19 = vpack.c.bf16 %v5584_v17, %v5583_v42  ;;  %v5597_v17 = vld [vmem:[#allocation2 + $0x114] sm:$0xff] }
 0x4ad   : > { %12638 = vmatprep.subr.bf16.mxu1 %v14495_v28 }
 0x4af   : > { %12603 = vmatmul.mubr.msk.bf16.gmra.mrb[40].mxu1 %vm588_vm15, %v16762_v7 }
 0x4b0   : > { %12606 = vmatprep.mubr.msk.bf16.mxu1 %vm588_vm15, %v16764_v36  ;;  %12639 = vmatpush3.bf16.msra.mxu1 %v14495_v28  ;;  %v5611_v28 = vpack.c.bf16 %v5586_v56, %v5585_v0  ;;  %v5598_v0 = vld [vmem:[#allocation2 + $0x11c] sm:$0xff]  ;;  %v5595_v56 = vld [vmem:[#allocation2 + $0x104] sm:$0xff] }
 0x4b1   : > { %12640 = vmatprep.subr.bf16.mxu1 %v14496_v6  ;;  %v5616_v42 = vpack.c.bf16 %v5596_v62, %v5595_v56  ;;  %v6280_v62 = vld [vmem:[#allocation2 + $0x5d] sm:$0xff]  ;;  %v6281_v56 = vld [vmem:[#allocation2 + $0x65] sm:$0xff] }
 0x4b4   : > { %12641 = vmatpush3.bf16.msra.mxu1 %v14496_v6  ;;  %v5612_v6 = vpack.c.bf16 %v5588_v21, %v5587_v22  ;;  %v5617_v21 = vpack.c.bf16 %v5598_v0, %v5597_v17  ;;  %v5618_v22 = vpack.c.bf16 %v5600_v4, %v5599_v63  ;;  %v6282_v17 = vld [vmem:[#allocation2 + $0x6d] sm:$0xff]  ;;  %v14505_v63 = vld [vmem:[#allocation15 + $0x20] sm:$0xff]  }
 0x4b5   : > { %12678 = vmatprep.subr.bf16.mxu1 %v14497_v20  ;;  %12767 = vmatpush3.bf16.msra.mxu0 %v14505_v63  ;;  %v6283_v4 = vld [vmem:[#allocation2 + $0x75] sm:$0xff]  ;;  %v6302_v63 = vld [vmem:[#allocation2 + $0x10d] sm:$0xff] }
 0x4b7   : > { %12607 = vmatmul.mubr.msk.bf16.gmra.mrb[44].mxu1 %vm588_vm15, %v5606_v2 }
 0x4b8   : > { %12610 = vmatprep.mubr.msk.bf16.mxu1 %vm588_vm15, %v16770_v59 }
 0x4bf   : > { %12611 = vmatmul.mubr.msk.bf16.gmra.mrb[48].mxu1 %vm588_vm15, %v5608_v57 }
 0x4c0   : > { %12614 = vmatprep.mubr.msk.bf16.mxu1 %vm588_vm15, %v5609_v49 }
 0x4c7   : > { %12615 = vmatmul.mubr.msk.bf16.gmra.mrb[52].mxu1 %vm588_vm15, %v5610_v19 }
 0x4c8   : > { %12618 = vmatprep.mubr.msk.bf16.mxu1 %vm588_vm15, %v5611_v28 }
 0x4cf   : > { %12619 = vmatmul.mubr.msk.bf16.gmra.mrb[56].mxu1 %vm588_vm15, %v5612_v6 }
 0x4d0   : > { %12622 = vmatprep.mubr.msk.bf16.mxu1 %vm588_vm15, %v5613_v11 }
 0x4d7   : > { %12623 = vmatmul.mubr.msk.bf16.gmra.mrb[60].mxu1 %vm588_vm15, %v5614_v48 }
 0x4d8   : > { %12626 = vmatprep.mubr.msk.bf16.mxu1 %vm588_vm15, %v5615_v10 }
 0x4df   : > { %12627 = vmatmul.mubr.msk.bf16.gmra.mrb[64].mxu1 %vm588_vm15, %v5616_v42 }
 0x4e0   : > { %12630 = vmatprep.mubr.msk.bf16.mxu1 %vm588_vm15, %v5617_v21 }
 0x4e7   : > { %12631 = vmatmul.mubr.msk.bf16.gmra.mrb[68].mxu1 %vm588_vm15, %v5618_v22 }
 0x4e8   : > { %12642 = vmatprep.mubr.msk.bf16.mxu1 %vm588_vm15, %v16753_v51  ;;  %v14501_v51 = vld [vmem:[#allocation12 + $0x100] sm:$0xff]  }
 0x4ef   : > { %12643 = vmatmul.mubr.msk.bf16.vlgmr.msra.gmra.mrb[36].mxu1 %vm588_vm15, %v16755_v52  ;;  %v5953_v52 = vld [vmem:[#allocation2 + $0x134] sm:$0xff] }
 0x4f0   : > { %12646 = vmatprep.mubr.msk.bf16.mxu1 %vm588_vm15, %v16762_v7  ;;  %12679 = vmatpush3.bf16.msra.mxu1 %v14497_v20  ;;  %v5954_v7 = vld [vmem:[#allocation2 + $0x13c] sm:$0xff]  ;;  %v6274_v20 = vld [vmem:[#allocation2 + $0x2d] sm:$0xff] }
 0x4f1   : > { %12680 = vmatprep.subr.bf16.mxu1 %v14498_v60 }
 0x4f4   : > { %12681 = vmatpush3.bf16.msra.mxu1 %v14498_v60  ;;  %v18507_v60 = vmov 0.0  }
 0x4f5   : > { %12682 = vmatprep.subr.bf16.mxu1 %v14499_v40  ;;  %12768 = vmatprep.subr.bf16.mxu0 %v18507_v60 }
 0x4f7   : > { %12647 = vmatmul.mubr.msk.bf16.gmra.mrb[40].mxu1 %vm588_vm15, %v16764_v36  ;;  %v5972_v36 = vpack.c.bf16 %v5954_v7, %v5953_v52  ;;  %v6287_v7 = vld [vmem:[#allocation2 + $0x95] sm:$0xff] }
 0x4f8   : > { %12650 = vmatprep.mubr.msk.bf16.mxu1 %vm588_vm15, %v5606_v2  ;;  %12683 = vmatpush3.bf16.msra.mxu1 %v14499_v40  ;;  %v6273_v2 = vld [vmem:[#allocation2 + $0x25] sm:$0xff]  ;;  %v6286_v40 = vld [vmem:[#allocation2 + $0x8d] sm:$0xff] }
 0x4f9   : > { %12684 = vmatprep.subr.bf16.mxu1 %v14500_v30 }
 0x4fc   : > { %12685 = vmatpush3.bf16.msra.mxu1 %v14500_v30 }
 0x4fd   : > { %12722 = vmatprep.subr.bf16.mxu1 %v14501_v51 }
 0x4ff   : > { %12651 = vmatmul.mubr.msk.bf16.gmra.mrb[44].mxu1 %vm588_vm15, %v16770_v59  ;;  %v6309_v59 = vpack.c.bf16 %v6274_v20, %v6273_v2  ;;  %v6290_v20 = vld [vmem:[#allocation2 + $0xad] sm:$0xff] }
 0x500   : > { %12654 = vmatprep.mubr.msk.bf16.mxu1 %vm588_vm15, %v5608_v57  ;;  %v6275_v57 = vld [vmem:[#allocation2 + $0x35] sm:$0xff] }
 0x507   : > { %12655 = vmatmul.mubr.msk.bf16.gmra.mrb[48].mxu1 %vm588_vm15, %v5609_v49  ;;  %v6276_v49 = vld [vmem:[#allocation2 + $0x3d] sm:$0xff] }
 0x508   : > { %12658 = vmatprep.mubr.msk.bf16.mxu1 %vm588_vm15, %v5610_v19  ;;  %v6278_v19 = vld [vmem:[#allocation2 + $0x4d] sm:$0xff] }
 0x50f   : > { %12659 = vmatmul.mubr.msk.bf16.gmra.mrb[52].mxu1 %vm588_vm15, %v5611_v28  ;;  %v6310_v28 = vpack.c.bf16 %v6276_v49, %v6275_v57  ;;  %v6291_v49 = vld [vmem:[#allocation2 + $0xb5] sm:$0xff] }
 0x510   : > { %12662 = vmatprep.mubr.msk.bf16.mxu1 %vm588_vm15, %v5612_v6  ;;  %v6277_v6 = vld [vmem:[#allocation2 + $0x45] sm:$0xff] }
 0x511   : > { %v6311_v15 = vpack.c.bf16 %v6278_v19, %v6277_v6  ;;  %v6292_v19 = vld [vmem:[#allocation2 + $0xbd] sm:$0xff] }
 0x512   : > { %v6318_v6 = vpack.c.bf16 %v6292_v19, %v6291_v49  ;;  %v6628_v49 = vld [vmem:[#allocation2 + $0x2e] sm:$0xff]  ;;  %v6627_v19 = vld [vmem:[#allocation2 + $0x26] sm:$0xff] }
 0x517   : > { %12663 = vmatmul.mubr.msk.bf16.gmra.mrb[56].mxu1 %vm588_vm15, %v5613_v11  ;;  %v14502_v11 = vld [vmem:[#allocation12 + $0x108] sm:$0xff]  }
 0x518   : > { %12666 = vmatprep.mubr.msk.bf16.mxu1 %vm588_vm15, %v5614_v48  ;;  %v14503_v48 = vld [vmem:[#allocation12 + $0x110] sm:$0xff]  }
 0x51f   : > { %12667 = vmatmul.mubr.msk.bf16.gmra.mrb[60].mxu1 %vm588_vm15, %v5615_v10  ;;  %v6279_v10 = vld [vmem:[#allocation2 + $0x55] sm:$0xff] }
 0x520   : > { %12670 = vmatprep.mubr.msk.bf16.mxu1 %vm588_vm15, %v5616_v42  ;;  %v6312_v0 = vpack.c.bf16 %v6280_v62, %v6279_v10  ;;  %v14504_v42 = vld [vmem:[#allocation12 + $0x118] sm:$0xff]   ;;  %v6296_v10 = vld [vmem:[#allocation2 + $0xdd] sm:$0xff] }
 0x521   : > { %v6298_v62 = vld [vmem:[#allocation2 + $0xed] sm:$0xff] }
 0x527   : > { %12671 = vmatmul.mubr.msk.bf16.gmra.mrb[64].mxu1 %vm588_vm15, %v5617_v21  ;;  %v6313_v21 = vpack.c.bf16 %v6282_v17, %v6281_v56 }
 0x528   : > { %12674 = vmatprep.mubr.msk.bf16.mxu1 %vm588_vm15, %v5618_v22  ;;  %v6284_v22 = vld [vmem:[#allocation2 + $0x7d] sm:$0xff] }
 0x529   : > { %v6314_v30 = vpack.c.bf16 %v6284_v22, %v6283_v4  ;;  %v6301_v22 = vld [vmem:[#allocation2 + $0x105] sm:$0xff] }
 0x52f   : > { %12675 = vmatmul.mubr.msk.bf16.gmra.mrb[68].mxu1 %vm588_vm15, %v5972_v36  ;;  %v6288_v36 = vld [vmem:[#allocation2 + $0x9d] sm:$0xff] }
 0x530   : > { %12686 = vmatprep.mubr.msk.bf16.mxu1 %vm588_vm15, %v6309_v59  ;;  %v6316_v2 = vpack.c.bf16 %v6288_v36, %v6287_v7  ;;  %v6289_v59 = vld [vmem:[#allocation2 + $0xa5] sm:$0xff]  ;;  %v6306_v7 = vld [vmem:[#allocation2 + $0x12d] sm:$0xff] }
 0x531   : > { %v6317_v57 = vpack.c.bf16 %v6290_v20, %v6289_v59  ;;  %v6308_v59 = vld [vmem:[#allocation2 + $0x13d] sm:$0xff] }
 0x537   : > { %12687 = vmatmul.mubr.msk.bf16.vlgmr.msra.gmra.mrb[36].mxu1 %vm588_vm15, %v6310_v28  ;;  %v6294_v28 = vld [vmem:[#allocation2 + $0xcd] sm:$0xff] }
 0x538   : > { %12690 = vmatprep.mubr.msk.bf16.mxu1 %vm588_vm15, %v6311_v15  ;;  %12723 = vmatpush3.bf16.msra.mxu1 %v14501_v51  ;;  %v6285_v51 = vld [vmem:[#allocation2 + $0x85] sm:$0xff] }
 0x539   : > { %12724 = vmatprep.subr.bf16.mxu1 %v14502_v11  ;;  %v6315_v52 = vpack.c.bf16 %v6286_v40, %v6285_v51  ;;  %v6323_v40 = vpack.c.bf16 %v6302_v63, %v6301_v22  ;;  %v6304_v51 = vld [vmem:[#allocation2 + $0x11d] sm:$0xff] }
 0x53a   : > { %v6638_v22 = vld [vmem:[#allocation2 + $0x7e] sm:$0xff] }
 0x53c   : > { %12725 = vmatpush3.bf16.msra.mxu1 %v14502_v11  ;;  %v6293_v11 = vld [vmem:[#allocation2 + $0xc5] sm:$0xff] }
 0x53d   : > { %12726 = vmatprep.subr.bf16.mxu1 %v14503_v48  ;;  %v6319_v15 = vpack.c.bf16 %v6294_v28, %v6293_v11  ;;  %v6663_v28 = vpack.c.bf16 %v6628_v49, %v6627_v19  ;;  %v6630_v11 = vld [vmem:[#allocation2 + $0x3e] sm:$0xff]  ;;  %v6645_v49 = vld [vmem:[#allocation2 + $0xb6] sm:$0xff] }
 0x53e   : > { %v6646_v19 = vld [vmem:[#allocation2 + $0xbe] sm:$0xff] }
 0x53f   : > { %12691 = vmatmul.mubr.msk.bf16.gmra.mrb[40].mxu1 %vm588_vm15, %v6312_v0  ;;  %v6297_v0 = vld [vmem:[#allocation2 + $0xe5] sm:$0xff] }
 0x540   : > { %12694 = vmatprep.mubr.msk.bf16.mxu1 %vm588_vm15, %v6313_v21  ;;  %12727 = vmatpush3.bf16.msra.mxu1 %v14503_v48  ;;  %v6295_v48 = vld [vmem:[#allocation2 + $0xd5] sm:$0xff]  ;;  %v6321_v56 = vpack.c.bf16 %v6298_v62, %v6297_v0  ;;  %v6300_v21 = vld [vmem:[#allocation2 + $0xfd] sm:$0xff] }
 0x541   : > { %12728 = vmatprep.subr.bf16.mxu1 %v14504_v42  ;;  %v6320_v17 = vpack.c.bf16 %v6296_v10, %v6295_v48  ;;  %v6631_v10 = vld [vmem:[#allocation2 + $0x46] sm:$0xff]  ;;  %v6634_v0 = vld [vmem:[#allocation2 + $0x5e] sm:$0xff] }
 0x544   : > { %12729 = vmatpush3.bf16.msra.mxu1 %v14504_v42  ;;  %v6299_v42 = vld [vmem:[#allocation2 + $0xf5] sm:$0xff] }
 0x545   : > { %v6322_v4 = vpack.c.bf16 %v6300_v21, %v6299_v42  ;;  %v6635_v21 = vld [vmem:[#allocation2 + $0x66] sm:$0xff] }
 0x547   : > { %12695 = vmatmul.mubr.msk.bf16.gmra.mrb[44].mxu1 %vm588_vm15, %v6314_v30  ;;  %v6303_v30 = vld [vmem:[#allocation2 + $0x115] sm:$0xff] }
 0x548   : > { %12698 = vmatprep.mubr.msk.bf16.mxu1 %vm588_vm15, %v6315_v52  ;;  %v6305_v52 = vld [vmem:[#allocation2 + $0x125] sm:$0xff]  ;;  %v6324_v36 = vpack.c.bf16 %v6304_v51, %v6303_v30 }
 0x549   : > { %v6325_v20 = vpack.c.bf16 %v6306_v7, %v6305_v52  ;;  %v6639_v51 = vld [vmem:[#allocation2 + $0x86] sm:$0xff]  ;;  %v6641_v7 = vld [vmem:[#allocation2 + $0x96] sm:$0xff] }
 0x54f   : > { %12699 = vmatmul.mubr.msk.bf16.gmra.mrb[48].mxu1 %vm588_vm15, %v6316_v2  ;;  %v6307_v2 = vld [vmem:[#allocation2 + $0x135] sm:$0xff] }
 0x550   : > { %12702 = vmatprep.mubr.msk.bf16.mxu1 %vm588_vm15, %v6317_v57  ;;  %v6326_v57 = vpack.c.bf16 %v6308_v59, %v6307_v2  ;;  %v6643_v59 = vld [vmem:[#allocation2 + $0xa6] sm:$0xff] }
 0x557   : > { %12703 = vmatmul.mubr.msk.bf16.gmra.mrb[52].mxu1 %vm588_vm15, %v6318_v6  ;;  %v6629_v6 = vld [vmem:[#allocation2 + $0x36] sm:$0xff] }
 0x558   : > { %12706 = vmatprep.mubr.msk.bf16.mxu1 %vm588_vm15, %v6319_v15  ;;  %v6632_v15 = vld [vmem:[#allocation2 + $0x4e] sm:$0xff]  ;;  %v6664_v48 = vpack.c.bf16 %v6630_v11, %v6629_v6  ;;  %v6672_v6 = vpack.c.bf16 %v6646_v19, %v6645_v49  ;;  %v6647_v11 = vld [vmem:[#allocation2 + $0xc6] sm:$0xff]  ;;  %v14506_v49 = vld [vmem:[#allocation15 + $0x28] sm:$0xff]   ;;  %v16847_v19 = vpop.permute.xlu0 %14290 }
 0x559   : > { %v6665_v62 = vpack.c.bf16 %v6632_v15, %v6631_v10  ;;  %v6650_v10 = vld [vmem:[#allocation2 + $0xde] sm:$0xff]  ;;  %12769 = vmatpush3.bf16.msra.mxu0 %v14506_v49 }
 0x55a   : > { %12770 = vmatprep.subr.bf16.mxu0 %v18507_v60 }
 0x55f   : > { %12707 = vmatmul.mubr.msk.bf16.gmra.mrb[56].mxu1 %vm588_vm15, %v6320_v17  ;;  %v6633_v17 = vld [vmem:[#allocation2 + $0x56] sm:$0xff] }
 0x560   : > { %12710 = vmatprep.mubr.msk.bf16.mxu1 %vm588_vm15, %v6321_v56  ;;  %v6636_v56 = vld [vmem:[#allocation2 + $0x6e] sm:$0xff]  ;;  %v6666_v42 = vpack.c.bf16 %v6634_v0, %v6633_v17  ;;  %v6651_v0 = vld [vmem:[#allocation2 + $0xe6] sm:$0xff] }
 0x561   : > { %v6667_v63 = vpack.c.bf16 %v6636_v56, %v6635_v21  ;;  %v6654_v21 = vld [vmem:[#allocation2 + $0xfe] sm:$0xff] }
 0x567   : > { %12711 = vmatmul.mubr.msk.bf16.gmra.mrb[60].mxu1 %vm588_vm15, %v6322_v4  ;;  %v6637_v4 = vld [vmem:[#allocation2 + $0x76] sm:$0xff] }
 0x568   : > { %12714 = vmatprep.mubr.msk.bf16.mxu1 %vm588_vm15, %v6323_v40  ;;  %v6640_v40 = vld [vmem:[#allocation2 + $0x8e] sm:$0xff]  ;;  %v6668_v30 = vpack.c.bf16 %v6638_v22, %v6637_v4  ;;  %v6655_v22 = vld [vmem:[#allocation2 + $0x106] sm:$0xff] }
 0x569   : > { %v6669_v52 = vpack.c.bf16 %v6640_v40, %v6639_v51  ;;  %v6658_v51 = vld [vmem:[#allocation2 + $0x11e] sm:$0xff] }
 0x56f   : > { %12715 = vmatmul.mubr.msk.bf16.gmra.mrb[64].mxu1 %vm588_vm15, %v6324_v36  ;;  %v6642_v36 = vld [vmem:[#allocation2 + $0x9e] sm:$0xff] }
 0x570   : > { %12718 = vmatprep.mubr.msk.bf16.mxu1 %vm588_vm15, %v6325_v20  ;;  %v6644_v20 = vld [vmem:[#allocation2 + $0xae] sm:$0xff]  ;;  %v6670_v2 = vpack.c.bf16 %v6642_v36, %v6641_v7 }
 0x571   : > { %v6660_v7 = vld [vmem:[#allocation2 + $0x12e] sm:$0xff] }
 0x577   : > { %12719 = vmatmul.mubr.msk.bf16.gmra.mrb[68].mxu1 %vm588_vm15, %v6326_v57  ;;  %v6671_v57 = vpack.c.bf16 %v6644_v20, %v6643_v59  ;;  %v6662_v59 = vld [vmem:[#allocation2 + $0x13e] sm:$0xff] }
 0x578   : > { %12730 = vmatprep.mubr.msk.bf16.mxu1 %vm588_vm15, %v6663_v28  ;;  %v6648_v28 = vld [vmem:[#allocation2 + $0xce] sm:$0xff] }
 0x579   : > { %v6673_v15 = vpack.c.bf16 %v6648_v28, %v6647_v11  ;;  %v16849_v28 = vpop.permute.xlu1 %14295 }
 0x57d   : > { %v16853_v11 = vpop.permute.xlu1 %14305 }
 0x57f   : > { %12731 = vmatmul.mubr.msk.bf16.vlgmr.msra.gmra.mrb[36].mxu1 %vm588_vm15, %v6664_v48  ;;  %v6649_v48 = vld [vmem:[#allocation2 + $0xd6] sm:$0xff] }
 0x580   : > { %12734 = vmatprep.mubr.msk.bf16.mxu1 %vm588_vm15, %v6665_v62  ;;  %v6652_v62 = vld [vmem:[#allocation2 + $0xee] sm:$0xff]  ;;  %v6674_v17 = vpack.c.bf16 %v6650_v10, %v6649_v48 }
 0x581   : > { %v6675_v56 = vpack.c.bf16 %v6652_v62, %v6651_v0  ;;  %v16857_v48 = vpop.permute.xlu1 %14315 }
 0x585   : > { %v16861_v62 = vpop.permute.xlu1 %14325 }
 0x587   : > { %12735 = vmatmul.mubr.msk.bf16.gmra.mrb[40].mxu1 %vm588_vm15, %v6666_v42  ;;  %v6653_v42 = vld [vmem:[#allocation2 + $0xf6] sm:$0xff] }
 0x588   : > { %12738 = vmatprep.mubr.msk.bf16.mxu1 %vm588_vm15, %v6667_v63  ;;  %v6656_v63 = vld [vmem:[#allocation2 + $0x10e] sm:$0xff]  ;;  %v6676_v4 = vpack.c.bf16 %v6654_v21, %v6653_v42 }
 0x589   : > { %v6677_v40 = vpack.c.bf16 %v6656_v63, %v6655_v22  ;;  %v16865_v0 = vpop.permute.xlu1 %14335 }
 0x58d   : > { %v16870_v21 = vpop.permute.xlu1 %14345 }
 0x58e   : > { %v18559_v18 = vunpack.i.h.bf16 %v16870_v21 }
 0x58f   : > { %12739 = vmatmul.mubr.msk.bf16.gmra.mrb[44].mxu1 %vm588_vm15, %v6668_v30  ;;  %v6657_v30 = vld [vmem:[#allocation2 + $0x116] sm:$0xff] }
 0x590   : > { %12742 = vmatprep.mubr.msk.bf16.mxu1 %vm588_vm15, %v6669_v52  ;;  %v6659_v52 = vld [vmem:[#allocation2 + $0x126] sm:$0xff]  ;;  %v6678_v36 = vpack.c.bf16 %v6658_v51, %v6657_v30 }
 0x591   : > { %v6679_v20 = vpack.c.bf16 %v6660_v7, %v6659_v52 }
 0x597   : > { %12743 = vmatmul.mubr.msk.bf16.gmra.mrb[48].mxu1 %vm588_vm15, %v6670_v2  ;;  %v6661_v2 = vld [vmem:[#allocation2 + $0x136] sm:$0xff] }
 0x598   : > { %12746 = vmatprep.mubr.msk.bf16.mxu1 %vm588_vm15, %v6671_v57  ;;  %v6680_v57 = vpack.c.bf16 %v6662_v59, %v6661_v2 }
 0x59f   : > { %12747 = vmatmul.mubr.msk.bf16.gmra.mrb[52].mxu1 %vm588_vm15, %v6672_v6  ;;  %v16851_v6 = vpop.permute.xlu0 %14300 }
 0x5a0   : > { %12750 = vmatprep.mubr.msk.bf16.mxu1 %vm588_vm15, %v6673_v15 }
 0x5a3   : > { %v16855_v15 = vpop.permute.xlu0 %14310 }
 0x5a7   : > { %12751 = vmatmul.mubr.msk.bf16.gmra.mrb[56].mxu1 %vm588_vm15, %v6674_v17  ;;  %v16859_v10 = vpop.permute.xlu0 %14320 }
 0x5a8   : > { %12754 = vmatprep.mubr.msk.bf16.mxu1 %vm588_vm15, %v6675_v56  ;;  %v14507_v56 = vld [vmem:[#allocation15 + $0x30] sm:$0xff]  }
 0x5a9   : > { %12771 = vmatpush3.bf16.msra.mxu0 %v14507_v56 }
 0x5aa   : > { %12772 = vmatprep.subr.bf16.mxu0 %v18507_v60 }
 0x5ab   : > { %v16863_v17 = vpop.permute.xlu0 %14330 }
 0x5ad   : > { %12773 = vmatpush3.bf16.msra.mxu0 %v14508_v46 }
 0x5ae   : > { %12810 = vmatprep.subr.bf16.mxu0 %v18507_v60 }
 0x5af   : > { %12755 = vmatmul.mubr.msk.bf16.gmra.mrb[60].mxu1 %vm588_vm15, %v6676_v4  ;;  %v16867_v42 = vpop.permute.xlu0 %14340  ;;  %v16874_v4 = vpop.permute.xlu1 %14355 }
 0x5b0   : > { %12758 = vmatprep.mubr.msk.bf16.mxu1 %vm588_vm15, %v6677_v40  ;;  %18508 = vst [vmem:[#allocation59_spill] sm:$0xff] %v16874_v4 }
 0x5b3   : > { %v16872_v63 = vpop.permute.xlu0 %14350  ;;  %v16878_v40 = vpop.permute.xlu1 %14365 }
 0x5b4   : > { %18510 = vst [vmem:[#allocation61_spill] sm:$0xff] %v16878_v40  ;;  %v18532_v40 = vunpack.i.h.bf16 %v16849_v28 }
 0x5b7   : > { %12759 = vmatmul.mubr.msk.bf16.gmra.mrb[64].mxu1 %vm588_vm15, %v6678_v36  ;;  %v16876_v22 = vpop.permute.xlu0 %14360  ;;  %v16882_v51 = vpop.permute.xlu1 %14375 }
 0x5b8   : > { %12762 = vmatprep.mubr.msk.bf16.mxu1 %vm588_vm15, %v6679_v20  ;;  %18509 = vst [vmem:[#allocation60_spill] sm:$0xff] %v16876_v22  ;;  %18512 = vst [vmem:[#allocation63_spill] sm:$0xff] %v16882_v51 }
 0x5bb   : > { %v16880_v30 = vpop.permute.xlu0 %14370  ;;  %v16886_v7 = vpop.permute.xlu1 %14385 }
 0x5bc   : > { %18511 = vst [vmem:[#allocation62_spill] sm:$0xff] %v16880_v30  ;;  %18514 = vst [vmem:[#allocation65_spill] sm:$0xff] %v16886_v7 }
 0x5bf   : > { %12763 = vmatmul.mubr.msk.bf16.gmra.mrb[68].mxu1 %vm588_vm15, %v6680_v57  ;;  %v16884_v52 = vpop.permute.xlu0 %14380  ;;  %v16890_v20 = vpop.permute.xlu1 %14395 }
 0x5c0   : > { %18513 = vst [vmem:[#allocation64_spill] sm:$0xff] %v16884_v52  ;;  %18516 = vst [vmem:[#allocation67_spill] sm:$0xff] %v16890_v20 }
 0x5c3   : > { %v16888_v36 = vpop.permute.xlu0 %14390  ;;  %v16894_v59 = vpop.permute.xlu1 %14405 }
 0x5c4   : > { %18515 = vst [vmem:[#allocation66_spill] sm:$0xff] %v16888_v36  ;;  %18518 = vst [vmem:[#allocation69_spill] sm:$0xff] %v16894_v59 }
 0x5c7   : > { %v16892_v2 = vpop.permute.xlu0 %14400  ;;  %v16910_v23 = vpop.permute.xlu1 %14415 }
 0x5c8   : > { %18517 = vst [vmem:[#allocation68_spill] sm:$0xff] %v16892_v2  ;;  %18520 = vst [vmem:[#allocation71_spill] sm:$0xff] %v16910_v23 }
 0x5cb   : > { %v16896_v57 = vpop.permute.xlu0 %14410  ;;  %v16938_v24 = vpop.permute.xlu1 %14425 }
 0x5cc   : > { %18519 = vst [vmem:[#allocation70_spill] sm:$0xff] %v16896_v57  ;;  %18522 = vst [vmem:[#allocation73_spill] sm:$0xff] %v16938_v24 }
 0x5cf   : > { %v16920_v25 = vpop.permute.xlu0 %14420  ;;  %v16968_v57 = vpop.permute.xlu1 %14435 }
 0x5d0   : > { %18521 = vst [vmem:[#allocation72_spill] sm:$0xff] %v16920_v25  ;;  %18524 = vst [vmem:[#allocation75_spill] sm:$0xff] %v16968_v57 }
 0x5d3   : > { %v16949_v41 = vpop.permute.xlu0 %14430  ;;  %v17005_v30 = vpop.permute.xlu1 %14445 }
 0x5d4   : > { %18523 = vst [vmem:[#allocation74_spill] sm:$0xff] %v16949_v41  ;;  %18528 = vst [vmem:[#allocation77_spill] sm:$0xff] %v17005_v30 }
 0x5d7   : > { %v16974_v25 = vpop.permute.xlu0 %14440 }
 0x5d8   : > { %18525 = vst [vmem:[#allocation76_spill] sm:$0xff] %v16974_v25 }
 0x652   : > { %v12732_v43 = vpop.f32.mrb[36].mxu1 }
 0x653   : > { %v6990_v58 = vadd.f32 %v12732_v43, %v16951_v3  ;;  %v6802_v56 = vpop.f32.mrb[37].mxu1 }
 0x654   : > { %v6988_v14 = vadd.f32 %v16951_v3, %v6802_v56  ;;  %v12733_v8 = vpop.f32.mrb[38].mxu1 }
 0x655   : > { %vm7026_vm1 = vcmp.ge.f32.partialorder %v6990_v58, 0.0  ;;  %v7062_v36 = vmul.f32 0.2, %v6990_v58  ;;  %v6991_v49 = vadd.f32 %v12733_v8, %v16951_v3  ;;  %v6805_v23 = vpop.f32.mrb[39].mxu1 }
 0x656   : > { %vm7024_vm13 = vcmp.ge.f32.partialorder %v6988_v14, 0.0  ;;  %v7060_v50 = vmul.f32 0.2, %v6988_v14  ;;  %v6989_v39 = vadd.f32 %v16951_v3, %v6805_v23 }
 0x657   : > { %v7098_v41 = vsel %vm7026_vm1, %v6990_v58, %v7062_v36  ;;  %vm7027_vm4 = vcmp.ge.f32.partialorder %v6991_v49, 0.0  ;;  %v7063_v56 = vmul.f32 0.2, %v6991_v49  ;;  %vm14948_vm1 = vmmov 0  }
 0x658   : > { %v7134_v20 = vsel %vm3762_vm3, %v7098_v41, 0.0  ;;  %v7096_v24 = vsel %vm7024_vm13, %v6988_v14, %v7060_v50  ;;  %vm7025_vm8 = vcmp.ge.f32.partialorder %v6989_v39, 0.0  ;;  %v7061_v8 = vmul.f32 0.2, %v6989_v39  ;;  %12774 = vmatprep.mubr.msk.bf16.mxu0 %vm14948_vm1, %v18507_v60 }
 0x659   : > { %v7207_v59 = vrot.slane %v7134_v20, 7  ;;  %v7316_v2 = vrot.slane %v7134_v20, 1  ;;  %v7132_v43 = vsel %vm3760_vm5, %v7096_v24, 0.0  ;;  %v7783_v57 = vmul.f32 0.5, %v7134_v20 }
 0x65a   : > { %v7204_v34 = vrot.slane %v7132_v43, 7  ;;  %v7313_v23 = vrot.slane %v7132_v43, 1  ;;  %v7099_v9 = vsel %vm7027_vm4, %v6991_v49, %v7063_v56  ;;  %v12736_v46 = vpop.f32.mrb[40].mxu1  ;;  %v7097_v36 = vsel %vm7025_vm8, %v6989_v39, %v7061_v8 }
 0x65b   : > { %v16984_v58 = vsel %vm3763_vm7, %v7099_v9, 0.0  ;;  %v6994_v14 = vadd.f32 %v12736_v46, %v16951_v3  ;;  %v6818_v50 = vpop.f32.mrb[41].mxu1  ;;  %v7781_v27 = vmul.f32 0.5, %v7132_v43  ;;  %v18526_v49 = vunpack.i.l.bf16 %v16853_v11 }
 0x65c   : > { %v7311_v41 = vsel %vm765_vm0, 0.0, %v7204_v34  ;;  %v18413_v16 = vrot.slane %v16984_v58, 7  ;;  %v18418_v24 = vrot.slane %v16984_v58, 1  ;;  %v12737_v20 = vpop.f32.mrb[42].mxu1  ;;  %v7784_v39 = vmul.f32 0.5, %v16984_v58 }
 0x65d   : > { %v7745_v9 = vmul.f32 %v18526_v49, %v7311_v41  ;;  %v7133_v46 = vsel %vm3761_vm10, %v7097_v36, 0.0  ;;  %v7066_v56 = vmul.f32 0.2, %v6994_v14  ;;  %v6821_v8 = vpop.f32.mrb[43].mxu1  ;;  %v18527_v41 = vunpack.i.h.bf16 %v16847_v19 }
 0x65e   : > { %v7210_v43 = vsel %vm765_vm0, %v7207_v59, %v18413_v16  ;;  %v7319_v7 = vsel %vm7312_vm9, %v7316_v2, %v18418_v24  ;;  %v7205_v51 = vrot.slane %v7133_v46, 7  ;;  %v7314_v60 = vrot.slane %v7133_v46, 1 }
 0x65f   : > { %v7817_v13 = vadd.f32 %v7781_v27, %v7745_v9  ;;  %v7748_v49 = vmul.f32 %v18527_v41, %v7210_v43  ;;  %v7782_v52 = vmul.f32 0.5, %v7133_v46  ;;  %vm7030_vm8 = vcmp.ge.f32.partialorder %v6994_v14, 0.0 }
 0x660   : > { %v7206_v36 = vsel %vm765_vm0, %v7204_v34, %v7205_v51  ;;  %v7208_v35 = vsel %vm765_vm0, %v7205_v51, %v7207_v59  ;;  %v7315_v16 = vsel %vm7312_vm9, %v7313_v23, %v7314_v60  ;;  %v7317_v12 = vsel %vm7312_vm9, %v7314_v60, %v7316_v2 }
 0x661   : > { %v17011_v1 = vadd.f32 %v7784_v39, %v7748_v49  ;;  %v18529_v24 = vunpack.i.h.bf16 %v16853_v11  ;;  %v18530_v9 = vunpack.i.l.bf16 %v16847_v19  ;;  %v18531_v46 = vunpack.i.l.bf16 %v16855_v15 }
 0x662   : > { %v8035_v34 = vmul.f32 %v18532_v40, %v7319_v7  ;;  %v7102_v4 = vsel %vm7030_vm8, %v6994_v14, %v7066_v56  ;;  %v6992_v51 = vadd.f32 %v16951_v3, %v6818_v50  ;;  %v6995_v59 = vadd.f32 %v12737_v20, %v16951_v3  ;;  %v12740_v60 = vpop.f32.mrb[44].mxu1  ;;  %v17031_v14 = vpop.permute.xlu0 %14450 }
 0x663   : > { %v7746_v27 = vmul.f32 %v18529_v24, %v7206_v36  ;;  %v7747_v43 = vmul.f32 %v18530_v9, %v7208_v35  ;;  %v8033_v41 = vmul.f32 %v18531_v46, %v7315_v16  ;;  %v18533_v11 = vunpack.i.h.bf16 %v16855_v15  ;;  %v6834_v19 = vpop.f32.mrb[45].mxu1  ;;  %18534 = vst [vmem:[#allocation78_spill] sm:$0xff] %v17031_v14  ;;  %v17036_v20 = vpop.permute.xlu1 %14455 }
 0x664   : > { %v17029_v40 = vsel %vm3766_vm14, %v7102_v4, 0.0  ;;  %vm7028_vm13 = vcmp.ge.f32.partialorder %v6992_v51, 0.0  ;;  %v12741_v7 = vpop.f32.mrb[46].mxu1  ;;  %v7064_v15 = vmul.f32 0.2, %v6992_v51  ;;  %vm7031_vm4 = vcmp.ge.f32.partialorder %v6995_v59, 0.0 }
 0x665   : > { %v7818_v2 = vadd.f32 %v7782_v52, %v7746_v27  ;;  %v7819_v23 = vadd.f32 %v7783_v57, %v7747_v43  ;;  %v8034_v24 = vmul.f32 %v18533_v11, %v7317_v12  ;;  %v8069_v39 = vadd.f32 %v8033_v41, %v7817_v13  ;;  %v6837_v12 = vpop.f32.mrb[47].mxu1  ;;  %18535 = vst [vmem:[#allocation79_spill] sm:$0xff] %v17036_v20 }
 0x666   : > { %v7067_v56 = vmul.f32 0.2, %v6995_v59  ;;  %v6993_v4 = vadd.f32 %v16951_v3, %v6821_v8  ;;  %v7215_v27 = vrot.slane %v17029_v40, 7  ;;  %v7100_v9 = vsel %vm7028_vm13, %v6992_v51, %v7064_v15 }
 0x667   : > { %v8070_v50 = vadd.f32 %v8034_v24, %v7818_v2  ;;  %v8071_v52 = vadd.f32 %v8035_v34, %v7819_v23  ;;  %8105 = vst.msk [vmem:[#allocation3 + $0x13] sm:$0xff] %vm588_vm15, %v8069_v39  ;;  %v7136_v43 = vsel %vm3764_vm12, %v7100_v9, 0.0  ;;  %v7324_v8 = vrot.slane %v17029_v40, 1 }
 0x668   : > { %v7103_v46 = vsel %vm7031_vm4, %v6995_v59, %v7067_v56  ;;  %vm7029_vm8 = vcmp.ge.f32.partialorder %v6993_v4, 0.0  ;;  %v7065_v41 = vmul.f32 0.2, %v6993_v4  ;;  %v7211_v34 = vrot.slane %v7136_v43, 7 }
 0x669   : > { %8106 = vst.msk [vmem:[#allocation3 + $0x1b] sm:$0xff] %vm588_vm15, %v8070_v50  ;;  %8107 = vst.msk [vmem:[#allocation3 + $0x23] sm:$0xff] %vm588_vm15, %v8071_v52  ;;  %v7320_v2 = vrot.slane %v7136_v43, 1  ;;  %v17050_v23 = vsel %vm3767_vm6, %v7103_v46, 0.0  ;;  %v6998_v51 = vadd.f32 %v12740_v60, %v16951_v3  ;;  %v18536_v59 = vrot.slane %v16984_v58, 7 }
 0x66a   : > { %v18424_v11 = vrot.slane %v17050_v23, 7  ;;  %v18423_v24 = vrot.slane %v17050_v23, 1  ;;  %v7101_v39 = vsel %vm7029_vm8, %v6993_v4, %v7065_v41  ;;  %v17055_v50 = vpop.f32.mrb[48].mxu1  ;;  %v18537_v15 = vrot.slane %v16984_v58, 1 }
 0x66b   : > { %v7212_v52 = vsel %vm765_vm0, %v18536_v59, %v7211_v34  ;;  %v7785_v9 = vmul.f32 0.5, %v7136_v43  ;;  %vm18538_vm13 = vcmp.eq.s32.totalorder %v16339_v32, 1  ;;  %v17065_v57 = vpop.f32.mrb[49].mxu1  ;;  %v18539_v4 = vunpack.i.l.bf16 %v16849_v28 }
 0x66c   : > { %v7321_v56 = vsel %vm7312_vm9, %v18537_v15, %v7320_v2  ;;  %v7137_v46 = vsel %vm18538_vm13, %v7101_v39, 0.0  ;;  %v18540_v60 = vunpack.i.l.bf16 %v16851_v6  ;;  %v7218_v59 = vsel %vm765_vm0, %v7215_v27, %v18424_v11  ;;  %v17077_v43 = vpop.f32.mrb[50].mxu1 }
 0x66d   : > { %v7749_v41 = vmul.f32 %v18539_v4, %v7212_v52  ;;  %v7327_v58 = vsel %vm7312_vm9, %v7324_v8, %v18423_v24  ;;  %v7787_v39 = vmul.f32 0.5, %v17029_v40  ;;  %v18541_v15 = vunpack.i.l.bf16 %v16859_v10  ;;  %v17083_v4 = vpop.f32.mrb[51].mxu1 }
 0x66e   : > { %v8036_v36 = vmul.f32 %v18540_v60, %v7321_v56  ;;  %v7788_v28 = vmul.f32 0.5, %v17050_v23  ;;  %v7213_v52 = vrot.slane %v7137_v46, 7  ;;  %v7322_v13 = vrot.slane %v7137_v46, 1 }
 0x66f   : > { %v7752_v49 = vmul.f32 %v18541_v15, %v7218_v59  ;;  %v7821_v56 = vadd.f32 %v7785_v9, %v7749_v41  ;;  %v6996_v16 = vadd.f32 %v16951_v3, %v6834_v19  ;;  %vm7034_vm4 = vcmp.ge.f32.partialorder %v6998_v51, 0.0 }
 0x670   : > { %v8072_v60 = vadd.f32 %v8036_v36, %v17011_v1  ;;  %v6999_v24 = vadd.f32 %v12741_v7, %v16951_v3  ;;  %v17091_v40 = vadd.f32 %v16951_v3, %v6837_v12  ;;  %v7214_v59 = vsel %vm765_vm0, %v7211_v34, %v7213_v52 }
 0x671   : > { %v17087_v35 = vadd.f32 %v7788_v28, %v7752_v49  ;;  %v7216_v15 = vsel %vm765_vm0, %v7213_v52, %v7215_v27  ;;  %v7323_v9 = vsel %vm7312_vm9, %v7320_v2, %v7322_v13  ;;  %v7786_v1 = vmul.f32 0.5, %v7137_v46 }
 0x672   : > { %8108 = vst.msk [vmem:[#allocation3 + $0x2b] sm:$0xff] %vm588_vm15, %v8072_v60  ;;  %v7325_v36 = vsel %vm7312_vm9, %v7322_v13, %v7324_v8  ;;  %v18542_v19 = vunpack.i.l.bf16 %v16857_v48  ;;  %v18543_v41 = vunpack.i.h.bf16 %v16857_v48  ;;  %v18544_v12 = vunpack.i.h.bf16 %v16851_v6  ;;  %v17106_v52 = vpop.f32.mrb[52].mxu1  ;;  %v8157_v48 = vld [vmem:[#allocation3 + $0x19] sm:$0xff] }
 0x673   : > { %v18545_v60 = vunpack.i.h.bf16 %v16861_v62  ;;  %v7070_v34 = vmul.f32 0.2, %v6998_v51  ;;  %vm7032_vm8 = vcmp.ge.f32.partialorder %v6996_v16, 0.0  ;;  %v7068_v27 = vmul.f32 0.2, %v6996_v16 }
 0x674   : > { %v7750_v49 = vmul.f32 %v18542_v19, %v7214_v59  ;;  %v7751_v7 = vmul.f32 %v18543_v41, %v7216_v15  ;;  %v8037_v28 = vmul.f32 %v18544_v12, %v7323_v9  ;;  %v18546_v13 = vunpack.i.l.bf16 %v16861_v62  ;;  %v17110_v19 = vpop.f32.mrb[53].mxu1  ;;  %v8226_v15 = vld [vmem:[#allocation3 + $0x13] sm:$0xff]  ;;  %v17115_v12 = vpop.permute.xlu0 %14460 }
 0x675   : > { %v8039_v11 = vmul.f32 %v18545_v60, %v7327_v58  ;;  %v7106_v6 = vsel %vm7034_vm4, %v6998_v51, %v7070_v34  ;;  %v7104_v9 = vsel %vm7032_vm8, %v6996_v16, %v7068_v27  ;;  %vm7035_vm13 = vcmp.ge.f32.partialorder %v6999_v24, 0.0  ;;  %v17113_v41 = vpop.f32.mrb[54].mxu1 }
 0x676   : > { %v7822_v2 = vadd.f32 %v7786_v1, %v7750_v49  ;;  %v7823_v46 = vadd.f32 %v7787_v39, %v7751_v7  ;;  %v8038_v8 = vmul.f32 %v18546_v13, %v7325_v36  ;;  %v8073_v59 = vadd.f32 %v8037_v28, %v7821_v56  ;;  %v17126_v51 = vpop.f32.mrb[55].mxu1 }
 0x677   : > { %v7071_v58 = vmul.f32 0.2, %v6999_v24  ;;  %v17120_v62 = vsel %vm18547_vm11, %v7106_v6, 0.0  ;;  %v17124_v39 = vsel %vm18548_vm2, %v7104_v9, 0.0  ;;  %vm8146_vm4 = vcmask 517120  }
 0x678   : > { %v8074_v60 = vadd.f32 %v8038_v8, %v7822_v2  ;;  %v8075_v1 = vadd.f32 %v8039_v11, %v7823_v46  ;;  %8109 = vst.msk [vmem:[#allocation3 + $0x33] sm:$0xff] %vm588_vm15, %v8073_v59  ;;  %v18428_v36 = vrot.slane %v17124_v39, 7  ;;  %v8193_v11 = vmul.f32 0.25, %v8157_v48 }
 0x679   : > { %v17131_v49 = vmul.f32 0.5, %v8226_v15  ;;  %v8141_v7 = vld [vmem:[#allocation3 + $0x24] sm:$0xff]  ;;  %v18427_v28 = vrot.slane %v17124_v39, 1  ;;  %v7107_v34 = vsel %vm7035_vm13, %v6999_v24, %v7071_v58  ;;  %v18436_v2 = vrot.slane %v17120_v62, 7 }
 0x67a   : > { %8110 = vst.msk [vmem:[#allocation3 + $0x3b] sm:$0xff] %vm588_vm15, %v8074_v60  ;;  %8111 = vst.msk [vmem:[#allocation3 + $0x43] sm:$0xff] %vm588_vm15, %v8075_v1  ;;  %v8229_v27 = vld [vmem:[#allocation3 + $0x2b] sm:$0xff]  ;;  %v18549_v46 = vrot.slane %v17050_v23, 7  ;;  %vm18550_vm2 = vcmp.eq.s32.totalorder %v16367_v26, 1  ;;  %vm7033_vm11 = vcmp.ge.f32.partialorder %v17091_v40, 0.0  ;;  %v18552_v48 = vunpack.i.h.bf16 %v16859_v10 }
 0x67b   : > { %8144 = vst.msk [vmem:[#allocation3] sm:$0xff] %vm588_vm15, %v8141_v7  ;;  %v17146_v8 = vsel %vm18550_vm2, %v7107_v34, 0.0  ;;  %v18551_v24 = vrot.slane %v17050_v23, 1  ;;  %v7789_v6 = vmul.f32 0.5, %v17124_v39  ;;  %v8158_v58 = vld [vmem:[#allocation3 + $0x21] sm:$0xff]  ;;  %v7332_v7 = vrot.slane %v17120_v62, 1 }
 0x67c   : > { %v7220_v13 = vsel %vm765_vm0, %v18549_v46, %v18428_v36  ;;  %v18435_v9 = vrot.slane %v17146_v8, 7  ;;  %v8227_v60 = vld [vmem:[#allocation3 + $0x1b] sm:$0xff]  ;;  %v8228_v1 = vld [vmem:[#allocation3 + $0x23] sm:$0xff]  ;;  %v18553_v34 = vunpack.i.l.bf16 %v16863_v17  ;;  %v7002_v23 = vadd.f32 %v17055_v50, %v16951_v3 }
 0x67d   : > { %v7329_v59 = vsel %vm7312_vm9, %v18551_v24, %v18427_v28  ;;  %v7753_v15 = vmul.f32 %v18552_v48, %v7220_v13  ;;  %v17164_v24 = vpop.f32.mrb[56].mxu1  ;;  %v8159_v10 = vld [vmem:[#allocation3 + $0x29] sm:$0xff]  ;;  %v8265_v13 = vmul.f32 0.5, %v8229_v27  ;;  %v7069_v28 = vmul.f32 0.2, %v17091_v40 }
 0x67e   : > { %v8040_v46 = vmul.f32 %v18553_v34, %v7329_v59  ;;  %v7226_v16 = vsel %vm765_vm0, %v18436_v2, %v18435_v9  ;;  %v17174_v59 = vpop.f32.mrb[57].mxu1  ;;  %v8334_v34 = vld [vmem:[#allocation3 + $0x25] sm:$0xff]  ;;  %v18555_v20 = vrot.slane %v17146_v8, 1  ;;  %v7792_v14 = vmul.f32 0.5, %v17146_v8 }
 0x67f   : > { %v17166_v48 = vadd.f32 %v7789_v6, %v7753_v15  ;;  %18554 = vst [vmem:[#allocation80_spill] sm:$0xff] %v17174_v59  ;;  %v8142_v36 = vld [vmem:[#allocation3 + $0x2c] sm:$0xff]  ;;  %v8143_v56 = vld [vmem:[#allocation3 + $0x34] sm:$0x3]  ;;  %v18556_v15 = vunpack.i.l.bf16 %v16867_v42  ;;  %v8194_v30 = vmul.f32 0.25, %v8158_v58  ;;  %v8263_v9 = vmul.f32 0.5, %v8227_v60 }
 0x680   : > { %v8076_v50 = vadd.f32 %v8040_v46, %v17087_v35  ;;  %v7335_v27 = vsel %vm7312_vm9, %v7332_v7, %v18555_v20  ;;  %v8264_v2 = vmul.f32 0.5, %v8228_v1  ;;  %8145 = vst.msk [vmem:[#allocation3 + $0x8] sm:$0xff] %vm588_vm15, %v8142_v36  ;;  %v8160_v25 = vld [vmem:[#allocation3 + $0x31] sm:$0xff]  ;;  %v7105_v35 = vsel %vm7033_vm11, %v17091_v40, %v7069_v28  ;;  %v17188_v46 = vpop.f32.mrb[58].mxu1 }
 0x681   : > { %v7756_v6 = vmul.f32 %v18556_v15, %v7226_v16  ;;  %8147 = vst.msk [vmem:[#allocation3 + $0x10] sm:$0x3] %vm8146_vm4, %v8143_v56  ;;  %18557 = vst [vmem:[#allocation81_spill] sm:$0xff] %v17188_v46  ;;  %v8230_v20 = vld [vmem:[#allocation3 + $0x33] sm:$0xff]  ;;  %v7791_v16 = vmul.f32 0.5, %v17120_v62  ;;  %vm18558_vm8 = vcmp.eq.s32.totalorder %v16359_v38, 1  ;;  %v8301_v26 = vadd.f32 %v8265_v13, %v8193_v11 }
 0x682   : > { %v8335_v59 = vld [vmem:[#allocation3 + $0x2d] sm:$0xff]  ;;  %8112 = vst.msk [vmem:[#allocation3 + $0x4b] sm:$0xff] %vm588_vm15, %v8076_v50  ;;  %v7141_v36 = vsel %vm18558_vm8, %v7105_v35, 0.0  ;;  %v7074_v60 = vmul.f32 0.2, %v7002_v23  ;;  %v17196_v56 = vmul.f32 0.25, %v8159_v10  ;;  %v8043_v53 = vmul.f32 %v18559_v18, %v7335_v27 }
 0x683   : > { %v17192_v58 = vadd.f32 %v7792_v14, %v7756_v6  ;;  %v8370_v1 = vmul.f32 0.25, %v8334_v34  ;;  %v8231_v15 = vld [vmem:[#allocation3 + $0x3b] sm:$0xff]  ;;  %vm7038_vm13 = vcmp.ge.f32.partialorder %v7002_v23, 0.0  ;;  %v17198_v28 = vmul.f32 0.25, %v8160_v25  ;;  %v17206_v50 = vpop.f32.mrb[59].mxu1  ;;  %v8232_v44 = vld [vmem:[#allocation3 + $0x43] sm:$0xff] }
 0x684   : > { %v8337_v40 = vld [vmem:[#allocation3 + $0x3d] sm:$0xff]  ;;  %v17204_v14 = vadd.f32 %v16951_v3, %v17065_v57  ;;  %18560 = vst [vmem:[#allocation82_spill] sm:$0xff] %v17206_v50  ;;  %v8266_v6 = vmul.f32 0.5, %v8230_v20  ;;  %v8371_v10 = vmul.f32 0.25, %v8335_v59  ;;  %v7221_v35 = vrot.slane %v7141_v36, 7  ;;  %v17210_v22 = vpop.f32.mrb[60].mxu1 }
 0x685   : > { %v8373_v46 = vmul.f32 0.25, %v8337_v40  ;;  %v7330_v34 = vrot.slane %v7141_v36, 1  ;;  %v17208_v38 = vmul.f32 0.5, %v8231_v15  ;;  %v7790_v13 = vmul.f32 0.5, %v7141_v36  ;;  %18561 = vst [vmem:[#allocation83_spill] sm:$0xff] %v17210_v22  ;;  %v8336_v40 = vld [vmem:[#allocation3 + $0x35] sm:$0xff] }
 0x686   : > { %v7110_v25 = vsel %vm7038_vm13, %v7002_v23, %v7074_v60  ;;  %v18562_v18 = vrot.slane %v17124_v39, 7  ;;  %v18563_v57 = vrot.slane %v17120_v62, 7  ;;  %v18564_v59 = vrot.slane %v17124_v39, 1 }
 0x687   : > { %v8409_v11 = vadd.f32 %v8373_v46, %v8301_v26  ;;  %v7333_v15 = vsel %vm7312_vm9, %v7330_v34, %v7332_v7  ;;  %v17222_v26 = vpop.f32.mrb[61].mxu1  ;;  %v8154_v23 = vld [vmem:[#allocation3 + $0x1] sm:$0xff]  ;;  %v18567_v62 = vunpack.i.h.bf16 %v16865_v0  ;;  %v18568_v39 = vunpack.i.h.bf16 %v16863_v17 }
 0x688   : > { %v7222_v27 = vsel %vm765_vm0, %v18562_v18, %v7221_v35  ;;  %v7224_v50 = vsel %vm765_vm0, %v7221_v35, %v18563_v57  ;;  %v7331_v20 = vsel %vm7312_vm9, %v18564_v59, %v7330_v34  ;;  %18565 = vst [vmem:[#allocation84_spill] sm:$0xff] %v17222_v26  ;;  %v8155_v46 = vld [vmem:[#allocation3 + $0x9] sm:$0xff]  ;;  %v8156_v36 = vld [vmem:[#allocation3 + $0x11] sm:$0xff]  ;;  %v18566_v18 = vunpack.i.l.bf16 %v16865_v0  ;;  %v17232_v59 = vpop.f32.mrb[62].mxu1 }
 0x689   : > { %v8445_v60 = vsel %vm3763_vm7, %v8409_v11, 0.0  ;;  %v7755_v35 = vmul.f32 %v18567_v62, %v7224_v50  ;;  %v8041_v57 = vmul.f32 %v18568_v39, %v7331_v20  ;;  %v8190_v7 = vmul.f32 0.25, %v8154_v23  ;;  %v8338_v61 = vld [vmem:[#allocation3 + $0x45] sm:$0xff]  ;;  %v17237_v50 = vpop.f32.mrb[63].mxu1 }
 0x68a   : > { %v7754_v22 = vmul.f32 %v18566_v18, %v7222_v27  ;;  %v8191_v34 = vmul.f32 0.25, %v8155_v46  ;;  %v8192_v26 = vmul.f32 0.25, %v8156_v36  ;;  %v8302_v29 = vadd.f32 %v8266_v6, %v8194_v30  ;;  %8481 = vst.msk [vmem:[#allocation2 + $0x2b] sm:$0xff] %vm588_vm15, %v8445_v60  ;;  %v8233_v23 = vld [vmem:[#allocation3 + $0x4b] sm:$0xff]  ;;  %v8161_v60 = vld [vmem:[#allocation3 + $0x39] sm:$0xff] }
 0x68b   : > { %v8372_v11 = vmul.f32 0.25, %v8336_v40  ;;  %v8374_v32 = vmul.f32 0.25, %v8338_v61  ;;  %v18569_v27 = vunpack.i.l.bf16 %v16870_v21  ;;  %v8298_v17 = vadd.f32 %v17131_v49, %v8190_v7  ;;  %v8163_v61 = vld [vmem:[#allocation3 + $0x49] sm:$0xff] }
 0x68c   : > { %v7826_v55 = vadd.f32 %v7790_v13, %v7754_v22  ;;  %v8299_v20 = vadd.f32 %v8263_v9, %v8191_v34  ;;  %v8300_v18 = vadd.f32 %v8264_v2, %v8192_v26  ;;  %v7827_v46 = vadd.f32 %v7791_v16, %v7755_v35 }
 0x68d   : > { %v8042_v0 = vmul.f32 %v18569_v27, %v7333_v15  ;;  %v8268_v36 = vmul.f32 0.5, %v8232_v44  ;;  %v8410_v62 = vadd.f32 %v8374_v32, %v8302_v29  ;;  %v8077_v30 = vadd.f32 %v8041_v57, %v17166_v48  ;;  %v8162_v15 = vld [vmem:[#allocation3 + $0x41] sm:$0xff]  ;;  %v17247_v32 = vpop.f32.mrb[64].mxu1 }
 0x68e   : > { %v8406_v40 = vadd.f32 %v8370_v1, %v8298_v17  ;;  %v8407_v39 = vadd.f32 %v8371_v10, %v8299_v20  ;;  %v8408_v22 = vadd.f32 %v8372_v11, %v8300_v18  ;;  %v8079_v13 = vadd.f32 %v8043_v53, %v7827_v46 }
 0x68f   : > { %v8078_v6 = vadd.f32 %v8042_v0, %v7826_v55  ;;  %v14462_v21 = vunpack.i.l.bf16 %v17115_v12  ;;  %v8269_v27 = vmul.f32 0.5, %v8233_v23  ;;  %v8446_v49 = vsel %vm3764_vm12, %v8410_v62, 0.0  ;;  %8113 = vst.msk [vmem:[#allocation3 + $0x53] sm:$0xff] %vm588_vm15, %v8077_v30  ;;  %v17258_v55 = vpop.f32.mrb[65].mxu1 }
 0x690   : > { %vm7036_vm7 = vcmp.ge.f32.partialorder %v17204_v14, 0.0  ;;  %v8442_v29 = vsel %vm3760_vm5, %v8406_v40, 0.0  ;;  %v8443_v44 = vsel %vm3761_vm10, %v8407_v39, 0.0  ;;  %v8444_v53 = vsel %vm3762_vm3, %v8408_v22, 0.0  ;;  %8482 = vst.msk [vmem:[#allocation2 + $0x33] sm:$0xff] %vm588_vm15, %v8446_v49  ;;  %8115 = vst.msk [vmem:[#allocation3 + $0x63] sm:$0xff] %vm588_vm15, %v8079_v13 }
 0x691   : > { %8114 = vst.msk [vmem:[#allocation3 + $0x5b] sm:$0xff] %vm588_vm15, %v8078_v6  ;;  %v7072_v45 = vmul.f32 0.2, %v17204_v14  ;;  %v8197_v2 = vmul.f32 0.25, %v8161_v60  ;;  %8478 = vst.msk [vmem:[#allocation2 + $0x13] sm:$0xff] %vm588_vm15, %v8442_v29  ;;  %vm18570_vm5 = vcmp.eq.s32.totalorder %v16389_v33, 1  ;;  %v7003_v5 = vadd.f32 %v17077_v43, %v16951_v3 }
 0x692   : > { %8479 = vst.msk [vmem:[#allocation2 + $0x1b] sm:$0xff] %vm588_vm15, %v8443_v44  ;;  %8480 = vst.msk [vmem:[#allocation2 + $0x23] sm:$0xff] %vm588_vm15, %v8444_v53  ;;  %v17265_v31 = vsel %vm18570_vm5, %v7110_v25, 0.0  ;;  %v7001_v54 = vadd.f32 %v16951_v3, %v17083_v4  ;;  %v17271_v9 = vpop.f32.mrb[66].mxu1  ;;  %v17273_v48 = vmul.f32 0.25, %v8162_v15  ;;  %v8303_v16 = vadd.f32 %v17208_v38, %v17196_v56 }
 0x693   : > { %v8304_v1 = vadd.f32 %v8268_v36, %v17198_v28  ;;  %v7108_v10 = vsel %vm7036_vm7, %v17204_v14, %v7072_v45  ;;  %v17281_v25 = vpop.f32.mrb[67].mxu1  ;;  %v17283_v26 = vmul.f32 0.25, %v8163_v61  ;;  %vm18571_vm3 = vcmp.eq.s32.totalorder %v16372_v47, 1 }
 0x694   : > { %v17287_v43 = vsel %vm18571_vm3, %v7108_v10, 0.0  ;;  %vm7039_vm10 = vcmp.ge.f32.partialorder %v7003_v5, 0.0  ;;  %v7075_v4 = vmul.f32 0.2, %v7003_v5  ;;  %v8305_v35 = vadd.f32 %v8269_v27, %v8197_v2  ;;  %v17328_v61 = vpop.f32.mrb[68].mxu1 }
 0x695   : > { %v7231_v57 = vrot.slane %v17265_v31, 7  ;;  %v7227_v38 = vrot.slane %v17287_v43, 7  ;;  %v7336_v56 = vrot.slane %v17287_v43, 1  ;;  %v7340_v28 = vrot.slane %v17265_v31, 1  ;;  %v17332_v53 = vpop.f32.mrb[69].mxu1 }
 0x696   : > { %v17294_v14 = vmul.f32 0.5, %v17265_v31  ;;  %v7111_v7 = vsel %vm7039_vm10, %v7003_v5, %v7075_v4  ;;  %v7073_v34 = vmul.f32 0.2, %v7001_v54  ;;  %v18572_v11 = vrot.slane %v17146_v8, 7  ;;  %v8234_v31 = vld [vmem:[#allocation3 + $0x53] sm:$0xff] }
 0x697   : > { %v18573_v17 = vrot.slane %v17146_v8, 1  ;;  %vm7037_vm12 = vcmp.ge.f32.partialorder %v7001_v54, 0.0  ;;  %v7006_v18 = vadd.f32 %v17106_v52, %v16951_v3  ;;  %v18574_v23 = vunpack.i.h.bf16 %v16867_v42  ;;  %v8339_v8 = vld [vmem:[#allocation3 + $0x4d] sm:$0xff] }
 0x698   : > { %v7228_v0 = vsel %vm765_vm0, %v18572_v11, %v7227_v38  ;;  %vm18575_vm2 = vcmp.eq.s32.totalorder %v16400_v37, 1  ;;  %v7004_v62 = vadd.f32 %v16951_v3, %v17110_v19  ;;  %v17314_v30 = vadd.f32 %v17113_v41, %v16951_v3  ;;  %v8340_v6 = vld [vmem:[#allocation3 + $0x55] sm:$0xff]  ;;  %v8341_v60 = vld [vmem:[#allocation3 + $0x5d] sm:$0xff] }
 0x699   : > { %v7337_v20 = vsel %vm7312_vm9, %v18573_v17, %v7336_v56  ;;  %v7757_v46 = vmul.f32 %v18574_v23, %v7228_v0  ;;  %v17308_v36 = vsel %vm18575_vm2, %v7111_v7, 0.0  ;;  %v7793_v40 = vmul.f32 0.5, %v17287_v43  ;;  %v18583_v11 = vld [vmem:[#allocation60_spill] sm:$0xff] }
 0x69a   : > { %v18576_v52 = vunpack.i.l.bf16 %v16872_v63  ;;  %v17321_v39 = vadd.f32 %v16951_v3, %v17126_v51  ;;  %v17325_v22 = vadd.f32 %v17164_v24, %v16951_v3  ;;  %v8375_v19 = vmul.f32 0.25, %v8339_v8  ;;  %v17335_v24 = vpop.f32.mrb[70].mxu1 }
 0x69b   : > { %v8376_v13 = vmul.f32 0.25, %v8340_v6  ;;  %v8377_v41 = vmul.f32 0.25, %v8341_v60  ;;  %v7109_v15 = vsel %vm7037_vm12, %v7001_v54, %v7073_v34  ;;  %v7829_v27 = vadd.f32 %v7793_v40, %v7757_v46  ;;  %v17343_v10 = vpop.f32.mrb[71].mxu1 }
 0x69c   : > { %v8044_v42 = vmul.f32 %v18576_v52, %v7337_v20  ;;  %v7233_v29 = vrot.slane %v17308_v36, 7  ;;  %v7078_v44 = vmul.f32 0.2, %v7006_v18  ;;  %v8411_v51 = vadd.f32 %v8375_v19, %v8303_v16  ;;  %v18579_v16 = vld [vmem:[#allocation31_spill] sm:$0xff] }
 0x69d   : > { %v8412_v45 = vadd.f32 %v8376_v13, %v8304_v1  ;;  %v8413_v2 = vadd.f32 %v8377_v41, %v8305_v35  ;;  %v7342_v3 = vrot.slane %v17308_v36, 1  ;;  %vm7042_vm8 = vcmp.ge.f32.partialorder %v7006_v18, 0.0  ;;  %v8164_v41 = vld [vmem:[#allocation3 + $0x51] sm:$0xff] }
 0x69e   : > { %v8080_v49 = vadd.f32 %v8044_v42, %v17192_v58  ;;  %v7234_v5 = vsel %vm765_vm0, %v7231_v57, %v7233_v29  ;;  %v18577_v58 = vld [vmem:[#allocation38_spill] sm:$0xff]  ;;  %vm7040_vm13 = vcmp.ge.f32.partialorder %v7004_v62, 0.0  ;;  %vm18580_vm7 = vcmp.eq.s32.totalorder %v18579_v16, 1 }
 0x69f   : > { %vm18578_vm11 = vcmp.eq.s32.totalorder %v18577_v58, 1  ;;  %v8447_v1 = vsel %vm18580_vm7, %v8411_v51, 0.0  ;;  %v8448_v4 = vsel %vm3766_vm14, %v8412_v45, 0.0  ;;  %v8449_v7 = vsel %vm3767_vm6, %v8413_v2, 0.0 }
 0x6a0   : > { %8116 = vst.msk [vmem:[#allocation3 + $0x6b] sm:$0xff] %vm588_vm15, %v8080_v49  ;;  %v7145_v54 = vsel %vm18578_vm11, %v7109_v15, 0.0  ;;  %v7343_v34 = vsel %vm7312_vm9, %v7340_v28, %v7342_v3  ;;  %8483 = vst.msk [vmem:[#allocation2 + $0x3b] sm:$0xff] %vm588_vm15, %v8447_v1  ;;  %v18584_v0 = vunpack.i.l.bf16 %v18583_v11  ;;  %v7796_v20 = vmul.f32 0.5, %v17308_v36  ;;  %v18585_v49 = vld [vmem:[#allocation59_spill] sm:$0xff]  ;;  %v18592_v1 = vld [vmem:[#allocation41_spill] sm:$0xff] }
 0x6a1   : > { %8484 = vst.msk [vmem:[#allocation2 + $0x43] sm:$0xff] %vm588_vm15, %v8448_v4  ;;  %8485 = vst.msk [vmem:[#allocation2 + $0x4b] sm:$0xff] %vm588_vm15, %v8449_v7  ;;  %v7229_v23 = vrot.slane %v7145_v54, 7  ;;  %v7338_v46 = vrot.slane %v7145_v54, 1  ;;  %v8270_v8 = vmul.f32 0.5, %v8234_v31  ;;  %v7794_v6 = vmul.f32 0.5, %v7145_v54 }
 0x6a2   : > { %v7760_v17 = vmul.f32 %v18584_v0, %v7234_v5  ;;  %v7114_v60 = vsel %vm7042_vm8, %v7006_v18, %v7078_v44  ;;  %v7076_v40 = vmul.f32 0.2, %v7004_v62  ;;  %v18586_v51 = vunpack.i.l.bf16 %v18585_v49  ;;  %v18589_v44 = vld [vmem:[#allocation61_spill] sm:$0xff] }
 0x6a3   : > { %v7230_v42 = vsel %vm765_vm0, %v7227_v38, %v7229_v23  ;;  %v7232_v19 = vsel %vm765_vm0, %v7229_v23, %v7231_v57  ;;  %v7339_v13 = vsel %vm7312_vm9, %v7336_v56, %v7338_v46  ;;  %v7341_v15 = vsel %vm7312_vm9, %v7338_v46, %v7340_v28 }
 0x6a4   : > { %v7832_v52 = vadd.f32 %v7796_v20, %v7760_v17  ;;  %v7758_v45 = vmul.f32 %v18586_v51, %v7230_v42  ;;  %v18587_v2 = vunpack.i.h.bf16 %v18585_v49  ;;  %v18588_v5 = vunpack.i.h.bf16 %v16872_v63 }
 0x6a5   : > { %v18590_v54 = vunpack.i.h.bf16 %v18589_v44  ;;  %v18591_v38 = vunpack.i.l.bf16 %v18589_v44  ;;  %vm18593_vm14 = vcmp.eq.s32.totalorder %v18592_v1, 1  ;;  %v7112_v28 = vsel %vm7040_vm13, %v7004_v62, %v7076_v40  ;;  %v18594_v62 = vld [vmem:[#allocation39_spill] sm:$0xff] }
 0x6a6   : > { %v7759_v31 = vmul.f32 %v18587_v2, %v7232_v19  ;;  %v8045_v18 = vmul.f32 %v18588_v5, %v7339_v13  ;;  %v17377_v56 = vsel %vm18593_vm14, %v7114_v60, 0.0  ;;  %v7830_v4 = vadd.f32 %v7794_v6, %v7758_v45  ;;  %v18598_v2 = vld [vmem:[#allocation42_spill] sm:$0xff] }
 0x6a7   : > { %v8047_v16 = vmul.f32 %v18590_v54, %v7343_v34  ;;  %v8046_v57 = vmul.f32 %v18591_v38, %v7341_v15  ;;  %v8342_v43 = vld [vmem:[#allocation3 + $0x65] sm:$0xff]  ;;  %v7079_v63 = vmul.f32 0.2, %v17314_v30  ;;  %v8200_v0 = vmul.f32 0.25, %v8164_v41  ;;  %v8165_v38 = vld [vmem:[#allocation3 + $0x59] sm:$0xff] }
 0x6a8   : > { %v7831_v35 = vadd.f32 %v17294_v14, %v7759_v31  ;;  %v8081_v7 = vadd.f32 %v8045_v18, %v7829_v27  ;;  %v8306_v17 = vadd.f32 %v8270_v8, %v17273_v48  ;;  %v8378_v34 = vmul.f32 0.25, %v8342_v43  ;;  %v8235_v14 = vld [vmem:[#allocation3 + $0x5b] sm:$0xff]  ;;  %v8236_v8 = vld [vmem:[#allocation3 + $0x63] sm:$0xff]  ;;  %v8237_v42 = vld [vmem:[#allocation3 + $0x6b] sm:$0xff] }
 0x6a9   : > { %vm7043_vm6 = vcmp.ge.f32.partialorder %v17314_v30, 0.0  ;;  %v8082_v20 = vadd.f32 %v8046_v57, %v7830_v4  ;;  %v7239_v46 = vrot.slane %v17377_v56, 7  ;;  %vm18595_vm5 = vcmp.eq.s32.totalorder %v18594_v62, 1  ;;  %v18596_v15 = vld [vmem:[#allocation34_spill] sm:$0xff]  ;;  %v8166_v43 = vld [vmem:[#allocation3 + $0x61] sm:$0xff] }
 0x6aa   : > { %v8083_v23 = vadd.f32 %v8047_v16, %v7831_v35  ;;  %8117 = vst.msk [vmem:[#allocation3 + $0x73] sm:$0xff] %vm588_vm15, %v8081_v7  ;;  %v17388_v6 = vsel %vm18595_vm5, %v7112_v28, 0.0  ;;  %v8414_v27 = vadd.f32 %v8378_v34, %v8306_v17  ;;  %v7348_v60 = vrot.slane %v17377_v56, 1  ;;  %v18601_v18 = vld [vmem:[#allocation62_spill] sm:$0xff]  ;;  %v18603_v34 = vld [vmem:[#allocation64_spill] sm:$0xff] }
 0x6ab   : > { %v7235_v40 = vrot.slane %v17388_v6, 7  ;;  %v7344_v48 = vrot.slane %v17388_v6, 1  ;;  %8118 = vst.msk [vmem:[#allocation3 + $0x7b] sm:$0xff] %vm588_vm15, %v8082_v20  ;;  %v7797_v19 = vmul.f32 0.5, %v17388_v6  ;;  %v7115_v13 = vsel %vm7043_vm6, %v17314_v30, %v7079_v63  ;;  %v8167_v63 = vld [vmem:[#allocation3 + $0x69] sm:$0xff] }
 0x6ac   : > { %8119 = vst.msk [vmem:[#allocation3 + $0x83] sm:$0xff] %vm588_vm15, %v8083_v23  ;;  %vm7041_vm3 = vcmp.ge.f32.partialorder %v17321_v39, 0.0  ;;  %v7077_v41 = vmul.f32 0.2, %v17321_v39  ;;  %vm18597_vm10 = vcmp.eq.s32.totalorder %v18596_v15, 1  ;;  %vm18599_vm12 = vcmp.eq.s32.totalorder %v18598_v2, 1 }
 0x6ad   : > { %v8450_v49 = vsel %vm18597_vm10, %v8414_v27, 0.0  ;;  %v7236_v51 = vsel %vm765_vm0, %v7233_v29, %v7235_v40  ;;  %v7345_v45 = vsel %vm7312_vm9, %v7342_v3, %v7344_v48  ;;  %v17411_v31 = vsel %vm18599_vm12, %v7115_v13, 0.0 }
 0x6ae   : > { %8486 = vst.msk [vmem:[#allocation2 + $0x53] sm:$0xff] %vm588_vm15, %v8450_v49  ;;  %v18600_v30 = vunpack.i.h.bf16 %v18583_v11  ;;  %v18602_v44 = vunpack.i.l.bf16 %v18601_v18  ;;  %v7241_v16 = vrot.slane %v17411_v31, 7  ;;  %v7350_v29 = vrot.slane %v17411_v31, 1 }
 0x6af   : > { %v8271_v36 = vmul.f32 0.5, %v8235_v14  ;;  %v8272_v57 = vmul.f32 0.5, %v8236_v8  ;;  %v8273_v3 = vmul.f32 0.5, %v8237_v42  ;;  %v7113_v28 = vsel %vm7041_vm3, %v17321_v39, %v7077_v41 }
 0x6b0   : > { %v7761_v5 = vmul.f32 %v18600_v30, %v7236_v51  ;;  %v8048_v54 = vmul.f32 %v18602_v44, %v7345_v45  ;;  %v7242_v11 = vsel %vm765_vm0, %v7239_v46, %v7241_v16  ;;  %v7351_v7 = vsel %vm7312_vm9, %v7348_v60, %v7350_v29 }
 0x6b1   : > { %v8343_v17 = vld [vmem:[#allocation3 + $0x6d] sm:$0xff]  ;;  %v18604_v20 = vunpack.i.l.bf16 %v18603_v34  ;;  %v7800_v23 = vmul.f32 0.5, %v17411_v31  ;;  %v7082_v14 = vmul.f32 0.2, %v17325_v22  ;;  %v8201_v27 = vmul.f32 0.25, %v8165_v38 }
 0x6b2   : > { %v7833_v4 = vadd.f32 %v7797_v19, %v7761_v5  ;;  %v8084_v35 = vadd.f32 %v8048_v54, %v7832_v52  ;;  %v18605_v52 = vld [vmem:[#allocation40_spill] sm:$0xff]  ;;  %v8379_v8 = vmul.f32 0.25, %v8343_v17  ;;  %vm7046_vm11 = vcmp.ge.f32.partialorder %v17325_v22, 0.0  ;;  %v8238_v41 = vld [vmem:[#allocation3 + $0x73] sm:$0xff] }
 0x6b3   : > { %v7764_v39 = vmul.f32 %v18604_v20, %v7242_v11  ;;  %vm18606_vm2 = vcmp.eq.s32.totalorder %v18605_v52, 1  ;;  %v8202_v19 = vmul.f32 0.25, %v8166_v43  ;;  %v8307_v13 = vadd.f32 %v8271_v36, %v17283_v26  ;;  %v8344_v5 = vld [vmem:[#allocation3 + $0x75] sm:$0xff]  ;;  %v8345_v44 = vld [vmem:[#allocation3 + $0x7d] sm:$0xff]  ;;  %v18635_v31 = vld [vmem:[#allocation66_spill] sm:$0xff] }
 0x6b4   : > { %v7149_v6 = vsel %vm18606_vm2, %v7113_v28, 0.0  ;;  %8120 = vst.msk [vmem:[#allocation3 + $0x8b] sm:$0xff] %vm588_vm15, %v8084_v35  ;;  %v17442_v51 = vmul.f32 0.25, %v8167_v63  ;;  %v8308_v45 = vadd.f32 %v8272_v57, %v8200_v0  ;;  %v8309_v30 = vadd.f32 %v8273_v3, %v8201_v27  ;;  %v8168_v43 = vld [vmem:[#allocation3 + $0x71] sm:$0xff] }
 0x6b5   : > { %v7237_v42 = vrot.slane %v7149_v6, 7  ;;  %v17440_v15 = vadd.f32 %v7800_v23, %v7764_v39  ;;  %v7346_v49 = vrot.slane %v7149_v6, 1  ;;  %v7799_v54 = vmul.f32 0.5, %v17377_v56  ;;  %v18607_v63 = vld [vmem:[#allocation35_spill] sm:$0xff] }
 0x6b6   : > { %v8380_v38 = vmul.f32 0.25, %v8344_v5  ;;  %v8381_v28 = vmul.f32 0.25, %v8345_v44  ;;  %v8415_v35 = vadd.f32 %v8379_v8, %v8307_v13  ;;  %v7118_v11 = vsel %vm7046_vm11, %v17325_v22, %v7082_v14  ;;  %v8239_v22 = vld [vmem:[#allocation3 + $0x7b] sm:$0xff]  ;;  %v18617_v5 = vld [vmem:[#allocation65_spill] sm:$0xff] }
 0x6b7   : > { %v8274_v17 = vmul.f32 0.5, %v8238_v41  ;;  %v7238_v26 = vsel %vm765_vm0, %v7235_v40, %v7237_v42  ;;  %v7240_v36 = vsel %vm765_vm0, %v7237_v42, %v7239_v46  ;;  %v7347_v0 = vsel %vm7312_vm9, %v7344_v48, %v7346_v49  ;;  %v18609_v23 = vld [vmem:[#allocation63_spill] sm:$0xff]  ;;  %v8240_v41 = vld [vmem:[#allocation3 + $0x83] sm:$0xff] }
 0x6b8   : > { %v8416_v57 = vadd.f32 %v8380_v38, %v8308_v45  ;;  %v8417_v3 = vadd.f32 %v8381_v28, %v8309_v30  ;;  %vm18608_vm8 = vcmp.eq.s32.totalorder %v18607_v63, 1  ;;  %v7349_v39 = vsel %vm7312_vm9, %v7346_v49, %v7348_v60  ;;  %v18613_v45 = vld [vmem:[#allocation36_spill] sm:$0xff]  ;;  %v18615_v30 = vld [vmem:[#allocation37_spill] sm:$0xff] }
 0x6b9   : > { %v8451_v20 = vsel %vm18608_vm8, %v8415_v35, 0.0  ;;  %v18610_v40 = vunpack.i.l.bf16 %v18609_v23  ;;  %v18611_v27 = vunpack.i.h.bf16 %v18609_v23  ;;  %v7798_v8 = vmul.f32 0.5, %v7149_v6  ;;  %v18620_v63 = vld [vmem:[#allocation45_spill] sm:$0xff]  ;;  %v18622_v23 = vld [vmem:[#allocation80_spill] sm:$0xff] }
 0x6ba   : > { %8487 = vst.msk [vmem:[#allocation2 + $0x5b] sm:$0xff] %vm588_vm15, %v8451_v20  ;;  %v18612_v48 = vunpack.i.h.bf16 %v18601_v18  ;;  %v8204_v13 = vmul.f32 0.25, %v8168_v43  ;;  %vm18614_vm13 = vcmp.eq.s32.totalorder %v18613_v45, 1  ;;  %vm18616_vm7 = vcmp.eq.s32.totalorder %v18615_v30, 1 }
 0x6bb   : > { %v7762_v14 = vmul.f32 %v18610_v40, %v7238_v26  ;;  %v7763_v46 = vmul.f32 %v18611_v27, %v7240_v36  ;;  %v8452_v56 = vsel %vm18614_vm13, %v8416_v57, 0.0  ;;  %v8453_v60 = vsel %vm18616_vm7, %v8417_v3, 0.0  ;;  %v8346_v49 = vld [vmem:[#allocation3 + $0x85] sm:$0xff]  ;;  %v8169_v27 = vld [vmem:[#allocation3 + $0x79] sm:$0xff] }
 0x6bc   : > { %v8049_v42 = vmul.f32 %v18612_v48, %v7347_v0  ;;  %v18618_v44 = vunpack.i.h.bf16 %v18617_v5  ;;  %v8310_v28 = vadd.f32 %v8274_v17, %v8202_v19  ;;  %8488 = vst.msk [vmem:[#allocation2 + $0x63] sm:$0xff] %vm588_vm15, %v8452_v56  ;;  %8489 = vst.msk [vmem:[#allocation2 + $0x6b] sm:$0xff] %vm588_vm15, %v8453_v60  ;;  %v8241_v6 = vld [vmem:[#allocation3 + $0x8b] sm:$0xff]  ;;  %v8382_v18 = vmul.f32 0.25, %v8346_v49  ;;  %v17477_v17 = vld [vmem:[#allocation13] ss:$0 sm:$0xff] }
 0x6bd   : > { %v7834_v35 = vadd.f32 %v7798_v8, %v7762_v14  ;;  %v18619_v43 = vunpack.i.l.bf16 %v18617_v5  ;;  %v8275_v36 = vmul.f32 0.5, %v8239_v22  ;;  %v7835_v0 = vadd.f32 %v7799_v54, %v7763_v46  ;;  %v18624_v54 = vld [vmem:[#allocation82_spill] sm:$0xff]  ;;  %v18626_v48 = vld [vmem:[#allocation83_spill] sm:$0xff] }
 0x6be   : > { %v8051_v38 = vmul.f32 %v18618_v44, %v7351_v7  ;;  %v8085_v57 = vadd.f32 %v8049_v42, %v7833_v4  ;;  %vm18621_vm14 = vcmp.eq.s32.totalorder %v18620_v63, 1  ;;  %v8276_v20 = vmul.f32 0.5, %v8240_v41  ;;  %v18627_v5 = vld [vmem:[#allocation43_spill] sm:$0xff] }
 0x6bf   : > { %v8050_v26 = vmul.f32 %v18619_v43, %v7349_v39  ;;  %v17475_v3 = vsel %vm18621_vm14, %v7118_v11, 0.0  ;;  %v8418_v7 = vadd.f32 %v8382_v18, %v8310_v28  ;;  %v7008_v40 = vadd.f32 %v17477_v17, %v18622_v23  ;;  %v18623_v39 = vld [vmem:[#allocation81_spill] sm:$0xff] }
 0x6c0   : > { %v8277_v14 = vmul.f32 0.5, %v8241_v6  ;;  %v8087_v8 = vadd.f32 %v8051_v38, %v7835_v0  ;;  %8121 = vst.msk [vmem:[#allocation3 + $0x93] sm:$0xff] %vm588_vm15, %v8085_v57  ;;  %v7011_v4 = vadd.f32 %v17477_v17, %v18623_v39  ;;  %v7009_v11 = vadd.f32 %v17477_v17, %v18624_v54 }
 0x6c1   : > { %v8086_v19 = vadd.f32 %v8050_v26, %v7834_v35  ;;  %vm18625_vm6 = vcmp.eq.s32.totalorder %v16372_v47, 1  ;;  %vm7044_vm5 = vcmp.ge.f32.partialorder %v7008_v40, 0.0  ;;  %v7080_v46 = vmul.f32 0.2, %v7008_v40  ;;  %v18629_v35 = vld [vmem:[#allocation46_spill] sm:$0xff]  ;;  %v18631_v26 = vld [vmem:[#allocation84_spill] sm:$0xff] }
 0x6c2   : > { %v8454_v22 = vsel %vm18625_vm6, %v8418_v7, 0.0  ;;  %v17491_v42 = vadd.f32 %v17477_v17, %v18626_v48  ;;  %8123 = vst.msk [vmem:[#allocation3 + $0xa3] sm:$0xff] %vm588_vm15, %v8087_v8  ;;  %vm7047_vm3 = vcmp.ge.f32.partialorder %v7011_v4, 0.0  ;;  %v7083_v41 = vmul.f32 0.2, %v7011_v4 }
 0x6c3   : > { %8122 = vst.msk [vmem:[#allocation3 + $0x9b] sm:$0xff] %vm588_vm15, %v8086_v19  ;;  %8490 = vst.msk [vmem:[#allocation2 + $0x73] sm:$0xff] %vm588_vm15, %v8454_v22  ;;  %vm7045_vm10 = vcmp.ge.f32.partialorder %v7009_v11, 0.0  ;;  %v7081_v45 = vmul.f32 0.2, %v7009_v11  ;;  %v8205_v56 = vmul.f32 0.25, %v8169_v27  ;;  %v8311_v47 = vadd.f32 %v8275_v36, %v17442_v51 }
 0x6c4   : > { %v8312_v30 = vadd.f32 %v8276_v20, %v8204_v13  ;;  %v7116_v60 = vsel %vm7044_vm5, %v7008_v40, %v7080_v46  ;;  %v7247_v49 = vrot.slane %v17475_v3, 7  ;;  %vm18628_vm12 = vcmp.eq.s32.totalorder %v18627_v5, 1  ;;  %v18632_v19 = vld [vmem:[#allocation44_spill] sm:$0xff] }
 0x6c5   : > { %v7152_v44 = vsel %vm18628_vm12, %v7116_v60, 0.0  ;;  %v7119_v38 = vsel %vm7047_vm3, %v7011_v4, %v7083_v41  ;;  %v7117_v28 = vsel %vm7045_vm10, %v7009_v11, %v7081_v45  ;;  %vm18630_vm2 = vcmp.eq.s32.totalorder %v18629_v35, 1 }
 0x6c6   : > { %v7243_v6 = vrot.slane %v7152_v44, 7  ;;  %v7352_v18 = vrot.slane %v7152_v44, 1  ;;  %v17501_v43 = vsel %vm18630_vm2, %v7119_v38, 0.0  ;;  %v7012_v0 = vadd.f32 %v17477_v17, %v18631_v26 }
 0x6c7   : > { %v8313_v57 = vadd.f32 %v8277_v14, %v8205_v56  ;;  %v7356_v51 = vrot.slane %v17475_v3, 1  ;;  %v7803_v13 = vmul.f32 0.5, %v17475_v3  ;;  %vm7050_vm11 = vcmp.ge.f32.partialorder %v17491_v42, 0.0  ;;  %v8347_v36 = vld [vmem:[#allocation3 + $0x8d] sm:$0xff] }
 0x6c8   : > { %v7244_v20 = vsel %vm765_vm0, %v7241_v16, %v7243_v6  ;;  %v7353_v7 = vsel %vm7312_vm9, %v7350_v29, %v7352_v18  ;;  %vm18633_vm8 = vcmp.eq.s32.totalorder %v18632_v19, 1  ;;  %v7086_v40 = vmul.f32 0.2, %v17491_v42  ;;  %v8242_v46 = vld [vmem:[#allocation3 + $0x93] sm:$0xff] }
 0x6c9   : > { %v7153_v23 = vsel %vm18633_vm8, %v7117_v28, 0.0  ;;  %v8383_v14 = vmul.f32 0.25, %v8347_v36  ;;  %v18634_v3 = vunpack.i.h.bf16 %v18603_v34  ;;  %v7249_v39 = vrot.slane %v17501_v43, 7 }
 0x6ca   : > { %v8348_v27 = vld [vmem:[#allocation3 + $0x95] sm:$0xff]  ;;  %v7358_v4 = vrot.slane %v17501_v43, 1  ;;  %v8349_v54 = vld [vmem:[#allocation3 + $0x9d] sm:$0xff]  ;;  %v7801_v11 = vmul.f32 0.5, %v7152_v44  ;;  %v18636_v22 = vunpack.i.l.bf16 %v18635_v31  ;;  %vm7048_vm13 = vcmp.ge.f32.partialorder %v7012_v0, 0.0 }
 0x6cb   : > { %v7765_v8 = vmul.f32 %v18634_v3, %v7244_v20  ;;  %v8384_v16 = vmul.f32 0.25, %v8348_v27  ;;  %v8385_v48 = vmul.f32 0.25, %v8349_v54  ;;  %v7245_v41 = vrot.slane %v7153_v23, 7 }
 0x6cc   : > { %v8052_v29 = vmul.f32 %v18636_v22, %v7353_v7  ;;  %v7354_v45 = vrot.slane %v7153_v23, 1  ;;  %v7084_v56 = vmul.f32 0.2, %v7012_v0  ;;  %v8419_v60 = vadd.f32 %v8383_v14, %v8311_v47 }
 0x6cd   : > { %v8420_v38 = vadd.f32 %v8384_v16, %v8312_v30  ;;  %v7837_v34 = vadd.f32 %v7801_v11, %v7765_v8  ;;  %v7804_v28 = vmul.f32 0.5, %v17501_v43  ;;  %v8421_v26 = vadd.f32 %v8385_v48, %v8313_v57  ;;  %v18639_v30 = vld [vmem:[#allocation68_spill] sm:$0xff]  ;;  %v18642_v16 = vld [vmem:[#allocation67_spill] sm:$0xff]  ;;  %v8171_v48 = vld [vmem:[#allocation3 + $0x89] sm:$0xff] }
 0x6ce   : > { %v8088_v36 = vadd.f32 %v8052_v29, %v17440_v15  ;;  %v7250_v44 = vsel %vm765_vm0, %v7247_v49, %v7249_v39  ;;  %v7359_v20 = vsel %vm7312_vm9, %v7356_v51, %v7358_v4  ;;  %v8278_v7 = vmul.f32 0.5, %v8242_v46  ;;  %v8170_v46 = vld [vmem:[#allocation3 + $0x81] sm:$0xff] }
 0x6cf   : > { %vm18637_vm7 = vcmp.eq.s32.totalorder %v18577_v58, 1  ;;  %vm18638_vm14 = vcmp.eq.s32.totalorder %v16389_v33, 1  ;;  %v18640_v14 = vunpack.i.l.bf16 %v18639_v30  ;;  %vm18641_vm6 = vcmp.eq.s32.totalorder %v16400_v37, 1 }
 0x6d0   : > { %v8455_v27 = vsel %vm18637_vm7, %v8419_v60, 0.0  ;;  %v8456_v47 = vsel %vm18638_vm14, %v8420_v38, 0.0  ;;  %v8457_v15 = vsel %vm18641_vm6, %v8421_v26, 0.0  ;;  %8124 = vst.msk [vmem:[#allocation3 + $0xab] sm:$0xff] %vm588_vm15, %v8088_v36  ;;  %v7246_v3 = vsel %vm765_vm0, %v7243_v6, %v7245_v41  ;;  %v8243_v60 = vld [vmem:[#allocation3 + $0x9b] sm:$0xff]  ;;  %v18645_v38 = vld [vmem:[#allocation69_spill] sm:$0xff] }
 0x6d1   : > { %v7768_v57 = vmul.f32 %v18640_v14, %v7250_v44  ;;  %8491 = vst.msk [vmem:[#allocation2 + $0x7b] sm:$0xff] %vm588_vm15, %v8455_v27  ;;  %8492 = vst.msk [vmem:[#allocation2 + $0x83] sm:$0xff] %vm588_vm15, %v8456_v47  ;;  %v7248_v58 = vsel %vm765_vm0, %v7245_v41, %v7247_v49  ;;  %v7355_v8 = vsel %vm7312_vm9, %v7352_v18, %v7354_v45  ;;  %v18643_v37 = vunpack.i.l.bf16 %v18642_v16 }
 0x6d2   : > { %8493 = vst.msk [vmem:[#allocation2 + $0x8b] sm:$0xff] %vm588_vm15, %v8457_v15  ;;  %v7357_v54 = vsel %vm7312_vm9, %v7354_v45, %v7356_v51  ;;  %v18644_v22 = vunpack.i.h.bf16 %v18642_v16  ;;  %v18646_v6 = vunpack.i.h.bf16 %v18645_v38  ;;  %v7802_v49 = vmul.f32 0.5, %v7153_v23  ;;  %v8244_v51 = vld [vmem:[#allocation3 + $0xa3] sm:$0xff] }
 0x6d3   : > { %v7840_v33 = vadd.f32 %v7804_v28, %v7768_v57  ;;  %v7766_v11 = vmul.f32 %v18643_v37, %v7246_v3  ;;  %v18647_v18 = vunpack.i.h.bf16 %v18635_v31  ;;  %v18648_v28 = vunpack.i.l.bf16 %v18645_v38  ;;  %v18649_v23 = vld [vmem:[#allocation49_spill] sm:$0xff]  ;;  %v18651_v57 = vld [vmem:[#allocation47_spill] sm:$0xff] }
 0x6d4   : > { %v7767_v29 = vmul.f32 %v18644_v22, %v7248_v58  ;;  %v8055_v26 = vmul.f32 %v18646_v6, %v7359_v20  ;;  %v7122_v44 = vsel %vm7050_vm11, %v17491_v42, %v7086_v40  ;;  %v7120_v27 = vsel %vm7048_vm13, %v7012_v0, %v7084_v56 }
 0x6d5   : > { %v8053_v41 = vmul.f32 %v18647_v18, %v7355_v8  ;;  %v8054_v36 = vmul.f32 %v18648_v28, %v7357_v54  ;;  %v7015_v47 = vadd.f32 %v17477_v17, %v17232_v59  ;;  %v7838_v14 = vadd.f32 %v7802_v49, %v7766_v11  ;;  %v8173_v49 = vld [vmem:[#allocation3 + $0x99] sm:$0xff] }
 0x6d6   : > { %v7839_v45 = vadd.f32 %v7803_v13, %v7767_v29  ;;  %vm18650_vm5 = vcmp.eq.s32.totalorder %v18649_v23, 1  ;;  %vm18652_vm3 = vcmp.eq.s32.totalorder %v18651_v57, 1  ;;  %v8206_v13 = vmul.f32 0.25, %v8170_v46 }
 0x6d7   : > { %v8089_v20 = vadd.f32 %v8053_v41, %v7837_v34  ;;  %v17565_v31 = vsel %vm18650_vm5, %v7122_v44, 0.0  ;;  %v17569_v15 = vsel %vm18652_vm3, %v7120_v27, 0.0  ;;  %v8207_v3 = vmul.f32 0.25, %v8171_v48  ;;  %v8350_v34 = vld [vmem:[#allocation3 + $0xa5] sm:$0xff] }
 0x6d8   : > { %v8279_v58 = vmul.f32 0.5, %v8243_v60  ;;  %v8091_v8 = vadd.f32 %v8055_v26, %v7839_v45  ;;  %v8280_v42 = vmul.f32 0.5, %v8244_v51  ;;  %v8090_v40 = vadd.f32 %v8054_v36, %v7838_v14  ;;  %v8245_v37 = vld [vmem:[#allocation3 + $0xab] sm:$0xff] }
 0x6d9   : > { %8125 = vst.msk [vmem:[#allocation3 + $0xb3] sm:$0xff] %vm588_vm15, %v8089_v20  ;;  %v7251_v59 = vrot.slane %v17569_v15, 7  ;;  %v7360_v0 = vrot.slane %v17569_v15, 1  ;;  %v8314_v56 = vadd.f32 %v8278_v7, %v8206_v13  ;;  %v7255_v54 = vrot.slane %v17565_v31, 7  ;;  %v8172_v26 = vld [vmem:[#allocation3 + $0x91] sm:$0xff] }
 0x6da   : > { %8127 = vst.msk [vmem:[#allocation3 + $0xc3] sm:$0xff] %vm588_vm15, %v8091_v8  ;;  %vm7051_vm10 = vcmp.ge.f32.partialorder %v7015_v47, 0.0  ;;  %v7087_v16 = vmul.f32 0.2, %v7015_v47  ;;  %v8386_v11 = vmul.f32 0.25, %v8350_v34  ;;  %8126 = vst.msk [vmem:[#allocation3 + $0xbb] sm:$0xff] %vm588_vm15, %v8090_v40  ;;  %v7013_v7 = vadd.f32 %v17477_v17, %v17237_v50 }
 0x6db   : > { %v7364_v22 = vrot.slane %v17565_v31, 1  ;;  %v7252_v29 = vsel %vm765_vm0, %v7249_v39, %v7251_v59  ;;  %v7361_v46 = vsel %vm7312_vm9, %v7358_v4, %v7360_v0  ;;  %v18653_v48 = vunpack.i.h.bf16 %v18639_v30  ;;  %v18654_v41 = vld [vmem:[#allocation70_spill] sm:$0xff]  ;;  %v8174_v4 = vld [vmem:[#allocation3 + $0xa1] sm:$0xff] }
 0x6dc   : > { %v7805_v38 = vmul.f32 0.5, %v17569_v15  ;;  %v7123_v6 = vsel %vm7051_vm10, %v7015_v47, %v7087_v16  ;;  %v8422_v18 = vadd.f32 %v8386_v11, %v8314_v56  ;;  %v18655_v39 = vunpack.i.l.bf16 %v18654_v41  ;;  %v18656_v36 = vld [vmem:[#allocation50_spill] sm:$0xff]  ;;  %v18659_v16 = vld [vmem:[#allocation72_spill] sm:$0xff] }
 0x6dd   : > { %v7769_v60 = vmul.f32 %v18653_v48, %v7252_v29  ;;  %vm18657_vm12 = vcmp.eq.s32.totalorder %v18656_v36, 1  ;;  %v7018_v43 = vadd.f32 %v17477_v17, %v17247_v32  ;;  %v8281_v51 = vmul.f32 0.5, %v8245_v37  ;;  %v8175_v8 = vld [vmem:[#allocation3 + $0xa9] sm:$0xff] }
 0x6de   : > { %v8056_v28 = vmul.f32 %v18655_v39, %v7361_v46  ;;  %v17597_v50 = vsel %vm18657_vm12, %v7123_v6, 0.0  ;;  %vm18658_vm2 = vcmp.eq.s32.totalorder %v18594_v62, 1  ;;  %vm7049_vm11 = vcmp.ge.f32.partialorder %v7013_v7, 0.0 }
 0x6df   : > { %v17601_v30 = vadd.f32 %v7805_v38, %v7769_v60  ;;  %v7257_v45 = vrot.slane %v17597_v50, 7  ;;  %v7366_v44 = vrot.slane %v17597_v50, 1  ;;  %v8458_v27 = vsel %vm18658_vm2, %v8422_v18, 0.0 }
 0x6e0   : > { %v8092_v47 = vadd.f32 %v8056_v28, %v7840_v33  ;;  %v7085_v14 = vmul.f32 0.2, %v7013_v7  ;;  %v8208_v20 = vmul.f32 0.25, %v8172_v26  ;;  %v8209_v13 = vmul.f32 0.25, %v8173_v49  ;;  %8494 = vst.msk [vmem:[#allocation2 + $0x93] sm:$0xff] %vm588_vm15, %v8458_v27  ;;  %v8351_v32 = vld [vmem:[#allocation3 + $0xad] sm:$0xff] }
 0x6e1   : > { %v7258_v40 = vsel %vm765_vm0, %v7255_v54, %v7257_v45  ;;  %v7367_v62 = vsel %vm7312_vm9, %v7364_v22, %v7366_v44  ;;  %v8210_v33 = vmul.f32 0.25, %v8174_v4  ;;  %v8315_v56 = vadd.f32 %v8279_v58, %v8207_v3  ;;  %v8176_v29 = vld [vmem:[#allocation3 + $0xb1] sm:$0xff]  ;;  %v8353_v3 = vld [vmem:[#allocation3 + $0xbd] sm:$0xff] }
 0x6e2   : > { %v8387_v34 = vmul.f32 0.25, %v8351_v32  ;;  %8128 = vst.msk [vmem:[#allocation3 + $0xcb] sm:$0xff] %vm588_vm15, %v8092_v47  ;;  %v18660_v37 = vunpack.i.l.bf16 %v18659_v16  ;;  %v8246_v46 = vld [vmem:[#allocation3 + $0xb3] sm:$0xff]  ;;  %v8316_v48 = vadd.f32 %v8280_v42, %v8208_v20  ;;  %v7807_v60 = vmul.f32 0.5, %v17565_v31  ;;  %v8248_v39 = vld [vmem:[#allocation3 + $0xc3] sm:$0xff] }
 0x6e3   : > { %v7808_v38 = vmul.f32 0.5, %v17597_v50  ;;  %v7121_v6 = vsel %vm7049_vm11, %v7013_v7, %v7085_v14  ;;  %v17624_v26 = vmul.f32 0.25, %v8175_v8  ;;  %v8317_v49 = vadd.f32 %v8281_v51, %v8209_v13  ;;  %v8352_v18 = vld [vmem:[#allocation3 + $0xb5] sm:$0xff] }
 0x6e4   : > { %v7772_v11 = vmul.f32 %v18660_v37, %v7258_v40  ;;  %vm7054_vm8 = vcmp.ge.f32.partialorder %v7018_v43, 0.0  ;;  %v7090_v58 = vmul.f32 0.2, %v7018_v43  ;;  %v8388_v28 = vmul.f32 0.25, %v8352_v18  ;;  %v18661_v32 = vld [vmem:[#allocation48_spill] sm:$0xff] }
 0x6e5   : > { %v8389_v4 = vmul.f32 0.25, %v8353_v3  ;;  %v8423_v27 = vadd.f32 %v8387_v34, %v8315_v56  ;;  %v17628_v42 = vmul.f32 0.25, %v8176_v29  ;;  %v8282_v20 = vmul.f32 0.5, %v8246_v46  ;;  %v18664_v56 = vld [vmem:[#allocation73_spill] sm:$0xff] }
 0x6e6   : > { %v17626_v47 = vadd.f32 %v7808_v38, %v7772_v11  ;;  %vm18662_vm13 = vcmp.eq.s32.totalorder %v18661_v32, 1  ;;  %v7016_v7 = vadd.f32 %v17477_v17, %v17258_v55  ;;  %v8424_v51 = vadd.f32 %v8388_v28, %v8316_v48  ;;  %v8177_v38 = vld [vmem:[#allocation3 + $0xb9] sm:$0xff] }
 0x6e7   : > { %v7157_v40 = vsel %vm18662_vm13, %v7121_v6, 0.0  ;;  %v8425_v14 = vadd.f32 %v8389_v4, %v8317_v49  ;;  %vm18663_vm7 = vcmp.eq.s32.totalorder %v18605_v52, 1  ;;  %v17636_v37 = vmul.f32 0.5, %v8248_v39  ;;  %v8567_v4 = vld [vmem:[#allocation2 + $0x1] ss:$2 sm:$0xff] }
 0x6e8   : > { %v8459_v13 = vsel %vm18663_vm7, %v8423_v27, 0.0  ;;  %v7253_v8 = vrot.slane %v7157_v40, 7  ;;  %v18665_v34 = vunpack.i.h.bf16 %v18664_v56  ;;  %v7362_v29 = vrot.slane %v7157_v40, 1  ;;  %v8569_v27 = vld [vmem:[#allocation2 + $0x11] ss:$2 sm:$0xff] }
 0x6e9   : > { %8495 = vst.msk [vmem:[#allocation2 + $0x9b] sm:$0xff] %vm588_vm15, %v8459_v13  ;;  %v7126_v46 = vsel %vm7054_vm8, %v7018_v43, %v7090_v58  ;;  %vm18666_vm14 = vcmp.eq.s32.totalorder %v18592_v1, 1  ;;  %vm18667_vm6 = vcmp.eq.s32.totalorder %v18598_v2, 1  ;;  %v8354_v52 = vld [vmem:[#allocation3 + $0xc5] sm:$0xff]  ;;  %v7806_v2 = vmul.f32 0.5, %v7157_v40 }
 0x6ea   : > { %v8059_v11 = vmul.f32 %v18665_v34, %v7367_v62  ;;  %v8460_v55 = vsel %vm18666_vm14, %v8424_v51, 0.0  ;;  %v8461_v48 = vsel %vm18667_vm6, %v8425_v14, 0.0  ;;  %v7254_v6 = vsel %vm765_vm0, %v7251_v59, %v7253_v8  ;;  %v18668_v59 = vld [vmem:[#allocation71_spill] sm:$0xff]  ;;  %v18673_v51 = vld [vmem:[#allocation53_spill] sm:$0xff] }
 0x6eb   : > { %v7256_v49 = vsel %vm765_vm0, %v7253_v8, %v7255_v54  ;;  %v8318_v62 = vadd.f32 %v8282_v20, %v8210_v33  ;;  %8496 = vst.msk [vmem:[#allocation2 + $0xa3] sm:$0xff] %vm588_vm15, %v8460_v55  ;;  %8497 = vst.msk [vmem:[#allocation2 + $0xab] sm:$0xff] %vm588_vm15, %v8461_v48  ;;  %v8390_v43 = vmul.f32 0.25, %v8354_v52  ;;  %v7363_v1 = vsel %vm7312_vm9, %v7360_v0, %v7362_v29  ;;  %v8178_v20 = vld [vmem:[#allocation3 + $0xc1] sm:$0xff] }
 0x6ec   : > { %v7365_v18 = vsel %vm7312_vm9, %v7362_v29, %v7364_v22  ;;  %v18669_v3 = vunpack.i.l.bf16 %v18668_v59  ;;  %v18670_v54 = vunpack.i.h.bf16 %v18668_v59  ;;  %v18671_v39 = vunpack.i.h.bf16 %v18654_v41  ;;  %v8247_v14 = vld [vmem:[#allocation3 + $0xbb] sm:$0xff]  ;;  %v14509_v41 = vld [vmem:[#allocation15] sm:$0xff]  }
 0x6ed   : > { %v17666_v15 = vmul.f32 0.25, %v8177_v38  ;;  %v8426_v0 = vadd.f32 %v8390_v43, %v8318_v62  ;;  %v18672_v40 = vunpack.i.l.bf16 %v18664_v56  ;;  %vm18674_vm5 = vcmp.eq.s32.totalorder %v18673_v51, 1  ;;  %v18676_v62 = vld [vmem:[#allocation51_spill] sm:$0xff] }
 0x6ee   : > { %v7770_v58 = vmul.f32 %v18669_v3, %v7254_v6  ;;  %v7771_v33 = vmul.f32 %v18670_v54, %v7256_v49  ;;  %v8057_v28 = vmul.f32 %v18671_v39, %v7363_v1  ;;  %v17672_v22 = vsel %vm18674_vm5, %v7126_v46, 0.0  ;;  %v8249_v6 = vld [vmem:[#allocation3 + $0xcb] sm:$0xff] }
 0x6ef   : > { %v8058_v31 = vmul.f32 %v18672_v40, %v7365_v18  ;;  %vm7052_vm3 = vcmp.ge.f32.partialorder %v7016_v7, 0.0  ;;  %vm18675_vm10 = vcmp.eq.s32.totalorder %v18627_v5, 1  ;;  %v7088_v38 = vmul.f32 0.2, %v7016_v7 }
 0x6f0   : > { %v7842_v13 = vadd.f32 %v7806_v2, %v7770_v58  ;;  %v7843_v8 = vadd.f32 %v7807_v60, %v7771_v33  ;;  %v8093_v34 = vadd.f32 %v8057_v28, %v17601_v30  ;;  %v8462_v29 = vsel %vm18675_vm10, %v8426_v0, 0.0  ;;  %v18679_v58 = vld [vmem:[#allocation54_spill] sm:$0xff] }
 0x6f1   : > { %v7019_v55 = vadd.f32 %v17477_v17, %v17271_v9  ;;  %v8602_v56 = vpack.c.bf16 %v8569_v27, %v8567_v4  ;;  %v17679_v48 = vmul.f32 0.25, %v8178_v20  ;;  %8498 = vst.msk [vmem:[#allocation2 + $0xb3] sm:$0xff] %vm588_vm15, %v8462_v29  ;;  %v7017_v30 = vadd.f32 %v17477_v17, %v17281_v25 }
 0x6f2   : > { %v8094_v46 = vadd.f32 %v8058_v31, %v7842_v13  ;;  %v8095_v52 = vadd.f32 %v8059_v11, %v7843_v8  ;;  %8129 = vst.msk [vmem:[#allocation3 + $0xd3] sm:$0xff] %vm588_vm15, %v8093_v34  ;;  %v8283_v60 = vmul.f32 0.5, %v8247_v14  ;;  %v7124_v5 = vsel %vm7052_vm3, %v7016_v7, %v7088_v38  ;;  %v14510_v7 = vld [vmem:[#allocation15 + $0x8] sm:$0xff]   ;;  %v18684_v8 = vld [vmem:[#allocation52_spill] sm:$0xff] }
 0x6f3   : > { %vm7055_vm12 = vcmp.ge.f32.partialorder %v7019_v55, 0.0  ;;  %v7091_v49 = vmul.f32 0.2, %v7019_v55  ;;  %12775 = vmatmul.mubr.msk.bf16.vlgmr.msra.gmra.mrb[36].mxu0 %vm588_vm15, %v8602_v56  ;;  %v7263_v9 = vrot.slane %v17672_v22, 7  ;;  %vm18677_vm2 = vcmp.eq.s32.totalorder %v18676_v62, 1  ;;  %v18682_v14 = vld [vmem:[#allocation74_spill] sm:$0xff] }
 0x6f4   : > { %8130 = vst.msk [vmem:[#allocation3 + $0xdb] sm:$0xff] %vm588_vm15, %v8094_v46  ;;  %8131 = vst.msk [vmem:[#allocation3 + $0xe3] sm:$0xff] %vm588_vm15, %v8095_v52  ;;  %v7160_v11 = vsel %vm18677_vm2, %v7124_v5, 0.0  ;;  %vm7053_vm11 = vcmp.ge.f32.partialorder %v7017_v30, 0.0  ;;  %v7089_v43 = vmul.f32 0.2, %v7017_v30  ;;  %12811 = vmatpush3.bf16.msra.mxu0 %v14509_v41  ;;  %v17701_v39 = vadd.f32 %v17477_v17, %v17328_v61 }
 0x6f5   : > { %v18678_v25 = vmov 0.0   ;;  %v7372_v1 = vrot.slane %v17672_v22, 1  ;;  %v7259_v2 = vrot.slane %v7160_v11, 7  ;;  %v7368_v18 = vrot.slane %v7160_v11, 1 }
 0x6f6   : > { %12778 = vmatprep.mubr.msk.bf16.mxu0 %vm14948_vm1, %v18678_v25  ;;  %v7127_v59 = vsel %vm7055_vm12, %v7019_v55, %v7091_v49  ;;  %12812 = vmatprep.subr.bf16.mxu0 %v18678_v25  ;;  %v8285_v3 = vmul.f32 0.5, %v8249_v6  ;;  %vm18680_vm8 = vcmp.eq.s32.totalorder %v18679_v58, 1  ;;  %v7125_v33 = vsel %vm7053_vm11, %v7017_v30, %v7089_v43 }
 0x6f7   : > { %v17697_v54 = vsel %vm18680_vm8, %v7127_v59, 0.0  ;;  %v7260_v28 = vsel %vm765_vm0, %v7257_v45, %v7259_v2  ;;  %v7369_v4 = vsel %vm7312_vm9, %v7366_v44, %v7368_v18  ;;  %v18681_v0 = vunpack.i.h.bf16 %v18659_v16  ;;  %v14511_v45 = vld [vmem:[#allocation15 + $0x10] sm:$0xff]  }
 0x6f8   : > { %v7265_v27 = vrot.slane %v17697_v54, 7  ;;  %v7374_v20 = vrot.slane %v17697_v54, 1  ;;  %v7809_v31 = vmul.f32 0.5, %v7160_v11  ;;  %v18683_v13 = vunpack.i.l.bf16 %v18682_v14  ;;  %12813 = vmatpush3.bf16.msra.mxu0 %v14510_v7 }
 0x6f9   : > { %v7773_v40 = vmul.f32 %v18681_v0, %v7260_v28  ;;  %vm18685_vm13 = vcmp.eq.s32.totalorder %v18684_v8, 1  ;;  %v8319_v50 = vadd.f32 %v8283_v60, %v17624_v26  ;;  %v8355_v41 = vld [vmem:[#allocation3 + $0xcd] sm:$0xff]  ;;  %12814 = vmatprep.subr.bf16.mxu0 %v18678_v25  ;;  %v8320_v38 = vadd.f32 %v17636_v37, %v17628_v42  ;;  %v18686_v60 = vld [vmem:[#allocation76_spill] sm:$0xff] }
 0x6fa   : > { %v8060_v61 = vmul.f32 %v18683_v13, %v7369_v4  ;;  %v7161_v34 = vsel %vm18685_vm13, %v7125_v33, 0.0  ;;  %v7266_v44 = vsel %vm765_vm0, %v7263_v9, %v7265_v27  ;;  %v7375_v16 = vsel %vm7312_vm9, %v7372_v1, %v7374_v20  ;;  %v8250_v52 = vld [vmem:[#allocation3 + $0xd3] sm:$0xff]  ;;  %v14512_v37 = vld [vmem:[#allocation15 + $0x18] sm:$0xff]  }
 0x6fb   : > { %v7261_v29 = vrot.slane %v7161_v34, 7  ;;  %v8391_v55 = vmul.f32 0.25, %v8355_v41  ;;  %v7845_v56 = vadd.f32 %v7809_v31, %v7773_v40  ;;  %v7370_v46 = vrot.slane %v7161_v34, 1  ;;  %v8356_v11 = vld [vmem:[#allocation3 + $0xd5] sm:$0xff]  ;;  %v8357_v43 = vld [vmem:[#allocation3 + $0xdd] sm:$0xff] }
 0x6fc   : > { %v8321_v26 = vadd.f32 %v8285_v3, %v17666_v15  ;;  %v8096_v30 = vadd.f32 %v8060_v61, %v17626_v47  ;;  %v18687_v6 = vunpack.i.l.bf16 %v18686_v60  ;;  %v7811_v7 = vmul.f32 0.5, %v17672_v22  ;;  %12815 = vmatpush3.bf16.msra.mxu0 %v14511_v45  ;;  %v18689_v13 = vld [vmem:[#allocation75_spill] sm:$0xff] }
 0x6fd   : > { %v7262_v49 = vsel %vm765_vm0, %v7259_v2, %v7261_v29  ;;  %v7812_v59 = vmul.f32 0.5, %v17697_v54  ;;  %vm7058_vm7 = vcmp.ge.f32.partialorder %v17701_v39, 0.0  ;;  %v7020_v42 = vadd.f32 %v17477_v17, %v17332_v53  ;;  %12816 = vmatprep.subr.bf16.mxu0 %v18678_v25 }
 0x6fe   : > { %v7776_v5 = vmul.f32 %v18687_v6, %v7266_v44  ;;  %v8392_v15 = vmul.f32 0.25, %v8356_v11  ;;  %v8393_v47 = vmul.f32 0.25, %v8357_v43  ;;  %v8427_v3 = vadd.f32 %v8391_v55, %v8319_v50  ;;  %8132 = vst.msk [vmem:[#allocation3 + $0xeb] sm:$0xff] %vm588_vm15, %v8096_v30  ;;  %v18695_v55 = vld [vmem:[#allocation77_spill] sm:$0xff] }
 0x6ff   : > { %v7094_v2 = vmul.f32 0.2, %v17701_v39  ;;  %v8286_v33 = vmul.f32 0.5, %v8250_v52  ;;  %v7264_v28 = vsel %vm765_vm0, %v7261_v29, %v7263_v9  ;;  %v7371_v4 = vsel %vm7312_vm9, %v7368_v18, %v7370_v46  ;;  %v8571_v18 = vld [vmem:[#allocation2 + $0x21] ss:$2 sm:$0xff] }
 0x700   : > { %v17740_v22 = vadd.f32 %v7812_v59, %v7776_v5  ;;  %v8428_v0 = vadd.f32 %v8392_v15, %v8320_v38  ;;  %v8429_v53 = vadd.f32 %v8393_v47, %v8321_v26  ;;  %vm18688_vm14 = vcmp.eq.s32.totalorder %v18632_v19, 1  ;;  %12817 = vmatpush3.bf16.msra.mxu0 %v14512_v37  ;;  %v8179_v38 = vld [vmem:[#allocation3 + $0xc9] sm:$0xff] }
 0x701   : > { %v8463_v40 = vsel %vm18688_vm14, %v8427_v3, 0.0  ;;  %v7373_v31 = vsel %vm7312_vm9, %v7370_v46, %v7372_v1  ;;  %v18690_v61 = vunpack.i.l.bf16 %v18689_v13  ;;  %v18691_v50 = vunpack.i.h.bf16 %v18689_v13  ;;  %12854 = vmatprep.subr.bf16.mxu0 %v18678_v25  ;;  %v18698_v3 = vld [vmem:[#allocation57_spill] sm:$0xff]  ;;  %v18700_v13 = vld [vmem:[#allocation55_spill] sm:$0xff] }
 0x702   : > { %8499 = vst.msk [vmem:[#allocation2 + $0xbb] sm:$0xff] %vm588_vm15, %v8463_v40  ;;  %v7810_v44 = vmul.f32 0.5, %v7161_v34  ;;  %v18692_v9 = vunpack.i.h.bf16 %v18682_v14  ;;  %vm18693_vm6 = vcmp.eq.s32.totalorder %v18620_v63, 1  ;;  %vm18694_vm5 = vcmp.eq.s32.totalorder %v18629_v35, 1  ;;  %v8251_v34 = vld [vmem:[#allocation3 + $0xdb] sm:$0xff]  ;;  %v8252_v14 = vld [vmem:[#allocation3 + $0xe3] sm:$0xff] }
 0x703   : > { %v7774_v45 = vmul.f32 %v18690_v61, %v7262_v49  ;;  %v7775_v41 = vmul.f32 %v18691_v50, %v7264_v28  ;;  %v8464_v19 = vsel %vm18693_vm6, %v8428_v0, 0.0  ;;  %v8465_v1 = vsel %vm18694_vm5, %v8429_v53, 0.0  ;;  %v8573_v49 = vld [vmem:[#allocation2 + $0x31] ss:$2 sm:$0xff] }
 0x704   : > { %v8061_v29 = vmul.f32 %v18692_v9, %v7371_v4  ;;  %v18696_v46 = vunpack.i.h.bf16 %v18695_v55  ;;  %v18697_v26 = vunpack.i.l.bf16 %v18695_v55  ;;  %8500 = vst.msk [vmem:[#allocation2 + $0xc3] sm:$0xff] %vm588_vm15, %v8464_v19  ;;  %8501 = vst.msk [vmem:[#allocation2 + $0xcb] sm:$0xff] %vm588_vm15, %v8465_v1  ;;  %v7130_v35 = vsel %vm7058_vm7, %v17701_v39, %v7094_v2  ;;  %v8577_v40 = vld [vmem:[#allocation2 + $0x51] ss:$2 sm:$0xff] }
 0x705   : > { %v7846_v6 = vadd.f32 %v7810_v44, %v7774_v45  ;;  %v7847_v63 = vadd.f32 %v7811_v7, %v7775_v41  ;;  %vm7056_vm3 = vcmp.ge.f32.partialorder %v7020_v42, 0.0  ;;  %v7023_v11 = vadd.f32 %v17477_v17, %v17335_v24  ;;  %v8358_v37 = vld [vmem:[#allocation3 + $0xe5] sm:$0xff]  ;;  %v8181_v44 = vld [vmem:[#allocation3 + $0xd9] sm:$0xff] }
 0x706   : > { %v8063_v52 = vmul.f32 %v18696_v46, %v7375_v16  ;;  %v8062_v30 = vmul.f32 %v18697_v26, %v7373_v31  ;;  %v8097_v5 = vadd.f32 %v8061_v29, %v7845_v56  ;;  %v7092_v16 = vmul.f32 0.2, %v7020_v42  ;;  %v8253_v2 = vld [vmem:[#allocation3 + $0xeb] sm:$0xff] }
 0x707   : > { %v8603_v43 = vpack.c.bf16 %v8573_v49, %v8571_v18  ;;  %v8215_v59 = vmul.f32 0.25, %v8179_v38  ;;  %vm18699_vm10 = vcmp.eq.s32.totalorder %v18698_v3, 1  ;;  %v8287_v7 = vmul.f32 0.5, %v8251_v34  ;;  %v18703_v29 = vld [vmem:[#allocation58_spill] sm:$0xff]  ;;  %v8182_v49 = vld [vmem:[#allocation3 + $0xe1] sm:$0xff] }
 0x708   : > { %v8098_v15 = vadd.f32 %v8062_v30, %v7846_v6  ;;  %v8099_v47 = vadd.f32 %v8063_v52, %v7847_v63  ;;  %8133 = vst.msk [vmem:[#allocation3 + $0xf3] sm:$0xff] %vm588_vm15, %v8097_v5  ;;  %v17773_v56 = vsel %vm18699_vm10, %v7130_v35, 0.0  ;;  %v8288_v28 = vmul.f32 0.5, %v8252_v14  ;;  %v18706_v14 = vld [vmem:[#allocation78_spill] sm:$0xff] }
 0x709   : > { %v8322_v39 = vadd.f32 %v8286_v33, %v17679_v48  ;;  %v8394_v4 = vmul.f32 0.25, %v8358_v37  ;;  %12779 = vmatmul.mubr.msk.bf16.gmra.mrb[40].mxu0 %vm588_vm15, %v8603_v43  ;;  %v7128_v24 = vsel %vm7056_vm3, %v7020_v42, %v7092_v16  ;;  %vm7059_vm12 = vcmp.ge.f32.partialorder %v7023_v11, 0.0 }
 0x70a   : > { %8134 = vst.msk [vmem:[#allocation3 + $0xfb] sm:$0xff] %vm588_vm15, %v8098_v15  ;;  %8135 = vst.msk [vmem:[#allocation3 + $0x103] sm:$0xff] %vm588_vm15, %v8099_v47  ;;  %v7095_v0 = vmul.f32 0.2, %v7023_v11  ;;  %v7021_v53 = vadd.f32 %v17477_v17, %v17343_v10  ;;  %12782 = vmatprep.mubr.msk.bf16.mxu0 %vm14948_vm1, %v18678_v25  ;;  %v7271_v33 = vrot.slane %v17773_v56, 7  ;;  %v7380_v31 = vrot.slane %v17773_v56, 1 }
 0x70b   : > { %v8430_v48 = vadd.f32 %v8394_v4, %v8322_v39  ;;  %vm18701_vm2 = vcmp.eq.s32.totalorder %v18700_v13, 1  ;;  %v8289_v45 = vmul.f32 0.5, %v8253_v2  ;;  %v8575_v10 = vld [vmem:[#allocation2 + $0x41] ss:$2 sm:$0xff]  ;;  %vm18702_vm11 = vcmp.eq.s32.totalorder %v18651_v57, 1 }
 0x70c   : > { %v17788_v61 = vsel %vm18701_vm2, %v7128_v24, 0.0  ;;  %v7131_v41 = vsel %vm7059_vm12, %v7023_v11, %v7095_v0  ;;  %v8180_v17 = vld [vmem:[#allocation3 + $0xd1] sm:$0xff]  ;;  %vm18704_vm8 = vcmp.eq.s32.totalorder %v18703_v29, 1  ;;  %v7093_v38 = vmul.f32 0.2, %v7021_v53  ;;  %vm18722_vm12 = vmmov %vm18701_vm2 }
 0x70d   : > { %v7267_v42 = vrot.slane %v17788_v61, 7  ;;  %v7376_v50 = vrot.slane %v17788_v61, 1  ;;  %v8466_v9 = vsel %vm18702_vm11, %v8430_v48, 0.0  ;;  %v7167_v18 = vsel %vm18704_vm8, %v7131_v41, 0.0  ;;  %v18708_v41 = vld [vmem:[#allocation79_spill] sm:$0xff] }
 0x70e   : > { %v8604_v19 = vpack.c.bf16 %v8577_v40, %v8575_v10  ;;  %8502 = vst.msk [vmem:[#allocation2 + $0xd3] sm:$0xff] %vm588_vm15, %v8466_v9  ;;  %v7273_v55 = vrot.slane %v7167_v18, 7  ;;  %v7382_v46 = vrot.slane %v7167_v18, 1  ;;  %v18705_v26 = vunpack.i.h.bf16 %v18686_v60  ;;  %v8514_v29 = vld [vmem:[#allocation2] ss:$2 sm:$0xff] }
 0x70f   : > { %v7268_v1 = vsel %vm765_vm0, %v7265_v27, %v7267_v42  ;;  %v7377_v57 = vsel %vm7312_vm9, %v7374_v20, %v7376_v50  ;;  %v8359_v52 = vld [vmem:[#allocation3 + $0xed] sm:$0xff]  ;;  %v7813_v34 = vmul.f32 0.5, %v17788_v61  ;;  %v18707_v6 = vunpack.i.l.bf16 %v18706_v14  ;;  %v14466_v20 = vpop.permute.xlu1 %14465 }
 0x710   : > { %v7777_v30 = vmul.f32 %v18705_v26, %v7268_v1  ;;  %vm7057_vm13 = vcmp.ge.f32.partialorder %v7021_v53, 0.0  ;;  %v8216_v5 = vmul.f32 0.25, %v8180_v17  ;;  %v8217_v27 = vmul.f32 0.25, %v8181_v44  ;;  %v8254_v11 = vld [vmem:[#allocation3 + $0xf3] sm:$0xff]  ;;  %v8581_v17 = vld [vmem:[#allocation2 + $0x71] ss:$2 sm:$0xff] }
 0x711   : > { %v8064_v63 = vmul.f32 %v18707_v6, %v7377_v57  ;;  %v8395_v35 = vmul.f32 0.25, %v8359_v52  ;;  %v7274_v54 = vsel %vm765_vm0, %v7271_v33, %v7273_v55  ;;  %v8323_v16 = vadd.f32 %v8287_v7, %v8215_v59  ;;  %12783 = vmatmul.mubr.msk.bf16.gmra.mrb[44].mxu0 %vm588_vm15, %v8604_v19  ;;  %v8360_v2 = vld [vmem:[#allocation3 + $0xf5] sm:$0xff]  ;;  %v8361_v4 = vld [vmem:[#allocation3 + $0xfd] sm:$0xff] }
 0x712   : > { %v7849_v43 = vadd.f32 %v7813_v34, %v7777_v30  ;;  %v7383_v37 = vsel %vm7312_vm9, %v7380_v31, %v7382_v46  ;;  %v14467_v15 = vunpack.i.l.bf16 %v14466_v20  ;;  %v8324_v47 = vadd.f32 %v8288_v28, %v8216_v5  ;;  %12786 = vmatprep.mubr.msk.bf16.mxu0 %vm14948_vm1, %v18678_v25  ;;  %v8579_v52 = vld [vmem:[#allocation2 + $0x61] ss:$2 sm:$0xff] }
 0x713   : > { %v8100_v60 = vadd.f32 %v8064_v63, %v17740_v22  ;;  %v8325_v39 = vadd.f32 %v8289_v45, %v8217_v27  ;;  %v7129_v24 = vsel %vm7057_vm13, %v7021_v53, %v7093_v38  ;;  %v8396_v59 = vmul.f32 0.25, %v8360_v2  ;;  %v18711_v38 = vld [vmem:[#allocation56_spill] sm:$0xff] }
 0x714   : > { %v8397_v7 = vmul.f32 0.25, %v8361_v4  ;;  %v8431_v0 = vadd.f32 %v8395_v35, %v8323_v16  ;;  %v7420_v22 = vsel %vm7312_vm9, %v7382_v46, 0.0  ;;  %v8218_v40 = vmul.f32 0.25, %v8182_v49 }
 0x715   : > { %8136 = vst.msk [vmem:[#allocation3 + $0x10b] sm:$0xff] %vm588_vm15, %v8100_v60  ;;  %v8290_v48 = vmul.f32 0.5, %v8254_v11  ;;  %v18709_v10 = vunpack.i.h.bf16 %v18708_v41  ;;  %v7816_v45 = vmul.f32 0.5, %v7167_v18  ;;  %v8432_v44 = vadd.f32 %v8396_v59, %v8324_v47  ;;  %v8585_v47 = vld [vmem:[#allocation2 + $0x91] ss:$2 sm:$0xff] }
 0x716   : > { %v8433_v9 = vadd.f32 %v8397_v7, %v8325_v39  ;;  %vm18710_vm7 = vcmp.eq.s32.totalorder %v18661_v32, 1  ;;  %vm18712_vm14 = vcmp.eq.s32.totalorder %v18711_v38, 1  ;;  %v8068_v57 = vmul.f32 %v14467_v15, %v7420_v22  ;;  %v8184_v7 = vld [vmem:[#allocation3 + $0xf1] sm:$0xff] }
 0x717   : > { %v7780_v28 = vmul.f32 %v18709_v10, %v7274_v54  ;;  %v8467_v53 = vsel %vm18710_vm7, %v8431_v0, 0.0  ;;  %v7165_v19 = vsel %vm18712_vm14, %v7129_v24, 0.0  ;;  %vm18713_vm6 = vcmp.eq.s32.totalorder %v18649_v23, 1  ;;  %v8186_v0 = vld [vmem:[#allocation3 + $0x101] sm:$0xff]  ;;  %vm18723_vm2 = vmmov %vm18712_vm14 }
 0x718   : > { %8503 = vst.msk [vmem:[#allocation2 + $0xdb] sm:$0xff] %vm588_vm15, %v8467_v53  ;;  %v7269_v55 = vrot.slane %v7165_v19, 7  ;;  %v7378_v46 = vrot.slane %v7165_v19, 1  ;;  %v8468_v26 = vsel %vm18713_vm6, %v8432_v44, 0.0  ;;  %vm18714_vm5 = vcmp.eq.s32.totalorder %v18656_v36, 1 }
 0x719   : > { %v7852_v1 = vadd.f32 %v7816_v45, %v7780_v28  ;;  %v8469_v18 = vsel %vm18714_vm5, %v8433_v9, 0.0  ;;  %v7814_v30 = vmul.f32 0.5, %v7165_v19  ;;  %v8605_v34 = vpack.c.bf16 %v8581_v17, %v8579_v52  ;;  %8504 = vst.msk [vmem:[#allocation2 + $0xe3] sm:$0xff] %vm588_vm15, %v8468_v26  ;;  %v8587_v17 = vld [vmem:[#allocation2 + $0xa1] ss:$2 sm:$0xff] }
 0x71a   : > { %8505 = vst.msk [vmem:[#allocation2 + $0xeb] sm:$0xff] %vm588_vm15, %v8469_v18  ;;  %v7270_v6 = vsel %vm765_vm0, %v7267_v42, %v7269_v55  ;;  %v7272_v63 = vsel %vm765_vm0, %v7269_v55, %v7271_v33  ;;  %v7379_v23 = vsel %vm7312_vm9, %v7376_v50, %v7378_v46  ;;  %v7381_v36 = vsel %vm7312_vm9, %v7378_v46, %v7380_v31 }
 0x71b   : > { %v8104_v32 = vadd.f32 %v8068_v57, %v7852_v1  ;;  %v18715_v5 = vunpack.i.l.bf16 %v18708_v41  ;;  %v7779_v35 = vmul.f32 %v14462_v21, %v7272_v63  ;;  %v18716_v42 = vunpack.i.h.bf16 %v18706_v14  ;;  %12787 = vmatmul.mubr.msk.bf16.gmra.mrb[48].mxu0 %vm588_vm15, %v8605_v34 }
 0x71c   : > { %v14468_v33 = vunpack.i.h.bf16 %v14466_v20  ;;  %v7815_v61 = vmul.f32 0.5, %v17773_v56  ;;  %v8362_v49 = vld [vmem:[#allocation3 + $0x105] sm:$0xff]  ;;  %12790 = vmatprep.mubr.msk.bf16.mxu0 %vm14948_vm1, %v18678_v25  ;;  %v8326_v31 = vadd.f32 %v8290_v48, %v8218_v40  ;;  %v18717_v11 = vunpack.i.h.bf16 %v17115_v12  ;;  %v8583_v56 = vld [vmem:[#allocation2 + $0x81] ss:$2 sm:$0xff] }
 0x71d   : > { %v7778_v27 = vmul.f32 %v18715_v5, %v7270_v6  ;;  %v8065_v54 = vmul.f32 %v18716_v42, %v7379_v23  ;;  %8140 = vst.msk [vmem:[#allocation3 + $0x12b] sm:$0xff] %vm588_vm15, %v8104_v32  ;;  %v8398_v50 = vmul.f32 0.25, %v8362_v49  ;;  %vm18718_vm0 = vcmp.eq.s32.totalorder %v18676_v62, 1  ;;  %v8255_v12 = vld [vmem:[#allocation3 + $0xfb] sm:$0xff]  ;;  %v8257_v59 = vld [vmem:[#allocation3 + $0x10b] sm:$0xff] }
 0x71e   : > { %v8066_v21 = vmul.f32 %v18717_v11, %v7381_v36  ;;  %v8067_v60 = vmul.f32 %v14468_v33, %v7383_v37  ;;  %v7851_v14 = vadd.f32 %v7815_v61, %v7779_v35  ;;  %v8606_v24 = vpack.c.bf16 %v8585_v47, %v8583_v56  ;;  %v8256_v37 = vld [vmem:[#allocation3 + $0x103] sm:$0xff]  ;;  %v8185_v62 = vld [vmem:[#allocation3 + $0xf9] sm:$0xff] }
 0x71f   : > { %v7850_v16 = vadd.f32 %v7814_v30, %v7778_v27  ;;  %v8101_v15 = vadd.f32 %v8065_v54, %v7849_v43  ;;  %v8434_v39 = vadd.f32 %v8398_v50, %v8326_v31  ;;  %v8183_v43 = vld [vmem:[#allocation3 + $0xe9] sm:$0xff]  ;;  %v8291_v22 = vmul.f32 0.5, %v8255_v12 }
 0x720   : > { %v8103_v2 = vadd.f32 %v8067_v60, %v7851_v14  ;;  %v8292_v40 = vmul.f32 0.5, %v8256_v37  ;;  %v8589_v48 = vld [vmem:[#allocation2 + $0xb1] ss:$2 sm:$0xff]  ;;  %v8219_v41 = vmul.f32 0.25, %v8183_v43  ;;  %v8293_v10 = vmul.f32 0.5, %v8257_v59 }
 0x721   : > { %v8102_v20 = vadd.f32 %v8066_v21, %v7850_v16  ;;  %8137 = vst.msk [vmem:[#allocation3 + $0x113] sm:$0xff] %vm588_vm15, %v8101_v15  ;;  %v8470_v4 = vsel %vm18718_vm0, %v8434_v39, 0.0  ;;  %v8220_v44 = vmul.f32 0.25, %v8184_v7  ;;  %v8222_v9 = vmul.f32 0.25, %v8186_v0  ;;  %v8187_v36 = vld [vmem:[#allocation3 + $0x109] sm:$0xff] }
 0x722   : > { %8506 = vst.msk [vmem:[#allocation2 + $0xf3] sm:$0xff] %vm588_vm15, %v8470_v4  ;;  %8139 = vst.msk [vmem:[#allocation3 + $0x123] sm:$0xff] %vm588_vm15, %v8103_v2  ;;  %v8221_v57 = vmul.f32 0.25, %v8185_v62  ;;  %v8607_v26 = vpack.c.bf16 %v8589_v48, %v8587_v17  ;;  %v8327_v18 = vadd.f32 %v8291_v22, %v8219_v41  ;;  %v8223_v21 = vmul.f32 0.25, %v8187_v36  ;;  %v8591_v14 = vld [vmem:[#allocation2 + $0xc1] ss:$2 sm:$0xff] }
 0x723   : > { %8138 = vst.msk [vmem:[#allocation3 + $0x11b] sm:$0xff] %vm588_vm15, %v8102_v20  ;;  %12791 = vmatmul.mubr.msk.bf16.gmra.mrb[52].mxu0 %vm588_vm15, %v8606_v24  ;;  %v8328_v30 = vadd.f32 %v8292_v40, %v8220_v44  ;;  %vm18719_vm9 = vcmp.eq.s32.totalorder %v18684_v8, 1  ;;  %v8593_v15 = vld [vmem:[#allocation2 + $0xd1] ss:$2 sm:$0xff]  ;;  %vm18720_vm3 = vcmp.eq.s32.totalorder %v18673_v51, 1  ;;  %vm18721_vm10 = vcmp.eq.s32.totalorder %v18679_v58, 1 }
 0x724   : > { %12794 = vmatprep.mubr.msk.bf16.mxu0 %vm14948_vm1, %v18678_v25  ;;  %v8329_v5 = vadd.f32 %v8293_v10, %v8221_v57  ;;  %v8608_v0 = vpack.c.bf16 %v8593_v15, %v8591_v14  ;;  %vm18724_vm11 = vcmp.eq.s32.totalorder %v18698_v3, 1  ;;  %v8518_v57 = vld [vmem:[#allocation2 + $0x20] ss:$2 sm:$0xff]  ;;  %v14517_v15 = vld [vmem:[#allocation15 + $0x60] sm:$0xff]   ;;  %vm18726_vm13 = vcmask 23552  }
 0x725   : > { %v8530_v36 = vld [vmem:[#allocation2 + $0x80] ss:$2 sm:$0xff]  ;;  %vm18727_vm7 = vmmov %vm18726_vm13 }
 0x726   : > { %v8931_v14 = vld [vmem:[#allocation2 + $0x12] ss:$2 sm:$0xff]  ;;  %vm18728_vm14 = vmmov %vm18727_vm7 }
 0x727   : > { %vm18729_vm6 = vmmov %vm18727_vm7 }
 0x728   : > { %v8148_v28 = vld [vmem:[#allocation3 + $0x10e] sm:$0xff]  ;;  %vm18730_vm5 = vmmov %vm18729_vm6 }
 0x729   : > { %v8258_v45 = vld [vmem:[#allocation3 + $0x113] sm:$0xff]  ;;  %8151 = vst.msk [vmem:[#allocation3 + $0x132] sm:$0xff] %vm588_vm15, %v8148_v28  ;;  %v8260_v46 = vld [vmem:[#allocation3 + $0x123] sm:$0xff]  ;;  %vm18731_vm0 = vmmov %vm18730_vm5 }
 0x72a   : > { %v8149_v53 = vld [vmem:[#allocation3 + $0x116] sm:$0xff]  ;;  %v8150_v19 = vld [vmem:[#allocation3 + $0x11e] sm:$0x3]  ;;  %v8294_v1 = vmul.f32 0.5, %v8258_v45  ;;  %v8363_v52 = vld [vmem:[#allocation3 + $0x10d] sm:$0xff]  ;;  %v8296_v31 = vmul.f32 0.5, %v8260_v46 }
 0x72b   : > { %8152 = vst.msk [vmem:[#allocation3 + $0x13a] sm:$0xff] %vm588_vm15, %v8149_v53  ;;  %v8259_v55 = vld [vmem:[#allocation3 + $0x11b] sm:$0xff]  ;;  %v8366_v63 = vld [vmem:[#allocation3 + $0x125] sm:$0xff]  ;;  %v8399_v23 = vmul.f32 0.25, %v8363_v52  ;;  %12795 = vmatmul.mubr.msk.bf16.gmra.mrb[56].mxu0 %vm588_vm15, %v8607_v26  ;;  %v8188_v54 = vld [vmem:[#allocation3 + $0x111] sm:$0xff] }
 0x72c   : > { %8153 = vst.msk [vmem:[#allocation3 + $0x142] sm:$0x3] %vm8146_vm4, %v8150_v19  ;;  %v8330_v34 = vadd.f32 %v8294_v1, %v8222_v9  ;;  %v8364_v32 = vld [vmem:[#allocation3 + $0x115] sm:$0xff]  ;;  %v8365_v6 = vld [vmem:[#allocation3 + $0x11d] sm:$0xff]  ;;  %v8402_v42 = vmul.f32 0.25, %v8366_v63  ;;  %v8295_v33 = vmul.f32 0.5, %v8259_v55  ;;  %12798 = vmatprep.mubr.msk.bf16.mxu0 %vm14948_vm1, %v18678_v25 }
 0x72d   : > { %v8400_v27 = vmul.f32 0.25, %v8364_v32  ;;  %v8401_v35 = vmul.f32 0.25, %v8365_v6  ;;  %v8435_v61 = vadd.f32 %v8399_v23, %v8327_v18  ;;  %v8189_v49 = vld [vmem:[#allocation3 + $0x119] sm:$0xff]  ;;  %v8224_v47 = vmul.f32 0.25, %v8188_v54  ;;  %v14513_v53 = vld [vmem:[#allocation15 + $0x40] sm:$0xff]   ;;  %v14514_v1 = vld [vmem:[#allocation15 + $0x48] sm:$0xff]  }
 0x72e   : > { %v8438_v11 = vadd.f32 %v8402_v42, %v8330_v34  ;;  %v8225_v24 = vmul.f32 0.25, %v8189_v49  ;;  %v8331_v8 = vadd.f32 %v8295_v33, %v8223_v21  ;;  %v8595_v45 = vld [vmem:[#allocation2 + $0xe1] ss:$2 sm:$0xff]  ;;  %v8516_v9 = vld [vmem:[#allocation2 + $0x10] ss:$2 sm:$0xff] }
 0x72f   : > { %v8436_v50 = vadd.f32 %v8400_v27, %v8328_v30  ;;  %v8437_v16 = vadd.f32 %v8401_v35, %v8329_v5  ;;  %v8471_v60 = vsel %vm18719_vm9, %v8435_v61, 0.0  ;;  %v8332_v51 = vadd.f32 %v8296_v31, %v8224_v47  ;;  %v8520_v55 = vld [vmem:[#allocation2 + $0x30] ss:$2 sm:$0xff]  ;;  %v14515_v46 = vld [vmem:[#allocation15 + $0x50] sm:$0xff]   ;;  %vm18732_vm9 = vmmov %vm18731_vm0 }
 0x730   : > { %v8261_v39 = vld [vmem:[#allocation3 + $0x12b] sm:$0xff]  ;;  %v8474_v4 = vsel %vm18722_vm12, %v8438_v11, 0.0  ;;  %8507 = vst.msk [vmem:[#allocation2 + $0xfb] sm:$0xff] %vm588_vm15, %v8471_v60  ;;  %v8549_v19 = vpack.c.bf16 %v8516_v9, %v8514_v29  ;;  %v8550_v52 = vpack.c.bf16 %v8520_v55, %v8518_v57  ;;  %v14516_v26 = vld [vmem:[#allocation15 + $0x58] sm:$0xff]   ;;  %v14523_v55 = vld [vmem:[#allocation15 + $0x90] sm:$0xff]   ;;  %vm596_vm12 = vcmask 516096  }
 0x731   : > { %v8367_v20 = vld [vmem:[#allocation3 + $0x12d] sm:$0xff]  ;;  %v8472_v2 = vsel %vm18720_vm3, %v8436_v50, 0.0  ;;  %v8473_v56 = vsel %vm18721_vm10, %v8437_v16, 0.0  ;;  %v8297_v12 = vmul.f32 0.5, %v8261_v39  ;;  %8510 = vst.msk [vmem:[#allocation2 + $0x113] sm:$0xff] %vm588_vm15, %v8474_v4  ;;  %vm18733_vm3 = vmmov %vm18731_vm0 }
 0x732   : > { %v8368_v37 = vld [vmem:[#allocation3 + $0x135] sm:$0xff]  ;;  %v8403_v59 = vmul.f32 0.25, %v8367_v20  ;;  %8508 = vst.msk [vmem:[#allocation2 + $0x103] sm:$0xff] %vm588_vm15, %v8472_v2  ;;  %8509 = vst.msk [vmem:[#allocation2 + $0x10b] sm:$0xff] %vm588_vm15, %v8473_v56  ;;  %v8524_v18 = vld [vmem:[#allocation2 + $0x50] ss:$2 sm:$0xff] }
 0x733   : > { %v8369_v43 = vld [vmem:[#allocation3 + $0x13d] sm:$0xff]  ;;  %v8404_v58 = vmul.f32 0.25, %v8368_v37  ;;  %v8333_v13 = vadd.f32 %v8297_v12, %v8225_v24  ;;  %12799 = vmatmul.mubr.msk.bf16.gmra.mrb[60].mxu0 %vm588_vm15, %v8608_v0  ;;  %v14518_v39 = vld [vmem:[#allocation15 + $0x68] sm:$0xff]   ;;  %v14521_v9 = vld [vmem:[#allocation15 + $0x80] sm:$0xff]   ;;  %10803 = vst.msk [vmem:[%s16267_s12 + $0x6b] sm:$0x1] %vm596_vm12, %v18678_v25 }
 0x734   : > { %v8405_v7 = vmul.f32 0.25, %v8369_v43  ;;  %v8439_v62 = vadd.f32 %v8403_v59, %v8331_v8  ;;  %12802 = vmatprep.mubr.msk.bf16.mxu0 %vm14948_vm1, %v18678_v25  ;;  %v8522_v30 = vld [vmem:[#allocation2 + $0x40] ss:$2 sm:$0xff]  ;;  %v8528_v32 = vld [vmem:[#allocation2 + $0x70] ss:$2 sm:$0xff]  ;;  %vm18734_vm10 = vmmov %vm18731_vm0 }
 0x735   : > { %v8440_v22 = vadd.f32 %v8404_v58, %v8332_v51  ;;  %v8551_v34 = vpack.c.bf16 %v8524_v18, %v8522_v30  ;;  %v8526_v6 = vld [vmem:[#allocation2 + $0x60] ss:$2 sm:$0xff]  ;;  %v8532_v23 = vld [vmem:[#allocation2 + $0x90] ss:$2 sm:$0xff] }
 0x736   : > { %v8441_v40 = vadd.f32 %v8405_v7, %v8333_v13  ;;  %v8475_v48 = vsel %vm18723_vm2, %v8439_v62, 0.0  ;;  %v8552_v63 = vpack.c.bf16 %v8528_v32, %v8526_v6  ;;  %v8553_v5 = vpack.c.bf16 %v8532_v23, %v8530_v36  ;;  %v8536_v27 = vld [vmem:[#allocation2 + $0xb0] ss:$2 sm:$0xff]  ;;  %v8534_v35 = vld [vmem:[#allocation2 + $0xa0] ss:$2 sm:$0xff] }
 0x737   : > { %v8476_v41 = vsel %vm18724_vm11, %v8440_v22, 0.0  ;;  %8511 = vst.msk [vmem:[#allocation2 + $0x11b] sm:$0xff] %vm588_vm15, %v8475_v48  ;;  %v8597_v28 = vld [vmem:[#allocation2 + $0xf1] ss:$2 sm:$0xff]  ;;  %v8554_v42 = vpack.c.bf16 %v8536_v27, %v8534_v35  ;;  %v8540_v54 = vld [vmem:[#allocation2 + $0xd0] ss:$2 sm:$0xff] }
 0x738   : > { %v8477_v10 = vsel %vm18704_vm8, %v8441_v40, 0.0  ;;  %8512 = vst.msk [vmem:[#allocation2 + $0x123] sm:$0xff] %vm588_vm15, %v8476_v41  ;;  %v8609_v17 = vpack.c.bf16 %v8597_v28, %v8595_v45  ;;  %v8538_v33 = vld [vmem:[#allocation2 + $0xc0] ss:$2 sm:$0xff]  ;;  %v8544_v49 = vld [vmem:[#allocation2 + $0xf0] ss:$2 sm:$0xff] }
 0x739   : > { %8513 = vst.msk [vmem:[#allocation2 + $0x12b] sm:$0xff] %vm588_vm15, %v8477_v10  ;;  %v8599_v3 = vld [vmem:[#allocation2 + $0x101] ss:$2 sm:$0xff]  ;;  %v8555_v61 = vpack.c.bf16 %v8540_v54, %v8538_v33  ;;  %v8542_v31 = vld [vmem:[#allocation2 + $0xe0] ss:$2 sm:$0xff]  ;;  %vm10806_vm11 = vcmask 523266  }
 0x73a   : > { %v8556_v50 = vpack.c.bf16 %v8544_v49, %v8542_v31  ;;  %v8546_v11 = vld [vmem:[#allocation2 + $0x100] ss:$2 sm:$0xff] }
 0x73b   : > { %12803 = vmatmul.mubr.msk.bf16.gmra.mrb[64].mxu0 %vm588_vm15, %v8609_v17  ;;  %v8929_v60 = vld [vmem:[#allocation2 + $0x2] ss:$2 sm:$0xff]  ;;  %v8935_v2 = vld [vmem:[#allocation2 + $0x32] ss:$2 sm:$0xff] }
 0x73c   : > { %12806 = vmatprep.mubr.msk.bf16.mxu0 %vm14948_vm1, %v18678_v25  ;;  %v8964_v47 = vpack.c.bf16 %v8931_v14, %v8929_v60  ;;  %v8933_v20 = vld [vmem:[#allocation2 + $0x22] ss:$2 sm:$0xff]  ;;  %v8939_v12 = vld [vmem:[#allocation2 + $0x52] ss:$2 sm:$0xff]  ;;  %v9362_v60 = vld [vmem:[#allocation2 + $0x23] ss:$2 sm:$0xff] }
 0x73d   : > { %v14519_v56 = vld [vmem:[#allocation15 + $0x70] sm:$0xff]   ;;  %v8965_v4 = vpack.c.bf16 %v8935_v2, %v8933_v20  ;;  %v14520_v24 = vld [vmem:[#allocation15 + $0x78] sm:$0xff]   ;;  %v14525_v14 = vld [vmem:[#allocation15 + $0xa0] sm:$0xff]  }
 0x73e   : > { %v8601_v38 = vld [vmem:[#allocation2 + $0x111] ss:$2 sm:$0xff]  ;;  %v8548_v16 = vld [vmem:[#allocation2 + $0x110] ss:$2 sm:$0xff]  ;;  %v14527_v2 = vld [vmem:[#allocation15 + $0xb0] sm:$0xff]  }
 0x73f   : > { %v8610_v44 = vpack.c.bf16 %v8601_v38, %v8599_v3  ;;  %v8557_v21 = vpack.c.bf16 %v8548_v16, %v8546_v11  ;;  %v8937_v8 = vld [vmem:[#allocation2 + $0x42] ss:$2 sm:$0xff]  ;;  %v8943_v43 = vld [vmem:[#allocation2 + $0x72] ss:$2 sm:$0xff]  ;;  %v9364_v20 = vld [vmem:[#allocation2 + $0x33] ss:$2 sm:$0xff] }
 0x740   : > { %v8966_v37 = vpack.c.bf16 %v8939_v12, %v8937_v8  ;;  %v8941_v59 = vld [vmem:[#allocation2 + $0x62] ss:$2 sm:$0xff]  ;;  %v8947_v58 = vld [vmem:[#allocation2 + $0x92] ss:$2 sm:$0xff]  ;;  %v9368_v12 = vld [vmem:[#allocation2 + $0x53] ss:$2 sm:$0xff] }
 0x741   : > { %v8967_v51 = vpack.c.bf16 %v8943_v43, %v8941_v59  ;;  %v8945_v7 = vld [vmem:[#allocation2 + $0x82] ss:$2 sm:$0xff]  ;;  %v8951_v13 = vld [vmem:[#allocation2 + $0xb2] ss:$2 sm:$0xff]  ;;  %v9372_v43 = vld [vmem:[#allocation2 + $0x73] ss:$2 sm:$0xff] }
 0x742   : > { %v8968_v0 = vpack.c.bf16 %v8947_v58, %v8945_v7  ;;  %v8949_v62 = vld [vmem:[#allocation2 + $0xa2] ss:$2 sm:$0xff]  ;;  %v8955_v40 = vld [vmem:[#allocation2 + $0xd2] ss:$2 sm:$0xff]  ;;  %v9376_v58 = vld [vmem:[#allocation2 + $0x93] ss:$2 sm:$0xff] }
 0x743   : > { %12807 = vmatmul.mubr.msk.bf16.gmra.mrb[68].mxu0 %vm588_vm15, %v8610_v44  ;;  %v8969_v22 = vpack.c.bf16 %v8951_v13, %v8949_v62  ;;  %v8953_v48 = vld [vmem:[#allocation2 + $0xc2] ss:$2 sm:$0xff]  ;;  %v8959_v10 = vld [vmem:[#allocation2 + $0xf2] ss:$2 sm:$0xff]  ;;  %v9380_v13 = vld [vmem:[#allocation2 + $0xb3] ss:$2 sm:$0xff] }
 0x744   : > { %12818 = vmatprep.mubr.msk.bf16.mxu0 %vm14948_vm1, %v18678_v25  ;;  %v8970_v41 = vpack.c.bf16 %v8955_v40, %v8953_v48  ;;  %v8957_v28 = vld [vmem:[#allocation2 + $0xe2] ss:$2 sm:$0xff]  ;;  %v8963_v17 = vld [vmem:[#allocation2 + $0x112] ss:$2 sm:$0xff]  ;;  %v9384_v40 = vld [vmem:[#allocation2 + $0xd3] ss:$2 sm:$0xff] }
 0x745   : > { %v8971_v45 = vpack.c.bf16 %v8959_v10, %v8957_v28  ;;  %v8961_v38 = vld [vmem:[#allocation2 + $0x102] ss:$2 sm:$0xff]  ;;  %v9152_v44 = vld [vmem:[#allocation2 + $0x12] ss:$2 sm:$0xff]  ;;  %v9388_v10 = vld [vmem:[#allocation2 + $0xf3] ss:$2 sm:$0xff] }
 0x746   : > { %v8972_v3 = vpack.c.bf16 %v8963_v17, %v8961_v38  ;;  %v9153_v29 = vld [vmem:[#allocation2 + $0x22] ss:$2 sm:$0xff]  ;;  %v9154_v57 = vld [vmem:[#allocation2 + $0x32] ss:$2 sm:$0xff]  ;;  %v9392_v17 = vld [vmem:[#allocation2 + $0x113] ss:$2 sm:$0xff] }
 0x747   : > { %v9156_v18 = vld [vmem:[#allocation2 + $0x52] ss:$2 sm:$0xff] }
 0x748   : > { %v9158_v32 = vld [vmem:[#allocation2 + $0x72] ss:$2 sm:$0xff] }
 0x749   : > { %v9160_v23 = vld [vmem:[#allocation2 + $0x92] ss:$2 sm:$0xff] }
 0x74a   : > { %v9162_v27 = vld [vmem:[#allocation2 + $0xb2] ss:$2 sm:$0xff] }
 0x74b   : > { %12819 = vmatmul.mubr.msk.bf16.vlgmr.msra.gmra.mrb[36].mxu0 %vm588_vm15, %v8549_v19  ;;  %v14522_v19 = vld [vmem:[#allocation15 + $0x88] sm:$0xff]  }
 0x74c   : > { %12855 = vmatpush3.bf16.msra.mxu0 %v14513_v53  ;;  %12822 = vmatprep.mubr.msk.bf16.mxu0 %vm14948_vm1, %v18678_v25  ;;  %v9171_v53 = vpack.c.bf16 %v9153_v29, %v9152_v44  ;;  %v9164_v54 = vld [vmem:[#allocation2 + $0xd2] ss:$2 sm:$0xff] }
 0x74d   : > { %12856 = vmatprep.subr.bf16.mxu0 %v18678_v25  ;;  %v9166_v49 = vld [vmem:[#allocation2 + $0xf2] ss:$2 sm:$0xff] }
 0x74e   : > { %v9168_v16 = vld [vmem:[#allocation2 + $0x112] ss:$2 sm:$0xff] }
 0x74f   : > { %v9586_v44 = vld [vmem:[#allocation2 + $0x24] ss:$2 sm:$0xff]  ;;  %v14529_v29 = vld [vmem:[#allocation15 + $0xc0] sm:$0xff]  }
 0x750   : > { %12857 = vmatpush3.bf16.msra.mxu0 %v14514_v1  ;;  %v9155_v1 = vld [vmem:[#allocation2 + $0x42] ss:$2 sm:$0xff] }
 0x751   : > { %12858 = vmatprep.subr.bf16.mxu0 %v18678_v25 }
 0x753   : > { %12823 = vmatmul.mubr.msk.bf16.gmra.mrb[40].mxu0 %vm588_vm15, %v8550_v52  ;;  %v14524_v52 = vld [vmem:[#allocation15 + $0x98] sm:$0xff]  }
 0x754   : > { %12826 = vmatprep.mubr.msk.bf16.mxu0 %vm14948_vm1, %v18678_v25  ;;  %12859 = vmatpush3.bf16.msra.mxu0 %v14515_v46  ;;  %v9172_v46 = vpack.c.bf16 %v9155_v1, %v9154_v57  ;;  %v9588_v1 = vld [vmem:[#allocation2 + $0x34] ss:$2 sm:$0xff]  ;;  %v14531_v57 = vld [vmem:[#allocation15 + $0xd0] sm:$0xff]  }
 0x755   : > { %12860 = vmatprep.subr.bf16.mxu0 %v18678_v25 }
 0x758   : > { %12861 = vmatpush3.bf16.msra.mxu0 %v14516_v26  ;;  %v9157_v26 = vld [vmem:[#allocation2 + $0x62] ss:$2 sm:$0xff] }
 0x759   : > { %12898 = vmatprep.subr.bf16.mxu0 %v18678_v25  ;;  %v9173_v30 = vpack.c.bf16 %v9157_v26, %v9156_v18  ;;  %v9592_v26 = vld [vmem:[#allocation2 + $0x54] ss:$2 sm:$0xff] }
 0x75b   : > { %12827 = vmatmul.mubr.msk.bf16.gmra.mrb[44].mxu0 %vm588_vm15, %v8551_v34  ;;  %v9159_v34 = vld [vmem:[#allocation2 + $0x82] ss:$2 sm:$0xff] }
 0x75c   : > { %12830 = vmatprep.mubr.msk.bf16.mxu0 %vm14948_vm1, %v18678_v25  ;;  %v9174_v6 = vpack.c.bf16 %v9159_v34, %v9158_v32  ;;  %v9596_v34 = vld [vmem:[#allocation2 + $0x74] ss:$2 sm:$0xff] }
 0x763   : > { %12831 = vmatmul.mubr.msk.bf16.gmra.mrb[48].mxu0 %vm588_vm15, %v8552_v63  ;;  %v9161_v63 = vld [vmem:[#allocation2 + $0xa2] ss:$2 sm:$0xff] }
 0x764   : > { %12834 = vmatprep.mubr.msk.bf16.mxu0 %vm14948_vm1, %v18678_v25  ;;  %v9175_v36 = vpack.c.bf16 %v9161_v63, %v9160_v23  ;;  %v9600_v63 = vld [vmem:[#allocation2 + $0x94] ss:$2 sm:$0xff] }
 0x76b   : > { %12835 = vmatmul.mubr.msk.bf16.gmra.mrb[52].mxu0 %vm588_vm15, %v8553_v5  ;;  %v9163_v5 = vld [vmem:[#allocation2 + $0xc2] ss:$2 sm:$0xff] }
 0x76c   : > { %12838 = vmatprep.mubr.msk.bf16.mxu0 %vm14948_vm1, %v18678_v25  ;;  %v9176_v35 = vpack.c.bf16 %v9163_v5, %v9162_v27  ;;  %v9604_v5 = vld [vmem:[#allocation2 + $0xb4] ss:$2 sm:$0xff] }
 0x773   : > { %12839 = vmatmul.mubr.msk.bf16.gmra.mrb[56].mxu0 %vm588_vm15, %v8554_v42  ;;  %v9165_v42 = vld [vmem:[#allocation2 + $0xe2] ss:$2 sm:$0xff] }
 0x774   : > { %12842 = vmatprep.mubr.msk.bf16.mxu0 %vm14948_vm1, %v18678_v25  ;;  %v9177_v33 = vpack.c.bf16 %v9165_v42, %v9164_v54  ;;  %v9608_v42 = vld [vmem:[#allocation2 + $0xd4] ss:$2 sm:$0xff] }
 0x77b   : > { %12843 = vmatmul.mubr.msk.bf16.gmra.mrb[60].mxu0 %vm588_vm15, %v8555_v61  ;;  %v9167_v61 = vld [vmem:[#allocation2 + $0x102] ss:$2 sm:$0xff] }
 0x77c   : > { %12846 = vmatprep.mubr.msk.bf16.mxu0 %vm14948_vm1, %v18678_v25  ;;  %v9178_v31 = vpack.c.bf16 %v9167_v61, %v9166_v49  ;;  %v9612_v61 = vld [vmem:[#allocation2 + $0xf4] ss:$2 sm:$0xff] }
 0x783   : > { %12847 = vmatmul.mubr.msk.bf16.gmra.mrb[64].mxu0 %vm588_vm15, %v8556_v50  ;;  %v9170_v50 = vld [vmem:[#allocation2 + $0x122] ss:$2 sm:$0xff] }
 0x784   : > { %12850 = vmatprep.mubr.msk.bf16.mxu0 %vm14948_vm1, %v18678_v25  ;;  %v9179_v11 = vpack.c.bf16 %v9170_v50, %v9168_v16  ;;  %v9616_v50 = vld [vmem:[#allocation2 + $0x114] ss:$2 sm:$0xff] }
 0x78b   : > { %12851 = vmatmul.mubr.msk.bf16.gmra.mrb[68].mxu0 %vm588_vm15, %v8557_v21  ;;  %v9360_v21 = vld [vmem:[#allocation2 + $0x13] ss:$2 sm:$0xff] }
 0x78c   : > { %12862 = vmatprep.mubr.msk.bf16.mxu0 %vm14948_vm1, %v18678_v25 }
 0x793   : > { %12863 = vmatmul.mubr.msk.bf16.vlgmr.msra.gmra.mrb[36].mxu0 %vm588_vm15, %v8964_v47  ;;  %v14526_v47 = vld [vmem:[#allocation15 + $0xa8] sm:$0xff]  }
 0x794   : > { %12899 = vmatpush3.bf16.msra.mxu0 %v14517_v15  ;;  %12866 = vmatprep.mubr.msk.bf16.mxu0 %vm14948_vm1, %v18678_v25  ;;  %v9395_v15 = vpack.c.bf16 %v9362_v60, %v9360_v21  ;;  %v9808_v21 = vld [vmem:[#allocation2 + $0x34] ss:$2 sm:$0xff] }
 0x795   : > { %12900 = vmatprep.subr.bf16.mxu0 %v18678_v25  ;;  %v14533_v60 = vld [vmem:[#allocation15 + $0xe0] sm:$0xff]  }
 0x798   : > { %12901 = vmatpush3.bf16.msra.mxu0 %v14518_v39  ;;  %v9366_v39 = vld [vmem:[#allocation2 + $0x43] ss:$2 sm:$0xff] }
 0x799   : > { %12902 = vmatprep.subr.bf16.mxu0 %v18678_v25 }
 0x79b   : > { %12867 = vmatmul.mubr.msk.bf16.gmra.mrb[40].mxu0 %vm588_vm15, %v8965_v4  ;;  %v14528_v4 = vld [vmem:[#allocation15 + $0xb8] sm:$0xff]  }
 0x79c   : > { %12870 = vmatprep.mubr.msk.bf16.mxu0 %vm14948_vm1, %v18678_v25  ;;  %12903 = vmatpush3.bf16.msra.mxu0 %v14519_v56  ;;  %v9396_v56 = vpack.c.bf16 %v9366_v39, %v9364_v20  ;;  %v9809_v39 = vld [vmem:[#allocation2 + $0x44] ss:$2 sm:$0xff] }
 0x79d   : > { %12904 = vmatprep.subr.bf16.mxu0 %v18678_v25  ;;  %v14535_v20 = vld [vmem:[#allocation15 + $0xf0] sm:$0xff]  }
 0x7a0   : > { %12905 = vmatpush3.bf16.msra.mxu0 %v14520_v24  ;;  %v9370_v24 = vld [vmem:[#allocation2 + $0x63] ss:$2 sm:$0xff] }
 0x7a1   : > { %12942 = vmatprep.subr.bf16.mxu0 %v18678_v25  ;;  %v9397_v8 = vpack.c.bf16 %v9370_v24, %v9368_v12  ;;  %v9811_v24 = vld [vmem:[#allocation2 + $0x64] ss:$2 sm:$0xff] }
 0x7a3   : > { %12871 = vmatmul.mubr.msk.bf16.gmra.mrb[44].mxu0 %vm588_vm15, %v8966_v37  ;;  %v9374_v37 = vld [vmem:[#allocation2 + $0x83] ss:$2 sm:$0xff] }
 0x7a4   : > { %12874 = vmatprep.mubr.msk.bf16.mxu0 %vm14948_vm1, %v18678_v25  ;;  %v9398_v59 = vpack.c.bf16 %v9374_v37, %v9372_v43  ;;  %v9813_v37 = vld [vmem:[#allocation2 + $0x84] ss:$2 sm:$0xff] }
 0x7ab   : > { %12875 = vmatmul.mubr.msk.bf16.gmra.mrb[48].mxu0 %vm588_vm15, %v8967_v51  ;;  %v9378_v51 = vld [vmem:[#allocation2 + $0xa3] ss:$2 sm:$0xff] }
 0x7ac   : > { %12878 = vmatprep.mubr.msk.bf16.mxu0 %vm14948_vm1, %v18678_v25  ;;  %v9399_v7 = vpack.c.bf16 %v9378_v51, %v9376_v58  ;;  %v9815_v51 = vld [vmem:[#allocation2 + $0xa4] ss:$2 sm:$0xff] }
 0x7b3   : > { %12879 = vmatmul.mubr.msk.bf16.gmra.mrb[52].mxu0 %vm588_vm15, %v8968_v0  ;;  %v9382_v0 = vld [vmem:[#allocation2 + $0xc3] ss:$2 sm:$0xff] }
 0x7b4   : > { %12882 = vmatprep.mubr.msk.bf16.mxu0 %vm14948_vm1, %v18678_v25  ;;  %v9400_v62 = vpack.c.bf16 %v9382_v0, %v9380_v13  ;;  %v9817_v0 = vld [vmem:[#allocation2 + $0xc4] ss:$2 sm:$0xff] }
 0x7bb   : > { %12883 = vmatmul.mubr.msk.bf16.gmra.mrb[56].mxu0 %vm588_vm15, %v8969_v22  ;;  %v9386_v22 = vld [vmem:[#allocation2 + $0xe3] ss:$2 sm:$0xff] }
 0x7bc   : > { %12886 = vmatprep.mubr.msk.bf16.mxu0 %vm14948_vm1, %v18678_v25  ;;  %v9401_v48 = vpack.c.bf16 %v9386_v22, %v9384_v40  ;;  %v9819_v22 = vld [vmem:[#allocation2 + $0xe4] ss:$2 sm:$0xff] }
 0x7c3   : > { %12887 = vmatmul.mubr.msk.bf16.gmra.mrb[60].mxu0 %vm588_vm15, %v8970_v41  ;;  %v9390_v41 = vld [vmem:[#allocation2 + $0x103] ss:$2 sm:$0xff] }
 0x7c4   : > { %12890 = vmatprep.mubr.msk.bf16.mxu0 %vm14948_vm1, %v18678_v25  ;;  %v9402_v28 = vpack.c.bf16 %v9390_v41, %v9388_v10  ;;  %v9821_v41 = vld [vmem:[#allocation2 + $0x104] ss:$2 sm:$0xff] }
 0x7cb   : > { %12891 = vmatmul.mubr.msk.bf16.gmra.mrb[64].mxu0 %vm588_vm15, %v8971_v45  ;;  %v9394_v45 = vld [vmem:[#allocation2 + $0x123] ss:$2 sm:$0xff] }
 0x7cc   : > { %12894 = vmatprep.mubr.msk.bf16.mxu0 %vm14948_vm1, %v18678_v25  ;;  %v9403_v38 = vpack.c.bf16 %v9394_v45, %v9392_v17  ;;  %v9825_v45 = vld [vmem:[#allocation2 + $0x134] ss:$2 sm:$0xff] }
 0x7d3   : > { %12895 = vmatmul.mubr.msk.bf16.gmra.mrb[68].mxu0 %vm588_vm15, %v8972_v3  ;;  %v9584_v3 = vld [vmem:[#allocation2 + $0x14] ss:$2 sm:$0xff] }
 0x7d4   : > { %12906 = vmatprep.mubr.msk.bf16.mxu0 %vm14948_vm1, %v18678_v25 }
 0x7db   : > { %12907 = vmatmul.mubr.msk.bf16.vlgmr.msra.gmra.mrb[36].mxu0 %vm588_vm15, %v9171_v53  ;;  %v14530_v53 = vld [vmem:[#allocation15 + $0xc8] sm:$0xff]  }
 0x7dc   : > { %12943 = vmatpush3.bf16.msra.mxu0 %v14521_v9  ;;  %12910 = vmatprep.mubr.msk.bf16.mxu0 %vm14948_vm1, %v18678_v25  ;;  %v9619_v9 = vpack.c.bf16 %v9586_v44, %v9584_v3  ;;  %v10017_v3 = vld [vmem:[#allocation2 + $0x35] ss:$2 sm:$0xff] }
 0x7dd   : > { %12944 = vmatprep.subr.bf16.mxu0 %v18678_v25  ;;  %v14537_v44 = vld [vmem:[#allocation15 + $0x100] sm:$0xff]  }
 0x7e0   : > { %12945 = vmatpush3.bf16.msra.mxu0 %v14522_v19  ;;  %v9590_v19 = vld [vmem:[#allocation2 + $0x44] ss:$2 sm:$0xff] }
 0x7e1   : > { %12946 = vmatprep.subr.bf16.mxu0 %v18678_v25 }
 0x7e3   : > { %12911 = vmatmul.mubr.msk.bf16.gmra.mrb[40].mxu0 %vm588_vm15, %v9172_v46  ;;  %v14532_v46 = vld [vmem:[#allocation15 + $0xd8] sm:$0xff]  }
 0x7e4   : > { %12914 = vmatprep.mubr.msk.bf16.mxu0 %vm14948_vm1, %v18678_v25  ;;  %12947 = vmatpush3.bf16.msra.mxu0 %v14523_v55  ;;  %v9620_v55 = vpack.c.bf16 %v9590_v19, %v9588_v1  ;;  %v10019_v19 = vld [vmem:[#allocation2 + $0x45] ss:$2 sm:$0xff] }
 0x7e5   : > { %12948 = vmatprep.subr.bf16.mxu0 %v18678_v25  ;;  %v14539_v1 = vld [vmem:[#allocation15 + $0x110] sm:$0xff]  }
 0x7e8   : > { %12949 = vmatpush3.bf16.msra.mxu0 %v14524_v52  ;;  %v9594_v52 = vld [vmem:[#allocation2 + $0x64] ss:$2 sm:$0xff] }
 0x7e9   : > { %12986 = vmatprep.subr.bf16.mxu0 %v18678_v25  ;;  %v9621_v18 = vpack.c.bf16 %v9594_v52, %v9592_v26  ;;  %v10023_v52 = vld [vmem:[#allocation2 + $0x65] ss:$2 sm:$0xff] }
 0x7eb   : > { %12915 = vmatmul.mubr.msk.bf16.gmra.mrb[44].mxu0 %vm588_vm15, %v9173_v30  ;;  %v9598_v30 = vld [vmem:[#allocation2 + $0x84] ss:$2 sm:$0xff] }
 0x7ec   : > { %12918 = vmatprep.mubr.msk.bf16.mxu0 %vm14948_vm1, %v18678_v25  ;;  %v9622_v32 = vpack.c.bf16 %v9598_v30, %v9596_v34  ;;  %v10027_v30 = vld [vmem:[#allocation2 + $0x85] ss:$2 sm:$0xff] }
 0x7f3   : > { %12919 = vmatmul.mubr.msk.bf16.gmra.mrb[48].mxu0 %vm588_vm15, %v9174_v6  ;;  %v9602_v6 = vld [vmem:[#allocation2 + $0xa4] ss:$2 sm:$0xff] }
 0x7f4   : > { %12922 = vmatprep.mubr.msk.bf16.mxu0 %vm14948_vm1, %v18678_v25  ;;  %v9623_v23 = vpack.c.bf16 %v9602_v6, %v9600_v63  ;;  %v10031_v6 = vld [vmem:[#allocation2 + $0xa5] ss:$2 sm:$0xff] }
 0x7fb   : > { %12923 = vmatmul.mubr.msk.bf16.gmra.mrb[52].mxu0 %vm588_vm15, %v9175_v36  ;;  %v9606_v36 = vld [vmem:[#allocation2 + $0xc4] ss:$2 sm:$0xff] }
 0x7fc   : > { %12926 = vmatprep.mubr.msk.bf16.mxu0 %vm14948_vm1, %v18678_v25  ;;  %v9624_v27 = vpack.c.bf16 %v9606_v36, %v9604_v5  ;;  %v10035_v36 = vld [vmem:[#allocation2 + $0xc5] ss:$2 sm:$0xff] }
 0x803   : > { %12927 = vmatmul.mubr.msk.bf16.gmra.mrb[56].mxu0 %vm588_vm15, %v9176_v35  ;;  %v9610_v35 = vld [vmem:[#allocation2 + $0xe4] ss:$2 sm:$0xff] }
 0x804   : > { %12930 = vmatprep.mubr.msk.bf16.mxu0 %vm14948_vm1, %v18678_v25  ;;  %v9625_v54 = vpack.c.bf16 %v9610_v35, %v9608_v42  ;;  %v10039_v35 = vld [vmem:[#allocation2 + $0xe5] ss:$2 sm:$0xff] }
 0x80b   : > { %12931 = vmatmul.mubr.msk.bf16.gmra.mrb[60].mxu0 %vm588_vm15, %v9177_v33  ;;  %v9614_v33 = vld [vmem:[#allocation2 + $0x104] ss:$2 sm:$0xff] }
 0x80c   : > { %12934 = vmatprep.mubr.msk.bf16.mxu0 %vm14948_vm1, %v18678_v25  ;;  %v9626_v49 = vpack.c.bf16 %v9614_v33, %v9612_v61  ;;  %v10043_v33 = vld [vmem:[#allocation2 + $0x105] ss:$2 sm:$0xff] }
 0x813   : > { %12935 = vmatmul.mubr.msk.bf16.gmra.mrb[64].mxu0 %vm588_vm15, %v9178_v31  ;;  %v9618_v31 = vld [vmem:[#allocation2 + $0x124] ss:$2 sm:$0xff] }
 0x814   : > { %12938 = vmatprep.mubr.msk.bf16.mxu0 %vm14948_vm1, %v18678_v25  ;;  %v9627_v16 = vpack.c.bf16 %v9618_v31, %v9616_v50  ;;  %v10049_v31 = vld [vmem:[#allocation2 + $0x135] ss:$2 sm:$0xff] }
 0x81b   : > { %12939 = vmatmul.mubr.msk.bf16.gmra.mrb[68].mxu0 %vm588_vm15, %v9179_v11  ;;  %v9807_v11 = vld [vmem:[#allocation2 + $0x24] ss:$2 sm:$0xff] }
 0x81c   : > { %12950 = vmatprep.mubr.msk.bf16.mxu0 %vm14948_vm1, %v18678_v25 }
 0x823   : > { %12951 = vmatmul.mubr.msk.bf16.vlgmr.msra.gmra.mrb[36].mxu0 %vm588_vm15, %v9395_v15  ;;  %v14534_v15 = vld [vmem:[#allocation15 + $0xe8] sm:$0xff]  }
 0x824   : > { %12987 = vmatpush3.bf16.msra.mxu0 %v14525_v14  ;;  %12954 = vmatprep.mubr.msk.bf16.mxu0 %vm14948_vm1, %v18678_v25  ;;  %v9826_v14 = vpack.c.bf16 %v9808_v21, %v9807_v11  ;;  %v10239_v11 = vld [vmem:[#allocation2 + $0x26] ss:$2 sm:$0xff]  ;;  %v10241_v21 = vld [vmem:[#allocation2 + $0x36] ss:$2 sm:$0xff] }
 0x825   : > { %12988 = vmatprep.subr.bf16.mxu0 %v18678_v25 }
 0x828   : > { %12989 = vmatpush3.bf16.msra.mxu0 %v14526_v47  ;;  %v9810_v47 = vld [vmem:[#allocation2 + $0x54] ss:$2 sm:$0xff] }
 0x829   : > { %12990 = vmatprep.subr.bf16.mxu0 %v18678_v25 }
 0x82b   : > { %12955 = vmatmul.mubr.msk.bf16.gmra.mrb[40].mxu0 %vm588_vm15, %v9396_v56  ;;  %v14536_v56 = vld [vmem:[#allocation15 + $0xf8] sm:$0xff]  }
 0x82c   : > { %12958 = vmatprep.mubr.msk.bf16.mxu0 %vm14948_vm1, %v18678_v25  ;;  %12991 = vmatpush3.bf16.msra.mxu0 %v14527_v2  ;;  %v9827_v2 = vpack.c.bf16 %v9810_v47, %v9809_v39  ;;  %v10245_v47 = vld [vmem:[#allocation2 + $0x56] ss:$2 sm:$0xff]  ;;  %v10243_v39 = vld [vmem:[#allocation2 + $0x46] ss:$2 sm:$0xff] }
 0x82d   : > { %12992 = vmatprep.subr.bf16.mxu0 %v18678_v25 }
 0x830   : > { %12993 = vmatpush3.bf16.msra.mxu0 %v14528_v4  ;;  %v9812_v4 = vld [vmem:[#allocation2 + $0x74] ss:$2 sm:$0xff] }
 0x831   : > { %13030 = vmatprep.subr.bf16.mxu0 %v18678_v25  ;;  %v9828_v12 = vpack.c.bf16 %v9812_v4, %v9811_v24  ;;  %v10253_v24 = vld [vmem:[#allocation2 + $0x96] ss:$2 sm:$0xff] }
 0x833   : > { %12959 = vmatmul.mubr.msk.bf16.gmra.mrb[44].mxu0 %vm588_vm15, %v9397_v8  ;;  %v9814_v8 = vld [vmem:[#allocation2 + $0x94] ss:$2 sm:$0xff] }
 0x834   : > { %12962 = vmatprep.mubr.msk.bf16.mxu0 %vm14948_vm1, %v18678_v25  ;;  %v9829_v43 = vpack.c.bf16 %v9814_v8, %v9813_v37  ;;  %v10257_v37 = vld [vmem:[#allocation2 + $0xb6] ss:$2 sm:$0xff] }
 0x83b   : > { %12963 = vmatmul.mubr.msk.bf16.gmra.mrb[48].mxu0 %vm588_vm15, %v9398_v59  ;;  %v9816_v59 = vld [vmem:[#allocation2 + $0xb4] ss:$2 sm:$0xff] }
 0x83c   : > { %12966 = vmatprep.mubr.msk.bf16.mxu0 %vm14948_vm1, %v18678_v25  ;;  %v9830_v58 = vpack.c.bf16 %v9816_v59, %v9815_v51  ;;  %v10261_v51 = vld [vmem:[#allocation2 + $0xd6] ss:$2 sm:$0xff] }
 0x843   : > { %12967 = vmatmul.mubr.msk.bf16.gmra.mrb[52].mxu0 %vm588_vm15, %v9399_v7  ;;  %v9818_v7 = vld [vmem:[#allocation2 + $0xd4] ss:$2 sm:$0xff] }
 0x844   : > { %12970 = vmatprep.mubr.msk.bf16.mxu0 %vm14948_vm1, %v18678_v25  ;;  %v9831_v13 = vpack.c.bf16 %v9818_v7, %v9817_v0  ;;  %v10265_v0 = vld [vmem:[#allocation2 + $0xf6] ss:$2 sm:$0xff] }
 0x84b   : > { %12971 = vmatmul.mubr.msk.bf16.gmra.mrb[56].mxu0 %vm588_vm15, %v9400_v62  ;;  %v9820_v62 = vld [vmem:[#allocation2 + $0xf4] ss:$2 sm:$0xff] }
 0x84c   : > { %12974 = vmatprep.mubr.msk.bf16.mxu0 %vm14948_vm1, %v18678_v25  ;;  %v9832_v40 = vpack.c.bf16 %v9820_v62, %v9819_v22  ;;  %v10269_v22 = vld [vmem:[#allocation2 + $0x116] ss:$2 sm:$0xff] }
 0x853   : > { %12975 = vmatmul.mubr.msk.bf16.gmra.mrb[60].mxu0 %vm588_vm15, %v9401_v48  ;;  %v9822_v48 = vld [vmem:[#allocation2 + $0x114] ss:$2 sm:$0xff] }
 0x854   : > { %12978 = vmatprep.mubr.msk.bf16.mxu0 %vm14948_vm1, %v18678_v25  ;;  %v9833_v10 = vpack.c.bf16 %v9822_v48, %v9821_v41  ;;  %v10271_v41 = vld [vmem:[#allocation2 + $0x126] ss:$2 sm:$0xff] }
 0x85b   : > { %12979 = vmatmul.mubr.msk.bf16.gmra.mrb[64].mxu0 %vm588_vm15, %v9402_v28  ;;  %v9823_v28 = vld [vmem:[#allocation2 + $0x124] ss:$2 sm:$0xff] }
 0x85c   : > { %12982 = vmatprep.mubr.msk.bf16.mxu0 %vm14948_vm1, %v18678_v25  ;;  %v9834_v17 = vpack.c.bf16 %v9825_v45, %v9823_v28  ;;  %v11501_v45 = vld [vmem:[%s15329_s25 + $0x13] ss:$2 sm:$0xff] }
 0x863   : > { %12983 = vmatmul.mubr.msk.bf16.gmra.mrb[68].mxu0 %vm588_vm15, %v9403_v38  ;;  %v10015_v38 = vld [vmem:[#allocation2 + $0x25] ss:$2 sm:$0xff] }
 0x864   : > { %12994 = vmatprep.mubr.msk.bf16.mxu0 %vm14948_vm1, %v18678_v25 }
 0x86b   : > { %12995 = vmatmul.mubr.msk.bf16.vlgmr.msra.gmra.mrb[36].mxu0 %vm588_vm15, %v9619_v9  ;;  %v14538_v9 = vld [vmem:[#allocation15 + $0x108] sm:$0xff]  }
 0x86c   : > { %13031 = vmatpush3.bf16.msra.mxu0 %v14529_v29  ;;  %12998 = vmatprep.mubr.msk.bf16.mxu0 %vm14948_vm1, %v18678_v25  ;;  %v10050_v29 = vpack.c.bf16 %v10017_v3, %v10015_v38  ;;  %v11503_v3 = vld [vmem:[%s15329_s25 + $0x33] ss:$2 sm:$0xff] }
 0x86d   : > { %13032 = vmatprep.subr.bf16.mxu0 %v18678_v25 }
 0x870   : > { %13033 = vmatpush3.bf16.msra.mxu0 %v14530_v53  ;;  %v10021_v53 = vld [vmem:[#allocation2 + $0x55] ss:$2 sm:$0xff] }
 0x871   : > { %13034 = vmatprep.subr.bf16.mxu0 %v18678_v25 }
 0x873   : > { %12999 = vmatmul.mubr.msk.bf16.gmra.mrb[40].mxu0 %vm588_vm15, %v9620_v55  ;;  %v14540_v55 = vld [vmem:[#allocation15 + $0x118] sm:$0xff]  }
 0x874   : > { %13002 = vmatprep.mubr.msk.bf16.mxu0 %vm14948_vm1, %v18678_v25  ;;  %13035 = vmatpush3.bf16.msra.mxu0 %v14531_v57  ;;  %v10051_v57 = vpack.c.bf16 %v10021_v53, %v10019_v19  ;;  %v11506_v53 = vld [vmem:[%s15329_s25 + $0x63] ss:$2 sm:$0xff] }
 0x875   : > { %13036 = vmatprep.subr.bf16.mxu0 %v18678_v25 }
 0x878   : > { %13037 = vmatpush3.bf16.msra.mxu0 %v14532_v46  ;;  %v10025_v46 = vld [vmem:[#allocation2 + $0x75] ss:$2 sm:$0xff] }
 0x879   : > { %13074 = vmatprep.subr.bf16.mxu0 %v18678_v25  ;;  %v10052_v26 = vpack.c.bf16 %v10025_v46, %v10023_v52  ;;  %v11509_v46 = vld [vmem:[%s15329_s25 + $0x93] ss:$2 sm:$0xff]  ;;  %v11510_v52 = vld [vmem:[%s15329_s25 + $0xa3] ss:$2 sm:$0xff] }
 0x87b   : > { %13003 = vmatmul.mubr.msk.bf16.gmra.mrb[44].mxu0 %vm588_vm15, %v9621_v18  ;;  %v10029_v18 = vld [vmem:[#allocation2 + $0x95] ss:$2 sm:$0xff] }
 0x87c   : > { %13006 = vmatprep.mubr.msk.bf16.mxu0 %vm14948_vm1, %v18678_v25  ;;  %v10053_v34 = vpack.c.bf16 %v10029_v18, %v10027_v30  ;;  %v11511_v18 = vld [vmem:[%s15329_s25 + $0xb3] ss:$2 sm:$0xff]  ;;  %v11512_v30 = vld [vmem:[%s15329_s25 + $0xc3] ss:$2 sm:$0xff] }
 0x883   : > { %13007 = vmatmul.mubr.msk.bf16.gmra.mrb[48].mxu0 %vm588_vm15, %v9622_v32  ;;  %v10033_v32 = vld [vmem:[#allocation2 + $0xb5] ss:$2 sm:$0xff] }
 0x884   : > { %13010 = vmatprep.mubr.msk.bf16.mxu0 %vm14948_vm1, %v18678_v25  ;;  %v10054_v63 = vpack.c.bf16 %v10033_v32, %v10031_v6  ;;  %v11513_v32 = vld [vmem:[%s15329_s25 + $0xd3] ss:$2 sm:$0xff]  ;;  %v11514_v6 = vld [vmem:[%s15329_s25 + $0xe3] ss:$2 sm:$0xff] }
 0x88b   : > { %13011 = vmatmul.mubr.msk.bf16.gmra.mrb[52].mxu0 %vm588_vm15, %v9623_v23  ;;  %v10037_v23 = vld [vmem:[#allocation2 + $0xd5] ss:$2 sm:$0xff] }
 0x88c   : > { %13014 = vmatprep.mubr.msk.bf16.mxu0 %vm14948_vm1, %v18678_v25  ;;  %v10055_v5 = vpack.c.bf16 %v10037_v23, %v10035_v36  ;;  %v11515_v23 = vld [vmem:[%s15329_s25 + $0xf3] ss:$2 sm:$0xff]  ;;  %v11516_v36 = vld [vmem:[%s15329_s25 + $0x103] ss:$2 sm:$0xff] }
 0x893   : > { %13015 = vmatmul.mubr.msk.bf16.gmra.mrb[56].mxu0 %vm588_vm15, %v9624_v27  ;;  %v10041_v27 = vld [vmem:[#allocation2 + $0xf5] ss:$2 sm:$0xff] }
 0x894   : > { %13018 = vmatprep.mubr.msk.bf16.mxu0 %vm14948_vm1, %v18678_v25  ;;  %v10056_v42 = vpack.c.bf16 %v10041_v27, %v10039_v35  ;;  %v11517_v27 = vld [vmem:[%s15329_s25 + $0x113] ss:$2 sm:$0xff]  ;;  %v11518_v35 = vld [vmem:[%s15329_s25 + $0x123] ss:$2 sm:$0xff] }
 0x89b   : > { %13019 = vmatmul.mubr.msk.bf16.gmra.mrb[60].mxu0 %vm588_vm15, %v9625_v54  ;;  %v10045_v54 = vld [vmem:[#allocation2 + $0x115] ss:$2 sm:$0xff] }
 0x89c   : > { %13022 = vmatprep.mubr.msk.bf16.mxu0 %vm14948_vm1, %v18678_v25  ;;  %v10057_v61 = vpack.c.bf16 %v10045_v54, %v10043_v33  ;;  %v11500_v54 = vld [vmem:[#allocation16] ss:$0 sm:$0xff]  ;;  %v11519_v33 = vld [vmem:[#allocation19] ss:$0 sm:$0xff] }
 0x8a3   : > { %13023 = vmatmul.mubr.msk.bf16.gmra.mrb[64].mxu0 %vm588_vm15, %v9626_v49  ;;  %v10047_v49 = vld [vmem:[#allocation2 + $0x125] ss:$2 sm:$0xff] }
 0x8a4   : > { %13026 = vmatprep.mubr.msk.bf16.mxu0 %vm14948_vm1, %v18678_v25  ;;  %v10058_v50 = vpack.c.bf16 %v10049_v31, %v10047_v49 }
 0x8ab   : > { %13027 = vmatmul.mubr.msk.bf16.gmra.mrb[68].mxu0 %vm588_vm15, %v9627_v16  ;;  %v10530_v16 = vld [vmem:[#allocation18] sm:$0x3] }
 0x8ac   : > { %13038 = vmatprep.mubr.msk.bf16.mxu0 %vm14948_vm1, %v18678_v25 }
 0x8b3   : > { %13039 = vmatmul.mubr.msk.bf16.vlgmr.msra.gmra.mrb[36].mxu0 %vm588_vm15, %v9826_v14 }
 0x8b4   : > { %13075 = vmatpush3.bf16.msra.mxu0 %v14533_v60  ;;  %13042 = vmatprep.mubr.msk.bf16.mxu0 %vm14948_vm1, %v18678_v25  ;;  %v18725_v60 = vld [vmem:[#allocation30_spill] sm:$0xff] }
 0x8b5   : > { %13076 = vmatprep.subr.bf16.mxu0 %v18678_v25  ;;  %v10566_v14 = vand.u32 %v10530_v16, %v18725_v60 }
 0x8b8   : > { %13077 = vmatpush3.bf16.msra.mxu0 %v14534_v15  ;;  %v10274_v15 = vpack.c.bf16 %v10241_v21, %v10239_v11  ;;  %v10721_v11 = vpop.permute.xlu0 %10720 }
 0x8b9   : > { %13078 = vmatprep.subr.bf16.mxu0 %v18678_v25 }
 0x8bb   : > { %13043 = vmatmul.mubr.msk.bf16.gmra.mrb[40].mxu0 %vm588_vm15, %v9827_v2  ;;  %v10249_v2 = vld [vmem:[#allocation2 + $0x76] ss:$2 sm:$0xff] }
 0x8bc   : > { %13046 = vmatprep.mubr.msk.bf16.mxu0 %vm14948_vm1, %v18678_v25  ;;  %13079 = vmatpush3.bf16.msra.mxu0 %v14535_v20  ;;  %v10275_v20 = vpack.c.bf16 %v10245_v47, %v10243_v39 }
 0x8bd   : > { %13080 = vmatprep.subr.bf16.mxu0 %v18678_v25 }
 0x8c0   : > { %13081 = vmatpush3.bf16.msra.mxu0 %v14536_v56  ;;  %v10247_v56 = vld [vmem:[#allocation2 + $0x66] ss:$2 sm:$0xff] }
 0x8c1   : > { %13118 = vmatprep.subr.bf16.mxu0 %v18678_v25  ;;  %v10276_v4 = vpack.c.bf16 %v10249_v2, %v10247_v56 }
 0x8c3   : > { %13047 = vmatmul.mubr.msk.bf16.gmra.mrb[44].mxu0 %vm588_vm15, %v9828_v12  ;;  %v10251_v12 = vld [vmem:[#allocation2 + $0x86] ss:$2 sm:$0xff] }
 0x8c4   : > { %13050 = vmatprep.mubr.msk.bf16.mxu0 %vm14948_vm1, %v18678_v25  ;;  %v10277_v8 = vpack.c.bf16 %v10253_v24, %v10251_v12  ;;  %v10727_v24 = vpop.permute.xlu0 %10726 }
 0x8c5   : > { %vm10769_vm8 = vcmp.eq.s32.totalorder %v10727_v24, 1 }
 0x8cb   : > { %13051 = vmatmul.mubr.msk.bf16.gmra.mrb[48].mxu0 %vm588_vm15, %v9829_v43  ;;  %v10255_v43 = vld [vmem:[#allocation2 + $0xa6] ss:$2 sm:$0xff] }
 0x8cc   : > { %13054 = vmatprep.mubr.msk.bf16.mxu0 %vm14948_vm1, %v18678_v25  ;;  %v10278_v59 = vpack.c.bf16 %v10257_v37, %v10255_v43 }
 0x8d3   : > { %13055 = vmatmul.mubr.msk.bf16.gmra.mrb[52].mxu0 %vm588_vm15, %v9830_v58  ;;  %v10259_v58 = vld [vmem:[#allocation2 + $0xc6] ss:$2 sm:$0xff] }
 0x8d4   : > { %13058 = vmatprep.mubr.msk.bf16.mxu0 %vm14948_vm1, %v18678_v25  ;;  %v10279_v7 = vpack.c.bf16 %v10261_v51, %v10259_v58 }
 0x8db   : > { %13059 = vmatmul.mubr.msk.bf16.gmra.mrb[56].mxu0 %vm588_vm15, %v9831_v13  ;;  %v10263_v13 = vld [vmem:[#allocation2 + $0xe6] ss:$2 sm:$0xff] }
 0x8dc   : > { %13062 = vmatprep.mubr.msk.bf16.mxu0 %vm14948_vm1, %v18678_v25  ;;  %v10280_v62 = vpack.c.bf16 %v10265_v0, %v10263_v13 }
 0x8e3   : > { %13063 = vmatmul.mubr.msk.bf16.gmra.mrb[60].mxu0 %vm588_vm15, %v9832_v40  ;;  %v10267_v40 = vld [vmem:[#allocation2 + $0x106] ss:$2 sm:$0xff] }
 0x8e4   : > { %13066 = vmatprep.mubr.msk.bf16.mxu0 %vm14948_vm1, %v18678_v25  ;;  %v10281_v48 = vpack.c.bf16 %v10269_v22, %v10267_v40  ;;  %v10733_v22 = vpop.permute.xlu0 %10732 }
 0x8eb   : > { %13067 = vmatmul.mubr.msk.bf16.gmra.mrb[64].mxu0 %vm588_vm15, %v9833_v10  ;;  %v10273_v10 = vld [vmem:[#allocation2 + $0x136] ss:$2 sm:$0xff] }
 0x8ec   : > { %13070 = vmatprep.mubr.msk.bf16.mxu0 %vm14948_vm1, %v18678_v25  ;;  %v10282_v28 = vpack.c.bf16 %v10273_v10, %v10271_v41 }
 0x8f3   : > { %13071 = vmatmul.mubr.msk.bf16.gmra.mrb[68].mxu0 %vm588_vm15, %v9834_v17  ;;  %v11502_v17 = vld [vmem:[%s15329_s25 + $0x23] ss:$2 sm:$0xff] }
 0x8f4   : > { %13082 = vmatprep.mubr.msk.bf16.mxu0 %vm14948_vm1, %v18678_v25  ;;  %v10521_v38 = vpack.c.bf16 %v11502_v17, %v11501_v45 }
 0x8fb   : > { %13083 = vmatmul.mubr.msk.bf16.vlgmr.msra.gmra.mrb[36].mxu0 %vm588_vm15, %v10050_v29 }
 0x8fc   : > { %13119 = vmatpush3.bf16.msra.mxu0 %v14537_v44  ;;  %13086 = vmatprep.mubr.msk.bf16.mxu0 %vm14948_vm1, %v18678_v25  ;;  %v11504_v44 = vld [vmem:[%s15329_s25 + $0x43] ss:$2 sm:$0xff] }
 0x8fd   : > { %13120 = vmatprep.subr.bf16.mxu0 %v18678_v25  ;;  %v10522_v29 = vpack.c.bf16 %v11504_v44, %v11503_v3 }
 0x900   : > { %13121 = vmatpush3.bf16.msra.mxu0 %v14538_v9  ;;  %v11505_v9 = vld [vmem:[%s15329_s25 + $0x53] ss:$2 sm:$0xff] }
 0x901   : > { %13122 = vmatprep.subr.bf16.mxu0 %v18678_v25  ;;  %v10523_v19 = vpack.c.bf16 %v11506_v53, %v11505_v9  ;;  %v10739_v9 = vpop.permute.xlu0 %10738 }
 0x903   : > { %13087 = vmatmul.mubr.msk.bf16.gmra.mrb[40].mxu0 %vm588_vm15, %v10051_v57  ;;  %v11508_v57 = vld [vmem:[%s15329_s25 + $0x83] ss:$2 sm:$0xff] }
 0x904   : > { %13090 = vmatprep.mubr.msk.bf16.mxu0 %vm14948_vm1, %v18678_v25  ;;  %13123 = vmatpush3.bf16.msra.mxu0 %v14539_v1  ;;  %v11507_v1 = vld [vmem:[%s15329_s25 + $0x73] ss:$2 sm:$0xff] }
 0x905   : > { %13124 = vmatprep.subr.bf16.mxu0 %v18678_v25 }
 0x908   : > { %13125 = vmatpush3.bf16.msra.mxu0 %v14540_v55  ;;  %v10524_v55 = vpack.c.bf16 %v11508_v57, %v11507_v1 }
 0x909   : > { %13162 = vmatprep.subr.bf16.mxu0 %v18678_v25 }
 0x90b   : > { %13091 = vmatmul.mubr.msk.bf16.gmra.mrb[44].mxu0 %vm588_vm15, %v10052_v26  ;;  %v10525_v26 = vpack.c.bf16 %v11510_v52, %v11509_v46 }
 0x90c   : > { %13094 = vmatprep.mubr.msk.bf16.mxu0 %vm14948_vm1, %v18678_v25 }
 0x913   : > { %13095 = vmatmul.mubr.msk.bf16.gmra.mrb[48].mxu0 %vm588_vm15, %v10053_v34  ;;  %v10526_v34 = vpack.c.bf16 %v11512_v30, %v11511_v18 }
 0x914   : > { %13098 = vmatprep.mubr.msk.bf16.mxu0 %vm14948_vm1, %v18678_v25 }
 0x91b   : > { %13099 = vmatmul.mubr.msk.bf16.gmra.mrb[52].mxu0 %vm588_vm15, %v10054_v63  ;;  %v10527_v63 = vpack.c.bf16 %v11514_v6, %v11513_v32  ;;  %v10745_v6 = vpop.permute.xlu0 %10744 }
 0x91c   : > { %13102 = vmatprep.mubr.msk.bf16.mxu0 %vm14948_vm1, %v18678_v25  ;;  %vm10775_vm12 = vcmp.eq.s32.totalorder %v10745_v6, 1 }
 0x923   : > { %13103 = vmatmul.mubr.msk.bf16.gmra.mrb[56].mxu0 %vm588_vm15, %v10055_v5  ;;  %v10528_v5 = vpack.c.bf16 %v11516_v36, %v11515_v23 }
 0x924   : > { %13106 = vmatprep.mubr.msk.bf16.mxu0 %vm14948_vm1, %v18678_v25 }
 0x92b   : > { %13107 = vmatmul.mubr.msk.bf16.gmra.mrb[60].mxu0 %vm588_vm15, %v10056_v42  ;;  %v10529_v42 = vpack.c.bf16 %v11518_v35, %v11517_v27 }
 0x92c   : > { %13110 = vmatprep.mubr.msk.bf16.mxu0 %vm14948_vm1, %v18678_v25 }
 0x933   : > { %13111 = vmatmul.mubr.msk.bf16.gmra.mrb[64].mxu0 %vm588_vm15, %v10057_v61  ;;  %v18198_v61 = vadd.f32 %v11519_v33, %v11500_v54 }
 0x934   : > { %13114 = vmatprep.mubr.msk.bf16.mxu0 %vm14948_vm1, %v18678_v25 }
 0x93b   : > { %13115 = vmatmul.mubr.msk.bf16.gmra.mrb[68].mxu0 %vm588_vm15, %v10058_v50 }
 0x93c   : > { %13126 = vmatprep.mubr.msk.bf16.mxu0 %vm14948_vm1, %v18678_v25 }
 0x943   : > { %13127 = vmatmul.mubr.msk.bf16.vlgmr.msra.gmra.mrb[36].mxu0 %vm588_vm15, %v10274_v15  ;;  %v10724_v15 = vpop.permute.xlu1 %10723 }
 0x944   : > { %13163 = vmatpush3.bf16.msra.mxu0 %v10566_v14  ;;  %13130 = vmatprep.mubr.msk.bf16.mxu0 %vm14948_vm1, %v18678_v25  ;;  %vm10768_vm2 = vcmp.eq.s32.totalorder %v10724_v15, 1 }
 0x947   : > { %v10730_v43 = vpop.permute.xlu1 %10729 }
 0x94b   : > { %13131 = vmatmul.mubr.msk.bf16.gmra.mrb[40].mxu0 %vm588_vm15, %v10275_v20  ;;  %v10736_v10 = vpop.permute.xlu1 %10735 }
 0x94c   : > { %13134 = vmatprep.mubr.msk.bf16.mxu0 %vm14948_vm1, %v18678_v25 }
 0x94f   : > { %v10742_v57 = vpop.permute.xlu1 %10741 }
 0x953   : > { %13135 = vmatmul.mubr.msk.bf16.gmra.mrb[44].mxu0 %vm588_vm15, %v10276_v4 }
 0x954   : > { %13138 = vmatprep.mubr.msk.bf16.mxu0 %vm14948_vm1, %v18678_v25 }
 0x95b   : > { %13139 = vmatmul.mubr.msk.bf16.gmra.mrb[48].mxu0 %vm588_vm15, %v10277_v8 }
 0x95c   : > { %13142 = vmatprep.mubr.msk.bf16.mxu0 %vm14948_vm1, %v18678_v25 }
 0x963   : > { %13143 = vmatmul.mubr.msk.bf16.gmra.mrb[52].mxu0 %vm588_vm15, %v10278_v59 }
 0x964   : > { %13146 = vmatprep.mubr.msk.bf16.mxu0 %vm14948_vm1, %v18678_v25 }
 0x96b   : > { %13147 = vmatmul.mubr.msk.bf16.gmra.mrb[56].mxu0 %vm588_vm15, %v10279_v7 }
 0x96c   : > { %13150 = vmatprep.mubr.msk.bf16.mxu0 %vm14948_vm1, %v18678_v25 }
 0x973   : > { %13151 = vmatmul.mubr.msk.bf16.gmra.mrb[60].mxu0 %vm588_vm15, %v10280_v62 }
 0x974   : > { %13154 = vmatprep.mubr.msk.bf16.mxu0 %vm14948_vm1, %v18678_v25 }
 0x97b   : > { %13155 = vmatmul.mubr.msk.bf16.gmra.mrb[64].mxu0 %vm588_vm15, %v10281_v48 }
 0x97c   : > { %13158 = vmatprep.mubr.msk.bf16.mxu0 %vm14948_vm1, %v18678_v25 }
 0x983   : > { %13159 = vmatmul.mubr.msk.bf16.gmra.mrb[68].mxu0 %vm588_vm15, %v10282_v28 }
 0x984   : > { %13164 = vmatprep.mubr.msk.bf16.mxu0 %vm14948_vm1, %v18678_v25 }
 0x98b   : > { %13165 = vmatmul.mubr.msk.bf16.vlgmr.msra.gmra.mrb[36].mxu0 %vm18726_vm13, %v10521_v38  ;;  %vm10808_vm13 = vcmask 519168  }
 0x98c   : > { %13168 = vmatprep.mubr.msk.bf16.mxu0 %vm14948_vm1, %v18678_v25 }
 0x993   : > { %13169 = vmatmul.mubr.msk.bf16.gmra.mrb[40].mxu0 %vm18727_vm7, %v10522_v29  ;;  %vm10770_vm7 = vcmp.eq.s32.totalorder %v10730_v43, 1 }
 0x994   : > { %13172 = vmatprep.mubr.msk.bf16.mxu0 %vm14948_vm1, %v18678_v25 }
 0x99b   : > { %13173 = vmatmul.mubr.msk.bf16.gmra.mrb[44].mxu0 %vm18728_vm14, %v10523_v19  ;;  %vm10810_vm14 = vcmask 523268  }
 0x99c   : > { %13176 = vmatprep.mubr.msk.bf16.mxu0 %vm14948_vm1, %v18678_v25 }
 0x9a3   : > { %13177 = vmatmul.mubr.msk.bf16.gmra.mrb[48].mxu0 %vm18729_vm6, %v10524_v55  ;;  %vm10771_vm6 = vcmp.eq.s32.totalorder %v10733_v22, 1 }
 0x9a4   : > { %13180 = vmatprep.mubr.msk.bf16.mxu0 %vm14948_vm1, %v18678_v25 }
 0x9ab   : > { %13181 = vmatmul.mubr.msk.bf16.gmra.mrb[52].mxu0 %vm18730_vm5, %v10525_v26  ;;  %vm10812_vm5 = vcmask 521216  }
 0x9ac   : > { %13184 = vmatprep.mubr.msk.bf16.mxu0 %vm14948_vm1, %v18678_v25 }
 0x9b3   : > { %13185 = vmatmul.mubr.msk.bf16.gmra.mrb[56].mxu0 %vm18731_vm0, %v10526_v34  ;;  %vm10772_vm0 = vcmp.eq.s32.totalorder %v10736_v10, 1 }
 0x9b4   : > { %13188 = vmatprep.mubr.msk.bf16.mxu0 %vm14948_vm1, %v18678_v25 }
 0x9bb   : > { %13189 = vmatmul.mubr.msk.bf16.gmra.mrb[60].mxu0 %vm18732_vm9, %v10527_v63  ;;  %vm10814_vm9 = vcmask 523270  }
 0x9bc   : > { %13192 = vmatprep.mubr.msk.bf16.mxu0 %vm14948_vm1, %v18678_v25 }
 0x9c3   : > { %13193 = vmatmul.mubr.msk.bf16.gmra.mrb[64].mxu0 %vm18733_vm3, %v10528_v5  ;;  %vm10773_vm3 = vcmp.eq.s32.totalorder %v10739_v9, 1 }
 0x9c4   : > { %13196 = vmatprep.mubr.msk.bf16.mxu0 %vm14948_vm1, %v18678_v25  ;;  %vm10767_vm1 = vcmp.eq.s32.totalorder %v10721_v11, 1 }
 0x9cb   : > { %13197 = vmatmul.mubr.msk.bf16.gmra.mrb[68].mxu0 %vm18734_vm10, %v10529_v42  ;;  %vm10774_vm10 = vcmp.eq.s32.totalorder %v10742_v57, 1  ;;  %v10748_v42 = vpop.permute.xlu1 %10747 }
 0xa5e   : > { %v10602_v49 = vpop.f32.mrb[36].mxu0 }
 0xa5f   : > { %v13237_v31 = vadd.f32 %v18198_v61, %v10602_v49  ;;  %v13166_v50 = vpop.f32.mrb[37].mxu0 }
 0xa60   : > { %v10605_v16 = vpop.f32.mrb[38].mxu0 }
 0xa61   : > { %v10687_v21 = vmul.f32 0.70710677, %v13237_v31  ;;  %v13239_v60 = vadd.f32 %v18198_v61, %v10605_v16  ;;  %v13167_v14 = vpop.f32.mrb[39].mxu0  ;;  %v10751_v31 = vpop.permute.xlu0 %10750 }
 0xa63   : > { %v10783_v47 = vsel %vm10767_vm1, %v10687_v21, 0.0  ;;  %v10688_v25 = vmul.f32 0.70710677, %v13239_v60  ;;  %vm10776_vm1 = vcmp.eq.s32.totalorder %v10748_v42, 1 }
 0xa64   : > { %10804 = vst.msk [vmem:[%s16267_s12 + $0xb] sm:$0xff] %vm588_vm15, %v10783_v47  ;;  %v10754_v47 = vpop.permute.xlu1 %10753 }
 0xa65   : > { %v10784_v39 = vsel %vm10768_vm2, %v10688_v25, 0.0  ;;  %vm10777_vm2 = vcmp.eq.s32.totalorder %v10751_v31, 1 }
 0xa66   : > { %10805 = vst.msk [vmem:[%s16267_s12 + $0x13] sm:$0x3] %vm8146_vm4, %v10784_v39  ;;  %v10610_v20 = vpop.f32.mrb[40].mxu0 }
 0xa67   : > { %v13241_v2 = vadd.f32 %v18198_v61, %v10610_v20  ;;  %v13170_v56 = vpop.f32.mrb[41].mxu0 }
 0xa68   : > { %v10613_v4 = vpop.f32.mrb[42].mxu0  ;;  %v10760_v43 = vpop.permute.xlu1 %10759 }
 0xa69   : > { %v10689_v12 = vmul.f32 0.70710677, %v13241_v2  ;;  %v13243_v8 = vadd.f32 %v18198_v61, %v10613_v4  ;;  %v13171_v37 = vpop.f32.mrb[43].mxu0  ;;  %v10757_v2 = vpop.permute.xlu0 %10756 }
 0xa6b   : > { %v10785_v59 = vsel %vm10769_vm8, %v10689_v12, 0.0  ;;  %v10690_v51 = vmul.f32 0.70710677, %v13243_v8  ;;  %vm10778_vm8 = vcmp.eq.s32.totalorder %v10754_v47, 1 }
 0xa6c   : > { %10807 = vst.msk [vmem:[%s16267_s12 + $0x13] sm:$0xfc] %vm10806_vm11, %v10785_v59 }
 0xa6d   : > { %v10786_v58 = vsel %vm10770_vm7, %v10690_v51, 0.0  ;;  %v10763_v51 = vpop.permute.xlu0 %10762 }
 0xa6e   : > { %10809 = vst.msk [vmem:[%s16267_s12 + $0x1b] sm:$0xf] %vm10808_vm13, %v10786_v58  ;;  %v10618_v7 = vpop.f32.mrb[44].mxu0 }
 0xa6f   : > { %v13245_v0 = vadd.f32 %v18198_v61, %v10618_v7  ;;  %v13174_v13 = vpop.f32.mrb[45].mxu0 }
 0xa70   : > { %v10621_v62 = vpop.f32.mrb[46].mxu0 }
 0xa71   : > { %v10691_v40 = vmul.f32 0.70710677, %v13245_v0  ;;  %v13247_v48 = vadd.f32 %v18198_v61, %v10621_v62  ;;  %v13175_v41 = vpop.f32.mrb[47].mxu0 }
 0xa73   : > { %v10787_v28 = vsel %vm10771_vm6, %v10691_v40, 0.0  ;;  %v10692_v45 = vmul.f32 0.70710677, %v13247_v48  ;;  %v10766_v48 = vpop.permute.xlu1 %10765 }
 0xa74   : > { %10811 = vst.msk [vmem:[%s16267_s12 + $0x1b] sm:$0xf0] %vm10810_vm14, %v10787_v28  ;;  %vm10782_vm7 = vcmp.eq.s32.totalorder %v10766_v48, 1 }
 0xa75   : > { %v10788_v17 = vsel %vm10772_vm0, %v10692_v45, 0.0 }
 0xa76   : > { %10813 = vst.msk [vmem:[%s16267_s12 + $0x23] sm:$0x3f] %vm10812_vm5, %v10788_v17  ;;  %v10626_v38 = vpop.f32.mrb[48].mxu0 }
 0xa77   : > { %v13249_v3 = vadd.f32 %v18198_v61, %v10626_v38  ;;  %v13178_v44 = vpop.f32.mrb[49].mxu0 }
 0xa78   : > { %v10629_v29 = vpop.f32.mrb[50].mxu0 }
 0xa79   : > { %v10693_v53 = vmul.f32 0.70710677, %v13249_v3  ;;  %v13251_v19 = vadd.f32 %v18198_v61, %v10629_v29  ;;  %v13179_v1 = vpop.f32.mrb[51].mxu0 }
 0xa7b   : > { %v10789_v55 = vsel %vm10773_vm3, %v10693_v53, 0.0  ;;  %v10694_v46 = vmul.f32 0.70710677, %v13251_v19 }
 0xa7c   : > { %10815 = vst.msk [vmem:[%s16267_s12 + $0x23] sm:$0xc0] %vm10814_vm9, %v10789_v55 }
 0xa7d   : > { %v10790_v52 = vsel %vm10774_vm10, %v10694_v46, 0.0 }
 0xa7e   : > { %10816 = vst.msk [vmem:[%s16267_s12 + $0x2b] sm:$0xff] %vm588_vm15, %v10790_v52  ;;  %v10634_v26 = vpop.f32.mrb[52].mxu0 }
 0xa7f   : > { %v13182_v18 = vpop.f32.mrb[53].mxu0 }
 0xa80   : > { %v10636_v30 = vpop.f32.mrb[54].mxu0 }
 0xa81   : > { %v13253_v34 = vadd.f32 %v18198_v61, %v10636_v30  ;;  %v13183_v32 = vpop.f32.mrb[55].mxu0 }
 0xa83   : > { %v10695_v63 = vmul.f32 0.70710677, %v13253_v34 }
 0xa85   : > { %v10791_v23 = vsel %vm10775_vm12, %v10695_v63, 0.0 }
 0xa86   : > { %10817 = vst.msk [vmem:[%s16267_s12 + $0x33] sm:$0xff] %vm588_vm15, %v10791_v23  ;;  %v10641_v36 = vpop.f32.mrb[56].mxu0 }
 0xa87   : > { %v13255_v5 = vadd.f32 %v18198_v61, %v10641_v36  ;;  %v13186_v27 = vpop.f32.mrb[57].mxu0 }
 0xa88   : > { %v10644_v35 = vpop.f32.mrb[58].mxu0 }
 0xa89   : > { %v10696_v54 = vmul.f32 0.70710677, %v13255_v5  ;;  %v13257_v33 = vadd.f32 %v18198_v61, %v10644_v35  ;;  %v13187_v49 = vpop.f32.mrb[59].mxu0 }
 0xa8b   : > { %v10792_v50 = vsel %vm10776_vm1, %v10696_v54, 0.0  ;;  %v10697_v16 = vmul.f32 0.70710677, %v13257_v33 }
 0xa8c   : > { %10818 = vst.msk [vmem:[%s16267_s12 + $0x3b] sm:$0x3] %vm8146_vm4, %v10792_v50  ;;  %vm10779_vm4 = vcmp.eq.s32.totalorder %v10757_v2, 1 }
 0xa8d   : > { %v10793_v11 = vsel %vm10777_vm2, %v10697_v16, 0.0 }
 0xa8e   : > { %10819 = vst.msk [vmem:[%s16267_s12 + $0x3b] sm:$0xfc] %vm10806_vm11, %v10793_v11  ;;  %v10649_v21 = vpop.f32.mrb[60].mxu0  ;;  %vm10780_vm11 = vcmp.eq.s32.totalorder %v10760_v43, 1 }
 0xa8f   : > { %v13259_v60 = vadd.f32 %v18198_v61, %v10649_v21  ;;  %v13190_v14 = vpop.f32.mrb[61].mxu0 }
 0xa90   : > { %v10652_v15 = vpop.f32.mrb[62].mxu0 }
 0xa91   : > { %v10698_v25 = vmul.f32 0.70710677, %v13259_v60  ;;  %v13261_v39 = vadd.f32 %v18198_v61, %v10652_v15  ;;  %v13191_v20 = vpop.f32.mrb[63].mxu0 }
 0xa93   : > { %v10794_v56 = vsel %vm10778_vm8, %v10698_v25, 0.0  ;;  %v10699_v4 = vmul.f32 0.70710677, %v13261_v39 }
 0xa94   : > { %10820 = vst.msk [vmem:[%s16267_s12 + $0x43] sm:$0xf] %vm10808_vm13, %v10794_v56  ;;  %vm10781_vm13 = vcmp.eq.s32.totalorder %v10763_v51, 1 }
 0xa95   : > { %v10795_v24 = vsel %vm10779_vm4, %v10699_v4, 0.0 }
 0xa96   : > { %10821 = vst.msk [vmem:[%s16267_s12 + $0x43] sm:$0xf0] %vm10810_vm14, %v10795_v24  ;;  %v10657_v12 = vpop.f32.mrb[64].mxu0 }
 0xa97   : > { %v13263_v8 = vadd.f32 %v18198_v61, %v10657_v12  ;;  %v13194_v37 = vpop.f32.mrb[65].mxu0 }
 0xa98   : > { %v10660_v59 = vpop.f32.mrb[66].mxu0 }
 0xa99   : > { %v10700_v58 = vmul.f32 0.70710677, %v13263_v8  ;;  %v13265_v7 = vadd.f32 %v18198_v61, %v10660_v59  ;;  %v13195_v0 = vpop.f32.mrb[67].mxu0 }
 0xa9b   : > { %v10796_v13 = vsel %vm10780_vm11, %v10700_v58, 0.0  ;;  %v10701_v62 = vmul.f32 0.70710677, %v13265_v7 }
 0xa9c   : > { %10822 = vst.msk [vmem:[%s16267_s12 + $0x4b] sm:$0x3f] %vm10812_vm5, %v10796_v13 }
 0xa9d   : > { %v10797_v22 = vsel %vm10781_vm13, %v10701_v62, 0.0 }
 0xa9e   : > { %10823 = vst.msk [vmem:[%s16267_s12 + $0x4b] sm:$0xc0] %vm10814_vm9, %v10797_v22  ;;  %v10665_v40 = vpop.f32.mrb[68].mxu0 }
 0xa9f   : > { %v13267_v41 = vadd.f32 %v18198_v61, %v10665_v40  ;;  %v13198_v10 = vpop.f32.mrb[69].mxu0 }
 0xaa0   : > { %v10668_v28 = vpop.f32.mrb[70].mxu0 }
 0xaa1   : > { %v10702_v45 = vmul.f32 0.70710677, %v13267_v41  ;;  %v13199_v17 = vpop.f32.mrb[71].mxu0 }
 0xaa3   : > { %v10798_v38 = vsel %vm10782_vm7, %v10702_v45, 0.0 }
 0xaa4   : > { %10824 = vst.msk [vmem:[%s16267_s12 + $0x53] sm:$0xff] %vm588_vm15, %v10798_v38 }
 0xaa5   : > { %14853 = shalt.err (!%p14850_p0)
}
 0xaa6   : > { %s14854_s25 = scalar_lea.hbm %s18251_s2, 1792  ;;  %s14858_s29 = scalar_lea.hbm %s18735_s1, 3584 }
 0xaa7   : > { %p14855_p5 = scmp.ne.s32.totalorder %s18251_s2, %s14854_s25  ;;  %p14859_p4 = scmp.lt.u32.totalorder %s18251_s2, %s18735_s1 }
 0xaa8   : > { %p14860_p12 = scmp.lt.u32.totalorder %s14858_s29, %s14854_s25  ;;  %p14862_p1 = scmp.lt.u32.totalorder %s14854_s25, %s18251_s2 }
 0xaa9   : > { %p14856_p9 = pnand %p14855_p5, %p18736_p3 }
 0xaaa   : > { %p14861_p13 = por %p14860_p12, %p14859_p4 }
 0xaab   : > { %p14857_p7 = pneg %p14856_p9 }
 0xaac   : > { %p14863_p2 = por %p14862_p1, %p14861_p13 }
 0xaae   : > { %p14864_p8 = pnand %p14863_p2, %p14857_p7 }
 0xab0   : > { %14867 = shalt.err (!%p14864_p8)
}
 0xab1   : > { %s14950_s28 = smov 128   ;;  %s14951_s26 = smov 8  }
 0xab2   : > { %14175 = dma.vmem_to_hbm [thread:$0]  (%p18736_p3), %s18253_s11, 1792, %s18251_s2, %s10826_s19, %s14950_s28, %s14950_s28, %s14951_s26  }
 0xab3 PF: > { %s10854_s17 = sand.u32 1, %s14914_s13   ;;  %p18737_p6 = scmp.ne.s32.totalorder %s18462_s10, 0 }
 0xab4   : > { %p18738_p10 = scmp.ge.s32.totalorder %s14926_s16, 2  ;;  %s10855_s27 = scalar_lea.sflag [#allocation6], %s10854_s17 }
 0xab6   : > { %p14210_p11 = pnand %p18738_p10, %p18737_p6 }
 0xab8   : > { %14909 = dma.done.wait (!%p14210_p11), %s10855_s27, 1792  }
 0xab9   : > { %14911 = vsyncadd (!%p14210_p11), %s10855_s27, 4294965504  ;;  %p28_p0 = scmp.ge.s32.totalorder %s15249_s23, 4   ;;  %s18739_s13 = smov %s14918_s14 }
 0xaba   : > { %s18740_s14 = smov %s14922_s15  ;;  %s18741_s15 = smov %s15261_s21 }
 0xabb   : > { %s18742_s16 = smov %s15249_s23  ;;  %30 = sbr.rel (!%p28_p0) target bundleno = 14 (0xe), region = 310 }
 0xac2   :  { %10860 = vsyncpa [#allocation5], 1 }
 0xac3   :  { %10862 = vsyncpa [#allocation5 + $0x1], 1 }
 0xac4   :  { %10863 = vsyncpa [#allocation8], 1 }
 0xac5   :  { %10864 = vsyncpa [#allocation11], 1 }
 0xac6   :  { %10865 = vsyncpa [#allocation14], 1 }
 0xac7   :  { %10866 = vsyncpa [#allocation17], 1 }
 0xac8   :  { %10867 = vsyncpa [#allocation20], 1 }
 0xac9   :  { %10868 = vsyncpa [#allocation6], 1 }
 0xaca   :  { %10870 = vsyncpa [#allocation6 + $0x1], 1 }

</bundles_post_ra>
